<compile_context>
chip_gen: v6e
topology: v6e:2x2x1
jax: 0.10.0
libtpu: 0.0.40
codegen_flags: <defaults>
</compile_context>

<pallas_src>
import functools

import jax
import jax.numpy as jnp
import numpy as np
from jax import lax
from jax.experimental import pallas as pl
from jax.experimental.pallas import tpu as pltpu


def _cdiv(a, b):
    return (a + b - 1) // b


def _round_up(a, b):
    return _cdiv(a, b) * b


# ---------------------------------------------------------------------------
# Pallas kernel: fused ASPP head
#   br0 = relu(x @ W0 + b0)                        (1x1 branch, in-kernel)
#   cat = [br0 | d1 | d2 | d3]                     (VMEM scratch, K = 4*depth)
#   out = relu(cat @ Wo[:4*depth] + img_bias)      (image branch == bias)
# ---------------------------------------------------------------------------
def _aspp_head_kernel(x_ref, d1_ref, d2_ref, d3_ref,
                      w0_ref, b0_ref, wo_ref, img_ref,
                      o_ref, cat_ref):
    f32 = jnp.float32
    depth = d1_ref.shape[-1]

    # branch 0: 1x1 conv + folded BN + ReLU, fused in-kernel
    br0 = jnp.dot(x_ref[0], w0_ref[...], preferred_element_type=f32)
    br0 = jnp.maximum(br0 + b0_ref[...], 0.0)

    # Stage the 4 full-resolution branches side by side in a VMEM scratch;
    # the big (N, 5*depth, H, W) concat is never built.  All ops below are
    # row-wise — no reduction across pixels — so a ragged last tile is safe.
    cat_ref[:, 0 * depth:1 * depth] = br0.astype(cat_ref.dtype)
    cat_ref[:, 1 * depth:2 * depth] = d1_ref[0]
    cat_ref[:, 2 * depth:3 * depth] = d2_ref[0]
    cat_ref[:, 3 * depth:4 * depth] = d3_ref[0]

    # Single out-conv matmul with K = 4*depth (MXU accumulates over K);
    # the image-level branch + out_conv bias arrive as a per-image bias.
    acc = jnp.dot(cat_ref[...], wo_ref[...], preferred_element_type=f32)
    acc = acc + img_ref[0]
    o_ref[0] = jnp.maximum(acc, 0.0).astype(o_ref.dtype)


def aspp_head_fused(x3, d1, d2, d3, w0, b0, wo_cat, img_bias, *,
                    tm, out_dtype=jnp.bfloat16):
    """x3: (N, HW, Cin) bf16; d*: (N, HW, depth) bf16; w0: (Cin, depth) bf16;
    b0: (1, depth) f32; wo_cat: (4*depth, Nout) bf16; img_bias: (N, 1, Nout)
    f32 -> (N, HW, Nout) out_dtype.  The last pixel tile may be ragged."""
    N, HW, cin = x3.shape
    depth = d1.shape[-1]
    nout = wo_cat.shape[1]
    assert tm % 8 == 0
    grid = (N, _cdiv(HW, tm))

    def pix_spec(c):
        return pl.BlockSpec((1, tm, c), lambda n, i: (n, i, 0))

    def wt_spec(r, c):
        # constant index_map -> fetched once, stays resident in VMEM
        return pl.BlockSpec((r, c), lambda n, i: (0, 0))

    return pl.pallas_call(
        _aspp_head_kernel,
        out_shape=jax.ShapeDtypeStruct((N, HW, nout), out_dtype),
        grid_spec=pltpu.PrefetchScalarGridSpec(
            num_scalar_prefetch=0,
            grid=grid,
            in_specs=[
                pix_spec(cin),                    # x
                pix_spec(depth),                  # d1
                pix_spec(depth),                  # d2
                pix_spec(depth),                  # d3
                wt_spec(cin, depth),              # w0  (1x1 branch)
                wt_spec(1, depth),                # b0
                wt_spec(4 * depth, nout),         # out_conv slices 0..3
                pl.BlockSpec((1, 1, nout), lambda n, i: (n, 0, 0)),  # img bias
            ],
            out_specs=pl.BlockSpec((1, tm, nout), lambda n, i: (n, i, 0)),
            scratch_shapes=[pltpu.VMEM((tm, 4 * depth), jnp.bfloat16)],
        ),
        compiler_params=pltpu.CompilerParams(
            dimension_semantics=("parallel", "parallel"),
            vmem_limit_bytes=40 * 1024 * 1024,   # v7x-safe; raise on v6e
        ),
    )(x3, d1, d2, d3, w0, b0, wo_cat, img_bias)


# ---------------------------------------------------------------------------
# Parameters (PyTorch-style conv + BN) and inference-time folding
# ---------------------------------------------------------------------------
def _convbn_init(key, cin, cout, k):
    kw, kb, kg, kbeta, kmean, kvar = jax.random.split(key, 6)
    return dict(
        w=0.05 * jax.random.normal(kw, (cout, cin, k, k), jnp.float32),
        b=0.05 * jax.random.normal(kb, (cout,), jnp.float32),
        gamma=1.0 + 0.05 * jax.random.normal(kg, (cout,), jnp.float32),
        beta=0.05 * jax.random.normal(kbeta, (cout,), jnp.float32),
        mean=0.05 * jax.random.normal(kmean, (cout,), jnp.float32),
        var=jnp.abs(1.0 + 0.05 * jax.random.normal(kvar, (cout,), jnp.float32)),
    )


def init_aspp_params(key, in_channels=1024, depth=256, out_channels=1024):
    ks = jax.random.split(key, 6)
    return dict(
        conv0=_convbn_init(ks[0], in_channels, depth, 1),
        conv1=_convbn_init(ks[1], in_channels, depth, 3),
        conv2=_convbn_init(ks[2], in_channels, depth, 3),
        conv3=_convbn_init(ks[3], in_channels, depth, 3),
        imgl=_convbn_init(ks[4], in_channels, depth, 1),
        out=_convbn_init(ks[5], 5 * depth, out_channels, 1),
    )


def _fold_bn(p, eps=1e-5):
    scale = p["gamma"] * lax.rsqrt(p["var"] + eps)
    w = p["w"] * scale[:, None, None, None]
    b = (p["b"] - p["mean"]) * scale + p["beta"]
    return w, b


def fold_aspp_params(params):
    """Fold inference BN into conv weights; pre-transpose / cast once."""
    depth = params["conv0"]["w"].shape[0]
    bf16 = jnp.bfloat16

    w0, b0 = _fold_bn(params["conv0"])           # (depth, Cin, 1, 1)
    w1, b1 = _fold_bn(params["conv1"])           # (depth, Cin, 3, 3)
    w2, b2 = _fold_bn(params["conv2"])
    w3, b3 = _fold_bn(params["conv3"])
    wi, bi = _fold_bn(params["imgl"])            # (depth, Cin, 1, 1)
    wo, bo = _fold_bn(params["out"])             # (Nout, 5*depth, 1, 1)
    wo_t = jnp.transpose(wo[:, :, 0, 0])         # (5*depth, Nout)

    return dict(
        w0=jnp.transpose(w0[:, :, 0, 0]).astype(bf16),          # (Cin, depth)
        b0=b0.reshape(1, depth).astype(jnp.float32),
        w1=jnp.transpose(w1, (2, 3, 1, 0)).astype(bf16),         # HWIO
        b1=b1.astype(jnp.float32),
        w2=jnp.transpose(w2, (2, 3, 1, 0)).astype(bf16),
        b2=b2.astype(jnp.float32),
        w3=jnp.transpose(w3, (2, 3, 1, 0)).astype(bf16),
        b3=b3.astype(jnp.float32),
        w_img=jnp.transpose(wi[:, :, 0, 0]).astype(bf16),        # (Cin, depth)
        b_img=bi.astype(jnp.float32),
        wo_cat=wo_t[:4 * depth].astype(bf16),    # (4*depth, Nout) branches 0-3
        wo4=wo_t[4 * depth:].astype(bf16),       # (depth, Nout)  image branch
        b_out=bo.astype(jnp.float32),
    )


# ---------------------------------------------------------------------------
# Forward
# ---------------------------------------------------------------------------
def _dilated_branch(x_nhwc_bf16, w_hwio, b, dilation):
    # TODO(synk): dilated 3x3 convs use XLA's conv_general_dilated, not a
    # hand-written Pallas conv kernel (halos up to 8 rows per dilation).
    y = lax.conv_general_dilated(
        x_nhwc_bf16, w_hwio,
        window_strides=(1, 1),
        padding=((dilation, dilation), (dilation, dilation)),
        rhs_dilation=(dilation, dilation),
        dimension_numbers=("NHWC", "HWIO", "NHWC"),
        preferred_element_type=jnp.float32)
    return jnp.maximum(y + b, 0.0).astype(jnp.bfloat16)


def _aspp_forward_nhwc(x_nhwc, fp, tm, out_dtype):
    N, H, W, cin = x_nhwc.shape
    depth = fp["w0"].shape[1]
    nout = fp["wo_cat"].shape[1]
    HW = H * W

    xb = x_nhwc.astype(jnp.bfloat16)

    # dilated 3x3 branches (ConvBn2d_D, dilation 2/4/8), BN folded, ReLU.
    d1 = _dilated_branch(xb, fp["w1"], fp["b1"], 2)
    d2 = _dilated_branch(xb, fp["w2"], fp["b2"], 4)
    d3 = _dilated_branch(xb, fp["w3"], fp["b3"], 8)

    # image-level branch: pool(1x1) -> 1x1 conv + BN + ReLU; bilinear upsample
    # of a 1x1 map is a broadcast -> its out_conv contribution is a per-image
    # bias vector (out_conv bias folded in).
    pooled = jnp.mean(xb.astype(jnp.float32), axis=(1, 2)).astype(jnp.bfloat16)
    img = jnp.maximum(
        jnp.dot(pooled, fp["w_img"], preferred_element_type=jnp.float32)
        + fp["b_img"], 0.0).astype(jnp.bfloat16)                 # (N, depth)
    img_bias = (jnp.dot(img, fp["wo4"], preferred_element_type=jnp.float32)
                + fp["b_out"])[:, None, :]                       # (N, 1, Nout)

    # balanced pixel tiling, no padding copies; last tile may be ragged.
    n_tiles = max(1, _cdiv(HW, tm))
    tm_eff = _round_up(_cdiv(HW, n_tiles), 8)

    out = aspp_head_fused(
        xb.reshape(N, HW, cin),
        d1.reshape(N, HW, depth),
        d2.reshape(N, HW, depth),
        d3.reshape(N, HW, depth),
        fp["w0"], fp["b0"], fp["wo_cat"], img_bias,
        tm=tm_eff, out_dtype=out_dtype)
    return out.reshape(N, H, W, nout)


@functools.partial(jax.jit, static_argnames=("tm", "out_dtype"))
def aspp_forward_nhwc(x_nhwc, fp, tm=1024, out_dtype=jnp.bfloat16):
    """Native layout: (N, H, W, Cin) -> (N, H, W, out_channels), no transposes."""
    return _aspp_forward_nhwc(x_nhwc, fp, tm, out_dtype)


@functools.partial(jax.jit, static_argnames=("tm", "out_dtype"))
def aspp_forward(x, fp, tm=1024, out_dtype=jnp.bfloat16):
    """PyTorch-parity layout: (N, Cin, H, W) -> (N, out_channels, H, W).
    The NCHW<->NHWC transposes exist only in this compatibility wrapper —
    NHWC callers should use aspp_forward_nhwc and skip them entirely."""
    xh = jnp.transpose(x, (0, 2, 3, 1))
    out = _aspp_forward_nhwc(xh, fp, tm, out_dtype)
    return jnp.transpose(out, (0, 3, 1, 2))


# ---------------------------------------------------------------------------
# Pure-JAX reference (materializes the concat) for correctness checking
# ---------------------------------------------------------------------------
@jax.jit
def aspp_reference(x, fp):
    N, cin, H, W = x.shape
    depth = fp["w0"].shape[1]
    xh = jnp.transpose(x, (0, 2, 3, 1))
    xb = xh.astype(jnp.bfloat16)

    br0 = jnp.maximum(
        jnp.einsum("nhwc,cd->nhwd", xb, fp["w0"],
                   preferred_element_type=jnp.float32) + fp["b0"][0],
        0.0).astype(jnp.bfloat16)
    d1 = _dilated_branch(xb, fp["w1"], fp["b1"], 2)
    d2 = _dilated_branch(xb, fp["w2"], fp["b2"], 4)
    d3 = _dilated_branch(xb, fp["w3"], fp["b3"], 8)
    pooled = jnp.mean(xb.astype(jnp.float32), axis=(1, 2)).astype(jnp.bfloat16)
    img = jnp.maximum(
        jnp.dot(pooled, fp["w_img"], preferred_element_type=jnp.float32)
        + fp["b_img"], 0.0).astype(jnp.bfloat16)
    img_map = jnp.broadcast_to(img[:, None, None, :], (N, H, W, depth))

    cat = jnp.concatenate([br0, d1, d2, d3, img_map], axis=-1)   # (N,H,W,5d)
    wo = jnp.concatenate([fp["wo_cat"], fp["wo4"]], axis=0)      # (5d, Nout)
    out = jnp.einsum("nhwk,ko->nhwo", cat, wo,
                     preferred_element_type=jnp.float32) + fp["b_out"]
    out = jnp.maximum(out, 0.0)
    return jnp.transpose(out, (0, 3, 1, 2))


if __name__ == "__main__":
    # Channel sizes are fixed by the module (Conv2d(1024, depth, ...)).
    in_channels, depth, out_channels = 1024, 256, 1024

    key = jax.random.PRNGKey(0)
    kx1, kx2, kp = jax.random.split(key, 3)
    params = init_aspp_params(kp, in_channels, depth, out_channels)
    fp = fold_aspp_params(params)

    def check(x, tm):
        out = aspp_forward(x, fp, tm=tm)
        jax.block_until_ready(out)
        n, _, h, w = x.shape
        assert out.shape == (n, out_channels, h, w)
        assert out.dtype == jnp.bfloat16
        o = np.asarray(out, dtype=np.float32)
        assert np.all(o >= 0.0)            # final ReLU
        assert np.all(np.isfinite(o))
        ref = np.asarray(aspp_reference(x, fp), dtype=np.float32)
        np.testing.assert_allclose(o, ref, rtol=3e-2, atol=3e-2)

    # 1) small, tile-exact case (HW = 256 -> single exact tile)
    x1 = jax.random.normal(kx1, (2, in_channels, 16, 16), dtype=jnp.float32)
    check(x1, tm=1024)

    # 2) ragged case: HW = 320 with tm=128 -> 3 balanced tiles of 112 rows,
    #    last tile partially out of bounds (exercises the no-pad path).
    x2 = jax.random.normal(kx2, (1, in_channels, 16, 20), dtype=jnp.float32)
    check(x2, tm=128)

    print("KERNEL_OK")
</pallas_src>

<mosaic_0001>
module attributes {stable_mosaic.version = 11 : i64} {
  func.func @_aspp_head_kernel(%arg0: i32, %arg1: i32, %arg2: memref<1x256x1024xbf16, #tpu.memory_space<vmem>>, %arg3: memref<1x256x256xbf16, #tpu.memory_space<vmem>>, %arg4: memref<1x256x256xbf16, #tpu.memory_space<vmem>>, %arg5: memref<1x256x256xbf16, #tpu.memory_space<vmem>>, %arg6: memref<1024x256xbf16, #tpu.memory_space<vmem>>, %arg7: memref<1x256xf32, #tpu.memory_space<vmem>>, %arg8: memref<1024x1024xbf16, #tpu.memory_space<vmem>>, %arg9: memref<1x1x1024xf32, #tpu.memory_space<vmem>>, %arg10: memref<1x256x1024xbf16, #tpu.memory_space<vmem>>, %arg11: memref<256x1024xbf16, #tpu.memory_space<vmem>>) attributes {dimension_semantics = [#tpu.dimension_semantics<parallel>, #tpu.dimension_semantics<parallel>], iteration_bounds = array<i64: 2, 1>, scalar_prefetch = 0 : i64, scratch_operands = 1 : i64, tpu.core_type = #tpu.core_type<tc>, window_params = [{transform_indices = @transform_0, window_bounds = array<i64: 1, 256, 1024>}, {transform_indices = @transform_1, window_bounds = array<i64: 1, 256, 256>}, {transform_indices = @transform_2, window_bounds = array<i64: 1, 256, 256>}, {transform_indices = @transform_3, window_bounds = array<i64: 1, 256, 256>}, {pipeline_mode = #tpu.pipeline_mode<synchronous>, transform_indices = @transform_4, window_bounds = array<i64: 1024, 256>}, {pipeline_mode = #tpu.pipeline_mode<synchronous>, transform_indices = @transform_5, window_bounds = array<i64: 1, 256>}, {pipeline_mode = #tpu.pipeline_mode<synchronous>, transform_indices = @transform_6, window_bounds = array<i64: 1024, 1024>}, {transform_indices = @transform_7, window_bounds = array<i64: 1, 1, 1024>}, {transform_indices = @transform_8, window_bounds = array<i64: 1, 256, 1024>}]} {
    %c0 = arith.constant 0 : index
    %c0_0 = arith.constant 0 : index
    %c0_1 = arith.constant 0 : index
    %0 = vector.load %arg2[%c0, %c0_0, %c0_1] : memref<1x256x1024xbf16, #tpu.memory_space<vmem>>, vector<1x256x1024xbf16>
    %1 = vector.shape_cast %0 : vector<1x256x1024xbf16> to vector<256x1024xbf16>
    %c0_2 = arith.constant 0 : index
    %c0_3 = arith.constant 0 : index
    %2 = vector.load %arg6[%c0_2, %c0_3] : memref<1024x256xbf16, #tpu.memory_space<vmem>>, vector<1024x256xbf16>
    %cst = arith.constant dense<0.000000e+00> : vector<256x256xf32>
    %3 = tpu.matmul %1, %2, %cst {dimension_numbers = #tpu.dot_dimension_numbers<[1], [0], [0], [1], [0, 0, 1, 1], [], []>} : vector<256x1024xbf16>, vector<1024x256xbf16>, vector<256x256xf32> -> vector<256x256xf32>
    %c0_4 = arith.constant 0 : index
    %c0_5 = arith.constant 0 : index
    %4 = vector.load %arg7[%c0_4, %c0_5] : memref<1x256xf32, #tpu.memory_space<vmem>>, vector<1x256xf32>
    %5 = vector.broadcast %4 : vector<1x256xf32> to vector<256x256xf32>
    %6 = arith.addf %3, %5 : vector<256x256xf32>
    %cst_6 = arith.constant 0.000000e+00 : f32
    %7 = vector.broadcast %cst_6 : f32 to vector<256x256xf32>
    %8 = arith.maximumf %6, %7 : vector<256x256xf32>
    %9 = arith.truncf %8 : vector<256x256xf32> to vector<256x256xbf16>
    %c0_7 = arith.constant 0 : index
    %c0_8 = arith.constant 0 : index
    %10 = vector.load %arg11[%c0_7, %c0_8] : memref<256x1024xbf16, #tpu.memory_space<vmem>>, vector<256x256xbf16>
    tpu.vector_store %arg11[%c0_7, %c0_8], %9 {strides = array<i32>} : memref<256x1024xbf16, #tpu.memory_space<vmem>>, vector<256x256xbf16>,
    %c0_9 = arith.constant 0 : index
    %c0_10 = arith.constant 0 : index
    %c0_11 = arith.constant 0 : index
    %11 = vector.load %arg3[%c0_9, %c0_10, %c0_11] : memref<1x256x256xbf16, #tpu.memory_space<vmem>>, vector<1x256x256xbf16>
    %12 = vector.shape_cast %11 : vector<1x256x256xbf16> to vector<256x256xbf16>
    %c0_12 = arith.constant 0 : index
    %c256 = arith.constant 256 : index
    %13 = vector.load %arg11[%c0_12, %c256] : memref<256x1024xbf16, #tpu.memory_space<vmem>>, vector<256x256xbf16>
    tpu.vector_store %arg11[%c0_12, %c256], %12 {strides = array<i32>} : memref<256x1024xbf16, #tpu.memory_space<vmem>>, vector<256x256xbf16>,
    %c0_13 = arith.constant 0 : index
    %c0_14 = arith.constant 0 : index
    %c0_15 = arith.constant 0 : index
    %14 = vector.load %arg4[%c0_13, %c0_14, %c0_15] : memref<1x256x256xbf16, #tpu.memory_space<vmem>>, vector<1x256x256xbf16>
    %15 = vector.shape_cast %14 : vector<1x256x256xbf16> to vector<256x256xbf16>
    %c0_16 = arith.constant 0 : index
    %c512 = arith.constant 512 : index
    %16 = vector.load %arg11[%c0_16, %c512] : memref<256x1024xbf16, #tpu.memory_space<vmem>>, vector<256x256xbf16>
    tpu.vector_store %arg11[%c0_16, %c512], %15 {strides = array<i32>} : memref<256x1024xbf16, #tpu.memory_space<vmem>>, vector<256x256xbf16>,
    %c0_17 = arith.constant 0 : index
    %c0_18 = arith.constant 0 : index
    %c0_19 = arith.constant 0 : index
    %17 = vector.load %arg5[%c0_17, %c0_18, %c0_19] : memref<1x256x256xbf16, #tpu.memory_space<vmem>>, vector<1x256x256xbf16>
    %18 = vector.shape_cast %17 : vector<1x256x256xbf16> to vector<256x256xbf16>
    %c0_20 = arith.constant 0 : index
    %c768 = arith.constant 768 : index
    %19 = vector.load %arg11[%c0_20, %c768] : memref<256x1024xbf16, #tpu.memory_space<vmem>>, vector<256x256xbf16>
    tpu.vector_store %arg11[%c0_20, %c768], %18 {strides = array<i32>} : memref<256x1024xbf16, #tpu.memory_space<vmem>>, vector<256x256xbf16>,
    %c0_21 = arith.constant 0 : index
    %c0_22 = arith.constant 0 : index
    %20 = vector.load %arg11[%c0_21, %c0_22] : memref<256x1024xbf16, #tpu.memory_space<vmem>>, vector<256x1024xbf16>
    %c0_23 = arith.constant 0 : index
    %c0_24 = arith.constant 0 : index
    %21 = vector.load %arg8[%c0_23, %c0_24] : memref<1024x1024xbf16, #tpu.memory_space<vmem>>, vector<1024x1024xbf16>
    %cst_25 = arith.constant dense<0.000000e+00> : vector<256x1024xf32>
    %22 = tpu.matmul %20, %21, %cst_25 {dimension_numbers = #tpu.dot_dimension_numbers<[1], [0], [0], [1], [0, 0, 1, 1], [], []>} : vector<256x1024xbf16>, vector<1024x1024xbf16>, vector<256x1024xf32> -> vector<256x1024xf32>
    %c0_26 = arith.constant 0 : index
    %c0_27 = arith.constant 0 : index
    %c0_28 = arith.constant 0 : index
    %23 = vector.load %arg9[%c0_26, %c0_27, %c0_28] : memref<1x1x1024xf32, #tpu.memory_space<vmem>>, vector<1x1x1024xf32>
    %24 = vector.shape_cast %23 : vector<1x1x1024xf32> to vector<1x1024xf32>
    %25 = vector.broadcast %24 : vector<1x1024xf32> to vector<256x1024xf32>
    %26 = arith.addf %22, %25 : vector<256x1024xf32>
    %cst_29 = arith.constant 0.000000e+00 : f32
    %27 = vector.broadcast %cst_29 : f32 to vector<256x1024xf32>
    %28 = arith.maximumf %26, %27 : vector<256x1024xf32>
    %29 = arith.truncf %28 : vector<256x1024xf32> to vector<256x1024xbf16>
    %c0_30 = arith.constant 0 : index
    %c0_31 = arith.constant 0 : index
    %c0_32 = arith.constant 0 : index
    %30 = vector.load %arg10[%c0_30, %c0_31, %c0_32] : memref<1x256x1024xbf16, #tpu.memory_space<vmem>>, vector<1x256x1024xbf16>
    %31 = vector.shape_cast %30 : vector<1x256x1024xbf16> to vector<256x1024xbf16>
    %32 = vector.shape_cast %29 : vector<256x1024xbf16> to vector<1x256x1024xbf16>
    tpu.vector_store %arg10[%c0_30, %c0_31, %c0_32], %32 {strides = array<i32>} : memref<1x256x1024xbf16, #tpu.memory_space<vmem>>, vector<1x256x1024xbf16>,
    return
  }
  func.func @transform_0(%arg0: i32, %arg1: i32) -> (i32, i32, i32) {
    %c0_i32 = arith.constant 0 : i32
    %c0_i32_0 = arith.constant 0 : i32
    return %arg0, %arg1, %c0_i32 : i32, i32, i32
  }
  func.func @transform_1(%arg0: i32, %arg1: i32) -> (i32, i32, i32) {
    %c0_i32 = arith.constant 0 : i32
    %c0_i32_0 = arith.constant 0 : i32
    return %arg0, %arg1, %c0_i32 : i32, i32, i32
  }
  func.func @transform_2(%arg0: i32, %arg1: i32) -> (i32, i32, i32) {
    %c0_i32 = arith.constant 0 : i32
    %c0_i32_0 = arith.constant 0 : i32
    return %arg0, %arg1, %c0_i32 : i32, i32, i32
  }
  func.func @transform_3(%arg0: i32, %arg1: i32) -> (i32, i32, i32) {
    %c0_i32 = arith.constant 0 : i32
    %c0_i32_0 = arith.constant 0 : i32
    return %arg0, %arg1, %c0_i32 : i32, i32, i32
  }
  func.func @transform_4(%arg0: i32, %arg1: i32) -> (i32, i32) {
    %c0_i32 = arith.constant 0 : i32
    %c0_i32_0 = arith.constant 0 : i32
    %c0_i32_1 = arith.constant 0 : i32
    return %c0_i32, %c0_i32_0 : i32, i32
  }
  func.func @transform_5(%arg0: i32, %arg1: i32) -> (i32, i32) {
    %c0_i32 = arith.constant 0 : i32
    %c0_i32_0 = arith.constant 0 : i32
    %c0_i32_1 = arith.constant 0 : i32
    return %c0_i32, %c0_i32_0 : i32, i32
  }
  func.func @transform_6(%arg0: i32, %arg1: i32) -> (i32, i32) {
    %c0_i32 = arith.constant 0 : i32
    %c0_i32_0 = arith.constant 0 : i32
    %c0_i32_1 = arith.constant 0 : i32
    return %c0_i32, %c0_i32_0 : i32, i32
  }
  func.func @transform_7(%arg0: i32, %arg1: i32) -> (i32, i32, i32) {
    %c0_i32 = arith.constant 0 : i32
    %c0_i32_0 = arith.constant 0 : i32
    %c0_i32_1 = arith.constant 0 : i32
    return %arg0, %c0_i32, %c0_i32_0 : i32, i32, i32
  }
  func.func @transform_8(%arg0: i32, %arg1: i32) -> (i32, i32, i32) {
    %c0_i32 = arith.constant 0 : i32
    %c0_i32_0 = arith.constant 0 : i32
    return %arg0, %arg1, %c0_i32 : i32, i32, i32
  }
}

</mosaic_0001>

<bundles_post_ra>
// kernel: aspp_forward.1
= control target key start
LH: loop header
LB: loop body
LE: loop exit
PB: predicated region body
PF: predicated region fallthrough
CT: control target
= control target key end

     0   :  { %s19961_s0 = inlined_call_operand.vmem [shape: bf16[2,256,1024], index: 0, kind: input, shape index: {}]   ;;  %s19962_s1 = inlined_call_operand.vmem [shape: bf16[2,256,256], index: 1, kind: input, shape index: {}]   ;;  %s19963_s2 = inlined_call_operand.vmem [shape: bf16[2,256,256], index: 2, kind: input, shape index: {}]   ;;  %s19964_s3 = inlined_call_operand.vmem [shape: bf16[2,256,256], index: 3, kind: input, shape index: {}]   ;;  %s19965_s4 = inlined_call_operand.vmem [shape: bf16[1024,256], index: 4, kind: input, shape index: {}]   ;;  %s19966_s5 = inlined_call_operand.vmem [shape: f32[1,256], index: 5, kind: input, shape index: {}]   ;;  %s19967_s6 = inlined_call_operand.vmem [shape: bf16[1024,1024], index: 6, kind: input, shape index: {}]   ;;  %s19968_s7 = inlined_call_operand.vmem [shape: f32[2,1,1024], index: 7, kind: input, shape index: {}]   ;;  %s19969_s8 = inlined_call_operand.hbm [shape: bf16[2,256,1024], index: 8, kind: output, shape index: {}]  }
   0x1   :  { %20042 = sst [smem:[#allocation167_spill]] %s19961_s0 }
   0x2   :  { %13 = vsyncpa [#allocation4], 0 }
   0x3   :  { %15 = vsyncpa [#allocation4 + $0x1], 0  ;;  %s13651_s27 = smov 0   ;;  %s13653_s28 = smov 0  }
   0x4   :  { %s13655_s29 = smov 0   ;;  %s13657_s30 = smov 0  }
   0x5   :  { %s13659_s9 = smov 0   ;;  %s13661_s10 = smov 0  }
   0x6 LB: > { %s11568_s11 = sadd.s32 4294967295, %s13601_s10   ;;  %s11569_s12 = sadd.s32 4294967294, %s13601_s10   ;;  %s13601_s10 = sphi %s13661_s10, %s21_s10   ;;  %s13597_s9 = sphi %s13659_s9, %s21215_s9   ;;  %s13593_s30 = sphi %s13657_s30, %s21214_s30   ;;  %s13589_s29 = sphi %s13655_s29, %s21213_s29   ;;  %s13585_s28 = sphi %s13653_s28, %s21212_s28   ;;  %s13581_s27 = sphi %s13651_s27, %s21211_s27  }
   0x7   : > { %s33_s13 = sadd.s32 1, %s13597_s9  ;;  %s243_s14 = sadd.s32 1, %s13589_s29 }
   0x8   : > { %p35_p0 = scmp.ge.s32.totalorder %s33_s13, 2  ;;  %p253_p1 = scmp.ne.s32.totalorder %s13589_s29, %s13585_s28 }
   0x9   : > { %p254_p2 = scmp.eq.s32.totalorder %s11568_s11, 1  ;;  %p259_p3 = scmp.ne.s32.totalorder %s13585_s28, %s13581_s27 }
   0xa   : > { %s21217_s13 = smov (%p35_p0, %s33_s13), 0  ;;  %p260_p5 = scmp.eq.s32.totalorder %s11569_s12, 1 }
   0xb   : > { %p13691_p4 = por %p254_p2, %p253_p1  ;;  %s238_s16 = ssub.s32 %s13597_s9, %s21217_s13 }
   0xc   : > { %p11572_p6 = scmp.ge.s32.totalorder %s13601_s10, 1  ;;  %p241_p7 = scmp.eq.s32.totalorder %s238_s16, 0 }
   0xd   : > { %p13698_p8 = por %p260_p5, %p259_p3  ;;  %p350_p9 = scmp.lt.s32.totalorder %s13601_s10, 3 }
   0xe   : > { %s13704_s18 = scalar_select %p241_p7, %s13589_s29, %s243_s14  }
   0xf   : > { %p351_p10 = pnand %p11572_p6, %p350_p9 }
  0x11   : > { %354 = sbr.rel (%p351_p10) target bundleno = 1678 (0x68e), region = 52 }
  0x16   : > { %v12898_v0 = vld [vmem:[%s19965_s4 + $0x74] ss:$8 sps:$4 sm:$0xff]   ;;  %v12902_v2 = vld [vmem:[%s19965_s4 + $0x70] ss:$8 sps:$4 sm:$0xff]   ;;  %v12904_v4 = vld [vmem:[%s19965_s4 + $0x64] ss:$8 sps:$4 sm:$0xff]  }
  0x17   : > { %v12900_v1 = vld [vmem:[%s19965_s4 + $0x174] ss:$8 sps:$4 sm:$0xff]   ;;  %2020 = vmatprep.subr.bf16.mxu0 %v12898_v0  ;;  %v12903_v3 = vld [vmem:[%s19965_s4 + $0x170] ss:$8 sps:$4 sm:$0xff]   ;;  %v12906_v5 = vld [vmem:[%s19965_s4 + $0x164] ss:$8 sps:$4 sm:$0xff]  }
  0x18   : > { %2213 = vmatprep.subr.bf16.mxu1 %v12900_v1  ;;  %2021 = vmatpush1.bf16.msra.mxu0 %v12902_v2  ;;  %v12908_v6 = vld [vmem:[%s19965_s4 + $0x60] ss:$8 sps:$4 sm:$0xff]   ;;  %v12910_v8 = vld [vmem:[%s19965_s4 + $0x54] ss:$8 sps:$4 sm:$0xff]   ;;  %v12914_v10 = vld [vmem:[%s19965_s4 + $0x50] ss:$8 sps:$4 sm:$0xff]  }
  0x19   : > { %2214 = vmatpush1.bf16.msra.mxu1 %v12903_v3  ;;  %2022 = vmatprep.subr.bf16.mxu0 %v12904_v4  ;;  %v12909_v7 = vld [vmem:[%s19965_s4 + $0x160] ss:$8 sps:$4 sm:$0xff]   ;;  %v12912_v9 = vld [vmem:[%s19965_s4 + $0x154] ss:$8 sps:$4 sm:$0xff]   ;;  %v12915_v11 = vld [vmem:[%s19965_s4 + $0x150] ss:$8 sps:$4 sm:$0xff]  }
  0x1a   : > { %2215 = vmatprep.subr.bf16.mxu1 %v12906_v5  ;;  %v12916_v12 = vld [vmem:[%s19965_s4 + $0x44] ss:$8 sps:$4 sm:$0xff]   ;;  %v12920_v14 = vld [vmem:[%s19965_s4 + $0x40] ss:$8 sps:$4 sm:$0xff]   ;;  %v12922_v16 = vld [vmem:[%s19965_s4 + $0x34] ss:$8 sps:$4 sm:$0xff]  }
  0x1b   : > { %v12918_v13 = vld [vmem:[%s19965_s4 + $0x144] ss:$8 sps:$4 sm:$0xff]   ;;  %v12921_v15 = vld [vmem:[%s19965_s4 + $0x140] ss:$8 sps:$4 sm:$0xff]   ;;  %v12924_v17 = vld [vmem:[%s19965_s4 + $0x134] ss:$8 sps:$4 sm:$0xff]  }
  0x1c   : > { %2023 = vmatpush1.bf16.msra.mxu0 %v12908_v6  ;;  %v12926_v18 = vld [vmem:[%s19965_s4 + $0x30] ss:$8 sps:$4 sm:$0xff]   ;;  %v12928_v20 = vld [vmem:[%s19965_s4 + $0x24] ss:$8 sps:$4 sm:$0xff]   ;;  %v12932_v22 = vld [vmem:[%s19965_s4 + $0x20] ss:$8 sps:$4 sm:$0xff]  }
  0x1d   : > { %2216 = vmatpush1.bf16.msra.mxu1 %v12909_v7  ;;  %2024 = vmatprep.subr.bf16.mxu0 %v12910_v8  ;;  %v12927_v19 = vld [vmem:[%s19965_s4 + $0x130] ss:$8 sps:$4 sm:$0xff]   ;;  %v12930_v21 = vld [vmem:[%s19965_s4 + $0x124] ss:$8 sps:$4 sm:$0xff]   ;;  %v12933_v23 = vld [vmem:[%s19965_s4 + $0x120] ss:$8 sps:$4 sm:$0xff]  }
  0x1e   : > { %2217 = vmatprep.subr.bf16.mxu1 %v12912_v9  ;;  %v12934_v24 = vld [vmem:[%s19965_s4 + $0x14] ss:$8 sps:$4 sm:$0xff]   ;;  %v12938_v26 = vld [vmem:[%s19965_s4 + $0x10] ss:$8 sps:$4 sm:$0xff]   ;;  %v12940_v28 = vld [vmem:[%s19965_s4 + $0x4] ss:$8 sps:$4 sm:$0xff]  }
  0x1f   : > { %v12936_v25 = vld [vmem:[%s19965_s4 + $0x114] ss:$8 sps:$4 sm:$0xff]   ;;  %v12939_v27 = vld [vmem:[%s19965_s4 + $0x110] ss:$8 sps:$4 sm:$0xff]   ;;  %v12942_v29 = vld [vmem:[%s19965_s4 + $0x104] ss:$8 sps:$4 sm:$0xff]  }
  0x20   : > { %2025 = vmatpush1.bf16.msra.mxu0 %v12914_v10  ;;  %v12944_v30 = vld [vmem:[%s19965_s4] ss:$8 sps:$4 sm:$0xff]   ;;  %v12946_v32 = vld [vmem:[%s19965_s4 + $0xf4] ss:$8 sps:$4 sm:$0xff]   ;;  %p424_p11 = scmp.lt.s32.totalorder %s13593_s30, 1  ;;  %s20045_s0 = sld [smem:[#allocation167_spill]] }
  0x21   : > { %2218 = vmatpush1.bf16.msra.mxu1 %v12915_v11  ;;  %2026 = vmatprep.subr.bf16.mxu0 %v12916_v12  ;;  %v12945_v31 = vld [vmem:[%s19965_s4 + $0x100] ss:$8 sps:$4 sm:$0xff]   ;;  %v12948_v33 = vld [vmem:[%s19965_s4 + $0x1f4] ss:$8 sps:$4 sm:$0xff]   ;;  %v12950_v34 = vld [vmem:[%s19965_s4 + $0xf0] ss:$8 sps:$4 sm:$0xff]  }
  0x22   : > { %2219 = vmatprep.subr.bf16.mxu1 %v12918_v13  ;;  %v12951_v35 = vld [vmem:[%s19965_s4 + $0x1f0] ss:$8 sps:$4 sm:$0xff]   ;;  %v12952_v36 = vld [vmem:[%s19965_s4 + $0xe4] ss:$8 sps:$4 sm:$0xff]   ;;  %s13819_s21 = scalar_select %p424_p11, %s13593_s30, 1 }
  0x23   : > { %v12954_v37 = vld [vmem:[%s19965_s4 + $0x1e4] ss:$8 sps:$4 sm:$0xff]   ;;  %v12956_v38 = vld [vmem:[%s19965_s4 + $0xe0] ss:$8 sps:$4 sm:$0xff]   ;;  %v12958_v40 = vld [vmem:[%s19965_s4 + $0xd4] ss:$8 sps:$4 sm:$0xff]  }
  0x24   : > { %2027 = vmatpush1.bf16.msra.mxu0 %v12920_v14  ;;  %v12957_v39 = vld [vmem:[%s19965_s4 + $0x1e0] ss:$8 sps:$4 sm:$0xff]   ;;  %s12644_s16 = sshll.u32 %s13819_s21, 10  ;;  %v12960_v41 = vld [vmem:[%s19965_s4 + $0x1d4] ss:$8 sps:$4 sm:$0xff]   ;;  %s14520_s23 = sshll.u32 %s13819_s21, 8 }
  0x25   : > { %2220 = vmatpush1.bf16.msra.mxu1 %v12921_v15  ;;  %2028 = vmatprep.subr.bf16.mxu0 %v12922_v16  ;;  %v12962_v42 = vld [vmem:[%s19965_s4 + $0xd0] ss:$8 sps:$4 sm:$0xff]   ;;  %v12964_v44 = vld [vmem:[%s19965_s4 + $0xc4] ss:$8 sps:$4 sm:$0xff]   ;;  %v12968_v46 = vld [vmem:[%s19965_s4 + $0xc0] ss:$8 sps:$4 sm:$0xff]   ;;  %s14532_s25 = scalar_lea.vmem %s19962_s1, %s14520_s23  ;;  %s14911_s19 = scalar_lea.vmem %s19964_s3, %s14520_s23 }
  0x26   : > { %2221 = vmatprep.subr.bf16.mxu1 %v12924_v17  ;;  %v12963_v43 = vld [vmem:[%s19965_s4 + $0x1d0] ss:$8 sps:$4 sm:$0xff]   ;;  %s13846_s12 = scalar_lea.vmem %s20045_s0, %s12644_s16  ;;  %v12966_v45 = vld [vmem:[%s19965_s4 + $0x1c4] ss:$8 sps:$4 sm:$0xff]   ;;  %v12969_v48 = vld [vmem:[%s19965_s4 + $0x1c0] ss:$8 sps:$4 sm:$0xff]   ;;  %s14923_s16 = scalar_lea.vmem %s19963_s2, %s14520_s23 }
  0x27   : > { %v13858_v47 = vld [vmem:[%s13846_s12] sm:$0xff]  ;;  %v13867_v50 = vld [vmem:[%s13846_s12 + $0x8] sm:$0xff]  ;;  %v12970_v53 = vld [vmem:[%s19965_s4 + $0xb4] ss:$8 sps:$4 sm:$0xff]   ;;  %s11582_s22 = sshll.u32 %s13819_s21, 3  ;;  %s20039_s23 = sand.u32 1, %s13585_s28  }
  0x28   : > { %2029 = vmatpush1.bf16.msra.mxu0 %v12926_v18  ;;  %v13864_v49 = vld [vmem:[%s13846_s12 + $0x20] sm:$0xff]  ;;  %v477_v52 = vld [vmem:[%s13846_s12 + $0x28] sm:$0xff]  ;;  %v12972_v54 = vld [vmem:[%s19965_s4 + $0x1b4] ss:$8 sps:$4 sm:$0xff]   ;;  %s16117_s11 = scalar_lea.vmem %s19968_s7, %s11582_s22  ;;  %s16223_s20 = sshll.u32 %s20039_s23, 10 }
  0x29   : > { %2222 = vmatpush1.bf16.msra.mxu1 %v12927_v19  ;;  %2030 = vmatprep.subr.bf16.mxu0 %v12928_v20  ;;  %v11584_v51 = vcombine.high %v13858_v47, %v13864_v49  ;;  %v11586_v55 = vcombine.high %v13867_v50, %v477_v52  ;;  %v12974_v56 = vld [vmem:[%s19965_s4 + $0xb0] ss:$8 sps:$4 sm:$0xff]   ;;  %v12976_v58 = vld [vmem:[%s19965_s4 + $0xa4] ss:$8 sps:$4 sm:$0xff]   ;;  %v12980_v60 = vld [vmem:[%s19965_s4 + $0xa0] ss:$8 sps:$4 sm:$0xff]   ;;  %v11583_v12 = vcombine.low %v13858_v47, %v13864_v49 }
  0x2a   : > { %2223 = vmatprep.subr.bf16.mxu1 %v12930_v21  ;;  %v12975_v57 = vld [vmem:[%s19965_s4 + $0x1b0] ss:$8 sps:$4 sm:$0xff]   ;;  %v12978_v59 = vld [vmem:[%s19965_s4 + $0x1a4] ss:$8 sps:$4 sm:$0xff]   ;;  %v12981_v61 = vld [vmem:[%s19965_s4 + $0x1a0] ss:$8 sps:$4 sm:$0xff]   ;;  %v11585_v13 = vcombine.low %v13867_v50, %v477_v52 }
  0x2b   : > { %2052 = vmatprep.mubr.bf16.mxu0 %v11584_v51  ;;  %2245 = vmatprep.mubr.bf16.mxu1 %v11586_v55  ;;  %v12982_v62 = vld [vmem:[%s19965_s4 + $0x94] ss:$8 sps:$4 sm:$0xff]   ;;  %v12986_v0 = vld [vmem:[%s19965_s4 + $0x90] ss:$8 sps:$4 sm:$0xff]   ;;  %v12988_v2 = vld [vmem:[%s19965_s4 + $0x84] ss:$8 sps:$4 sm:$0xff]  }
  0x2c   : > { %2031 = vmatpush1.bf16.msra.mxu0 %v12932_v22  ;;  %v12984_v63 = vld [vmem:[%s19965_s4 + $0x194] ss:$8 sps:$4 sm:$0xff]   ;;  %v12987_v1 = vld [vmem:[%s19965_s4 + $0x190] ss:$8 sps:$4 sm:$0xff]   ;;  %v12990_v3 = vld [vmem:[%s19965_s4 + $0x184] ss:$8 sps:$4 sm:$0xff]  }
  0x2d   : > { %2224 = vmatpush1.bf16.msra.mxu1 %v12933_v23  ;;  %2032 = vmatprep.subr.bf16.mxu0 %v12934_v24  ;;  %v12992_v4 = vld [vmem:[%s19965_s4 + $0x80] ss:$8 sps:$4 sm:$0xff]   ;;  %v12996_v6 = vld [vmem:[%s19965_s4 + $0x274] ss:$8 sps:$4 sm:$0xff]   ;;  %v12994_v14 = vld [vmem:[%s19965_s4 + $0x270] ss:$8 sps:$4 sm:$0xff]  }
  0x2e   : > { %2225 = vmatprep.subr.bf16.mxu1 %v12936_v25  ;;  %v12993_v5 = vld [vmem:[%s19965_s4 + $0x180] ss:$8 sps:$4 sm:$0xff]   ;;  %v12999_v7 = vld [vmem:[%s19965_s4 + $0x374] ss:$8 sps:$4 sm:$0xff]   ;;  %v12997_v15 = vld [vmem:[%s19965_s4 + $0x370] ss:$8 sps:$4 sm:$0xff]  }
  0x2f   : > { %v480_v8 = vld [vmem:[%s13846_s12 + $0x40] sm:$0xff]  ;;  %v481_v10 = vld [vmem:[%s13846_s12 + $0x48] sm:$0xff]  ;;  %v13021_v49 = vld [vmem:[%s19965_s4 + $0x330] ss:$8 sps:$4 sm:$0xff]   ;;  %s16259_s22 = scalar_lea.vmem [#allocation3], %s16223_s20  ;;  %s21210_s0 = sand.u32 1, %s13585_s28  }
  0x30   : > { %2033 = vmatpush1.bf16.msra.mxu0 %v12938_v26  ;;  %v484_v9 = vld [vmem:[%s13846_s12 + $0x60] sm:$0xff]  ;;  %v485_v11 = vld [vmem:[%s13846_s12 + $0x68] sm:$0xff]  ;;  %v13008_v26 = vld [vmem:[%s19965_s4 + $0x254] ss:$8 sps:$4 sm:$0xff]   ;;  %s19916_s26 = scalar_lea.sflag [#allocation4], %s21210_s0  ;;  %s13603_s21 = smov [#allocation3]  }
  0x31   : > { %2226 = vmatpush1.bf16.msra.mxu1 %v12939_v27  ;;  %2034 = vmatprep.subr.bf16.mxu0 %v12940_v28  ;;  %v11592_v16 = vcombine.high %v480_v8, %v484_v9  ;;  %v11594_v17 = vcombine.high %v481_v10, %v485_v11  ;;  %v13002_v18 = vld [vmem:[%s19965_s4 + $0x264] ss:$8 sps:$4 sm:$0xff]   ;;  %v13000_v19 = vld [vmem:[%s19965_s4 + $0x260] ss:$8 sps:$4 sm:$0xff]   ;;  %v13011_v27 = vld [vmem:[%s19965_s4 + $0x354] ss:$8 sps:$4 sm:$0xff]   ;;  %v11591_v28 = vcombine.low %v480_v8, %v484_v9 }
  0x32   : > { %2227 = vmatprep.subr.bf16.mxu1 %v12942_v29  ;;  %v13003_v20 = vld [vmem:[%s19965_s4 + $0x360] ss:$8 sps:$4 sm:$0xff]   ;;  %v13005_v21 = vld [vmem:[%s19965_s4 + $0x364] ss:$8 sps:$4 sm:$0xff]   ;;  %v11593_v29 = vcombine.low %v481_v10, %v485_v11  ;;  %v13044_v10 = vld [vmem:[%s19965_s4 + $0x2f4] ss:$8 sps:$4 sm:$0xff]  }
  0x33   : > { %v488_v22 = vld [vmem:[%s13846_s12 + $0x80] sm:$0xff]  ;;  %v489_v24 = vld [vmem:[%s13846_s12 + $0x88] sm:$0xff]  ;;  %v13047_v11 = vld [vmem:[%s19965_s4 + $0x3f4] ss:$8 sps:$4 sm:$0xff]   ;;  %s13529_s20 = sshll.u32 %s13603_s21, 4  ;;  %s13530_s20 = int_to_ptr.vmem [resolvable:$false] %s13529_s20 }
  0x34   : > { %2035 = vmatpush1.bf16.msra.mxu0 %v12944_v30  ;;  %v492_v23 = vld [vmem:[%s13846_s12 + $0xa0] sm:$0xff]  ;;  %v493_v25 = vld [vmem:[%s13846_s12 + $0xa8] sm:$0xff]  ;;  %s13531_s14 = scalar_lea.vmem %s13530_s20, 32768 }
  0x35   : > { %2228 = vmatpush1.bf16.msra.mxu1 %v12945_v31  ;;  %2036 = vmatprep.subr.bf16.mxu0 %v12946_v32  ;;  %v11600_v30 = vcombine.high %v488_v22, %v492_v23  ;;  %v11602_v31 = vcombine.high %v489_v24, %v493_v25  ;;  %v13006_v32 = vld [vmem:[%s19965_s4 + $0x250] ss:$8 sps:$4 sm:$0xff]   ;;  %v13026_v50 = vld [vmem:[%s19965_s4 + $0x224] ss:$8 sps:$4 sm:$0xff]   ;;  %v13036_v8 = vld [vmem:[%s19965_s4 + $0x200] ss:$8 sps:$4 sm:$0xff]  }
  0x36   : > { %2229 = vmatprep.subr.bf16.mxu1 %v12948_v33  ;;  %v13009_v33 = vld [vmem:[%s19965_s4 + $0x350] ss:$8 sps:$4 sm:$0xff]   ;;  %v13029_v51 = vld [vmem:[%s19965_s4 + $0x324] ss:$8 sps:$4 sm:$0xff]   ;;  %v13039_v9 = vld [vmem:[%s19965_s4 + $0x300] ss:$8 sps:$4 sm:$0xff]  }
  0x37   : > { %v504_v52 = vld [vmem:[%s13846_s12 + $0x100] sm:$0xff]  ;;  %v509_v55 = vld [vmem:[%s13846_s12 + $0x128] sm:$0xff] }
  0x38   : > { %2037 = vmatpush2.bf16.msra.mxu0 %v12950_v34  ;;  %v13014_v34 = vld [vmem:[%s19965_s4 + $0x244] ss:$8 sps:$4 sm:$0xff]  }
  0x39   : > { %2230 = vmatpush2.bf16.msra.mxu1 %v12951_v35  ;;  %2038 = vmatprep.subr.bf16.mxu0 %v12952_v36  ;;  %v13017_v35 = vld [vmem:[%s19965_s4 + $0x344] ss:$8 sps:$4 sm:$0xff]  }
  0x3a   : > { %2231 = vmatprep.subr.bf16.mxu1 %v12954_v37  ;;  %v496_v36 = vld [vmem:[%s13846_s12 + $0xc0] sm:$0xff] }
  0x3b   : > { %v500_v37 = vld [vmem:[%s13846_s12 + $0xe0] sm:$0xff] }
  0x3c   : > { %2039 = vmatpush2.bf16.msra.mxu0 %v12956_v38  ;;  %v497_v38 = vld [vmem:[%s13846_s12 + $0xc8] sm:$0xff] }
  0x3d   : > { %2232 = vmatpush2.bf16.msra.mxu1 %v12957_v39  ;;  %2040 = vmatprep.subr.bf16.mxu0 %v12958_v40  ;;  %v501_v39 = vld [vmem:[%s13846_s12 + $0xe8] sm:$0xff] }
  0x3e   : > { %2233 = vmatprep.subr.bf16.mxu1 %v12960_v41  ;;  %v13012_v40 = vld [vmem:[%s19965_s4 + $0x240] ss:$8 sps:$4 sm:$0xff]   ;;  %v11610_v47 = vcombine.high %v497_v38, %v501_v39 }
  0x3f   : > { %v13015_v41 = vld [vmem:[%s19965_s4 + $0x340] ss:$8 sps:$4 sm:$0xff]  }
  0x40   : > { %2041 = vmatpush2.bf16.msra.mxu0 %v12962_v42  ;;  %v13020_v42 = vld [vmem:[%s19965_s4 + $0x234] ss:$8 sps:$4 sm:$0xff]  }
  0x41   : > { %2234 = vmatpush2.bf16.msra.mxu1 %v12963_v43  ;;  %2042 = vmatprep.subr.bf16.mxu0 %v12964_v44  ;;  %v13023_v43 = vld [vmem:[%s19965_s4 + $0x334] ss:$8 sps:$4 sm:$0xff]   ;;  %v11599_v44 = vcombine.low %v488_v22, %v492_v23  ;;  %v521_v22 = vld [vmem:[%s13846_s12 + $0x188] sm:$0xff] }
  0x42   : > { %2235 = vmatprep.subr.bf16.mxu1 %v12966_v45  ;;  %v11601_v45 = vcombine.low %v489_v24, %v493_v25  ;;  %v525_v23 = vld [vmem:[%s13846_s12 + $0x1a8] sm:$0xff] }
  0x43   : > { %v13048_v24 = vld [vmem:[%s19965_s4 + $0x2e0] ss:$8 sps:$4 sm:$0xff]  }
  0x44   : > { %2043 = vmatpush2.bf16.msra.mxu0 %v12968_v46  ;;  %v11608_v46 = vcombine.high %v496_v36, %v500_v37  ;;  %v13051_v25 = vld [vmem:[%s19965_s4 + $0x3e0] ss:$8 sps:$4 sm:$0xff]  }
  0x45   : > { %2236 = vmatpush2.bf16.msra.mxu1 %v12969_v48  ;;  %2044 = vmatprep.subr.bf16.mxu0 %v12970_v53  ;;  %v13018_v48 = vld [vmem:[%s19965_s4 + $0x230] ss:$8 sps:$4 sm:$0xff]   ;;  %v508_v53 = vld [vmem:[%s13846_s12 + $0x120] sm:$0xff] }
  0x46   : > { %2237 = vmatprep.subr.bf16.mxu1 %v12972_v54  ;;  %v505_v54 = vld [vmem:[%s13846_s12 + $0x108] sm:$0xff] }
  0x48   : > { %2045 = vmatpush2.bf16.msra.mxu0 %v12974_v56  ;;  %v13024_v56 = vld [vmem:[%s19965_s4 + $0x220] ss:$8 sps:$4 sm:$0xff]  }
  0x49   : > { %2238 = vmatpush2.bf16.msra.mxu1 %v12975_v57  ;;  %2046 = vmatprep.subr.bf16.mxu0 %v12976_v58  ;;  %v13027_v57 = vld [vmem:[%s19965_s4 + $0x320] ss:$8 sps:$4 sm:$0xff]   ;;  %v13032_v58 = vld [vmem:[%s19965_s4 + $0x214] ss:$8 sps:$4 sm:$0xff]  }
  0x4a   : > { %2239 = vmatprep.subr.bf16.mxu1 %v12978_v59  ;;  %v13035_v59 = vld [vmem:[%s19965_s4 + $0x314] ss:$8 sps:$4 sm:$0xff]  }
  0x4c   : > { %2047 = vmatpush2.bf16.msra.mxu0 %v12980_v60  ;;  %v11607_v60 = vcombine.low %v496_v36, %v500_v37  ;;  %v528_v36 = vld [vmem:[%s13846_s12 + $0x1c0] sm:$0xff] }
  0x4d   : > { %2240 = vmatpush2.bf16.msra.mxu1 %v12981_v61  ;;  %2048 = vmatprep.subr.bf16.mxu0 %v12982_v62  ;;  %v11609_v61 = vcombine.low %v497_v38, %v501_v39  ;;  %v11616_v62 = vcombine.high %v504_v52, %v508_v53  ;;  %v532_v37 = vld [vmem:[%s13846_s12 + $0x1e0] sm:$0xff]  ;;  %v529_v38 = vld [vmem:[%s13846_s12 + $0x1c8] sm:$0xff] }
  0x4e   : > { %2241 = vmatprep.subr.bf16.mxu1 %v12984_v63  ;;  %v11618_v63 = vcombine.high %v505_v54, %v509_v55  ;;  %v533_v39 = vld [vmem:[%s13846_s12 + $0x1e8] sm:$0xff] }
  0x50   : > { %2049 = vmatpush2.bf16.msra.mxu0 %v12986_v0  ;;  %v13030_v0 = vld [vmem:[%s19965_s4 + $0x210] ss:$8 sps:$4 sm:$0xff]  }
  0x51   : > { %2242 = vmatpush2.bf16.msra.mxu1 %v12987_v1  ;;  %2050 = vmatprep.subr.bf16.mxu0 %v12988_v2  ;;  %v13033_v1 = vld [vmem:[%s19965_s4 + $0x310] ss:$8 sps:$4 sm:$0xff]   ;;  %v13038_v2 = vld [vmem:[%s19965_s4 + $0x204] ss:$8 sps:$4 sm:$0xff]  }
  0x52   : > { %2243 = vmatprep.subr.bf16.mxu1 %v12990_v3  ;;  %v13041_v3 = vld [vmem:[%s19965_s4 + $0x304] ss:$8 sps:$4 sm:$0xff]  }
  0x54   : > { %2051 = vmatpush2.bf16.msra.mxu0 %v12992_v4  ;;  %v512_v4 = vld [vmem:[%s13846_s12 + $0x140] sm:$0xff] }
  0x55   : > { %2244 = vmatpush2.bf16.msra.mxu1 %v12993_v5  ;;  %2406 = vmatprep.subr.bf16.mxu0 %v12996_v6  ;;  %v516_v5 = vld [vmem:[%s13846_s12 + $0x160] sm:$0xff]  ;;  %v513_v6 = vld [vmem:[%s13846_s12 + $0x148] sm:$0xff] }
  0x56   : > { %2599 = vmatprep.subr.bf16.mxu1 %v12999_v7  ;;  %v517_v7 = vld [vmem:[%s13846_s12 + $0x168] sm:$0xff] }
  0x57   : > { %2053 = vmatmul.mubr.bf16.vlgmr.msra.gmra.mxu0 %v11583_v12  ;;  %v11615_v12 = vcombine.low %v504_v52, %v508_v53  ;;  %v536_v52 = vld [vmem:[%s13846_s12 + $0x200] sm:$0xff] }
  0x58   : > { %2246 = vmatmul.mubr.bf16.vlgmr.msra.gmra.mxu1 %v11585_v13  ;;  %2407 = vmatpush1.bf16.msra.mxu0 %v12994_v14  ;;  %v11617_v13 = vcombine.low %v505_v54, %v509_v55  ;;  %v11624_v14 = vcombine.high %v512_v4, %v516_v5  ;;  %v540_v53 = vld [vmem:[%s13846_s12 + $0x220] sm:$0xff]  ;;  %v537_v54 = vld [vmem:[%s13846_s12 + $0x208] sm:$0xff] }
  0x59   : > { %2600 = vmatpush1.bf16.msra.mxu1 %v12997_v15  ;;  %2062 = vmatprep.mubr.bf16.mxu0 %v11592_v16  ;;  %v11626_v15 = vcombine.high %v513_v6, %v517_v7  ;;  %v13042_v16 = vld [vmem:[%s19965_s4 + $0x2f0] ss:$8 sps:$4 sm:$0xff]   ;;  %v541_v55 = vld [vmem:[%s13846_s12 + $0x228] sm:$0xff] }
  0x5a   : > { %2255 = vmatprep.mubr.bf16.mxu1 %v11594_v17  ;;  %2408 = vmatprep.subr.bf16.mxu0 %v13002_v18  ;;  %v13045_v17 = vld [vmem:[%s19965_s4 + $0x3f0] ss:$8 sps:$4 sm:$0xff]   ;;  %v13050_v18 = vld [vmem:[%s19965_s4 + $0x2e4] ss:$8 sps:$4 sm:$0xff]  }
  0x5b   : > { %2601 = vmatprep.subr.bf16.mxu1 %v13005_v21  ;;  %v524_v21 = vld [vmem:[%s13846_s12 + $0x1a0] sm:$0xff] }
  0x5c   : > { %2409 = vmatpush1.bf16.msra.mxu0 %v13000_v19  ;;  %v13053_v19 = vld [vmem:[%s19965_s4 + $0x3e4] ss:$8 sps:$4 sm:$0xff]  }
  0x5d   : > { %2602 = vmatpush1.bf16.msra.mxu1 %v13003_v20  ;;  %2410 = vmatprep.subr.bf16.mxu0 %v13008_v26  ;;  %v520_v20 = vld [vmem:[%s13846_s12 + $0x180] sm:$0xff]  ;;  %v13056_v26 = vld [vmem:[%s19965_s4 + $0x2d4] ss:$8 sps:$4 sm:$0xff]  }
  0x5e   : > { %2603 = vmatprep.subr.bf16.mxu1 %v13011_v27  ;;  %v13059_v27 = vld [vmem:[%s19965_s4 + $0x3d4] ss:$8 sps:$4 sm:$0xff]  }
  0x5f   : > { %2063 = vmatmul.mubr.bf16.gmra.mxu0 %v11591_v28  ;;  %v11623_v28 = vcombine.low %v512_v4, %v516_v5  ;;  %v544_v4 = vld [vmem:[%s13846_s12 + $0x240] sm:$0xff] }
  0x60   : > { %2256 = vmatmul.mubr.bf16.gmra.mxu1 %v11593_v29  ;;  %2072 = vmatprep.mubr.bf16.mxu0 %v11600_v30  ;;  %v11625_v29 = vcombine.low %v513_v6, %v517_v7  ;;  %v11632_v30 = vcombine.high %v520_v20, %v524_v21  ;;  %v548_v5 = vld [vmem:[%s13846_s12 + $0x260] sm:$0xff]  ;;  %v545_v6 = vld [vmem:[%s13846_s12 + $0x248] sm:$0xff] }
  0x61   : > { %2265 = vmatprep.mubr.bf16.mxu1 %v11602_v31  ;;  %2411 = vmatpush1.bf16.msra.mxu0 %v13006_v32  ;;  %v11634_v31 = vcombine.high %v521_v22, %v525_v23  ;;  %v13054_v32 = vld [vmem:[%s19965_s4 + $0x2d0] ss:$8 sps:$4 sm:$0xff]   ;;  %v549_v7 = vld [vmem:[%s13846_s12 + $0x268] sm:$0xff] }
  0x62   : > { %2604 = vmatpush1.bf16.msra.mxu1 %v13009_v33  ;;  %2412 = vmatprep.subr.bf16.mxu0 %v13014_v34  ;;  %v13057_v33 = vld [vmem:[%s19965_s4 + $0x3d0] ss:$8 sps:$4 sm:$0xff]   ;;  %v13062_v34 = vld [vmem:[%s19965_s4 + $0x2c4] ss:$8 sps:$4 sm:$0xff]  }
  0x63   : > { %2605 = vmatprep.subr.bf16.mxu1 %v13017_v35  ;;  %v13065_v35 = vld [vmem:[%s19965_s4 + $0x3c4] ss:$8 sps:$4 sm:$0xff]  }
  0x65   : > { %2413 = vmatpush1.bf16.msra.mxu0 %v13012_v40  ;;  %v13060_v40 = vld [vmem:[%s19965_s4 + $0x2c0] ss:$8 sps:$4 sm:$0xff]  }
  0x66   : > { %2606 = vmatpush1.bf16.msra.mxu1 %v13015_v41  ;;  %2414 = vmatprep.subr.bf16.mxu0 %v13020_v42  ;;  %v13063_v41 = vld [vmem:[%s19965_s4 + $0x3c0] ss:$8 sps:$4 sm:$0xff]   ;;  %v13068_v42 = vld [vmem:[%s19965_s4 + $0x2b4] ss:$8 sps:$4 sm:$0xff]  }
  0x67   : > { %2607 = vmatprep.subr.bf16.mxu1 %v13023_v43  ;;  %2073 = vmatmul.mubr.bf16.gmra.mxu0 %v11599_v44  ;;  %v13071_v43 = vld [vmem:[%s19965_s4 + $0x3b4] ss:$8 sps:$4 sm:$0xff]   ;;  %v11631_v44 = vcombine.low %v520_v20, %v524_v21 }
  0x68   : > { %2266 = vmatmul.mubr.bf16.gmra.mxu1 %v11601_v45  ;;  %2082 = vmatprep.mubr.bf16.mxu0 %v11608_v46  ;;  %v11633_v45 = vcombine.low %v521_v22, %v525_v23  ;;  %v11640_v46 = vcombine.high %v528_v36, %v532_v37  ;;  %v560_v22 = vld [vmem:[%s13846_s12 + $0x2c0] sm:$0xff] }
  0x69   : > { %2275 = vmatprep.mubr.bf16.mxu1 %v11610_v47  ;;  %2415 = vmatpush1.bf16.msra.mxu0 %v13018_v48  ;;  %v11642_v47 = vcombine.high %v529_v38, %v533_v39  ;;  %v13066_v48 = vld [vmem:[%s19965_s4 + $0x2b0] ss:$8 sps:$4 sm:$0xff]   ;;  %v564_v23 = vld [vmem:[%s13846_s12 + $0x2e0] sm:$0xff] }
  0x6a   : > { %2608 = vmatpush1.bf16.msra.mxu1 %v13021_v49  ;;  %2416 = vmatprep.subr.bf16.mxu0 %v13026_v50  ;;  %v13069_v49 = vld [vmem:[%s19965_s4 + $0x3b0] ss:$8 sps:$4 sm:$0xff]   ;;  %v13074_v50 = vld [vmem:[%s19965_s4 + $0x2a4] ss:$8 sps:$4 sm:$0xff]  }
  0x6b   : > { %2609 = vmatprep.subr.bf16.mxu1 %v13029_v51  ;;  %v13077_v51 = vld [vmem:[%s19965_s4 + $0x3a4] ss:$8 sps:$4 sm:$0xff]  }
  0x6d   : > { %2417 = vmatpush1.bf16.msra.mxu0 %v13024_v56  ;;  %v13072_v56 = vld [vmem:[%s19965_s4 + $0x2a0] ss:$8 sps:$4 sm:$0xff]  }
  0x6e   : > { %2610 = vmatpush1.bf16.msra.mxu1 %v13027_v57  ;;  %2418 = vmatprep.subr.bf16.mxu0 %v13032_v58  ;;  %v13075_v57 = vld [vmem:[%s19965_s4 + $0x3a0] ss:$8 sps:$4 sm:$0xff]   ;;  %v13080_v58 = vld [vmem:[%s19965_s4 + $0x294] ss:$8 sps:$4 sm:$0xff]  }
  0x6f   : > { %2611 = vmatprep.subr.bf16.mxu1 %v13035_v59  ;;  %2083 = vmatmul.mubr.bf16.gmra.mxu0 %v11607_v60  ;;  %v13083_v59 = vld [vmem:[%s19965_s4 + $0x394] ss:$8 sps:$4 sm:$0xff]   ;;  %v11639_v60 = vcombine.low %v528_v36, %v532_v37  ;;  %v11671_v36 = vcombine.low %v560_v22, %v564_v23 }
  0x70   : > { %2276 = vmatmul.mubr.bf16.gmra.mxu1 %v11609_v61  ;;  %2092 = vmatprep.mubr.bf16.mxu0 %v11616_v62  ;;  %v11641_v61 = vcombine.low %v529_v38, %v533_v39  ;;  %v11648_v62 = vcombine.high %v536_v52, %v540_v53 }
  0x71   : > { %2285 = vmatprep.mubr.bf16.mxu1 %v11618_v63  ;;  %2419 = vmatpush1.bf16.msra.mxu0 %v13030_v0  ;;  %v11650_v63 = vcombine.high %v537_v54, %v541_v55  ;;  %v13078_v0 = vld [vmem:[%s19965_s4 + $0x290] ss:$8 sps:$4 sm:$0xff]  }
  0x72   : > { %2612 = vmatpush1.bf16.msra.mxu1 %v13033_v1  ;;  %2420 = vmatprep.subr.bf16.mxu0 %v13038_v2  ;;  %v13081_v1 = vld [vmem:[%s19965_s4 + $0x390] ss:$8 sps:$4 sm:$0xff]   ;;  %v13086_v2 = vld [vmem:[%s19965_s4 + $0x284] ss:$8 sps:$4 sm:$0xff]  }
  0x73   : > { %2613 = vmatprep.subr.bf16.mxu1 %v13041_v3  ;;  %v13089_v3 = vld [vmem:[%s19965_s4 + $0x384] ss:$8 sps:$4 sm:$0xff]  }
  0x75   : > { %2421 = vmatpush1.bf16.msra.mxu0 %v13036_v8  ;;  %v13084_v8 = vld [vmem:[%s19965_s4 + $0x280] ss:$8 sps:$4 sm:$0xff]  }
  0x76   : > { %2614 = vmatpush1.bf16.msra.mxu1 %v13039_v9  ;;  %2422 = vmatprep.subr.bf16.mxu0 %v13044_v10  ;;  %v13087_v9 = vld [vmem:[%s19965_s4 + $0x380] ss:$8 sps:$4 sm:$0xff]   ;;  %v11647_v10 = vcombine.low %v536_v52, %v540_v53 }
  0x77   : > { %2615 = vmatprep.subr.bf16.mxu1 %v13047_v11  ;;  %2093 = vmatmul.mubr.bf16.gmra.mxu0 %v11615_v12  ;;  %v11649_v11 = vcombine.low %v537_v54, %v541_v55  ;;  %v11656_v12 = vcombine.high %v544_v4, %v548_v5  ;;  %v584_v52 = vld [vmem:[%s13846_s12 + $0x380] sm:$0xff]  ;;  %v585_v54 = vld [vmem:[%s13846_s12 + $0x388] sm:$0xff] }
  0x78   : > { %2286 = vmatmul.mubr.bf16.gmra.mxu1 %v11617_v13  ;;  %2102 = vmatprep.mubr.bf16.mxu0 %v11624_v14  ;;  %v11658_v13 = vcombine.high %v545_v6, %v549_v7  ;;  %v552_v14 = vld [vmem:[%s13846_s12 + $0x280] sm:$0xff]  ;;  %v589_v55 = vld [vmem:[%s13846_s12 + $0x3a8] sm:$0xff] }
  0x79   : > { %2295 = vmatprep.mubr.bf16.mxu1 %v11626_v15  ;;  %2423 = vmatpush2.bf16.msra.mxu0 %v13042_v16  ;;  %v556_v15 = vld [vmem:[%s13846_s12 + $0x2a0] sm:$0xff]  ;;  %v553_v16 = vld [vmem:[%s13846_s12 + $0x288] sm:$0xff] }
  0x7a   : > { %2616 = vmatpush2.bf16.msra.mxu1 %v13045_v17  ;;  %2424 = vmatprep.subr.bf16.mxu0 %v13050_v18  ;;  %v557_v17 = vld [vmem:[%s13846_s12 + $0x2a8] sm:$0xff]  ;;  %v11655_v18 = vcombine.low %v544_v4, %v548_v5  ;;  %v11664_v20 = vcombine.high %v552_v14, %v556_v15  ;;  %v588_v53 = vld [vmem:[%s13846_s12 + $0x3a0] sm:$0xff]  ;;  %v474_v4 = vld [vmem:[%s13846_s12 + $0x10] sm:$0xff] }
  0x7b   : > { %2617 = vmatprep.subr.bf16.mxu1 %v13053_v19  ;;  %v11657_v19 = vcombine.low %v545_v6, %v549_v7  ;;  %v11666_v21 = vcombine.high %v553_v16, %v557_v17  ;;  %v478_v5 = vld [vmem:[%s13846_s12 + $0x30] sm:$0xff]  ;;  %v475_v6 = vld [vmem:[%s13846_s12 + $0x18] sm:$0xff] }
  0x7c   : > { %v479_v7 = vld [vmem:[%s13846_s12 + $0x38] sm:$0xff] }
  0x7d   : > { %2425 = vmatpush2.bf16.msra.mxu0 %v13048_v24  ;;  %v561_v24 = vld [vmem:[%s13846_s12 + $0x2c8] sm:$0xff] }
  0x7e   : > { %2618 = vmatpush2.bf16.msra.mxu1 %v13051_v25  ;;  %2426 = vmatprep.subr.bf16.mxu0 %v13056_v26  ;;  %v565_v25 = vld [vmem:[%s13846_s12 + $0x2e8] sm:$0xff]  ;;  %v11663_v26 = vcombine.low %v552_v14, %v556_v15  ;;  %v483_v14 = vld [vmem:[%s13846_s12 + $0x58] sm:$0xff] }
  0x7f   : > { %2619 = vmatprep.subr.bf16.mxu1 %v13059_v27  ;;  %2103 = vmatmul.mubr.bf16.gmra.mxu0 %v11623_v28  ;;  %v11665_v27 = vcombine.low %v553_v16, %v557_v17  ;;  %v11672_v28 = vcombine.high %v560_v22, %v564_v23  ;;  %v11673_v37 = vcombine.low %v561_v24, %v565_v25  ;;  %v487_v15 = vld [vmem:[%s13846_s12 + $0x78] sm:$0xff]  ;;  %v3448_v16 = vld [vmem:[%s19967_s6 + $0x180] sm:$0xff] }
  0x80   : > { %2296 = vmatmul.mubr.bf16.gmra.mxu1 %v11625_v29  ;;  %2112 = vmatprep.mubr.bf16.mxu0 %v11632_v30  ;;  %v11674_v29 = vcombine.high %v561_v24, %v565_v25  ;;  %v568_v30 = vld [vmem:[%s13846_s12 + $0x300] sm:$0xff]  ;;  %v11587_v17 = vcombine.low %v474_v4, %v478_v5  ;;  %v11598_v23 = vcombine.high %v483_v14, %v487_v15 }
  0x81   : > { %2305 = vmatprep.mubr.bf16.mxu1 %v11634_v31  ;;  %2427 = vmatpush2.bf16.msra.mxu0 %v13054_v32  ;;  %v572_v31 = vld [vmem:[%s13846_s12 + $0x320] sm:$0xff]  ;;  %v569_v32 = vld [vmem:[%s13846_s12 + $0x308] sm:$0xff] }
  0x82   : > { %2620 = vmatpush2.bf16.msra.mxu1 %v13057_v33  ;;  %2428 = vmatprep.subr.bf16.mxu0 %v13062_v34  ;;  %v573_v33 = vld [vmem:[%s13846_s12 + $0x328] sm:$0xff]  ;;  %v14167_v34 = vld [vmem:[%s19967_s6 + $0x1c0] sm:$0xff]  ;;  %v11680_v39 = vcombine.high %v568_v30, %v572_v31 }
  0x83   : > { %2621 = vmatprep.subr.bf16.mxu1 %v13065_v35  ;;  %v14172_v35 = vld [vmem:[%s19967_s6 + $0x1e0] sm:$0xff] }
  0x84   : > { %v12056_v38 = vcombine.high %v14167_v34, %v14172_v35  ;;  %v12055_v24 = vcombine.low %v14167_v34, %v14172_v35  ;;  %v14243_v34 = vld [vmem:[%s13846_s12 + $0x98] sm:$0xff] }
  0x85   : > { %2429 = vmatpush2.bf16.msra.mxu0 %v13060_v40  ;;  %v11682_v40 = vcombine.high %v569_v32, %v573_v33  ;;  %v14246_v35 = vld [vmem:[%s13846_s12 + $0xb8] sm:$0xff] }
  0x86   : > { %2622 = vmatpush2.bf16.msra.mxu1 %v13063_v41  ;;  %2430 = vmatprep.subr.bf16.mxu0 %v13068_v42  ;;  %v14179_v41 = vld [vmem:[%s19967_s6 + $0x5c0] sm:$0xff] }
  0x87   : > { %2623 = vmatprep.subr.bf16.mxu1 %v13071_v43  ;;  %2113 = vmatmul.mubr.bf16.gmra.mxu0 %v11631_v44  ;;  %v14184_v42 = vld [vmem:[%s19967_s6 + $0x5e0] sm:$0xff] }
  0x88   : > { %2306 = vmatmul.mubr.bf16.gmra.mxu1 %v11633_v45  ;;  %2122 = vmatprep.mubr.bf16.mxu0 %v11640_v46  ;;  %v12184_v43 = vcombine.high %v14179_v41, %v14184_v42  ;;  %v576_v44 = vld [vmem:[%s13846_s12 + $0x340] sm:$0xff]  ;;  %v577_v46 = vld [vmem:[%s13846_s12 + $0x348] sm:$0xff]  ;;  %v12183_v25 = vcombine.low %v14179_v41, %v14184_v42  ;;  %v11597_v42 = vcombine.low %v483_v14, %v487_v15 }
  0x89   : > { %2315 = vmatprep.mubr.bf16.mxu1 %v11642_v47  ;;  %2431 = vmatpush2.bf16.msra.mxu0 %v13066_v48  ;;  %v580_v45 = vld [vmem:[%s13846_s12 + $0x360] sm:$0xff]  ;;  %v581_v47 = vld [vmem:[%s13846_s12 + $0x368] sm:$0xff]  ;;  %v11679_v48 = vcombine.low %v568_v30, %v572_v31 }
  0x8a   : > { %2624 = vmatpush2.bf16.msra.mxu1 %v13069_v49  ;;  %2432 = vmatprep.subr.bf16.mxu0 %v13074_v50  ;;  %v11681_v49 = vcombine.low %v569_v32, %v573_v33  ;;  %v11688_v50 = vcombine.high %v576_v44, %v580_v45  ;;  %v3568_v30 = vld [vmem:[%s19967_s6 + $0x540] sm:$0xff]  ;;  %v14237_v32 = vld [vmem:[%s13846_s12 + $0x90] sm:$0xff] }
  0x8b   : > { %2625 = vmatprep.subr.bf16.mxu1 %v13077_v51  ;;  %v11690_v51 = vcombine.high %v577_v46, %v581_v47  ;;  %v3572_v31 = vld [vmem:[%s19967_s6 + $0x560] sm:$0xff]  ;;  %v14240_v33 = vld [vmem:[%s13846_s12 + $0xb0] sm:$0xff] }
  0x8c   : > { %v3536_v14 = vld [vmem:[%s19967_s6 + $0x440] sm:$0xff] }
  0x8d   : > { %2433 = vmatpush2.bf16.msra.mxu0 %v13072_v56  ;;  %v11687_v56 = vcombine.low %v576_v44, %v580_v45  ;;  %v3560_v44 = vld [vmem:[%s19967_s6 + $0x500] sm:$0xff] }
  0x8e   : > { %2626 = vmatpush2.bf16.msra.mxu1 %v13075_v57  ;;  %2434 = vmatprep.subr.bf16.mxu0 %v13080_v58  ;;  %v11689_v57 = vcombine.low %v577_v46, %v581_v47  ;;  %v11696_v58 = vcombine.high %v584_v52, %v588_v53  ;;  %v3564_v45 = vld [vmem:[%s19967_s6 + $0x520] sm:$0xff]  ;;  %v11604_v46 = vcombine.high %v14237_v32, %v14240_v33 }
  0x8f   : > { %2627 = vmatprep.subr.bf16.mxu1 %v13083_v59  ;;  %2123 = vmatmul.mubr.bf16.gmra.mxu0 %v11639_v60  ;;  %v11698_v59 = vcombine.high %v585_v54, %v589_v55  ;;  %v592_v60 = vld [vmem:[%s13846_s12 + $0x3c0] sm:$0xff]  ;;  %v11606_v47 = vcombine.high %v14243_v34, %v14246_v35 }
  0x90   : > { %2316 = vmatmul.mubr.bf16.gmra.mxu1 %v11641_v61  ;;  %2132 = vmatprep.mubr.bf16.mxu0 %v11648_v62  ;;  %v596_v61 = vld [vmem:[%s13846_s12 + $0x3e0] sm:$0xff]  ;;  %v593_v62 = vld [vmem:[%s13846_s12 + $0x3c8] sm:$0xff] }
  0x91   : > { %2325 = vmatprep.mubr.bf16.mxu1 %v11650_v63  ;;  %2435 = vmatpush2.bf16.msra.mxu0 %v13078_v0  ;;  %v597_v63 = vld [vmem:[%s13846_s12 + $0x3e8] sm:$0xff]  ;;  %v11695_v0 = vcombine.low %v584_v52, %v588_v53  ;;  %v3424_v52 = vld [vmem:[%s19967_s6 + $0xc0] sm:$0xff] }
  0x92   : > { %2628 = vmatpush2.bf16.msra.mxu1 %v13081_v1  ;;  %2436 = vmatprep.subr.bf16.mxu0 %v13086_v2  ;;  %v11697_v1 = vcombine.low %v585_v54, %v589_v55  ;;  %v11704_v2 = vcombine.high %v592_v60, %v596_v61  ;;  %v3428_v53 = vld [vmem:[%s19967_s6 + $0xe0] sm:$0xff] }
  0x93   : > { %2629 = vmatprep.subr.bf16.mxu1 %v13089_v3  ;;  %v11706_v3 = vcombine.high %v593_v62, %v597_v63  ;;  %v3552_v54 = vld [vmem:[%s19967_s6 + $0x4c0] sm:$0xff] }
  0x94   : > { %v3556_v55 = vld [vmem:[%s19967_s6 + $0x4e0] sm:$0xff] }
  0x95   : > { %2437 = vmatpush2.bf16.msra.mxu0 %v13084_v8  ;;  %v11703_v8 = vcombine.low %v592_v60, %v596_v61  ;;  %v12159_v61 = vcombine.low %v3560_v44, %v3564_v45  ;;  %v3540_v15 = vld [vmem:[%s19967_s6 + $0x460] sm:$0xff] }
  0x96   : > { %2630 = vmatpush2.bf16.msra.mxu1 %v13087_v9  ;;  %7154 = vmatprep.subr.bf16.mxu0 %v12056_v38  ;;  %v11705_v9 = vcombine.low %v593_v62, %v597_v63  ;;  %v12024_v62 = vcombine.high %v3424_v52, %v3428_v53  ;;  %v12152_v63 = vcombine.high %v3552_v54, %v3556_v55 }
  0x97   : > { %2133 = vmatmul.mubr.bf16.gmra.mxu0 %v11647_v10  ;;  %7347 = vmatprep.subr.bf16.mxu1 %v12184_v43  ;;  %v11588_v10 = vcombine.high %v474_v4, %v478_v5  ;;  %v3436_v43 = vld [vmem:[%s19967_s6 + $0x120] sm:$0xff] }
  0x98   : > { %2326 = vmatmul.mubr.bf16.gmra.mxu1 %v11649_v11  ;;  %2142 = vmatprep.mubr.bf16.mxu0 %v11656_v12  ;;  %v11590_v11 = vcombine.high %v475_v6, %v479_v7  ;;  %v482_v12 = vld [vmem:[%s13846_s12 + $0x50] sm:$0xff]  ;;  %v3544_v4 = vld [vmem:[%s19967_s6 + $0x480] sm:$0xff] }
  0x99   : > { %2335 = vmatprep.mubr.bf16.mxu1 %v11658_v13  ;;  %v486_v13 = vld [vmem:[%s13846_s12 + $0x70] sm:$0xff]  ;;  %v3548_v5 = vld [vmem:[%s19967_s6 + $0x4a0] sm:$0xff] }
  0x9a   : > { %v11596_v22 = vcombine.high %v482_v12, %v486_v13  ;;  %v11595_v41 = vcombine.low %v482_v12, %v486_v13  ;;  %v3408_v12 = vld [vmem:[%s19967_s6 + $0x40] sm:$0xff] }
  0x9b   : > { %v3412_v13 = vld [vmem:[%s19967_s6 + $0x60] sm:$0xff] }
  0x9f   : > { %2143 = vmatmul.mubr.bf16.gmra.mxu0 %v11655_v18  ;;  %v11589_v18 = vcombine.low %v475_v6, %v479_v7 }
  0xa0   : > { %2336 = vmatmul.mubr.bf16.gmra.mxu1 %v11657_v19  ;;  %2152 = vmatprep.mubr.bf16.mxu0 %v11664_v20  ;;  %v3452_v19 = vld [vmem:[%s19967_s6 + $0x1a0] sm:$0xff] }
  0xa1   : > { %2345 = vmatprep.mubr.bf16.mxu1 %v11666_v21  ;;  %v3576_v20 = vld [vmem:[%s19967_s6 + $0x580] sm:$0xff] }
  0xa2   : > { %v3580_v21 = vld [vmem:[%s19967_s6 + $0x5a0] sm:$0xff] }
  0xa7   : > { %2153 = vmatmul.mubr.bf16.gmra.mxu0 %v11663_v26  ;;  %v12048_v26 = vcombine.high %v3448_v16, %v3452_v19 }
  0xa8   : > { %2346 = vmatmul.mubr.bf16.gmra.mxu1 %v11665_v27  ;;  %2162 = vmatprep.mubr.bf16.mxu0 %v11672_v28  ;;  %v12176_v27 = vcombine.high %v3576_v20, %v3580_v21  ;;  %v3440_v28 = vld [vmem:[%s19967_s6 + $0x140] sm:$0xff] }
  0xa9   : > { %2355 = vmatprep.mubr.bf16.mxu1 %v11674_v29  ;;  %v3444_v29 = vld [vmem:[%s19967_s6 + $0x160] sm:$0xff] }
  0xaa   : > { %v12040_v38 = vcombine.high %v3440_v28, %v3444_v29 }
  0xaf   : > { %2163 = vmatmul.mubr.bf16.gmra.mxu0 %v11671_v36  ;;  %v12047_v36 = vcombine.low %v3448_v16, %v3452_v19  ;;  %v14321_v16 = vld [vmem:[%s13846_s12 + $0x110] sm:$0xff]  ;;  %v511_v19 = vld [vmem:[%s13846_s12 + $0x138] sm:$0xff] }
  0xb0   : > { %2356 = vmatmul.mubr.bf16.gmra.mxu1 %v11673_v37  ;;  %2172 = vmatprep.mubr.bf16.mxu0 %v11680_v39  ;;  %v12175_v37 = vcombine.low %v3576_v20, %v3580_v21  ;;  %v12168_v39 = vcombine.high %v3568_v30, %v3572_v31  ;;  %v12143_v21 = vcombine.low %v3544_v4, %v3548_v5 }
  0xb1   : > { %2365 = vmatprep.mubr.bf16.mxu1 %v11682_v40  ;;  %v3432_v40 = vld [vmem:[%s19967_s6 + $0x100] sm:$0xff] }
  0xb2   : > { %v12031_v60 = vcombine.low %v3432_v40, %v3436_v43 }
  0xb7   : > { %2173 = vmatmul.mubr.bf16.gmra.mxu0 %v11679_v48  ;;  %v12039_v48 = vcombine.low %v3440_v28, %v3444_v29  ;;  %v3528_v28 = vld [vmem:[%s19967_s6 + $0x400] sm:$0xff] }
  0xb8   : > { %2366 = vmatmul.mubr.bf16.gmra.mxu1 %v11681_v49  ;;  %2182 = vmatprep.mubr.bf16.mxu0 %v11688_v50  ;;  %v12167_v49 = vcombine.low %v3568_v30, %v3572_v31  ;;  %v12032_v50 = vcombine.high %v3432_v40, %v3436_v43  ;;  %v3532_v29 = vld [vmem:[%s19967_s6 + $0x420] sm:$0xff]  ;;  %v514_v40 = vld [vmem:[%s13846_s12 + $0x150] sm:$0xff]  ;;  %v519_v43 = vld [vmem:[%s13846_s12 + $0x178] sm:$0xff] }
  0xb9   : > { %2375 = vmatprep.mubr.bf16.mxu1 %v11690_v51  ;;  %v12160_v51 = vcombine.high %v3560_v44, %v3564_v45  ;;  %v12127_v45 = vcombine.low %v3528_v28, %v3532_v29 }
  0xbf   : > { %2183 = vmatmul.mubr.bf16.gmra.mxu0 %v11687_v56  ;;  %v14277_v56 = vld [vmem:[%s13846_s12 + $0xd0] sm:$0xff] }
  0xc0   : > { %2376 = vmatmul.mubr.bf16.gmra.mxu1 %v11689_v57  ;;  %2192 = vmatprep.mubr.bf16.mxu0 %v11696_v58  ;;  %v14280_v57 = vld [vmem:[%s13846_s12 + $0xf0] sm:$0xff]  ;;  %v14283_v58 = vld [vmem:[%s13846_s12 + $0xd8] sm:$0xff] }
  0xc1   : > { %2385 = vmatprep.mubr.bf16.mxu1 %v11698_v59  ;;  %v14286_v59 = vld [vmem:[%s13846_s12 + $0xf8] sm:$0xff]  ;;  %v11612_v6 = vcombine.high %v14277_v56, %v14280_v57 }
  0xc2   : > { %v11614_v7 = vcombine.high %v14283_v58, %v14286_v59 }
  0xc7   : > { %2193 = vmatmul.mubr.bf16.gmra.mxu0 %v11695_v0  ;;  %v3416_v0 = vld [vmem:[%s19967_s6 + $0x80] sm:$0xff] }
  0xc8   : > { %2386 = vmatmul.mubr.bf16.gmra.mxu1 %v11697_v1  ;;  %2202 = vmatprep.mubr.bf16.mxu0 %v11704_v2  ;;  %v11603_v1 = vcombine.low %v14237_v32, %v14240_v33  ;;  %v11605_v2 = vcombine.low %v14243_v34, %v14246_v35  ;;  %v12007_v32 = vcombine.low %v3408_v12, %v3412_v13 }
  0xc9   : > { %2395 = vmatprep.mubr.bf16.mxu1 %v11706_v3  ;;  %v3420_v3 = vld [vmem:[%s19967_s6 + $0xa0] sm:$0xff]  ;;  %v12135_v33 = vcombine.low %v3536_v14, %v3540_v15  ;;  %v12128_v35 = vcombine.high %v3528_v28, %v3532_v29 }
  0xca   : > { %v12015_v20 = vcombine.low %v3416_v0, %v3420_v3 }
  0xcf   : > { %2203 = vmatmul.mubr.bf16.gmra.mxu0 %v11703_v8  ;;  %v12023_v8 = vcombine.low %v3424_v52, %v3428_v53 }
  0xd0   : > { %2396 = vmatmul.mubr.bf16.gmra.mxu1 %v11705_v9  ;;  %2438 = vmatprep.mubr.bf16.mxu0 %v11588_v10  ;;  %v12151_v9 = vcombine.low %v3552_v54, %v3556_v55  ;;  %v12016_v10 = vcombine.high %v3416_v0, %v3420_v3  ;;  %v3640_v54 = vld [vmem:[%s19967_s6 + $0x780] sm:$0xff] }
  0xd1   : > { %2631 = vmatprep.mubr.bf16.mxu1 %v11590_v11  ;;  %v12144_v11 = vcombine.high %v3544_v4, %v3548_v5  ;;  %v3644_v55 = vld [vmem:[%s19967_s6 + $0x7a0] sm:$0xff] }
  0xd2   : > { %v3508_v3 = vld [vmem:[%s19967_s6 + $0x360] sm:$0xff] }
  0xd7   : > { %2439 = vmatmul.mubr.bf16.vlgmr.msra.gmra.mxu0 %v11587_v17  ;;  %v14324_v17 = vld [vmem:[%s13846_s12 + $0x130] sm:$0xff] }
  0xd8   : > { %2632 = vmatmul.mubr.bf16.vlgmr.msra.gmra.mxu1 %v11589_v18  ;;  %2448 = vmatprep.mubr.bf16.mxu0 %v11596_v22  ;;  %v14327_v18 = vld [vmem:[%s13846_s12 + $0x118] sm:$0xff]  ;;  %v12008_v22 = vcombine.high %v3408_v12, %v3412_v13  ;;  %v11620_v30 = vcombine.high %v14321_v16, %v14324_v17 }
  0xd9   : > { %2641 = vmatprep.mubr.bf16.mxu1 %v11598_v23  ;;  %7155 = vmatpush1.bf16.msra.mxu0 %v12055_v24  ;;  %v12136_v23 = vcombine.high %v3536_v14, %v3540_v15  ;;  %v3400_v24 = vld [vmem:[%s19967_s6] sm:$0xff]  ;;  %v11622_v31 = vcombine.high %v14327_v18, %v511_v19  ;;  %v530_v14 = vld [vmem:[%s13846_s12 + $0x1d0] sm:$0xff] }
  0xda   : > { %7348 = vmatpush1.bf16.msra.mxu1 %v12183_v25  ;;  %7156 = vmatprep.subr.bf16.mxu0 %v12048_v26  ;;  %v11611_v25 = vcombine.low %v14277_v56, %v14280_v57  ;;  %v11613_v26 = vcombine.low %v14283_v58, %v14286_v59  ;;  %v12240_v59 = vcombine.high %v3640_v54, %v3644_v55  ;;  %v534_v15 = vld [vmem:[%s13846_s12 + $0x1f0] sm:$0xff] }
  0xdb   : > { %7349 = vmatprep.subr.bf16.mxu1 %v12176_v27  ;;  %v3404_v27 = vld [vmem:[%s19967_s6 + $0x20] sm:$0xff] }
  0xdc   : > { %v12000_v34 = vcombine.high %v3400_v24, %v3404_v27  ;;  %v11999_v44 = vcombine.low %v3400_v24, %v3404_v27  ;;  %v11644_v24 = vcombine.high %v530_v14, %v534_v15  ;;  %v3628_v27 = vld [vmem:[%s19967_s6 + $0x720] sm:$0xff] }
  0xdd   : > { %7157 = vmatpush1.bf16.msra.mxu0 %v12047_v36  ;;  %v3520_v36 = vld [vmem:[%s19967_s6 + $0x3c0] sm:$0xff] }
  0xde   : > { %7350 = vmatpush1.bf16.msra.mxu1 %v12175_v37  ;;  %7158 = vmatprep.subr.bf16.mxu0 %v12040_v38  ;;  %v3524_v37 = vld [vmem:[%s19967_s6 + $0x3e0] sm:$0xff] }
  0xdf   : > { %7351 = vmatprep.subr.bf16.mxu1 %v12168_v39  ;;  %2449 = vmatmul.mubr.bf16.gmra.mxu0 %v11595_v41  ;;  %v3648_v38 = vld [vmem:[%s19967_s6 + $0x7c0] sm:$0xff]  ;;  %v518_v41 = vld [vmem:[%s13846_s12 + $0x170] sm:$0xff]  ;;  %v12119_v56 = vcombine.low %v3520_v36, %v3524_v37 }
  0xe0   : > { %2642 = vmatmul.mubr.bf16.gmra.mxu1 %v11597_v42  ;;  %2458 = vmatprep.mubr.bf16.mxu0 %v11604_v46  ;;  %v3652_v39 = vld [vmem:[%s19967_s6 + $0x7e0] sm:$0xff]  ;;  %v515_v42 = vld [vmem:[%s13846_s12 + $0x158] sm:$0xff]  ;;  %v12120_v46 = vcombine.high %v3520_v36, %v3524_v37  ;;  %v11628_v52 = vcombine.high %v514_v40, %v518_v41  ;;  %v11627_v4 = vcombine.low %v514_v40, %v518_v41 }
  0xe1   : > { %2651 = vmatprep.mubr.bf16.mxu1 %v11606_v47  ;;  %7159 = vmatpush1.bf16.msra.mxu0 %v12039_v48  ;;  %v12248_v47 = vcombine.high %v3648_v38, %v3652_v39  ;;  %v11619_v48 = vcombine.low %v14321_v16, %v14324_v17  ;;  %v11630_v53 = vcombine.high %v515_v42, %v519_v43  ;;  %v531_v16 = vld [vmem:[%s13846_s12 + $0x1d8] sm:$0xff]  ;;  %v3492_v36 = vld [vmem:[%s19967_s6 + $0x2e0] sm:$0xff] }
  0xe2   : > { %7352 = vmatpush1.bf16.msra.mxu1 %v12167_v49  ;;  %7160 = vmatprep.subr.bf16.mxu0 %v12032_v50  ;;  %v11621_v49 = vcombine.low %v14327_v18, %v511_v19  ;;  %v3512_v50 = vld [vmem:[%s19967_s6 + $0x380] sm:$0xff]  ;;  %v12247_v57 = vcombine.low %v3648_v38, %v3652_v39  ;;  %v11629_v5 = vcombine.low %v515_v42, %v519_v43  ;;  %v535_v17 = vld [vmem:[%s13846_s12 + $0x1f8] sm:$0xff] }
  0xe3   : > { %7353 = vmatprep.subr.bf16.mxu1 %v12160_v51  ;;  %v3516_v51 = vld [vmem:[%s19967_s6 + $0x3a0] sm:$0xff]  ;;  %v11643_v37 = vcombine.low %v530_v14, %v534_v15  ;;  %v11645_v38 = vcombine.low %v531_v16, %v535_v17  ;;  %v14485_v14 = vld [vmem:[%s13846_s12 + $0x298] sm:$0xff] }
  0xe4   : > { %v12112_v58 = vcombine.high %v3512_v50, %v3516_v51  ;;  %v12111_v0 = vcombine.low %v3512_v50, %v3516_v51  ;;  %v3496_v18 = vld [vmem:[%s19967_s6 + $0x300] sm:$0xff]  ;;  %v14435_v50 = vld [vmem:[%s13846_s12 + $0x250] sm:$0xff]  ;;  %v14488_v15 = vld [vmem:[%s13846_s12 + $0x2b8] sm:$0xff] }
  0xe5   : > { %7161 = vmatpush1.bf16.msra.mxu0 %v12031_v60  ;;  %v522_v60 = vld [vmem:[%s13846_s12 + $0x190] sm:$0xff]  ;;  %v3500_v19 = vld [vmem:[%s19967_s6 + $0x320] sm:$0xff] }
  0xe6   : > { %7354 = vmatpush1.bf16.msra.mxu1 %v12159_v61  ;;  %7162 = vmatprep.subr.bf16.mxu0 %v12024_v62  ;;  %v526_v61 = vld [vmem:[%s13846_s12 + $0x1b0] sm:$0xff]  ;;  %v523_v62 = vld [vmem:[%s13846_s12 + $0x198] sm:$0xff] }
  0xe7   : > { %7355 = vmatprep.subr.bf16.mxu1 %v12152_v63  ;;  %2459 = vmatmul.mubr.bf16.gmra.mxu0 %v11603_v1  ;;  %v527_v63 = vld [vmem:[%s13846_s12 + $0x1b8] sm:$0xff]  ;;  %v12239_v1 = vcombine.low %v3640_v54, %v3644_v55  ;;  %v14438_v51 = vld [vmem:[%s13846_s12 + $0x270] sm:$0xff]  ;;  %v3480_v55 = vld [vmem:[%s19967_s6 + $0x280] sm:$0xff] }
  0xe8   : > { %2652 = vmatmul.mubr.bf16.gmra.mxu1 %v11605_v2  ;;  %2468 = vmatprep.mubr.bf16.mxu0 %v11612_v6  ;;  %v3504_v2 = vld [vmem:[%s19967_s6 + $0x340] sm:$0xff] }
  0xe9   : > { %2661 = vmatprep.mubr.bf16.mxu1 %v11614_v7  ;;  %7163 = vmatpush1.bf16.msra.mxu0 %v12023_v8  ;;  %v12104_v6 = vcombine.high %v3504_v2, %v3508_v3  ;;  %v11636_v7 = vcombine.high %v522_v60, %v526_v61  ;;  %v11638_v8 = vcombine.high %v523_v62, %v527_v63 }
  0xea   : > { %7356 = vmatpush1.bf16.msra.mxu1 %v12151_v9  ;;  %7164 = vmatprep.subr.bf16.mxu0 %v12016_v10  ;;  %v3632_v9 = vld [vmem:[%s19967_s6 + $0x740] sm:$0xff] }
  0xeb   : > { %7357 = vmatprep.subr.bf16.mxu1 %v12144_v11  ;;  %v3636_v10 = vld [vmem:[%s19967_s6 + $0x760] sm:$0xff]  ;;  %v12103_v11 = vcombine.low %v3504_v2, %v3508_v3 }
  0xec   : > { %v12232_v12 = vcombine.high %v3632_v9, %v3636_v10  ;;  %v12231_v13 = vcombine.low %v3632_v9, %v3636_v10  ;;  %v3600_v9 = vld [vmem:[%s19967_s6 + $0x640] sm:$0xff] }
  0xed   : > { %7165 = vmatpush1.bf16.msra.mxu0 %v12015_v20  ;;  %v11635_v20 = vcombine.low %v522_v60, %v526_v61  ;;  %v3604_v10 = vld [vmem:[%s19967_s6 + $0x660] sm:$0xff] }
  0xee   : > { %7358 = vmatpush1.bf16.msra.mxu1 %v12143_v21  ;;  %7166 = vmatprep.subr.bf16.mxu0 %v12008_v22  ;;  %v11637_v21 = vcombine.low %v523_v62, %v527_v63  ;;  %v12095_v22 = vcombine.low %v3496_v18, %v3500_v19  ;;  %v11660_v62 = vcombine.high %v14435_v50, %v14438_v51 }
  0xef   : > { %7359 = vmatprep.subr.bf16.mxu1 %v12136_v23  ;;  %2469 = vmatmul.mubr.bf16.gmra.mxu0 %v11611_v25  ;;  %v12096_v23 = vcombine.high %v3496_v18, %v3500_v19  ;;  %v11646_v25 = vcombine.high %v531_v16, %v535_v17  ;;  %v12200_v16 = vcombine.high %v3600_v9, %v3604_v10 }
  0xf0   : > { %2662 = vmatmul.mubr.bf16.gmra.mxu1 %v11613_v26  ;;  %2478 = vmatprep.mubr.bf16.mxu0 %v11620_v30  ;;  %v3624_v26 = vld [vmem:[%s19967_s6 + $0x700] sm:$0xff]  ;;  %v538_v30 = vld [vmem:[%s13846_s12 + $0x210] sm:$0xff]  ;;  %v12199_v19 = vcombine.low %v3600_v9, %v3604_v10 }
  0xf1   : > { %2671 = vmatprep.mubr.bf16.mxu1 %v11622_v31  ;;  %7167 = vmatpush1.bf16.msra.mxu0 %v12007_v32  ;;  %v12224_v28 = vcombine.high %v3624_v26, %v3628_v27  ;;  %v12223_v29 = vcombine.low %v3624_v26, %v3628_v27  ;;  %v730_v31 = vlaneseq  ;;  %v542_v32 = vld [vmem:[%s13846_s12 + $0x230] sm:$0xff]  ;;  %v11670_v27 = vcombine.high %v14485_v14, %v14488_v15 }
  0xf2   : > { %7360 = vmatpush1.bf16.msra.mxu1 %v12135_v33  ;;  %7168 = vmatprep.subr.bf16.mxu0 %v12000_v34  ;;  %v539_v33 = vld [vmem:[%s13846_s12 + $0x218] sm:$0xff]  ;;  %v11652_v41 = vcombine.high %v538_v30, %v542_v32 }
  0xf3   : > { %7361 = vmatprep.subr.bf16.mxu1 %v12128_v35  ;;  %v543_v34 = vld [vmem:[%s13846_s12 + $0x238] sm:$0xff]  ;;  %v3488_v35 = vld [vmem:[%s19967_s6 + $0x2c0] sm:$0xff]  ;;  %v14422_v43 = vshrl.u32 %v730_v31, 7 }
  0xf4   : > { %v12087_v39 = vcombine.low %v3488_v35, %v3492_v36  ;;  %v12088_v40 = vcombine.high %v3488_v35, %v3492_v36  ;;  %v11654_v42 = vcombine.high %v539_v33, %v543_v34  ;;  %v3596_v35 = vld [vmem:[%s19967_s6 + $0x620] sm:$0xff] }
  0xf5   : > { %7169 = vmatpush1.bf16.msra.mxu0 %v11999_v44  ;;  %20046 = vst [vmem:[#allocation6_spill] sm:$0xff] %v14422_v43  ;;  %v3616_v44 = vld [vmem:[%s19967_s6 + $0x6c0] sm:$0xff]  ;;  %v19970_v54 = vsub.s32 1, %v14422_v43 }
  0xf6   : > { %7362 = vmatpush1.bf16.msra.mxu1 %v12127_v45  ;;  %7170 = vmatprep.subr.bf16.mxu0 %v12120_v46  ;;  %v3620_v45 = vld [vmem:[%s19967_s6 + $0x6e0] sm:$0xff] }
  0xf7   : > { %7363 = vmatprep.subr.bf16.mxu1 %v12248_v47  ;;  %2479 = vmatmul.mubr.bf16.gmra.mxu0 %v11619_v48  ;;  %v12216_v46 = vcombine.high %v3616_v44, %v3620_v45  ;;  %v12215_v47 = vcombine.low %v3616_v44, %v3620_v45  ;;  %v728_v48 = vld [vmem:[%s19966_s5] sm:$0x3]  ;;  %v14526_v44 = vld [vmem:[%s13846_s12 + $0x2f0] sm:$0xff] }
  0xf8   : > { %2672 = vmatmul.mubr.bf16.gmra.mxu1 %v11621_v49  ;;  %2488 = vmatprep.mubr.bf16.mxu0 %v11628_v52  ;;  %v19971_v49 = vsub.s32 0, %v14422_v43  ;;  %v14441_v52 = vld [vmem:[%s13846_s12 + $0x258] sm:$0xff]  ;;  %v14469_v3 = vrot.slane %v728_v48, %v19970_v54  ;;  %v3808_v54 = vld [vmem:[%s19967_s6 + $0xcc0] sm:$0xff] }
  0xf9   : > { %2681 = vmatprep.mubr.bf16.mxu1 %v11630_v53  ;;  %7171 = vmatpush2.bf16.msra.mxu0 %v12119_v56  ;;  %v14444_v53 = vld [vmem:[%s13846_s12 + $0x278] sm:$0xff]  ;;  %v3484_v56 = vld [vmem:[%s19967_s6 + $0x2a0] sm:$0xff] }
  0xfa   : > { %7364 = vmatpush2.bf16.msra.mxu1 %v12247_v57  ;;  %7172 = vmatprep.subr.bf16.mxu0 %v12112_v58  ;;  %v11651_v57 = vcombine.low %v538_v30, %v542_v32  ;;  %v11653_v58 = vcombine.low %v539_v33, %v543_v34  ;;  %v12080_v60 = vcombine.high %v3480_v55, %v3484_v56  ;;  %v3592_v30 = vld [vmem:[%s19967_s6 + $0x600] sm:$0xff] }
  0xfb   : > { %7365 = vmatprep.subr.bf16.mxu1 %v12240_v59  ;;  %v12079_v59 = vcombine.low %v3480_v55, %v3484_v56  ;;  %v14455_v61 = vrot.slane %v728_v48, %v19971_v49  ;;  %v11662_v63 = vcombine.high %v14441_v52, %v14444_v53  ;;  %v3468_v48 = vld [vmem:[%s19967_s6 + $0x220] sm:$0xff] }
  0xfd   : > { %7173 = vmatpush2.bf16.msra.mxu0 %v12111_v0  ;;  %v3608_v0 = vld [vmem:[%s19967_s6 + $0x680] sm:$0xff] }
  0xfe   : > { %7366 = vmatpush2.bf16.msra.mxu1 %v12239_v1  ;;  %7174 = vmatprep.subr.bf16.mxu0 %v12104_v6  ;;  %v3612_v1 = vld [vmem:[%s19967_s6 + $0x6a0] sm:$0xff] }
  0xff   : > { %2489 = vmatmul.mubr.bf16.gmra.mxu0 %v11627_v4  ;;  %7367 = vmatprep.subr.bf16.mxu1 %v12232_v12  ;;  %v12208_v2 = vcombine.high %v3608_v0, %v3612_v1  ;;  %v12207_v4 = vcombine.low %v3608_v0, %v3612_v1 }
 0x100   : > { %2682 = vmatmul.mubr.bf16.gmra.mxu1 %v11629_v5  ;;  %2498 = vmatprep.mubr.bf16.mxu0 %v11636_v7 }
 0x101   : > { %2691 = vmatprep.mubr.bf16.mxu1 %v11638_v8  ;;  %7175 = vmatpush2.bf16.msra.mxu0 %v12103_v11  ;;  %v14473_v8 = vld [vmem:[%s13846_s12 + $0x290] sm:$0xff] }
 0x102   : > { %7368 = vmatpush2.bf16.msra.mxu1 %v12231_v13  ;;  %7176 = vmatprep.subr.bf16.mxu0 %v12096_v23  ;;  %v14482_v13 = vld [vmem:[%s13846_s12 + $0x2b0] sm:$0xff]  ;;  %v11661_v23 = vcombine.low %v14441_v52, %v14444_v53  ;;  %v563_v52 = vld [vmem:[%s13846_s12 + $0x2d8] sm:$0xff] }
 0x103   : > { %7369 = vmatprep.subr.bf16.mxu1 %v12224_v28  ;;  %v11668_v26 = vcombine.high %v14473_v8, %v14482_v13  ;;  %v3472_v28 = vld [vmem:[%s19967_s6 + $0x240] sm:$0xff]  ;;  %v567_v53 = vld [vmem:[%s13846_s12 + $0x2f8] sm:$0xff] }
 0x105   : > { %7177 = vmatpush2.bf16.msra.mxu0 %v12095_v22  ;;  %v11659_v22 = vcombine.low %v14435_v50, %v14438_v51 }
 0x106   : > { %7370 = vmatpush2.bf16.msra.mxu1 %v12223_v29  ;;  %7178 = vmatprep.subr.bf16.mxu0 %v12088_v40  ;;  %v3476_v29 = vld [vmem:[%s19967_s6 + $0x260] sm:$0xff] }
 0x107   : > { %2499 = vmatmul.mubr.bf16.gmra.mxu0 %v11635_v20  ;;  %7371 = vmatprep.subr.bf16.mxu1 %v12216_v46  ;;  %v12071_v33 = vcombine.low %v3472_v28, %v3476_v29  ;;  %v12072_v34 = vcombine.high %v3472_v28, %v3476_v29 }
 0x108   : > { %2692 = vmatmul.mubr.bf16.gmra.mxu1 %v11637_v21  ;;  %2508 = vmatprep.mubr.bf16.mxu0 %v11644_v24 }
 0x109   : > { %2701 = vmatprep.mubr.bf16.mxu1 %v11646_v25  ;;  %7179 = vmatpush2.bf16.msra.mxu0 %v12087_v39  ;;  %v12192_v39 = vcombine.high %v3592_v30, %v3596_v35 }
 0x10a   : > { %7372 = vmatpush2.bf16.msra.mxu1 %v12215_v47  ;;  %7180 = vmatprep.subr.bf16.mxu0 %v12080_v60  ;;  %v3464_v47 = vld [vmem:[%s19967_s6 + $0x200] sm:$0xff] }
 0x10b   : > { %7373 = vmatprep.subr.bf16.mxu1 %v12208_v2  ;;  %v12064_v55 = vcombine.high %v3464_v47, %v3468_v48 }
 0x10d   : > { %7181 = vmatpush2.bf16.msra.mxu0 %v12079_v59 }
 0x10e   : > { %7374 = vmatpush2.bf16.msra.mxu1 %v12207_v4  ;;  %7182 = vmatprep.subr.bf16.mxu0 %v12072_v34  ;;  %v11678_v4 = vcombine.high %v563_v52, %v567_v53 }
 0x10f   : > { %2509 = vmatmul.mubr.bf16.gmra.mxu0 %v11643_v37  ;;  %7375 = vmatprep.subr.bf16.mxu1 %v12200_v16 }
 0x110   : > { %2702 = vmatmul.mubr.bf16.gmra.mxu1 %v11645_v38  ;;  %2518 = vmatprep.mubr.bf16.mxu0 %v11652_v41  ;;  %v12191_v38 = vcombine.low %v3592_v30, %v3596_v35 }
 0x111   : > { %2711 = vmatprep.mubr.bf16.mxu1 %v11654_v42  ;;  %v14523_v42 = vld [vmem:[%s13846_s12 + $0x2d0] sm:$0xff]  ;;  %7183 = vmatpush2.bf16.msra.mxu0 %v12071_v33 }
 0x112   : > { %7376 = vmatpush2.bf16.msra.mxu1 %v12199_v19  ;;  %7184 = vmatprep.subr.bf16.mxu0 %v12064_v55  ;;  %v11676_v2 = vcombine.high %v14523_v42, %v14526_v44  ;;  %v575_v19 = vld [vmem:[%s13846_s12 + $0x338] sm:$0xff] }
 0x113   : > { %7377 = vmatprep.subr.bf16.mxu1 %v12192_v39  ;;  %v579_v55 = vld [vmem:[%s13846_s12 + $0x358] sm:$0xff] }
 0x116   : > { %7378 = vmatpush2.bf16.msra.mxu1 %v12191_v38  ;;  %v3800_v38 = vld [vmem:[%s19967_s6 + $0xc80] sm:$0xff] }
 0x117   : > { %v2054_v5 = vpop.f32.mrf.mxu0  ;;  %2519 = vmatmul.mubr.bf16.gmra.mxu0 %v11651_v57 }
 0x118   : > { %v2247_v6 = vpop.f32.mrf.mxu1  ;;  %2712 = vmatmul.mubr.bf16.gmra.mxu1 %v11653_v58  ;;  %v2055_v7 = vadd.f32 %v2054_v5, %v14455_v61  ;;  %2528 = vmatprep.mubr.bf16.mxu0 %v11660_v62  ;;  %v12063_v58 = vcombine.low %v3464_v47, %v3468_v48  ;;  %v11667_v62 = vcombine.low %v14473_v8, %v14482_v13 }
 0x119   : > { %2721 = vmatprep.mubr.bf16.mxu1 %v11662_v63  ;;  %v2056_v11 = vpop.f32.mrf.mxu0  ;;  %v11669_v63 = vcombine.low %v14485_v14, %v14488_v15  ;;  %v571_v15 = vld [vmem:[%s13846_s12 + $0x318] sm:$0xff] }
 0x11a   : > { %v2249_v12 = vpop.f32.mrf.mxu1  ;;  %v14490_v17 = vadd.f32 %v2247_v6, %v2055_v7  ;;  %v2057_v18 = vadd.f32 %v2056_v11, %v14469_v3  ;;  %7185 = vmatpush2.bf16.msra.mxu0 %v12063_v58  ;;  %v14561_v11 = vld [vmem:[%s13846_s12 + $0x310] sm:$0xff]  ;;  %v11686_v30 = vcombine.high %v571_v15, %v575_v19 }
 0x11b   : > { %v2058_v20 = vpop.f32.mrf.mxu0 }
 0x11c   : > { %v2251_v21 = vpop.f32.mrf.mxu1  ;;  %v14497_v24 = vadd.f32 %v2249_v12, %v2057_v18  ;;  %v2059_v25 = vadd.f32 %v2058_v20, %v14455_v61  ;;  %v574_v12 = vld [vmem:[%s13846_s12 + $0x330] sm:$0xff] }
 0x11d   : > { %v2060_v31 = vpop.f32.mrf.mxu0  ;;  %v11684_v29 = vcombine.high %v14561_v11, %v574_v12 }
 0x11e   : > { %v2253_v32 = vpop.f32.mrf.mxu1  ;;  %v14516_v36 = vadd.f32 %v2251_v21, %v2059_v25  ;;  %v2061_v37 = vadd.f32 %v2060_v31, %v14469_v3  ;;  %v11675_v25 = vcombine.low %v14523_v42, %v14526_v44  ;;  %v14581_v31 = vld [vmem:[%s19967_s6 + $0x9c0] sm:$0xff] }
 0x11f   : > { %v2064_v40 = vpop.f32.mrf.mxu0  ;;  %2529 = vmatmul.mubr.bf16.gmra.mxu0 %v11659_v22 }
 0x120   : > { %v2257_v41 = vpop.f32.mrf.mxu1  ;;  %2722 = vmatmul.mubr.bf16.gmra.mxu1 %v11661_v23  ;;  %v14534_v45 = vadd.f32 %v2253_v32, %v2061_v37  ;;  %v2065_v46 = vadd.f32 %v2064_v40, %v14455_v61  ;;  %2538 = vmatprep.mubr.bf16.mxu0 %v11668_v26  ;;  %v11677_v26 = vcombine.low %v563_v52, %v567_v53  ;;  %v14586_v32 = vld [vmem:[%s19967_s6 + $0x9e0] sm:$0xff]  ;;  %v582_v53 = vld [vmem:[%s13846_s12 + $0x370] sm:$0xff] }
 0x121   : > { %2731 = vmatprep.mubr.bf16.mxu1 %v11670_v27  ;;  %v2066_v50 = vpop.f32.mrf.mxu0  ;;  %v12312_v39 = vcombine.high %v14581_v31, %v14586_v32  ;;  %v14598_v40 = vld [vmem:[%s19967_s6 + $0xdc0] sm:$0xff] }
 0x122   : > { %v2259_v51 = vpop.f32.mrf.mxu1  ;;  %v14545_v56 = vadd.f32 %v2257_v41, %v2065_v46  ;;  %v2067_v57 = vadd.f32 %v2066_v50, %v14469_v3  ;;  %v14603_v41 = vld [vmem:[%s19967_s6 + $0xde0] sm:$0xff]  ;;  %v578_v50 = vld [vmem:[%s13846_s12 + $0x350] sm:$0xff] }
 0x123   : > { %v2068_v59 = vpop.f32.mrf.mxu0  ;;  %v12440_v46 = vcombine.high %v14598_v40, %v14603_v41  ;;  %7540 = vmatprep.subr.bf16.mxu0 %v12312_v39 }
 0x124   : > { %v2261_v60 = vpop.f32.mrf.mxu1  ;;  %v14552_v0 = vadd.f32 %v2259_v51, %v2067_v57  ;;  %v2069_v1 = vadd.f32 %v2068_v59, %v14455_v61  ;;  %v583_v57 = vld [vmem:[%s13846_s12 + $0x378] sm:$0xff] }
 0x125   : > { %v2070_v5 = vpop.f32.mrf.mxu0  ;;  %7733 = vmatprep.subr.bf16.mxu1 %v12440_v46 }
 0x126   : > { %v2263_v6 = vpop.f32.mrf.mxu1  ;;  %v14557_v7 = vadd.f32 %v2261_v60, %v2069_v1  ;;  %v2071_v8 = vadd.f32 %v2070_v5, %v14469_v3  ;;  %v11685_v1 = vcombine.low %v571_v15, %v575_v19  ;;  %v11692_v5 = vcombine.high %v578_v50, %v582_v53  ;;  %v586_v15 = vld [vmem:[%s13846_s12 + $0x390] sm:$0xff] }
 0x127   : > { %v2074_v9 = vpop.f32.mrf.mxu0  ;;  %2539 = vmatmul.mubr.bf16.gmra.mxu0 %v11667_v62 }
 0x128   : > { %v2267_v10 = vpop.f32.mrf.mxu1  ;;  %2732 = vmatmul.mubr.bf16.gmra.mxu1 %v11669_v63  ;;  %v14564_v13 = vadd.f32 %v2263_v6, %v2071_v8  ;;  %v2075_v14 = vadd.f32 %v2074_v9, %v14455_v61  ;;  %2548 = vmatprep.mubr.bf16.mxu0 %v11676_v2  ;;  %v11683_v63 = vcombine.low %v14561_v11, %v574_v12 }
 0x129   : > { %2741 = vmatprep.mubr.bf16.mxu1 %v11678_v4  ;;  %v2076_v16 = vpop.f32.mrf.mxu0  ;;  %v11694_v6 = vcombine.high %v579_v55, %v583_v57 }
 0x12a   : > { %v2269_v18 = vpop.f32.mrf.mxu1  ;;  %v14569_v20 = vadd.f32 %v2267_v10, %v2075_v14  ;;  %v2077_v21 = vadd.f32 %v2076_v16, %v14469_v3 }
 0x12b   : > { %v2078_v22 = vpop.f32.mrf.mxu0 }
 0x12c   : > { %v2271_v23 = vpop.f32.mrf.mxu1  ;;  %v14574_v27 = vadd.f32 %v2269_v18, %v2077_v21  ;;  %v2079_v28 = vadd.f32 %v2078_v22, %v14455_v61  ;;  %v590_v22 = vld [vmem:[%s13846_s12 + $0x3b0] sm:$0xff] }
 0x12d   : > { %v2080_v33 = vpop.f32.mrf.mxu0 }
 0x12e   : > { %v2273_v34 = vpop.f32.mrf.mxu1  ;;  %v14588_v35 = vadd.f32 %v2271_v23, %v2079_v28  ;;  %v2081_v37 = vadd.f32 %v2080_v33, %v14469_v3  ;;  %v587_v23 = vld [vmem:[%s13846_s12 + $0x398] sm:$0xff]  ;;  %v11691_v33 = vcombine.low %v578_v50, %v582_v53  ;;  %v594_v53 = vld [vmem:[%s13846_s12 + $0x3d0] sm:$0xff] }
 0x12f   : > { %v2084_v42 = vpop.f32.mrf.mxu0  ;;  %2549 = vmatmul.mubr.bf16.gmra.mxu0 %v11675_v25  ;;  %v591_v25 = vld [vmem:[%s13846_s12 + $0x3b8] sm:$0xff] }
 0x130   : > { %v2277_v44 = vpop.f32.mrf.mxu1  ;;  %2742 = vmatmul.mubr.bf16.gmra.mxu1 %v11677_v26  ;;  %v14607_v47 = vadd.f32 %v2273_v34, %v2081_v37  ;;  %v2085_v48 = vadd.f32 %v2084_v42, %v14455_v61  ;;  %2558 = vmatprep.mubr.bf16.mxu0 %v11684_v29  ;;  %v11693_v34 = vcombine.low %v579_v55, %v583_v57 }
 0x131   : > { %2751 = vmatprep.mubr.bf16.mxu1 %v11686_v30  ;;  %v2086_v51 = vpop.f32.mrf.mxu0  ;;  %v11700_v42 = vcombine.high %v586_v15, %v590_v22 }
 0x132   : > { %v2279_v52 = vpop.f32.mrf.mxu1  ;;  %v14614_v58 = vadd.f32 %v2277_v44, %v2085_v48  ;;  %v2087_v59 = vadd.f32 %v2086_v51, %v14469_v3  ;;  %v11702_v44 = vcombine.high %v587_v23, %v591_v25 }
 0x133   : > { %v2088_v60 = vpop.f32.mrf.mxu0 }
 0x134   : > { %v2281_v62 = vpop.f32.mrf.mxu1  ;;  %v14618_v2 = vadd.f32 %v2279_v52, %v2087_v59  ;;  %v2089_v4 = vadd.f32 %v2088_v60, %v14455_v61  ;;  %v598_v60 = vld [vmem:[%s13846_s12 + $0x3f0] sm:$0xff] }
 0x135   : > { %v2090_v8 = vpop.f32.mrf.mxu0 }
 0x136   : > { %v2283_v9 = vpop.f32.mrf.mxu1  ;;  %v14621_v10 = vadd.f32 %v2281_v62, %v2089_v4  ;;  %v2091_v14 = vadd.f32 %v2090_v8, %v14469_v3  ;;  %v595_v62 = vld [vmem:[%s13846_s12 + $0x3d8] sm:$0xff]  ;;  %v11699_v8 = vcombine.low %v586_v15, %v590_v22 }
 0x137   : > { %v2094_v16 = vpop.f32.mrf.mxu0  ;;  %2559 = vmatmul.mubr.bf16.gmra.mxu0 %v11683_v63  ;;  %v599_v63 = vld [vmem:[%s13846_s12 + $0x3f8] sm:$0xff] }
 0x138   : > { %v2287_v18 = vpop.f32.mrf.mxu1  ;;  %2752 = vmatmul.mubr.bf16.gmra.mxu1 %v11685_v1  ;;  %v14624_v11 = vadd.f32 %v2283_v9, %v2091_v14  ;;  %v2095_v12 = vadd.f32 %v2094_v16, %v14455_v61  ;;  %2568 = vmatprep.mubr.bf16.mxu0 %v11692_v5  ;;  %v11701_v9 = vcombine.low %v587_v23, %v591_v25 }
 0x139   : > { %2761 = vmatprep.mubr.bf16.mxu1 %v11694_v6  ;;  %v2096_v19 = vpop.f32.mrf.mxu0 }
 0x13a   : > { %v2289_v21 = vpop.f32.mrf.mxu1  ;;  %v14631_v26 = vadd.f32 %v2287_v18, %v2095_v12  ;;  %v2097_v28 = vadd.f32 %v2096_v19, %v14469_v3  ;;  %v11708_v18 = vcombine.high %v594_v53, %v598_v60  ;;  %v11710_v12 = vcombine.high %v595_v62, %v599_v63 }
 0x13b   : > { %v2098_v29 = vpop.f32.mrf.mxu0 }
 0x13c   : > { %v2291_v30 = vpop.f32.mrf.mxu1  ;;  %v14634_v37 = vadd.f32 %v2289_v21, %v2097_v28  ;;  %v2099_v39 = vadd.f32 %v2098_v29, %v14455_v61 }
 0x13d   : > { %v14637_v46 = vpop.f32.mrf.mxu0 }
 0x13e   : > { %v14639_v48 = vpop.f32.mrf.mxu1  ;;  %v14641_v51 = vadd.f32 %v2291_v30, %v2099_v39 }
 0x13f   : > { %v2104_v52 = vpop.f32.mrf.mxu0  ;;  %2569 = vmatmul.mubr.bf16.gmra.mxu0 %v11691_v33 }
 0x140   : > { %v2297_v59 = vpop.f32.mrf.mxu1  ;;  %2762 = vmatmul.mubr.bf16.gmra.mxu1 %v11693_v34  ;;  %v2105_v50 = vadd.f32 %v2104_v52, %v14455_v61  ;;  %2578 = vmatprep.mubr.bf16.mxu0 %v11700_v42  ;;  %v11707_v42 = vcombine.low %v594_v53, %v598_v60 }
 0x141   : > { %2771 = vmatprep.mubr.bf16.mxu1 %v11702_v44  ;;  %v2106_v55 = vpop.f32.mrf.mxu0  ;;  %v11709_v44 = vcombine.low %v595_v62, %v599_v63 }
 0x142   : > { %v2299_v57 = vpop.f32.mrf.mxu1  ;;  %v14648_v1 = vadd.f32 %v2297_v59, %v2105_v50  ;;  %v2107_v4 = vadd.f32 %v2106_v55, %v14469_v3  ;;  %v13092_v50 = vld [vmem:[%s14532_s25 + $0x4] ss:$8 sps:$4 sm:$0xff]  }
 0x143   : > { %v2108_v5 = vpop.f32.mrf.mxu0 }
 0x144   : > { %v2301_v6 = vpop.f32.mrf.mxu1  ;;  %v14651_v14 = vadd.f32 %v2299_v57, %v2107_v4  ;;  %v2109_v16 = vadd.f32 %v2108_v5, %v14455_v61 }
 0x145   : > { %v14654_v19 = vpop.f32.mrf.mxu0 }
 0x146   : > { %v14656_v21 = vpop.f32.mrf.mxu1  ;;  %v14658_v28 = vadd.f32 %v2301_v6, %v2109_v16  ;;  %v3836_v16 = vld [vmem:[%s19967_s6 + $0xda0] sm:$0xff] }
 0x147   : > { %v2114_v29 = vpop.f32.mrf.mxu0  ;;  %2579 = vmatmul.mubr.bf16.gmra.mxu0 %v11699_v8 }
 0x148   : > { %v2307_v30 = vpop.f32.mrf.mxu1  ;;  %2772 = vmatmul.mubr.bf16.gmra.mxu1 %v11701_v9  ;;  %v2115_v15 = vadd.f32 %v2114_v29, %v14455_v61  ;;  %2588 = vmatprep.mubr.bf16.mxu0 %v11708_v18  ;;  %v3832_v9 = vld [vmem:[%s19967_s6 + $0xd80] sm:$0xff] }
 0x149   : > { %2781 = vmatprep.mubr.bf16.mxu1 %v11710_v12  ;;  %v2116_v22 = vpop.f32.mrf.mxu0  ;;  %v13090_v29 = vld [vmem:[%s14532_s25] ss:$8 sps:$4 sm:$0xff]  }
 0x14a   : > { %v2309_v23 = vpop.f32.mrf.mxu1  ;;  %v14661_v25 = vadd.f32 %v2307_v30, %v2115_v15  ;;  %v2117_v33 = vadd.f32 %v2116_v22, %v14469_v3  ;;  %v12439_v22 = vcombine.low %v14598_v40, %v14603_v41  ;;  %v12431_v41 = vcombine.low %v3832_v9, %v3836_v16 }
 0x14b   : > { %v2118_v34 = vpop.f32.mrf.mxu0 }
 0x14c   : > { %v2311_v39 = vpop.f32.mrf.mxu1  ;;  %v14664_v52 = vadd.f32 %v2309_v23, %v2117_v33  ;;  %v2119_v59 = vadd.f32 %v2118_v34, %v14455_v61  ;;  %v13093_v23 = vld [vmem:[%s14532_s25 + $0x14] ss:$8 sps:$4 sm:$0xff]  }
 0x14d   : > { %v14668_v55 = vpop.f32.mrf.mxu0 }
 0x14e   : > { %v14670_v57 = vpop.f32.mrf.mxu1  ;;  %v14672_v4 = vadd.f32 %v2311_v39, %v2119_v59  ;;  %v12432_v39 = vcombine.high %v3832_v9, %v3836_v16  ;;  %v3828_v59 = vld [vmem:[%s19967_s6 + $0xd60] sm:$0xff] }
 0x14f   : > { %v2124_v5 = vpop.f32.mrf.mxu0  ;;  %2589 = vmatmul.mubr.bf16.gmra.mxu0 %v11707_v42 }
 0x150   : > { %v2317_v6 = vpop.f32.mrf.mxu1  ;;  %2782 = vmatmul.mubr.bf16.gmra.mxu1 %v11709_v44  ;;  %v2125_v53 = vadd.f32 %v2124_v5, %v14455_v61  ;;  %v3824_v44 = vld [vmem:[%s19967_s6 + $0xd40] sm:$0xff] }
 0x151   : > { %7379 = vmatprep.mubr.bf16.mxu1 %v13092_v50  ;;  %v2126_v60 = vpop.f32.mrf.mxu0 }
 0x152   : > { %v2319_v62 = vpop.f32.mrf.mxu1  ;;  %v14675_v63 = vadd.f32 %v2317_v6, %v2125_v53  ;;  %v2127_v8 = vadd.f32 %v2126_v60, %v14469_v3  ;;  %v12424_v60 = vcombine.high %v3824_v44, %v3828_v59 }
 0x153   : > { %v2128_v18 = vpop.f32.mrf.mxu0 }
 0x154   : > { %v2321_v12 = vpop.f32.mrf.mxu1  ;;  %v14685_v30 = vadd.f32 %v2319_v62, %v2127_v8  ;;  %v2129_v15 = vadd.f32 %v2128_v18, %v14455_v61  ;;  %v3816_v18 = vld [vmem:[%s19967_s6 + $0xd00] sm:$0xff] }
 0x155   : > { %v14691_v33 = vpop.f32.mrf.mxu0 }
 0x156   : > { %v14693_v34 = vpop.f32.mrf.mxu1  ;;  %v14695_v42 = vadd.f32 %v2321_v12, %v2129_v15  ;;  %v3820_v12 = vld [vmem:[%s19967_s6 + $0xd20] sm:$0xff] }
 0x157   : > { %v2134_v50 = vpop.f32.mrf.mxu0 }
 0x158   : > { %v2327_v5 = vpop.f32.mrf.mxu1  ;;  %7380 = vmatmul.mubr.bf16.vlgmr.msra.gmra.mxu1 %v13090_v29  ;;  %v2135_v40 = vadd.f32 %v2134_v50, %v14455_v61 }
 0x159   : > { %7734 = vmatpush1.bf16.msra.mxu1 %v12439_v22  ;;  %7389 = vmatprep.mubr.bf16.mxu1 %v13093_v23  ;;  %v2136_v6 = vpop.f32.mrf.mxu0  ;;  %v13095_v22 = vld [vmem:[%s14532_s25 + $0x10] ss:$8 sps:$4 sm:$0xff]   ;;  %v13096_v23 = vld [vmem:[%s14532_s25 + $0x24] ss:$8 sps:$4 sm:$0xff]  }
 0x15a   : > { %v2329_v53 = vpop.f32.mrf.mxu1  ;;  %7735 = vmatprep.subr.bf16.mxu1 %v12432_v39  ;;  %v14704_v62 = vadd.f32 %v2327_v5, %v2135_v40  ;;  %v2137_v8 = vadd.f32 %v2136_v6, %v14469_v3  ;;  %v12423_v39 = vcombine.low %v3824_v44, %v3828_v59  ;;  %v12416_v40 = vcombine.high %v3816_v18, %v3820_v12 }
 0x15b   : > { %v2138_v29 = vpop.f32.mrf.mxu0  ;;  %v12415_v59 = vcombine.low %v3816_v18, %v3820_v12 }
 0x15c   : > { %v2331_v15 = vpop.f32.mrf.mxu1  ;;  %v14714_v9 = vadd.f32 %v2329_v53, %v2137_v8  ;;  %v2139_v16 = vadd.f32 %v2138_v29, %v14455_v61  ;;  %v3812_v53 = vld [vmem:[%s19967_s6 + $0xce0] sm:$0xff] }
 0x15d   : > { %7736 = vmatpush1.bf16.msra.mxu1 %v12431_v41  ;;  %v14718_v50 = vpop.f32.mrf.mxu0 }
 0x15e   : > { %20047 = vst [vmem:[#allocation7_spill] sm:$0xff] %v14714_v9  ;;  %v14720_v5 = vpop.f32.mrf.mxu1  ;;  %7737 = vmatprep.subr.bf16.mxu1 %v12424_v60  ;;  %v14722_v6 = vadd.f32 %v2331_v15, %v2139_v16  ;;  %v12408_v15 = vcombine.high %v3808_v54, %v3812_v53  ;;  %v13105_v9 = vld [vmem:[%s14532_s25 + $0x54] ss:$8 sps:$4 sm:$0xff]  }
 0x15f   : > { %20048 = vst [vmem:[#allocation8_spill] sm:$0xff] %v14720_v5  ;;  %v2144_v8 = vpop.f32.mrf.mxu0 }
 0x160   : > { %20049 = vst [vmem:[#allocation9_spill] sm:$0xff] %v14722_v6  ;;  %v2337_v41 = vpop.f32.mrf.mxu1  ;;  %7390 = vmatmul.mubr.bf16.gmra.mxu1 %v13095_v22  ;;  %v2145_v44 = vadd.f32 %v2144_v8, %v14455_v61  ;;  %v3804_v22 = vld [vmem:[%s19967_s6 + $0xca0] sm:$0xff] }
 0x161   : > { %7399 = vmatprep.mubr.bf16.mxu1 %v13096_v23  ;;  %7738 = vmatpush1.bf16.msra.mxu1 %v12423_v39  ;;  %v2146_v60 = vpop.f32.mrf.mxu0  ;;  %v13098_v39 = vld [vmem:[%s14532_s25 + $0x20] ss:$8 sps:$4 sm:$0xff]   ;;  %v12400_v43 = vcombine.high %v3800_v38, %v3804_v22 }
 0x162   : > { %v2339_v29 = vpop.f32.mrf.mxu1  ;;  %7739 = vmatprep.subr.bf16.mxu1 %v12416_v40  ;;  %v14731_v16 = vadd.f32 %v2337_v41, %v2145_v44  ;;  %v2147_v49 = vadd.f32 %v2146_v60, %v14469_v3  ;;  %v13099_v40 = vld [vmem:[%s14532_s25 + $0x34] ss:$8 sps:$4 sm:$0xff]   ;;  %v12407_v41 = vcombine.low %v3808_v54, %v3812_v53  ;;  %v3792_v6 = vld [vmem:[%s19967_s6 + $0xc40] sm:$0xff]  ;;  %v12399_v53 = vcombine.low %v3800_v38, %v3804_v22 }
 0x163   : > { %v2148_v23 = vpop.f32.mrf.mxu0  ;;  %v13102_v22 = vld [vmem:[%s14532_s25 + $0x44] ss:$8 sps:$4 sm:$0xff]  }
 0x164   : > { %20050 = vst [vmem:[#allocation10_spill] sm:$0xff] %v14731_v16  ;;  %v2341_v8 = vpop.f32.mrf.mxu1  ;;  %v14741_v18 = vadd.f32 %v2339_v29, %v2147_v49  ;;  %v2149_v12 = vadd.f32 %v2148_v23, %v14455_v61  ;;  %v3796_v49 = vld [vmem:[%s19967_s6 + $0xc60] sm:$0xff] }
 0x165   : > { %7740 = vmatpush1.bf16.msra.mxu1 %v12415_v59  ;;  %v14745_v44 = vpop.f32.mrf.mxu0 }
 0x166   : > { %20051 = vst [vmem:[#allocation11_spill] sm:$0xff] %v14741_v18  ;;  %20052 = vst [vmem:[#allocation12_spill] sm:$0xff] %v14745_v44  ;;  %v14747_v60 = vpop.f32.mrf.mxu1  ;;  %7741 = vmatprep.subr.bf16.mxu1 %v12408_v15  ;;  %v14749_v16 = vadd.f32 %v2341_v8, %v2149_v12  ;;  %v12392_v8 = vcombine.high %v3792_v6, %v3796_v49  ;;  %v3904_v44 = vld [vmem:[%s19967_s6 + $0xfc0] sm:$0xff] }
 0x167   : > { %20053 = vst [vmem:[#allocation13_spill] sm:$0xff] %v14747_v60  ;;  %v2154_v29 = vpop.f32.mrf.mxu0  ;;  %v3784_v60 = vld [vmem:[%s19967_s6 + $0xc00] sm:$0xff] }
 0x168   : > { %20054 = vst [vmem:[#allocation14_spill] sm:$0xff] %v14749_v16  ;;  %v2347_v23 = vpop.f32.mrf.mxu1  ;;  %7400 = vmatmul.mubr.bf16.gmra.mxu1 %v13098_v39  ;;  %v2155_v54 = vadd.f32 %v2154_v29, %v14455_v61  ;;  %v3788_v39 = vld [vmem:[%s19967_s6 + $0xc20] sm:$0xff] }
 0x169   : > { %7409 = vmatprep.mubr.bf16.mxu1 %v13099_v40  ;;  %7742 = vmatpush1.bf16.msra.mxu1 %v12407_v41  ;;  %v2156_v59 = vpop.f32.mrf.mxu0  ;;  %v13101_v41 = vld [vmem:[%s14532_s25 + $0x30] ss:$8 sps:$4 sm:$0xff]  }
 0x16a   : > { %v2349_v15 = vpop.f32.mrf.mxu1  ;;  %7743 = vmatprep.subr.bf16.mxu1 %v12400_v43  ;;  %v14758_v12 = vadd.f32 %v2347_v23, %v2155_v54  ;;  %v2157_v16 = vadd.f32 %v2156_v59, %v14469_v3  ;;  %v12391_v23 = vcombine.low %v3792_v6, %v3796_v49  ;;  %v12383_v49 = vcombine.low %v3784_v60, %v3788_v39 }
 0x16b   : > { %v2158_v40 = vpop.f32.mrf.mxu0 }
 0x16c   : > { %20055 = vst [vmem:[#allocation15_spill] sm:$0xff] %v14758_v12  ;;  %v2351_v29 = vpop.f32.mrf.mxu1  ;;  %v14768_v38 = vadd.f32 %v2349_v15, %v2157_v16  ;;  %v2159_v43 = vadd.f32 %v2158_v40, %v14455_v61  ;;  %v12384_v12 = vcombine.high %v3784_v60, %v3788_v39  ;;  %v3908_v16 = vld [vmem:[%s19967_s6 + $0xfe0] sm:$0xff] }
 0x16d   : > { %7744 = vmatpush1.bf16.msra.mxu1 %v12399_v53  ;;  %v14772_v54 = vpop.f32.mrf.mxu0  ;;  %v3896_v39 = vld [vmem:[%s19967_s6 + $0xf80] sm:$0xff] }
 0x16e   : > { %20056 = vst [vmem:[#allocation16_spill] sm:$0xff] %v14768_v38  ;;  %20057 = vst [vmem:[#allocation17_spill] sm:$0xff] %v14772_v54  ;;  %v14774_v59 = vpop.f32.mrf.mxu1  ;;  %7745 = vmatprep.subr.bf16.mxu1 %v12392_v8  ;;  %v14776_v18 = vadd.f32 %v2351_v29, %v2159_v43  ;;  %v12504_v29 = vcombine.high %v3904_v44, %v3908_v16  ;;  %v13104_v54 = vld [vmem:[%s14532_s25 + $0x40] ss:$8 sps:$4 sm:$0xff]  }
 0x16f   : > { %20058 = vst [vmem:[#allocation18_spill] sm:$0xff] %v14774_v59  ;;  %v2164_v15 = vpop.f32.mrf.mxu0 }
 0x170   : > { %20059 = vst [vmem:[#allocation19_spill] sm:$0xff] %v14776_v18  ;;  %v2357_v53 = vpop.f32.mrf.mxu1  ;;  %7410 = vmatmul.mubr.bf16.gmra.mxu1 %v13101_v41  ;;  %v2165_v6 = vadd.f32 %v2164_v15, %v14455_v61 }
 0x171   : > { %7419 = vmatprep.mubr.bf16.mxu1 %v13102_v22  ;;  %7746 = vmatpush1.bf16.msra.mxu1 %v12391_v23  ;;  %v2166_v8 = vpop.f32.mrf.mxu0  ;;  %v12503_v22 = vcombine.low %v3904_v44, %v3908_v16 }
 0x172   : > { %v2359_v40 = vpop.f32.mrf.mxu1  ;;  %7747 = vmatprep.subr.bf16.mxu1 %v12384_v12  ;;  %v14785_v43 = vadd.f32 %v2357_v53, %v2165_v6  ;;  %v2167_v18 = vadd.f32 %v2166_v8, %v14469_v3 }
 0x173   : > { %v2168_v59 = vpop.f32.mrf.mxu0 }
 0x174   : > { %v2361_v38 = vpop.f32.mrf.mxu1  ;;  %v14789_v5 = vadd.f32 %v2359_v40, %v2167_v18  ;;  %v2169_v41 = vadd.f32 %v2168_v59, %v14455_v61  ;;  %v3900_v18 = vld [vmem:[%s19967_s6 + $0xfa0] sm:$0xff] }
 0x175   : > { %7748 = vmatpush1.bf16.msra.mxu1 %v12383_v49  ;;  %v14793_v23 = vpop.f32.mrf.mxu0  ;;  %v12496_v44 = vcombine.high %v3896_v39, %v3900_v18 }
 0x176   : > { %v14795_v60 = vpop.f32.mrf.mxu1  ;;  %7749 = vmatprep.subr.bf16.mxu1 %v12504_v29  ;;  %v14797_v12 = vadd.f32 %v2361_v38, %v2169_v41  ;;  %v12495_v38 = vcombine.low %v3896_v39, %v3900_v18  ;;  %v13107_v41 = vld [vmem:[%s14532_s25 + $0x50] ss:$8 sps:$4 sm:$0xff]   ;;  %v3888_v39 = vld [vmem:[%s19967_s6 + $0xf40] sm:$0xff] }
 0x177   : > { %20060 = vst [vmem:[#allocation20_spill] sm:$0xff] %v14795_v60  ;;  %v2174_v59 = vpop.f32.mrf.mxu0  ;;  %v13108_v60 = vld [vmem:[%s14532_s25 + $0x64] ss:$8 sps:$4 sm:$0xff]  }
 0x178   : > { %20061 = vst [vmem:[#allocation21_spill] sm:$0xff] %v14797_v12  ;;  %v2367_v15 = vpop.f32.mrf.mxu1  ;;  %7420 = vmatmul.mubr.bf16.gmra.mxu1 %v13104_v54  ;;  %v2175_v16 = vadd.f32 %v2174_v59, %v14455_v61  ;;  %v3892_v18 = vld [vmem:[%s19967_s6 + $0xf60] sm:$0xff] }
 0x179   : > { %7429 = vmatprep.mubr.bf16.mxu1 %v13105_v9  ;;  %7750 = vmatpush2.bf16.msra.mxu1 %v12503_v22  ;;  %v2176_v53 = vpop.f32.mrf.mxu0 }
 0x17a   : > { %v2369_v6 = vpop.f32.mrf.mxu1  ;;  %7751 = vmatprep.subr.bf16.mxu1 %v12496_v44  ;;  %v14806_v49 = vadd.f32 %v2367_v15, %v2175_v16  ;;  %v2177_v8 = vadd.f32 %v2176_v53, %v14469_v3  ;;  %v12487_v16 = vcombine.low %v3888_v39, %v3892_v18 }
 0x17b   : > { %v2178_v40 = vpop.f32.mrf.mxu0 }
 0x17c   : > { %20062 = vst [vmem:[#allocation22_spill] sm:$0xff] %v14806_v49  ;;  %v2371_v29 = vpop.f32.mrf.mxu1  ;;  %v14810_v12 = vadd.f32 %v2369_v6, %v2177_v8  ;;  %v2179_v54 = vadd.f32 %v2178_v40, %v14455_v61  ;;  %v13111_v49 = vld [vmem:[%s14532_s25 + $0x74] ss:$8 sps:$4 sm:$0xff]  }
 0x17d   : > { %7752 = vmatpush2.bf16.msra.mxu1 %v12495_v38  ;;  %v14814_v59 = vpop.f32.mrf.mxu0  ;;  %v12488_v38 = vcombine.high %v3888_v39, %v3892_v18 }
 0x17e   : > { %20063 = vst [vmem:[#allocation23_spill] sm:$0xff] %v14810_v12  ;;  %20064 = vst [vmem:[#allocation24_spill] sm:$0xff] %v14814_v59  ;;  %v14816_v9 = vpop.f32.mrf.mxu1  ;;  %v14818_v22 = vadd.f32 %v2371_v29, %v2179_v54 }
 0x17f   : > { %20065 = vst [vmem:[#allocation25_spill] sm:$0xff] %v14816_v9  ;;  %v2184_v15 = vpop.f32.mrf.mxu0  ;;  %7753 = vmatprep.subr.bf16.mxu1 %v12488_v38  ;;  %v13110_v9 = vld [vmem:[%s14532_s25 + $0x60] ss:$8 sps:$4 sm:$0xff]  }
 0x180   : > { %20066 = vst [vmem:[#allocation26_spill] sm:$0xff] %v14818_v22  ;;  %v2377_v44 = vpop.f32.mrf.mxu1  ;;  %7430 = vmatmul.mubr.bf16.gmra.mxu1 %v13107_v41  ;;  %v2185_v53 = vadd.f32 %v2184_v15, %v14455_v61  ;;  %v3880_v15 = vld [vmem:[%s19967_s6 + $0xf00] sm:$0xff] }
 0x181   : > { %7439 = vmatprep.mubr.bf16.mxu1 %v13108_v60  ;;  %v2186_v6 = vpop.f32.mrf.mxu0  ;;  %7754 = vmatpush2.bf16.msra.mxu1 %v12487_v16 }
 0x182   : > { %v2379_v8 = vpop.f32.mrf.mxu1  ;;  %v14827_v40 = vadd.f32 %v2377_v44, %v2185_v53  ;;  %v2187_v29 = vadd.f32 %v2186_v6, %v14469_v3  ;;  %v3884_v44 = vld [vmem:[%s19967_s6 + $0xf20] sm:$0xff] }
 0x183   : > { %v2188_v54 = vpop.f32.mrf.mxu0  ;;  %v12479_v53 = vcombine.low %v3880_v15, %v3884_v44  ;;  %v12480_v6 = vcombine.high %v3880_v15, %v3884_v44 }
 0x184   : > { %20067 = vst [vmem:[#allocation27_spill] sm:$0xff] %v14827_v40  ;;  %v2381_v22 = vpop.f32.mrf.mxu1  ;;  %v14831_v12 = vadd.f32 %v2379_v8, %v2187_v29  ;;  %v2189_v41 = vadd.f32 %v2188_v54, %v14455_v61 }
 0x185   : > { %v14835_v39 = vpop.f32.mrf.mxu0  ;;  %7755 = vmatprep.subr.bf16.mxu1 %v12480_v6 }
 0x186   : > { %20068 = vst [vmem:[#allocation28_spill] sm:$0xff] %v14831_v12  ;;  %20069 = vst [vmem:[#allocation29_spill] sm:$0xff] %v14835_v39  ;;  %v14837_v18 = vpop.f32.mrf.mxu1  ;;  %v14839_v60 = vadd.f32 %v2381_v22, %v2189_v41  ;;  %7756 = vmatpush2.bf16.msra.mxu1 %v12479_v53  ;;  %v13113_v12 = vld [vmem:[%s14532_s25 + $0x70] ss:$8 sps:$4 sm:$0xff]   ;;  %v13114_v39 = vld [vmem:[%s14532_s25 + $0x84] ss:$8 sps:$4 sm:$0xff]  }
 0x187   : > { %20070 = vst [vmem:[#allocation30_spill] sm:$0xff] %v14837_v18  ;;  %v2194_v16 = vpop.f32.mrf.mxu0 }
 0x188   : > { %20071 = vst [vmem:[#allocation31_spill] sm:$0xff] %v14839_v60  ;;  %v2387_v38 = vpop.f32.mrf.mxu1  ;;  %7440 = vmatmul.mubr.bf16.gmra.mxu1 %v13110_v9  ;;  %v2195_v8 = vadd.f32 %v2194_v16, %v14455_v61  ;;  %v3872_v16 = vld [vmem:[%s19967_s6 + $0xec0] sm:$0xff] }
 0x189   : > { %7449 = vmatprep.mubr.bf16.mxu1 %v13111_v49  ;;  %v2196_v22 = vpop.f32.mrf.mxu0 }
 0x18a   : > { %v2389_v29 = vpop.f32.mrf.mxu1  ;;  %v14848_v54 = vadd.f32 %v2387_v38, %v2195_v8  ;;  %v2197_v41 = vadd.f32 %v2196_v22, %v14469_v3  ;;  %v3876_v38 = vld [vmem:[%s19967_s6 + $0xee0] sm:$0xff] }
 0x18b   : > { %v2198_v60 = vpop.f32.mrf.mxu0  ;;  %v12472_v8 = vcombine.high %v3872_v16, %v3876_v38 }
 0x18c   : > { %20072 = vst [vmem:[#allocation32_spill] sm:$0xff] %v14848_v54  ;;  %v2391_v18 = vpop.f32.mrf.mxu1  ;;  %v14852_v40 = vadd.f32 %v2389_v29, %v2197_v41  ;;  %v2199_v9 = vadd.f32 %v2198_v60, %v14455_v61  ;;  %v12471_v60 = vcombine.low %v3872_v16, %v3876_v38 }
 0x18d   : > { %v14856_v15 = vpop.f32.mrf.mxu0  ;;  %7757 = vmatprep.subr.bf16.mxu1 %v12472_v8 }
 0x18e   : > { %20073 = vst [vmem:[#allocation33_spill] sm:$0xff] %v14852_v40  ;;  %20074 = vst [vmem:[#allocation34_spill] sm:$0xff] %v14856_v15  ;;  %v14858_v44 = vpop.f32.mrf.mxu1  ;;  %v14860_v49 = vadd.f32 %v2391_v18, %v2199_v9  ;;  %7758 = vmatpush2.bf16.msra.mxu1 %v12471_v60  ;;  %v13116_v40 = vld [vmem:[%s14532_s25 + $0x80] ss:$8 sps:$4 sm:$0xff]   ;;  %v13117_v15 = vld [vmem:[%s14532_s25 + $0x94] ss:$8 sps:$4 sm:$0xff]  }
 0x18f   : > { %20075 = vst [vmem:[#allocation35_spill] sm:$0xff] %v14858_v44  ;;  %v2204_v53 = vpop.f32.mrf.mxu0 }
 0x190   : > { %20076 = vst [vmem:[#allocation36_spill] sm:$0xff] %v14860_v49  ;;  %v2397_v6 = vpop.f32.mrf.mxu1  ;;  %7450 = vmatmul.mubr.bf16.gmra.mxu1 %v13113_v12  ;;  %v2205_v22 = vadd.f32 %v2204_v53, %v14455_v61  ;;  %v3868_v53 = vld [vmem:[%s19967_s6 + $0xea0] sm:$0xff] }
 0x191   : > { %7459 = vmatprep.mubr.bf16.mxu1 %v13114_v39  ;;  %v2206_v18 = vpop.f32.mrf.mxu0  ;;  %v3864_v39 = vld [vmem:[%s19967_s6 + $0xe80] sm:$0xff] }
 0x192   : > { %v2399_v29 = vpop.f32.mrf.mxu1  ;;  %v14869_v41 = vadd.f32 %v2397_v6, %v2205_v22  ;;  %v2207_v9 = vadd.f32 %v2206_v18, %v14469_v3  ;;  %v12463_v60 = vcombine.low %v3864_v39, %v3868_v53  ;;  %v12464_v8 = vcombine.high %v3864_v39, %v3868_v53  ;;  %v3856_v18 = vld [vmem:[%s19967_s6 + $0xe40] sm:$0xff] }
 0x193   : > { %v2208_v49 = vpop.f32.mrf.mxu0 }
 0x194   : > { %20077 = vst [vmem:[#allocation37_spill] sm:$0xff] %v14869_v41  ;;  %v2401_v44 = vpop.f32.mrf.mxu1  ;;  %v14873_v54 = vadd.f32 %v2399_v29, %v2207_v9  ;;  %v2209_v12 = vadd.f32 %v2208_v49, %v14455_v61  ;;  %7759 = vmatprep.subr.bf16.mxu1 %v12464_v8 }
 0x195   : > { %v14880_v16 = vpop.f32.mrf.mxu0  ;;  %7760 = vmatpush2.bf16.msra.mxu1 %v12463_v60 }
 0x196   : > { %20078 = vst [vmem:[#allocation38_spill] sm:$0xff] %v14873_v54  ;;  %20079 = vst [vmem:[#allocation39_spill] sm:$0xff] %v14880_v16  ;;  %v14882_v38 = vpop.f32.mrf.mxu1  ;;  %v14887_v6 = vadd.f32 %v2401_v44, %v2209_v12  ;;  %v3860_v44 = vld [vmem:[%s19967_s6 + $0xe60] sm:$0xff] }
 0x197   : > { %20080 = vst [vmem:[#allocation40_spill] sm:$0xff] %v14882_v38  ;;  %v2440_v22 = vpop.f32.mrf.mxu0  ;;  %v12456_v12 = vcombine.high %v3856_v18, %v3860_v44  ;;  %v3848_v38 = vld [vmem:[%s19967_s6 + $0xe00] sm:$0xff] }
 0x198   : > { %20081 = vst [vmem:[#allocation41_spill] sm:$0xff] %v14887_v6  ;;  %v2633_v61 = vpop.f32.mrf.mxu1  ;;  %7460 = vmatmul.mubr.bf16.gmra.mxu1 %v13116_v40  ;;  %v2441_v49 = vadd.f32 %v2440_v22, %v14490_v17  ;;  %v12455_v40 = vcombine.low %v3856_v18, %v3860_v44  ;;  %v13120_v6 = vld [vmem:[%s14532_s25 + $0xa4] ss:$8 sps:$4 sm:$0xff]  }
 0x199   : > { %7469 = vmatprep.mubr.bf16.mxu1 %v13117_v15  ;;  %v2442_v29 = vpop.f32.mrf.mxu0  ;;  %v13119_v15 = vld [vmem:[%s14532_s25 + $0x90] ss:$8 sps:$4 sm:$0xff]   ;;  %7761 = vmatprep.subr.bf16.mxu1 %v12456_v12 }
 0x19a   : > { %v2635_v9 = vpop.f32.mrf.mxu1  ;;  %v2443_v39 = vadd.f32 %v2442_v29, %v14497_v24  ;;  %v2634_v8 = vadd.f32 %v2633_v61, %v2441_v49  ;;  %7762 = vmatpush2.bf16.msra.mxu1 %v12455_v40  ;;  %v3852_v24 = vld [vmem:[%s19967_s6 + $0xe20] sm:$0xff] }
 0x19b   : > { %v2444_v53 = vpop.f32.mrf.mxu0  ;;  %v12447_v49 = vcombine.low %v3848_v38, %v3852_v24  ;;  %v12448_v29 = vcombine.high %v3848_v38, %v3852_v24 }
 0x19c   : > { %v2637_v17 = vpop.f32.mrf.mxu1  ;;  %v2445_v22 = vadd.f32 %v2444_v53, %v14516_v36  ;;  %v2636_v60 = vadd.f32 %v2635_v9, %v2443_v39  ;;  %v2792_v12 = vmax.f32 %v2634_v8, 0.0  ;;  %v13122_v39 = vld [vmem:[%s14532_s25 + $0xa0] ss:$8 sps:$4 sm:$0xff]  }
 0x19d   : > { %v2446_v54 = vpop.f32.mrf.mxu0  ;;  %7763 = vmatprep.subr.bf16.mxu1 %v12448_v29  ;;  %v3708_v8 = vld [vmem:[%s19967_s6 + $0x9a0] sm:$0xff] }
 0x19e   : > { %v2639_v41 = vpop.f32.mrf.mxu1  ;;  %v2638_v18 = vadd.f32 %v2637_v17, %v2445_v22  ;;  %v2447_v61 = vadd.f32 %v2446_v54, %v14534_v45  ;;  %v14917_v45 = vld [vmem:[%s19967_s6 + $0x980] sm:$0xff]  ;;  %v2793_v17 = vmax.f32 %v2636_v60, 0.0  ;;  %7764 = vmatpush2.bf16.msra.mxu1 %v12447_v49 }
 0x19f   : > { %v2450_v36 = vpop.f32.mrf.mxu0  ;;  %v14939_v60 = vld [vmem:[%s19967_s6 + $0x940] sm:$0xff]  ;;  %v12304_v49 = vcombine.high %v14917_v45, %v3708_v8 }
 0x1a0   : > { %v2643_v44 = vpop.f32.mrf.mxu1  ;;  %7470 = vmatmul.mubr.bf16.gmra.mxu1 %v13119_v15  ;;  %v2794_v40 = vmax.f32 %v2638_v18, 0.0  ;;  %v2640_v53 = vadd.f32 %v2639_v41, %v2447_v61  ;;  %v2451_v9 = vadd.f32 %v2450_v36, %v14545_v56 }
 0x1a1   : > { %7479 = vmatprep.mubr.bf16.mxu1 %v13120_v6  ;;  %v2452_v54 = vpop.f32.mrf.mxu0  ;;  %v13123_v6 = vld [vmem:[%s14532_s25 + $0xb4] ss:$8 sps:$4 sm:$0xff]  }
 0x1a2   : > { %v2645_v38 = vpop.f32.mrf.mxu1  ;;  %v14926_v15 = vpack.c.bf16 %v2794_v40, %v2792_v12  ;;  %v2795_v41 = vmax.f32 %v2640_v53, 0.0  ;;  %v2453_v56 = vadd.f32 %v2452_v54, %v14552_v0  ;;  %v2644_v22 = vadd.f32 %v2643_v44, %v2451_v9  ;;  %v14944_v0 = vld [vmem:[%s19967_s6 + $0x960] sm:$0xff] }
 0x1a3   : > { %v2454_v24 = vpop.f32.mrf.mxu0  ;;  %v12295_v59 = vcombine.low %v14939_v60, %v14944_v0 }
 0x1a4   : > { %20082 = vst [vmem:[#allocation42_spill] sm:$0xff] %v14926_v15  ;;  %v2647_v18 = vpop.f32.mrf.mxu1  ;;  %v14933_v61 = vpack.c.bf16 %v2795_v41, %v2793_v17  ;;  %v2455_v36 = vadd.f32 %v2454_v24, %v14557_v7  ;;  %v2646_v44 = vadd.f32 %v2645_v38, %v2453_v56  ;;  %v2796_v7 = vmax.f32 %v2644_v22, 0.0  ;;  %v14954_v41 = vld [vmem:[%s19967_s6 + $0x1c8] sm:$0xff] }
 0x1a5   : > { %v2456_v29 = vpop.f32.mrf.mxu0  ;;  %v12303_v17 = vcombine.low %v14917_v45, %v3708_v8  ;;  %v20084_v24 = vcombine.low %v14581_v31, %v14586_v32  ;;  %v14975_v8 = vld [vmem:[%s19967_s6 + $0x5e8] sm:$0xff]  ;;  %v12296_v31 = vcombine.high %v14939_v60, %v14944_v0  ;;  %v3688_v32 = vld [vmem:[%s19967_s6 + $0x900] sm:$0xff] }
 0x1a6   : > { %20083 = vst [vmem:[#allocation43_spill] sm:$0xff] %v14933_v61  ;;  %v2649_v12 = vpop.f32.mrf.mxu1  ;;  %v2648_v40 = vadd.f32 %v2647_v18, %v2455_v36  ;;  %v2457_v53 = vadd.f32 %v2456_v29, %v14564_v13  ;;  %7186 = vmatprep.mubr.bf16.mxu0 %v14933_v61  ;;  %v14959_v13 = vld [vmem:[%s19967_s6 + $0x1e8] sm:$0xff]  ;;  %v13125_v36 = vld [vmem:[%s14532_s25 + $0xb0] ss:$8 sps:$4 sm:$0xff]  }
 0x1a7   : > { %v2460_v9 = vpop.f32.mrf.mxu0  ;;  %7187 = vmatmul.mubr.bf16.vlgmr.msra.gmra.mxu0 %v14926_v15 }
 0x1a8   : > { %v2653_v54 = vpop.f32.mrf.mxu1  ;;  %7480 = vmatmul.mubr.bf16.gmra.mxu1 %v13122_v39  ;;  %v2798_v38 = vmax.f32 %v2648_v40, 0.0  ;;  %v2650_v56 = vadd.f32 %v2649_v12, %v2457_v53  ;;  %v2461_v22 = vadd.f32 %v2460_v9, %v14569_v20  ;;  %7541 = vmatpush1.bf16.msra.mxu0 %v20084_v24  ;;  %v14970_v39 = vld [vmem:[%s19967_s6 + $0x5c8] sm:$0xff]  ;;  %v2797_v12 = vmax.f32 %v2646_v44, 0.0  ;;  %v3680_v44 = vld [vmem:[%s19967_s6 + $0x8c0] sm:$0xff] }
 0x1a9   : > { %7489 = vmatprep.mubr.bf16.mxu1 %v13123_v6  ;;  %v2462_v20 = vpop.f32.mrf.mxu0  ;;  %7542 = vmatprep.subr.bf16.mxu0 %v12304_v49  ;;  %v3692_v6 = vld [vmem:[%s19967_s6 + $0x920] sm:$0xff]  ;;  %v12186_v29 = vcombine.high %v14970_v39, %v14975_v8 }
 0x1aa   : > { %v2655_v18 = vpop.f32.mrf.mxu1  ;;  %v14988_v40 = vpack.c.bf16 %v2798_v38, %v2796_v7  ;;  %v2799_v53 = vmax.f32 %v2650_v56, 0.0  ;;  %v2463_v49 = vadd.f32 %v2462_v20, %v14574_v27  ;;  %v13126_v9 = vld [vmem:[%s14532_s25 + $0xc4] ss:$8 sps:$4 sm:$0xff]   ;;  %v2654_v61 = vadd.f32 %v2653_v54, %v2461_v22 }
 0x1ab   : > { %v2464_v24 = vpop.f32.mrf.mxu0  ;;  %8119 = vmatprep.subr.bf16.mxu1 %v12186_v29  ;;  %v3684_v27 = vld [vmem:[%s19967_s6 + $0x8e0] sm:$0xff]  ;;  %v12288_v56 = vcombine.high %v3688_v32, %v3692_v6  ;;  %v12287_v0 = vcombine.low %v3688_v32, %v3692_v6 }
 0x1ac   : > { %20085 = vst [vmem:[#allocation44_spill] sm:$0xff] %v14988_v40  ;;  %v2657_v45 = vpop.f32.mrf.mxu1  ;;  %v14992_v15 = vpack.c.bf16 %v2799_v53, %v2797_v12  ;;  %v2465_v16 = vadd.f32 %v2464_v24, %v14588_v35  ;;  %7543 = vmatpush1.bf16.msra.mxu0 %v12303_v17  ;;  %v2656_v20 = vadd.f32 %v2655_v18, %v2463_v49  ;;  %v2800_v22 = vmax.f32 %v2654_v61, 0.0  ;;  %v3676_v32 = vld [vmem:[%s19967_s6 + $0x8a0] sm:$0xff] }
 0x1ad   : > { %v2466_v7 = vpop.f32.mrf.mxu0  ;;  %7544 = vmatprep.subr.bf16.mxu0 %v12296_v31  ;;  %v12280_v18 = vcombine.high %v3680_v44, %v3684_v27  ;;  %v13128_v61 = vld [vmem:[%s14532_s25 + $0xc0] ss:$8 sps:$4 sm:$0xff]  }
 0x1ae   : > { %20086 = vst [vmem:[#allocation45_spill] sm:$0xff] %v14992_v15  ;;  %v2659_v38 = vpop.f32.mrf.mxu1  ;;  %v2658_v54 = vadd.f32 %v2657_v45, %v2465_v16  ;;  %v2467_v35 = vadd.f32 %v2466_v7, %v14607_v47  ;;  %7196 = vmatprep.mubr.bf16.mxu0 %v14992_v15  ;;  %v3672_v47 = vld [vmem:[%s19967_s6 + $0x880] sm:$0xff]  ;;  %v2801_v6 = vmax.f32 %v2656_v20, 0.0 }
 0x1af   : > { %v2470_v17 = vpop.f32.mrf.mxu0  ;;  %7197 = vmatmul.mubr.bf16.gmra.mxu0 %v14988_v40  ;;  %v3668_v20 = vld [vmem:[%s19967_s6 + $0x860] sm:$0xff] }
 0x1b0   : > { %v2663_v60 = vpop.f32.mrf.mxu1  ;;  %7490 = vmatmul.mubr.bf16.gmra.mxu1 %v13125_v36  ;;  %v2802_v29 = vmax.f32 %v2658_v54, 0.0  ;;  %v2660_v12 = vadd.f32 %v2659_v38, %v2467_v35  ;;  %v2471_v31 = vadd.f32 %v2470_v17, %v14614_v58  ;;  %7545 = vmatpush1.bf16.msra.mxu0 %v12295_v59  ;;  %v13129_v59 = vld [vmem:[%s14532_s25 + $0xd4] ss:$8 sps:$4 sm:$0xff]   ;;  %v3664_v54 = vld [vmem:[%s19967_s6 + $0x840] sm:$0xff]  ;;  %v12272_v17 = vcombine.high %v3672_v47, %v3676_v32 }
 0x1b1   : > { %7499 = vmatprep.mubr.bf16.mxu1 %v13126_v9  ;;  %v2472_v16 = vpop.f32.mrf.mxu0  ;;  %7546 = vmatprep.subr.bf16.mxu0 %v12288_v56  ;;  %v12279_v56 = vcombine.low %v3680_v44, %v3684_v27 }
 0x1b2   : > { %v2665_v45 = vpop.f32.mrf.mxu1  ;;  %v15014_v36 = vpack.c.bf16 %v2802_v29, %v2800_v22  ;;  %v2803_v53 = vmax.f32 %v2660_v12, 0.0  ;;  %v2473_v58 = vadd.f32 %v2472_v16, %v14618_v2  ;;  %v2664_v9 = vadd.f32 %v2663_v60, %v2471_v31 }
 0x1b3   : > { %v2474_v49 = vpop.f32.mrf.mxu0 }
 0x1b4   : > { %20087 = vst [vmem:[#allocation46_spill] sm:$0xff] %v15014_v36  ;;  %v2667_v24 = vpop.f32.mrf.mxu1  ;;  %v15018_v7 = vpack.c.bf16 %v2803_v53, %v2801_v6  ;;  %v2475_v38 = vadd.f32 %v2474_v49, %v14621_v10  ;;  %7547 = vmatpush1.bf16.msra.mxu0 %v12287_v0  ;;  %v2666_v22 = vadd.f32 %v2665_v45, %v2473_v58  ;;  %v2804_v12 = vmax.f32 %v2664_v9, 0.0  ;;  %v13132_v49 = vld [vmem:[%s14532_s25 + $0xe4] ss:$8 sps:$4 sm:$0xff]  }
 0x1b5   : > { %v2476_v35 = vpop.f32.mrf.mxu0  ;;  %7548 = vmatprep.subr.bf16.mxu0 %v12280_v18  ;;  %v2101_v10 = vadd.f32 %v14637_v46, %v14469_v3  ;;  %v12271_v0 = vcombine.low %v3672_v47, %v3676_v32  ;;  %v12264_v6 = vcombine.high %v3664_v54, %v3668_v20  ;;  %v3660_v47 = vld [vmem:[%s19967_s6 + $0x820] sm:$0xff]  ;;  %v13131_v32 = vld [vmem:[%s14532_s25 + $0xd0] ss:$8 sps:$4 sm:$0xff]  }
 0x1b6   : > { %20088 = vst [vmem:[#allocation47_spill] sm:$0xff] %v15018_v7  ;;  %v2669_v2 = vpop.f32.mrf.mxu1  ;;  %v2668_v29 = vadd.f32 %v2667_v24, %v2475_v38  ;;  %v2477_v60 = vadd.f32 %v2476_v35, %v14624_v11  ;;  %7206 = vmatprep.mubr.bf16.mxu0 %v15018_v7  ;;  %v3656_v11 = vld [vmem:[%s19967_s6 + $0x800] sm:$0xff] }
 0x1b7   : > { %v2480_v44 = vpop.f32.mrf.mxu0  ;;  %7207 = vmatmul.mubr.bf16.gmra.mxu0 %v15014_v36  ;;  %v2294_v24 = vadd.f32 %v14639_v48, %v2101_v10  ;;  %v3780_v10 = vld [vmem:[%s19967_s6 + $0xbe0] sm:$0xff] }
 0x1b8   : > { %v2673_v27 = vpop.f32.mrf.mxu1  ;;  %7500 = vmatmul.mubr.bf16.gmra.mxu1 %v13128_v61  ;;  %v2806_v31 = vmax.f32 %v2668_v29, 0.0  ;;  %v2670_v16 = vadd.f32 %v2669_v2, %v2477_v60  ;;  %v2481_v45 = vadd.f32 %v2480_v44, %v14631_v26  ;;  %7549 = vmatpush1.bf16.msra.mxu0 %v12279_v56  ;;  %v2805_v61 = vmax.f32 %v2666_v22, 0.0 }
 0x1b9   : > { %7509 = vmatprep.mubr.bf16.mxu1 %v13129_v59  ;;  %v2482_v46 = vpop.f32.mrf.mxu0  ;;  %7550 = vmatprep.subr.bf16.mxu0 %v12272_v17  ;;  %v12263_v2 = vcombine.low %v3664_v54, %v3668_v20  ;;  %v3776_v17 = vld [vmem:[%s19967_s6 + $0xbc0] sm:$0xff] }
 0x1ba   : > { %v2675_v18 = vpop.f32.mrf.mxu1  ;;  %v15040_v53 = vpack.c.bf16 %v2806_v31, %v2804_v12  ;;  %v2807_v58 = vmax.f32 %v2670_v16, 0.0  ;;  %v2483_v26 = vadd.f32 %v2482_v46, %v14634_v37  ;;  %v2674_v56 = vadd.f32 %v2673_v27, %v2481_v45 }
 0x1bb   : > { %v2484_v9 = vpop.f32.mrf.mxu0  ;;  %v12256_v37 = vcombine.high %v3656_v11, %v3660_v47  ;;  %v12255_v27 = vcombine.low %v3656_v11, %v3660_v47  ;;  %v3768_v47 = vld [vmem:[%s19967_s6 + $0xb80] sm:$0xff] }
 0x1bc   : > { %20089 = vst [vmem:[#allocation48_spill] sm:$0xff] %v15040_v53  ;;  %v2677_v59 = vpop.f32.mrf.mxu1  ;;  %v15045_v38 = vpack.c.bf16 %v2807_v58, %v2805_v61  ;;  %v2485_v35 = vadd.f32 %v2484_v9, %v14641_v51  ;;  %7551 = vmatpush1.bf16.msra.mxu0 %v12271_v0  ;;  %v2676_v60 = vadd.f32 %v2675_v18, %v2483_v26  ;;  %v2808_v0 = vmax.f32 %v2674_v56, 0.0  ;;  %v13135_v56 = vld [vmem:[%s14532_s25 + $0xf4] ss:$8 sps:$4 sm:$0xff]  }
 0x1bd   : > { %v2486_v22 = vpop.f32.mrf.mxu0  ;;  %7552 = vmatprep.subr.bf16.mxu0 %v12264_v6  ;;  %v2111_v51 = vadd.f32 %v14654_v19, %v14469_v3  ;;  %v12376_v18 = vcombine.high %v3776_v17, %v3780_v10 }
 0x1be   : > { %20090 = vst [vmem:[#allocation49_spill] sm:$0xff] %v15045_v38  ;;  %v2679_v29 = vpop.f32.mrf.mxu1  ;;  %v2678_v44 = vadd.f32 %v2677_v59, %v2485_v35  ;;  %v2487_v48 = vadd.f32 %v2486_v22, %v2294_v24  ;;  %7216 = vmatprep.mubr.bf16.mxu0 %v15045_v38  ;;  %v2809_v19 = vmax.f32 %v2676_v60, 0.0 }
 0x1bf   : > { %v2490_v54 = vpop.f32.mrf.mxu0  ;;  %7217 = vmatmul.mubr.bf16.gmra.mxu0 %v15040_v53 }
 0x1c0   : > { %v2683_v20 = vpop.f32.mrf.mxu1  ;;  %7510 = vmatmul.mubr.bf16.gmra.mxu1 %v13131_v32  ;;  %v2810_v12 = vmax.f32 %v2678_v44, 0.0  ;;  %v2680_v31 = vadd.f32 %v2679_v29, %v2487_v48  ;;  %v2491_v16 = vadd.f32 %v2490_v54, %v14648_v1  ;;  %7553 = vmatpush1.bf16.msra.mxu0 %v12263_v2  ;;  %v3772_v1 = vld [vmem:[%s19967_s6 + $0xba0] sm:$0xff]  ;;  %v2304_v32 = vadd.f32 %v14656_v21, %v2111_v51 }
 0x1c1   : > { %7519 = vmatprep.mubr.bf16.mxu1 %v13132_v49  ;;  %v2492_v45 = vpop.f32.mrf.mxu0  ;;  %7554 = vmatprep.subr.bf16.mxu0 %v12256_v37  ;;  %v13134_v49 = vld [vmem:[%s14532_s25 + $0xe0] ss:$8 sps:$4 sm:$0xff]   ;;  %v12368_v22 = vcombine.high %v3768_v47, %v3772_v1 }
 0x1c2   : > { %v2685_v46 = vpop.f32.mrf.mxu1  ;;  %v15059_v6 = vpack.c.bf16 %v2810_v12, %v2808_v0  ;;  %v2811_v61 = vmax.f32 %v2680_v31, 0.0  ;;  %v2493_v11 = vadd.f32 %v2492_v45, %v14651_v14  ;;  %v2684_v9 = vadd.f32 %v2683_v20, %v2491_v16  ;;  %v3760_v21 = vld [vmem:[%s19967_s6 + $0xb40] sm:$0xff] }
 0x1c3   : > { %v2494_v58 = vpop.f32.mrf.mxu0  ;;  %v12375_v14 = vcombine.low %v3776_v17, %v3780_v10  ;;  %v2121_v17 = vadd.f32 %v14668_v55, %v14469_v3  ;;  %v12367_v10 = vcombine.low %v3768_v47, %v3772_v1  ;;  %v13137_v47 = vld [vmem:[%s14532_s25 + $0xf0] ss:$8 sps:$4 sm:$0xff]  }
 0x1c4   : > { %20091 = vst [vmem:[#allocation50_spill] sm:$0xff] %v15059_v6  ;;  %v2687_v26 = vpop.f32.mrf.mxu1  ;;  %v15070_v24 = vpack.c.bf16 %v2811_v61, %v2809_v19  ;;  %v2495_v59 = vadd.f32 %v2494_v58, %v14658_v28  ;;  %7555 = vmatpush1.bf16.msra.mxu0 %v12255_v27  ;;  %v2686_v29 = vadd.f32 %v2685_v46, %v2493_v11  ;;  %v3764_v28 = vld [vmem:[%s19967_s6 + $0xb60] sm:$0xff]  ;;  %v2812_v51 = vmax.f32 %v2684_v9, 0.0 }
 0x1c5   : > { %v2496_v35 = vpop.f32.mrf.mxu0  ;;  %7556 = vmatprep.subr.bf16.mxu0 %v12376_v18  ;;  %v12360_v31 = vcombine.high %v3760_v21, %v3764_v28  ;;  %v3752_v18 = vld [vmem:[%s19967_s6 + $0xb00] sm:$0xff]  ;;  %v2314_v19 = vadd.f32 %v14670_v57, %v2121_v17 }
 0x1c6   : > { %20092 = vst [vmem:[#allocation51_spill] sm:$0xff] %v15070_v24  ;;  %v2689_v2 = vpop.f32.mrf.mxu1  ;;  %v2688_v37 = vadd.f32 %v2687_v26, %v2495_v59  ;;  %v2497_v60 = vadd.f32 %v2496_v35, %v2304_v32  ;;  %7226 = vmatprep.mubr.bf16.mxu0 %v15070_v24  ;;  %v2813_v55 = vmax.f32 %v2686_v29, 0.0  ;;  %v13140_v26 = vld [vmem:[%s14911_s19 + $0x4] ss:$8 sps:$4 sm:$0xff]  }
 0x1c7   : > { %v2500_v44 = vpop.f32.mrf.mxu0  ;;  %7227 = vmatmul.mubr.bf16.gmra.mxu0 %v15059_v6  ;;  %v3744_v57 = vld [vmem:[%s19967_s6 + $0xac0] sm:$0xff] }
 0x1c8   : > { %v2693_v48 = vpop.f32.mrf.mxu1  ;;  %7520 = vmatmul.mubr.bf16.gmra.mxu1 %v13134_v49  ;;  %v2814_v54 = vmax.f32 %v2688_v37, 0.0  ;;  %v2690_v20 = vadd.f32 %v2689_v2, %v2497_v60  ;;  %v2501_v27 = vadd.f32 %v2500_v44, %v14661_v25  ;;  %7557 = vmatpush2.bf16.msra.mxu0 %v12375_v14  ;;  %v3756_v25 = vld [vmem:[%s19967_s6 + $0xb20] sm:$0xff]  ;;  %v2131_v2 = vadd.f32 %v14691_v33, %v14469_v3 }
 0x1c9   : > { %7529 = vmatprep.mubr.bf16.mxu1 %v13135_v56  ;;  %v2502_v0 = vpop.f32.mrf.mxu0  ;;  %7558 = vmatprep.subr.bf16.mxu0 %v12368_v22  ;;  %v12352_v59 = vcombine.high %v3752_v18, %v3756_v25  ;;  %v12351_v37 = vcombine.low %v3752_v18, %v3756_v25 }
 0x1ca   : > { %v2695_v12 = vpop.f32.mrf.mxu1  ;;  %v15085_v16 = vpack.c.bf16 %v2814_v54, %v2812_v51  ;;  %v2815_v45 = vmax.f32 %v2690_v20, 0.0  ;;  %v2503_v46 = vadd.f32 %v2502_v0, %v14664_v52  ;;  %v2694_v32 = vadd.f32 %v2693_v48, %v2501_v27  ;;  %v15117_v27 = vld [vmem:[%s19967_s6 + $0xa80] sm:$0xff] }
 0x1cb   : > { %v2504_v61 = vpop.f32.mrf.mxu0  ;;  %v12359_v52 = vcombine.low %v3760_v21, %v3764_v28  ;;  %v2324_v0 = vadd.f32 %v14693_v34, %v2131_v2  ;;  %v12185_v34 = vcombine.low %v14970_v39, %v14975_v8  ;;  %v15154_v8 = vld [vmem:[%s19967_s6 + $0x548] sm:$0xff] }
 0x1cc   : > { %20093 = vst [vmem:[#allocation52_spill] sm:$0xff] %v15085_v16  ;;  %v2697_v11 = vpop.f32.mrf.mxu1  ;;  %v15096_v1 = vpack.c.bf16 %v2815_v45, %v2813_v55  ;;  %v2505_v58 = vadd.f32 %v2504_v61, %v14672_v4  ;;  %7559 = vmatpush2.bf16.msra.mxu0 %v12367_v10  ;;  %v2696_v14 = vadd.f32 %v2695_v12, %v2503_v46  ;;  %v3748_v4 = vld [vmem:[%s19967_s6 + $0xae0] sm:$0xff]  ;;  %v2816_v60 = vmax.f32 %v2694_v32, 0.0  ;;  %v3581_v46 = vld [vmem:[%s19967_s6 + $0x5a8] sm:$0xff] }
 0x1cd   : > { %v2506_v49 = vpop.f32.mrf.mxu0  ;;  %7560 = vmatprep.subr.bf16.mxu0 %v12360_v31  ;;  %v12344_v10 = vcombine.high %v3744_v57, %v3748_v4  ;;  %v12343_v55 = vcombine.low %v3744_v57, %v3748_v4  ;;  %v13138_v45 = vld [vmem:[%s14911_s19] ss:$8 sps:$4 sm:$0xff]  }
 0x1ce   : > { %20094 = vst [vmem:[#allocation53_spill] sm:$0xff] %v15096_v1  ;;  %v2699_v9 = vpop.f32.mrf.mxu1  ;;  %v2698_v56 = vadd.f32 %v2697_v11, %v2505_v58  ;;  %v2507_v35 = vadd.f32 %v2506_v49, %v2314_v19  ;;  %7236 = vmatprep.mubr.bf16.mxu0 %v15096_v1  ;;  %v2817_v51 = vmax.f32 %v2696_v14, 0.0  ;;  %v15142_v32 = vld [vmem:[%s19967_s6 + $0xa40] sm:$0xff]  ;;  %v13144_v58 = vld [vmem:[%s14911_s19 + $0x14] ss:$8 sps:$4 sm:$0xff]  }
 0x1cf   : > { %v2510_v22 = vpop.f32.mrf.mxu0  ;;  %7237 = vmatmul.mubr.bf16.gmra.mxu0 %v15085_v16 }
 0x1d0   : > { %v2703_v29 = vpop.f32.mrf.mxu1  ;;  %7530 = vmatmul.mubr.bf16.gmra.mxu1 %v13137_v47  ;;  %v2818_v21 = vmax.f32 %v2698_v56, 0.0  ;;  %v2700_v28 = vadd.f32 %v2699_v9, %v2507_v35  ;;  %v2511_v17 = vadd.f32 %v2510_v22, %v14675_v63  ;;  %7561 = vmatpush2.bf16.msra.mxu0 %v12359_v52  ;;  %v15122_v63 = vld [vmem:[%s19967_s6 + $0xaa0] sm:$0xff]  ;;  %v15159_v9 = vld [vmem:[%s19967_s6 + $0x568] sm:$0xff] }
 0x1d1   : > { %7765 = vmatprep.mubr.bf16.mxu1 %v13140_v26  ;;  %v2512_v44 = vpop.f32.mrf.mxu0  ;;  %7562 = vmatprep.subr.bf16.mxu0 %v12352_v59  ;;  %v12336_v47 = vcombine.high %v15117_v27, %v15122_v63  ;;  %v2141_v59 = vadd.f32 %v14718_v50, %v14469_v3  ;;  %v12335_v35 = vcombine.low %v15117_v27, %v15122_v63 }
 0x1d2   : > { %v2705_v48 = vpop.f32.mrf.mxu1  ;;  %v15111_v33 = vpack.c.bf16 %v2818_v21, %v2816_v60  ;;  %v2819_v54 = vmax.f32 %v2700_v28, 0.0  ;;  %v2513_v20 = vadd.f32 %v2512_v44, %v14685_v30  ;;  %v3577_v30 = vld [vmem:[%s19967_s6 + $0x588] sm:$0xff]  ;;  %v2704_v25 = vadd.f32 %v2703_v29, %v2511_v17 }
 0x1d3   : > { %v2514_v12 = vpop.f32.mrf.mxu0  ;;  %v12178_v39 = vcombine.high %v3577_v30, %v3581_v46  ;;  %v12177_v57 = vcombine.low %v3577_v30, %v3581_v46  ;;  %v12170_v21 = vcombine.high %v15154_v8, %v15159_v9  ;;  %v20101_v46 = vld [vmem:[#allocation9_spill] sm:$0xff] }
 0x1d4   : > { %20095 = vst [vmem:[#allocation54_spill] sm:$0xff] %v15111_v33  ;;  %v2707_v31 = vpop.f32.mrf.mxu1  ;;  %v15132_v18 = vpack.c.bf16 %v2819_v54, %v2817_v51  ;;  %v2515_v19 = vadd.f32 %v2514_v12, %v14695_v42  ;;  %7563 = vmatpush2.bf16.msra.mxu0 %v12351_v37  ;;  %v2706_v52 = vadd.f32 %v2705_v48, %v2513_v20  ;;  %v15149_v42 = vld [vmem:[%s19967_s6 + $0xa60] sm:$0xff]  ;;  %v2820_v4 = vmax.f32 %v2704_v25, 0.0  ;;  %v20098_v48 = vld [vmem:[#allocation7_spill] sm:$0xff]  ;;  %v20099_v54 = vld [vmem:[#allocation8_spill] sm:$0xff] }
 0x1d5   : > { %v2516_v61 = vpop.f32.mrf.mxu0  ;;  %7564 = vmatprep.subr.bf16.mxu0 %v12344_v10  ;;  %v12328_v50 = vcombine.high %v15142_v32, %v15149_v42  ;;  %v3724_v51 = vld [vmem:[%s19967_s6 + $0xa20] sm:$0xff]  ;;  %v2334_v20 = vadd.f32 %v20099_v54, %v2141_v59  ;;  %v13146_v12 = vld [vmem:[%s14911_s19 + $0x10] ss:$8 sps:$4 sm:$0xff]  }
 0x1d6   : > { %20096 = vst [vmem:[#allocation55_spill] sm:$0xff] %v15132_v18  ;;  %v2709_v11 = vpop.f32.mrf.mxu1  ;;  %v2708_v26 = vadd.f32 %v2707_v31, %v2515_v19  ;;  %v2517_v49 = vadd.f32 %v2516_v61, %v2324_v0  ;;  %7246 = vmatprep.mubr.bf16.mxu0 %v15132_v18  ;;  %v2821_v28 = vmax.f32 %v2706_v52, 0.0  ;;  %v12327_v0 = vcombine.low %v15142_v32, %v15149_v42  ;;  %v3561_v31 = vld [vmem:[%s19967_s6 + $0x508] sm:$0xff] }
 0x1d7   : > { %v2520_v14 = vpop.f32.mrf.mxu0  ;;  %7247 = vmatmul.mubr.bf16.gmra.mxu0 %v15111_v33  ;;  %v13150_v19 = vld [vmem:[%s14911_s19 + $0x24] ss:$8 sps:$4 sm:$0xff]  }
 0x1d8   : > { %v2713_v56 = vpop.f32.mrf.mxu1  ;;  %7766 = vmatmul.mubr.bf16.vlgmr.msra.gmra.mxu1 %v13138_v45  ;;  %v2822_v2 = vmax.f32 %v2708_v26, 0.0  ;;  %v2710_v22 = vadd.f32 %v2709_v11, %v2517_v49  ;;  %v2521_v29 = vadd.f32 %v2520_v14, %v14704_v62  ;;  %7565 = vmatpush2.bf16.msra.mxu0 %v12343_v55  ;;  %v3720_v62 = vld [vmem:[%s19967_s6 + $0xa00] sm:$0xff]  ;;  %v3565_v55 = vld [vmem:[%s19967_s6 + $0x528] sm:$0xff] }
 0x1d9   : > { %8120 = vmatpush1.bf16.msra.mxu1 %v12185_v34  ;;  %v2522_v37 = vpop.f32.mrf.mxu0  ;;  %7566 = vmatprep.subr.bf16.mxu0 %v12336_v47  ;;  %v12320_v11 = vcombine.high %v3720_v62, %v3724_v51  ;;  %v12169_v47 = vcombine.low %v15154_v8, %v15159_v9  ;;  %v12162_v26 = vcombine.high %v3561_v31, %v3565_v55  ;;  %v3553_v49 = vld [vmem:[%s19967_s6 + $0x4c8] sm:$0xff] }
 0x1da   : > { %v2715_v60 = vpop.f32.mrf.mxu1  ;;  %7775 = vmatprep.mubr.bf16.mxu1 %v13144_v58  ;;  %v15171_v17 = vpack.c.bf16 %v2822_v2, %v2820_v4  ;;  %v2823_v44 = vmax.f32 %v2710_v22, 0.0  ;;  %v2523_v10 = vadd.f32 %v2522_v37, %v20098_v48  ;;  %8121 = vmatprep.subr.bf16.mxu1 %v12178_v39  ;;  %v2714_v30 = vadd.f32 %v2713_v56, %v2521_v29  ;;  %v3557_v42 = vld [vmem:[%s19967_s6 + $0x4e8] sm:$0xff]  ;;  %v20102_v39 = vld [vmem:[#allocation12_spill] sm:$0xff]  ;;  %v20103_v4 = vld [vmem:[#allocation10_spill] sm:$0xff] }
 0x1db   : > { %v2524_v27 = vpop.f32.mrf.mxu0  ;;  %v2151_v59 = vadd.f32 %v20102_v39, %v14469_v3  ;;  %v12319_v9 = vcombine.low %v3720_v62, %v3724_v51  ;;  %v12058_v37 = vcombine.high %v14954_v41, %v14959_v13  ;;  %v20105_v48 = vld [vmem:[#allocation11_spill] sm:$0xff] }
 0x1dc   : > { %20097 = vst [vmem:[#allocation56_spill] sm:$0xff] %v15171_v17  ;;  %v2717_v63 = vpop.f32.mrf.mxu1  ;;  %v15190_v45 = vpack.c.bf16 %v2823_v44, %v2821_v28  ;;  %v2525_v25 = vadd.f32 %v2524_v27, %v20101_v46  ;;  %7567 = vmatpush2.bf16.msra.mxu0 %v12335_v35  ;;  %v2716_v32 = vadd.f32 %v2715_v60, %v2523_v10  ;;  %v2824_v56 = vmax.f32 %v2714_v30, 0.0  ;;  %v3545_v62 = vld [vmem:[%s19967_s6 + $0x488] sm:$0xff]  ;;  %v13156_v46 = vld [vmem:[%s14911_s19 + $0x34] ss:$8 sps:$4 sm:$0xff]  }
 0x1dd   : > { %8122 = vmatpush1.bf16.msra.mxu1 %v12177_v57  ;;  %v2526_v34 = vpop.f32.mrf.mxu0  ;;  %7568 = vmatprep.subr.bf16.mxu0 %v12328_v50  ;;  %v12161_v60 = vcombine.low %v3561_v31, %v3565_v55  ;;  %v12154_v50 = vcombine.high %v3553_v49, %v3557_v42  ;;  %v3549_v51 = vld [vmem:[%s19967_s6 + $0x4a8] sm:$0xff]  ;;  %v20108_v55 = vld [vmem:[#allocation14_spill] sm:$0xff] }
 0x1de   : > { %20100 = vst [vmem:[#allocation7_spill] sm:$0xff] %v15190_v45  ;;  %v2719_v61 = vpop.f32.mrf.mxu1  ;;  %8123 = vmatprep.subr.bf16.mxu1 %v12170_v21  ;;  %v2718_v58 = vadd.f32 %v2717_v63, %v2525_v25  ;;  %v2527_v52 = vadd.f32 %v2526_v34, %v2334_v20  ;;  %7256 = vmatprep.mubr.bf16.mxu0 %v15190_v45  ;;  %v2825_v21 = vmax.f32 %v2716_v32, 0.0  ;;  %v13152_v27 = vld [vmem:[%s14911_s19 + $0x20] ss:$8 sps:$4 sm:$0xff]   ;;  %v20106_v63 = vld [vmem:[#allocation13_spill] sm:$0xff] }
 0x1df   : > { %v2530_v14 = vpop.f32.mrf.mxu0  ;;  %7257 = vmatmul.mubr.bf16.gmra.mxu0 %v15171_v17  ;;  %v12153_v34 = vcombine.low %v3553_v49, %v3557_v42 }
 0x1e0   : > { %v2723_v8 = vpop.f32.mrf.mxu1  ;;  %7776 = vmatmul.mubr.bf16.gmra.mxu1 %v13146_v12  ;;  %v2826_v35 = vmax.f32 %v2718_v58, 0.0  ;;  %v2720_v57 = vadd.f32 %v2719_v61, %v2527_v52  ;;  %v2531_v2 = vadd.f32 %v2530_v14, %v20103_v4  ;;  %7569 = vmatpush2.bf16.msra.mxu0 %v12327_v0  ;;  %v2344_v0 = vadd.f32 %v20106_v63, %v2151_v59  ;;  %v3537_v58 = vld [vmem:[%s19967_s6 + $0x448] sm:$0xff] }
 0x1e1   : > { %7785 = vmatprep.mubr.bf16.mxu1 %v13150_v19  ;;  %v2532_v22 = vpop.f32.mrf.mxu0  ;;  %7570 = vmatprep.subr.bf16.mxu0 %v12320_v11  ;;  %v12146_v61 = vcombine.high %v3545_v62, %v3549_v51  ;;  %v3541_v52 = vld [vmem:[%s19967_s6 + $0x468] sm:$0xff]  ;;  %v12145_v4 = vcombine.low %v3545_v62, %v3549_v51  ;;  %v13158_v62 = vld [vmem:[%s14911_s19 + $0x30] ss:$8 sps:$4 sm:$0xff]   ;;  %v20113_v51 = vld [vmem:[#allocation18_spill] sm:$0xff] }
 0x1e2   : > { %v2725_v29 = vpop.f32.mrf.mxu1  ;;  %8124 = vmatpush1.bf16.msra.mxu1 %v12169_v47  ;;  %v15209_v28 = vpack.c.bf16 %v2826_v35, %v2824_v56  ;;  %v2827_v44 = vmax.f32 %v2720_v57, 0.0  ;;  %v2533_v10 = vadd.f32 %v2532_v22, %v20105_v48  ;;  %v2724_v31 = vadd.f32 %v2723_v8, %v2531_v2  ;;  %v20115_v63 = vld [vmem:[#allocation19_spill] sm:$0xff] }
 0x1e3   : > { %8125 = vmatprep.subr.bf16.mxu1 %v12162_v26  ;;  %v2534_v54 = vpop.f32.mrf.mxu0  ;;  %v20109_v26 = vld [vmem:[#allocation17_spill] sm:$0xff]  ;;  %v12138_v2 = vcombine.high %v3537_v58, %v3541_v52 }
 0x1e4   : > { %20104 = vst [vmem:[#allocation8_spill] sm:$0xff] %v15209_v28  ;;  %v2727_v20 = vpop.f32.mrf.mxu1  ;;  %v15220_v12 = vpack.c.bf16 %v2827_v44, %v2825_v21  ;;  %v2535_v30 = vadd.f32 %v2534_v54, %v20108_v55  ;;  %7571 = vmatpush2.bf16.msra.mxu0 %v12319_v9  ;;  %v2726_v11 = vadd.f32 %v2725_v29, %v2533_v10  ;;  %v2828_v42 = vmax.f32 %v2724_v31, 0.0  ;;  %v20110_v9 = vld [vmem:[#allocation15_spill] sm:$0xff] }
 0x1e5   : > { %v2536_v25 = vpop.f32.mrf.mxu0  ;;  %7926 = vmatprep.subr.bf16.mxu0 %v12058_v37  ;;  %v2161_v39 = vadd.f32 %v20109_v26, %v14469_v3  ;;  %v3529_v21 = vld [vmem:[%s19967_s6 + $0x408] sm:$0xff] }
 0x1e6   : > { %20107 = vst [vmem:[#allocation9_spill] sm:$0xff] %v15220_v12  ;;  %v2729_v19 = vpop.f32.mrf.mxu1  ;;  %8126 = vmatpush1.bf16.msra.mxu1 %v12161_v60  ;;  %v2728_v47 = vadd.f32 %v2727_v20, %v2535_v30  ;;  %v2537_v32 = vadd.f32 %v2536_v25, %v2344_v0  ;;  %7266 = vmatprep.mubr.bf16.mxu0 %v15220_v12  ;;  %v2829_v22 = vmax.f32 %v2726_v11, 0.0  ;;  %v20112_v60 = vld [vmem:[#allocation16_spill] sm:$0xff]  ;;  %v3533_v44 = vld [vmem:[%s19967_s6 + $0x428] sm:$0xff] }
 0x1e7   : > { %8127 = vmatprep.subr.bf16.mxu1 %v12154_v50  ;;  %v2540_v59 = vpop.f32.mrf.mxu0  ;;  %7267 = vmatmul.mubr.bf16.gmra.mxu0 %v15209_v28  ;;  %v2354_v54 = vadd.f32 %v20113_v51, %v2161_v39  ;;  %v13162_v31 = vld [vmem:[%s14911_s19 + $0x44] ss:$8 sps:$4 sm:$0xff]   ;;  %v12130_v25 = vcombine.high %v3529_v21, %v3533_v44 }
 0x1e8   : > { %v2733_v49 = vpop.f32.mrf.mxu1  ;;  %7786 = vmatmul.mubr.bf16.gmra.mxu1 %v13152_v27  ;;  %v2830_v14 = vmax.f32 %v2728_v47, 0.0  ;;  %v2730_v8 = vadd.f32 %v2729_v19, %v2537_v32  ;;  %v2541_v56 = vadd.f32 %v2540_v59, %v20110_v9  ;;  %v3649_v11 = vld [vmem:[%s19967_s6 + $0x7c8] sm:$0xff]  ;;  %v2171_v32 = vadd.f32 %v14793_v23, %v14469_v3 }
 0x1e9   : > { %7795 = vmatprep.mubr.bf16.mxu1 %v13156_v46  ;;  %v2542_v35 = vpop.f32.mrf.mxu0  ;;  %v12137_v46 = vcombine.low %v3537_v58, %v3541_v52  ;;  %v3653_v47 = vld [vmem:[%s19967_s6 + $0x7e8] sm:$0xff] }
 0x1ea   : > { %v2735_v57 = vpop.f32.mrf.mxu1  ;;  %8128 = vmatpush1.bf16.msra.mxu1 %v12153_v34  ;;  %v15235_v29 = vpack.c.bf16 %v2830_v14, %v2828_v42  ;;  %v2831_v37 = vmax.f32 %v2730_v8, 0.0  ;;  %v2543_v50 = vadd.f32 %v2542_v35, %v20112_v60  ;;  %v2734_v27 = vadd.f32 %v2733_v49, %v2541_v56  ;;  %v20117_v60 = vld [vmem:[#allocation20_spill] sm:$0xff] }
 0x1eb   : > { %8129 = vmatprep.subr.bf16.mxu1 %v12146_v61  ;;  %v2544_v48 = vpop.f32.mrf.mxu0  ;;  %v12129_v8 = vcombine.low %v3529_v21, %v3533_v44  ;;  %v12250_v9 = vcombine.high %v3649_v11, %v3653_v47 }
 0x1ec   : > { %20111 = vst [vmem:[#allocation12_spill] sm:$0xff] %v15235_v29  ;;  %v2737_v10 = vpop.f32.mrf.mxu1  ;;  %v15246_v20 = vpack.c.bf16 %v2831_v37, %v2829_v22  ;;  %v2545_v0 = vadd.f32 %v2544_v48, %v20115_v63  ;;  %v2736_v19 = vadd.f32 %v2735_v57, %v2543_v50  ;;  %v2832_v52 = vmax.f32 %v2734_v27, 0.0  ;;  %v13164_v37 = vld [vmem:[%s14911_s19 + $0x40] ss:$8 sps:$4 sm:$0xff]   ;;  %v20119_v48 = vld [vmem:[#allocation21_spill] sm:$0xff] }
 0x1ed   : > { %v2546_v55 = vpop.f32.mrf.mxu0  ;;  %v2364_v50 = vadd.f32 %v20117_v60, %v2171_v32  ;;  %v20121_v32 = vld [vmem:[#allocation22_spill] sm:$0xff] }
 0x1ee   : > { %20114 = vst [vmem:[#allocation10_spill] sm:$0xff] %v15246_v20  ;;  %v2739_v30 = vpop.f32.mrf.mxu1  ;;  %8130 = vmatpush1.bf16.msra.mxu1 %v12145_v4  ;;  %v2738_v34 = vadd.f32 %v2737_v10, %v2545_v0  ;;  %v2547_v61 = vadd.f32 %v2546_v55, %v2354_v54  ;;  %7276 = vmatprep.mubr.bf16.mxu0 %v15246_v20  ;;  %v2833_v56 = vmax.f32 %v2736_v19, 0.0  ;;  %v3641_v4 = vld [vmem:[%s19967_s6 + $0x788] sm:$0xff]  ;;  %v20120_v55 = vld [vmem:[#allocation24_spill] sm:$0xff] }
 0x1ef   : > { %8131 = vmatprep.subr.bf16.mxu1 %v12138_v2  ;;  %v2550_v26 = vpop.f32.mrf.mxu0  ;;  %7277 = vmatmul.mubr.bf16.gmra.mxu0 %v15235_v29  ;;  %v12249_v54 = vcombine.low %v3649_v11, %v3653_v47 }
 0x1f0   : > { %v2743_v58 = vpop.f32.mrf.mxu1  ;;  %7796 = vmatmul.mubr.bf16.gmra.mxu1 %v13158_v62  ;;  %v2834_v39 = vmax.f32 %v2738_v34, 0.0  ;;  %v2740_v59 = vadd.f32 %v2739_v30, %v2547_v61  ;;  %v2551_v49 = vadd.f32 %v2550_v26, %v14785_v43  ;;  %v3645_v43 = vld [vmem:[%s19967_s6 + $0x7a8] sm:$0xff]  ;;  %v2181_v30 = vadd.f32 %v20120_v55, %v14469_v3 }
 0x1f1   : > { %7805 = vmatprep.mubr.bf16.mxu1 %v13162_v31  ;;  %v2552_v42 = vpop.f32.mrf.mxu0  ;;  %v12242_v27 = vcombine.high %v3641_v4, %v3645_v43 }
 0x1f2   : > { %v2745_v14 = vpop.f32.mrf.mxu1  ;;  %8132 = vmatpush1.bf16.msra.mxu1 %v12137_v46  ;;  %v15261_v23 = vpack.c.bf16 %v2834_v39, %v2832_v52  ;;  %v2835_v35 = vmax.f32 %v2740_v59, 0.0  ;;  %v2553_v57 = vadd.f32 %v2552_v42, %v14789_v5  ;;  %v2744_v44 = vadd.f32 %v2743_v58, %v2551_v49  ;;  %v13168_v5 = vld [vmem:[%s14911_s19 + $0x54] ss:$8 sps:$4 sm:$0xff]   ;;  %v20123_v49 = vld [vmem:[#allocation23_spill] sm:$0xff] }
 0x1f3   : > { %8133 = vmatprep.subr.bf16.mxu1 %v12130_v25  ;;  %v2554_v2 = vpop.f32.mrf.mxu0  ;;  %v12241_v58 = vcombine.low %v3641_v4, %v3645_v43  ;;  %v20124_v4 = vld [vmem:[#allocation25_spill] sm:$0xff] }
 0x1f4   : > { %20116 = vst [vmem:[#allocation11_spill] sm:$0xff] %v15261_v23  ;;  %v2747_v22 = vpop.f32.mrf.mxu1  ;;  %v15272_v21 = vpack.c.bf16 %v2835_v35, %v2833_v56  ;;  %v2555_v10 = vadd.f32 %v2554_v2, %v20119_v48  ;;  %v2746_v63 = vadd.f32 %v2745_v14, %v2553_v57  ;;  %v2836_v19 = vmax.f32 %v2744_v44, 0.0  ;;  %v3633_v14 = vld [vmem:[%s19967_s6 + $0x748] sm:$0xff]  ;;  %v13170_v35 = vld [vmem:[%s14911_s19 + $0x50] ss:$8 sps:$4 sm:$0xff]  }
 0x1f5   : > { %v2556_v62 = vpop.f32.mrf.mxu0  ;;  %v2374_v43 = vadd.f32 %v20124_v4, %v2181_v30  ;;  %v20133_v4 = vld [vmem:[#allocation31_spill] sm:$0xff] }
 0x1f6   : > { %20118 = vst [vmem:[#allocation13_spill] sm:$0xff] %v15272_v21  ;;  %v2749_v51 = vpop.f32.mrf.mxu1  ;;  %8134 = vmatpush1.bf16.msra.mxu1 %v12129_v8  ;;  %v2748_v0 = vadd.f32 %v2747_v22, %v2555_v10  ;;  %v2557_v31 = vadd.f32 %v2556_v62, %v2364_v50  ;;  %7286 = vmatprep.mubr.bf16.mxu0 %v15272_v21  ;;  %v2837_v52 = vmax.f32 %v2746_v63, 0.0  ;;  %v3637_v8 = vld [vmem:[%s19967_s6 + $0x768] sm:$0xff] }
 0x1f7   : > { %8135 = vmatprep.subr.bf16.mxu1 %v12250_v9  ;;  %v2560_v46 = vpop.f32.mrf.mxu0  ;;  %7287 = vmatmul.mubr.bf16.gmra.mxu0 %v15261_v23  ;;  %v12234_v57 = vcombine.high %v3633_v14, %v3637_v8  ;;  %v13174_v50 = vld [vmem:[%s14911_s19 + $0x64] ss:$8 sps:$4 sm:$0xff]   ;;  %v12233_v10 = vcombine.low %v3633_v14, %v3637_v8 }
 0x1f8   : > { %v2753_v25 = vpop.f32.mrf.mxu1  ;;  %7806 = vmatmul.mubr.bf16.gmra.mxu1 %v13164_v37  ;;  %v2838_v34 = vmax.f32 %v2748_v0, 0.0  ;;  %v2750_v61 = vadd.f32 %v2749_v51, %v2557_v31  ;;  %v2561_v11 = vadd.f32 %v2560_v46, %v20121_v32  ;;  %v20126_v37 = vld [vmem:[#allocation26_spill] sm:$0xff]  ;;  %v20128_v46 = vld [vmem:[#allocation27_spill] sm:$0xff] }
 0x1f9   : > { %7815 = vmatprep.mubr.bf16.mxu1 %v13168_v5  ;;  %v2562_v47 = vpop.f32.mrf.mxu0 }
 0x1fa   : > { %v2755_v26 = vpop.f32.mrf.mxu1  ;;  %8136 = vmatpush2.bf16.msra.mxu1 %v12249_v54  ;;  %v15281_v39 = vpack.c.bf16 %v2838_v34, %v2836_v19  ;;  %v2839_v59 = vmax.f32 %v2750_v61, 0.0  ;;  %v2563_v42 = vadd.f32 %v2562_v47, %v20123_v49  ;;  %v2754_v22 = vadd.f32 %v2753_v25, %v2561_v11  ;;  %v20127_v54 = vld [vmem:[#allocation29_spill] sm:$0xff]  ;;  %v20130_v47 = vld [vmem:[#allocation28_spill] sm:$0xff] }
 0x1fb   : > { %8137 = vmatprep.subr.bf16.mxu1 %v12242_v27  ;;  %v2564_v9 = vpop.f32.mrf.mxu0  ;;  %v2191_v27 = vadd.f32 %v20127_v54, %v14469_v3 }
 0x1fc   : > { %20122 = vst [vmem:[#allocation14_spill] sm:$0xff] %v15281_v39  ;;  %v2757_v56 = vpop.f32.mrf.mxu1  ;;  %v15292_v2 = vpack.c.bf16 %v2839_v59, %v2837_v52  ;;  %v2565_v60 = vadd.f32 %v2564_v9, %v20126_v37  ;;  %v2756_v5 = vadd.f32 %v2755_v26, %v2563_v42  ;;  %v2840_v31 = vmax.f32 %v2754_v22, 0.0  ;;  %v3629_v52 = vld [vmem:[%s19967_s6 + $0x728] sm:$0xff]  ;;  %v20131_v9 = vld [vmem:[#allocation30_spill] sm:$0xff]  ;;  %v13180_v22 = vld [vmem:[%s14911_s19 + $0x74] ss:$8 sps:$4 sm:$0xff]  }
 0x1fd   : > { %v2566_v44 = vpop.f32.mrf.mxu0  ;;  %v13176_v42 = vld [vmem:[%s14911_s19 + $0x60] ss:$8 sps:$4 sm:$0xff]  }
 0x1fe   : > { %20125 = vst [vmem:[#allocation17_spill] sm:$0xff] %v15292_v2  ;;  %v2759_v48 = vpop.f32.mrf.mxu1  ;;  %8138 = vmatpush2.bf16.msra.mxu1 %v12241_v58  ;;  %v2758_v62 = vadd.f32 %v2757_v56, %v2565_v60  ;;  %v2567_v51 = vadd.f32 %v2566_v44, %v2374_v43  ;;  %7296 = vmatprep.mubr.bf16.mxu0 %v15292_v2  ;;  %v2841_v61 = vmax.f32 %v2756_v5, 0.0  ;;  %v3625_v58 = vld [vmem:[%s19967_s6 + $0x708] sm:$0xff] }
 0x1ff   : > { %8139 = vmatprep.subr.bf16.mxu1 %v12234_v57  ;;  %v2570_v63 = vpop.f32.mrf.mxu0  ;;  %7297 = vmatmul.mubr.bf16.gmra.mxu0 %v15281_v39  ;;  %v12225_v14 = vcombine.low %v3625_v58, %v3629_v52  ;;  %v12226_v8 = vcombine.high %v3625_v58, %v3629_v52  ;;  %v2384_v56 = vadd.f32 %v20131_v9, %v2191_v27  ;;  %v13182_v52 = vld [vmem:[%s14911_s19 + $0x70] ss:$8 sps:$4 sm:$0xff]  }
 0x200   : > { %v2763_v0 = vpop.f32.mrf.mxu1  ;;  %7816 = vmatmul.mubr.bf16.gmra.mxu1 %v13170_v35  ;;  %v2842_v55 = vmax.f32 %v2758_v62, 0.0  ;;  %v2760_v30 = vadd.f32 %v2759_v48, %v2567_v51  ;;  %v2571_v25 = vadd.f32 %v2570_v63, %v20128_v46 }
 0x201   : > { %7825 = vmatprep.mubr.bf16.mxu1 %v13174_v50  ;;  %v2572_v19 = vpop.f32.mrf.mxu0 }
 0x202   : > { %v2765_v34 = vpop.f32.mrf.mxu1  ;;  %8140 = vmatpush2.bf16.msra.mxu1 %v12233_v10  ;;  %v15301_v32 = vpack.c.bf16 %v2842_v55, %v2840_v31  ;;  %v2843_v11 = vmax.f32 %v2760_v30, 0.0  ;;  %v2573_v26 = vadd.f32 %v2572_v19, %v20130_v47  ;;  %v2764_v57 = vadd.f32 %v2763_v0, %v2571_v25  ;;  %v20134_v10 = vld [vmem:[#allocation34_spill] sm:$0xff]  ;;  %v20135_v0 = vld [vmem:[#allocation32_spill] sm:$0xff]  ;;  %v3621_v47 = vld [vmem:[%s19967_s6 + $0x6e8] sm:$0xff] }
 0x203   : > { %v2574_v59 = vpop.f32.mrf.mxu0  ;;  %8141 = vmatprep.subr.bf16.mxu1 %v12226_v8  ;;  %v2201_v5 = vadd.f32 %v20134_v10, %v14469_v3 }
 0x204   : > { %20129 = vst [vmem:[#allocation15_spill] sm:$0xff] %v15301_v32  ;;  %v2767_v49 = vpop.f32.mrf.mxu1  ;;  %v15312_v35 = vpack.c.bf16 %v2843_v11, %v2841_v61  ;;  %v2575_v43 = vadd.f32 %v2574_v59, %v20133_v4  ;;  %v2766_v50 = vadd.f32 %v2765_v34, %v2573_v26  ;;  %v2844_v54 = vmax.f32 %v2764_v57, 0.0  ;;  %v20137_v34 = vld [vmem:[#allocation33_spill] sm:$0xff]  ;;  %v3617_v11 = vld [vmem:[%s19967_s6 + $0x6c8] sm:$0xff] }
 0x205   : > { %v2576_v37 = vpop.f32.mrf.mxu0  ;;  %v12217_v59 = vcombine.low %v3617_v11, %v3621_v47  ;;  %v13186_v4 = vld [vmem:[%s14911_s19 + $0x84] ss:$8 sps:$4 sm:$0xff]  }
 0x206   : > { %20132 = vst [vmem:[#allocation16_spill] sm:$0xff] %v15312_v35  ;;  %v2769_v60 = vpop.f32.mrf.mxu1  ;;  %v2768_v44 = vadd.f32 %v2767_v49, %v2575_v43  ;;  %v2577_v48 = vadd.f32 %v2576_v37, %v2384_v56  ;;  %7306 = vmatprep.mubr.bf16.mxu0 %v15312_v35  ;;  %8142 = vmatpush2.bf16.msra.mxu1 %v12225_v14  ;;  %v2845_v46 = vmax.f32 %v2766_v50, 0.0  ;;  %v20140_v56 = vld [vmem:[#allocation36_spill] sm:$0xff] }
 0x207   : > { %v2580_v62 = vpop.f32.mrf.mxu0  ;;  %7307 = vmatmul.mubr.bf16.gmra.mxu0 %v15301_v32  ;;  %v12218_v49 = vcombine.high %v3617_v11, %v3621_v47 }
 0x208   : > { %v2773_v51 = vpop.f32.mrf.mxu1  ;;  %7826 = vmatmul.mubr.bf16.gmra.mxu1 %v13176_v42  ;;  %v2846_v27 = vmax.f32 %v2768_v44, 0.0  ;;  %v2770_v63 = vadd.f32 %v2769_v60, %v2577_v48  ;;  %v2581_v31 = vadd.f32 %v2580_v62, %v20135_v0  ;;  %v20138_v42 = vld [vmem:[#allocation35_spill] sm:$0xff] }
 0x209   : > { %7835 = vmatprep.mubr.bf16.mxu1 %v13180_v22  ;;  %v2582_v55 = vpop.f32.mrf.mxu0  ;;  %v2394_v14 = vadd.f32 %v20138_v42, %v2201_v5  ;;  %8143 = vmatprep.subr.bf16.mxu1 %v12218_v49  ;;  %v20141_v44 = vld [vmem:[#allocation39_spill] sm:$0xff] }
 0x20a   : > { %v2775_v30 = vpop.f32.mrf.mxu1  ;;  %v15321_v25 = vpack.c.bf16 %v2846_v27, %v2844_v54  ;;  %v2847_v19 = vmax.f32 %v2770_v63, 0.0  ;;  %v2583_v61 = vadd.f32 %v2582_v55, %v20137_v34  ;;  %v2774_v9 = vadd.f32 %v2773_v51, %v2581_v31  ;;  %8144 = vmatpush2.bf16.msra.mxu1 %v12217_v59  ;;  %v20142_v27 = vld [vmem:[#allocation37_spill] sm:$0xff]  ;;  %v3609_v34 = vld [vmem:[%s19967_s6 + $0x688] sm:$0xff]  ;;  %v20145_v59 = vld [vmem:[#allocation40_spill] sm:$0xff] }
 0x20b   : > { %v2584_v26 = vpop.f32.mrf.mxu0  ;;  %v2211_v48 = vadd.f32 %v20141_v44, %v14469_v3  ;;  %v20144_v3 = vld [vmem:[#allocation38_spill] sm:$0xff] }
 0x20c   : > { %20136 = vst [vmem:[#allocation18_spill] sm:$0xff] %v15321_v25  ;;  %v2777_v58 = vpop.f32.mrf.mxu1  ;;  %v15332_v8 = vpack.c.bf16 %v2847_v19, %v2845_v46  ;;  %v2585_v57 = vadd.f32 %v2584_v26, %v20140_v56  ;;  %v2776_v37 = vadd.f32 %v2775_v30, %v2583_v61  ;;  %v2848_v62 = vmax.f32 %v2774_v9, 0.0  ;;  %v3613_v61 = vld [vmem:[%s19967_s6 + $0x6a8] sm:$0xff]  ;;  %v20147_v9 = vld [vmem:[#allocation41_spill] sm:$0xff] }
 0x20d   : > { %v2586_v43 = vpop.f32.mrf.mxu0  ;;  %v13188_v26 = vld [vmem:[%s14911_s19 + $0x80] ss:$8 sps:$4 sm:$0xff]   ;;  %v2404_v49 = vadd.f32 %v20145_v59, %v2211_v48 }
 0x20e   : > { %20139 = vst [vmem:[#allocation19_spill] sm:$0xff] %v15332_v8  ;;  %v2779_v22 = vpop.f32.mrf.mxu1  ;;  %v2778_v60 = vadd.f32 %v2777_v58, %v2585_v57  ;;  %v2587_v50 = vadd.f32 %v2586_v43, %v2394_v14  ;;  %7316 = vmatprep.mubr.bf16.mxu0 %v15332_v8  ;;  %v2849_v55 = vmax.f32 %v2776_v37, 0.0  ;;  %v12209_v58 = vcombine.low %v3609_v34, %v3613_v61  ;;  %v13192_v57 = vld [vmem:[%s14911_s19 + $0x94] ss:$8 sps:$4 sm:$0xff]  }
 0x20f   : > { %v2590_v10 = vpop.f32.mrf.mxu0  ;;  %7317 = vmatmul.mubr.bf16.gmra.mxu0 %v15321_v25  ;;  %v13236_v8 = vld [vmem:[%s14532_s25 + $0x14] ss:$8 sps:$4 sm:$0xff]  }
 0x210   : > { %v2783_v5 = vpop.f32.mrf.mxu1  ;;  %7836 = vmatmul.mubr.bf16.gmra.mxu1 %v13182_v52  ;;  %v2850_v51 = vmax.f32 %v2778_v60, 0.0  ;;  %v2780_v54 = vadd.f32 %v2779_v22, %v2587_v50  ;;  %v2591_v63 = vadd.f32 %v2590_v10, %v20142_v27  ;;  %v12210_v52 = vcombine.high %v3609_v34, %v3613_v61  ;;  %v13198_v34 = vld [vmem:[%s14911_s19 + $0xa4] ss:$8 sps:$4 sm:$0xff]  }
 0x211   : > { %7845 = vmatprep.mubr.bf16.mxu1 %v13186_v4  ;;  %v2592_v0 = vpop.f32.mrf.mxu0  ;;  %v3593_v61 = vld [vmem:[%s19967_s6 + $0x608] sm:$0xff] }
 0x212   : > { %v2785_v31 = vpop.f32.mrf.mxu1  ;;  %v15341_v30 = vpack.c.bf16 %v2850_v51, %v2848_v62  ;;  %v2851_v46 = vmax.f32 %v2780_v54, 0.0  ;;  %v2593_v19 = vadd.f32 %v2592_v0, %v20144_v3  ;;  %v2784_v14 = vadd.f32 %v2783_v5, %v2591_v63  ;;  %8145 = vmatprep.subr.bf16.mxu1 %v12210_v52  ;;  %v3601_v5 = vld [vmem:[%s19967_s6 + $0x648] sm:$0xff]  ;;  %v13194_v3 = vld [vmem:[%s14911_s19 + $0x90] ss:$8 sps:$4 sm:$0xff]  }
 0x213   : > { %v2594_v11 = vpop.f32.mrf.mxu0  ;;  %8146 = vmatpush2.bf16.msra.mxu1 %v12209_v58  ;;  %v3605_v54 = vld [vmem:[%s19967_s6 + $0x668] sm:$0xff] }
 0x214   : > { %20143 = vst [vmem:[#allocation20_spill] sm:$0xff] %v15341_v30  ;;  %v2787_v47 = vpop.f32.mrf.mxu1  ;;  %v15352_v42 = vpack.c.bf16 %v2851_v46, %v2849_v55  ;;  %v2595_v56 = vadd.f32 %v2594_v11, %v20147_v9  ;;  %v2786_v4 = vadd.f32 %v2785_v31, %v2593_v19  ;;  %v2852_v44 = vmax.f32 %v2784_v14, 0.0  ;;  %v13143_v55 = vld [vmem:[%s14923_s16 + $0x4] ss:$8 sps:$4 sm:$0xff]   ;;  %v13141_v9 = vld [vmem:[%s14923_s16] ss:$8 sps:$4 sm:$0xff]  }
 0x215   : > { %v2596_v43 = vpop.f32.mrf.mxu0  ;;  %v12201_v0 = vcombine.low %v3601_v5, %v3605_v54  ;;  %v12202_v31 = vcombine.high %v3601_v5, %v3605_v54  ;;  %v3597_v11 = vld [vmem:[%s19967_s6 + $0x628] sm:$0xff] }
 0x216   : > { %20146 = vst [vmem:[#allocation21_spill] sm:$0xff] %v15352_v42  ;;  %v2789_v22 = vpop.f32.mrf.mxu1  ;;  %v2788_v37 = vadd.f32 %v2787_v47, %v2595_v56  ;;  %v2597_v60 = vadd.f32 %v2596_v43, %v2404_v49  ;;  %7326 = vmatprep.mubr.bf16.mxu0 %v15352_v42  ;;  %v2853_v62 = vmax.f32 %v2786_v4, 0.0  ;;  %v12193_v58 = vcombine.low %v3593_v61, %v3597_v11  ;;  %v3449_v49 = vld [vmem:[%s19967_s6 + $0x188] sm:$0xff]  ;;  %v13147_v4 = vld [vmem:[%s14923_s16 + $0x14] ss:$8 sps:$4 sm:$0xff]  }
 0x217   : > { %7327 = vmatmul.mubr.bf16.gmra.mxu0 %v15341_v30  ;;  %8147 = vmatprep.subr.bf16.mxu1 %v12202_v31  ;;  %v3453_v14 = vld [vmem:[%s19967_s6 + $0x1a8] sm:$0xff] }
 0x218   : > { %v15358_v50 = vpop.f32.mrf.mxu1  ;;  %7846 = vmatmul.mubr.bf16.gmra.mxu1 %v13188_v26  ;;  %v2854_v48 = vmax.f32 %v2788_v37, 0.0  ;;  %v2790_v10 = vadd.f32 %v2789_v22, %v2597_v60  ;;  %v12194_v26 = vcombine.high %v3593_v61, %v3597_v11  ;;  %v12050_v43 = vcombine.high %v3449_v49, %v3453_v14  ;;  %v13204_v37 = vld [vmem:[%s14911_s19 + $0xb4] ss:$8 sps:$4 sm:$0xff]   ;;  %v3441_v60 = vld [vmem:[%s19967_s6 + $0x148] sm:$0xff]  ;;  %v13206_v11 = vld [vmem:[%s14911_s19 + $0xb0] ss:$8 sps:$4 sm:$0xff]  }
 0x219   : > { %7855 = vmatprep.mubr.bf16.mxu1 %v13192_v57  ;;  %8148 = vmatpush2.bf16.msra.mxu1 %v12201_v0  ;;  %v13200_v57 = vld [vmem:[%s14911_s19 + $0xa0] ss:$8 sps:$4 sm:$0xff]   ;;  %v12049_v5 = vcombine.low %v3449_v49, %v3453_v14 }
 0x21a   : > { %v15363_v51 = vpop.f32.mrf.mxu1  ;;  %v15368_v27 = vpack.c.bf16 %v2854_v48, %v2852_v44  ;;  %v2855_v63 = vmax.f32 %v2790_v10, 0.0  ;;  %8149 = vmatprep.subr.bf16.mxu1 %v12194_v26  ;;  %v3445_v44 = vld [vmem:[%s19967_s6 + $0x168] sm:$0xff]  ;;  %v20150_v10 = vcombine.low %v14954_v41, %v14959_v13 }
 0x21b   : > { %v15424_v54 = vld [vmem:[%s19967_s6 + $0x9e8] sm:$0xff]  ;;  %v12041_v49 = vcombine.low %v3441_v60, %v3445_v44 }
 0x21c   : > { %20148 = vst [vmem:[#allocation24_spill] sm:$0xff] %v15368_v27  ;;  %v15371_v46 = vpop.f32.mrf.mxu1  ;;  %v15374_v19 = vpack.c.bf16 %v2855_v63, %v2853_v62  ;;  %v15419_v62 = vld [vmem:[%s19967_s6 + $0x9c8] sm:$0xff]  ;;  %v12042_v63 = vcombine.high %v3441_v60, %v3445_v44 }
 0x21d   : > { %8150 = vmatpush2.bf16.msra.mxu1 %v12193_v58  ;;  %v3433_v41 = vld [vmem:[%s19967_s6 + $0x108] sm:$0xff] }
 0x21e   : > { %20149 = vst [vmem:[#allocation22_spill] sm:$0xff] %v15374_v19  ;;  %v15383_v47 = vpop.f32.mrf.mxu1  ;;  %7336 = vmatprep.mubr.bf16.mxu0 %v15374_v19  ;;  %v3437_v31 = vld [vmem:[%s19967_s6 + $0x128] sm:$0xff]  ;;  %v13161_v19 = vld [vmem:[%s14923_s16 + $0x30] ss:$8 sps:$4 sm:$0xff]  }
 0x21f   : > { %7337 = vmatmul.mubr.bf16.gmra.mxu0 %v15368_v27  ;;  %v13153_v58 = vld [vmem:[%s14923_s16 + $0x24] ss:$8 sps:$4 sm:$0xff]   ;;  %v12034_v14 = vcombine.high %v3433_v41, %v3437_v31  ;;  %v12033_v60 = vcombine.low %v3433_v41, %v3437_v31 }
 0x220   : > { %v15387_v52 = vpop.f32.mrf.mxu1  ;;  %7856 = vmatmul.mubr.bf16.gmra.mxu1 %v13194_v3  ;;  %7572 = vmatprep.mubr.bf16.mxu0 %v13143_v55  ;;  %v15439_v55 = vld [vmem:[%s19967_s6 + $0xdc8] sm:$0xff] }
 0x221   : > { %7865 = vmatprep.mubr.bf16.mxu1 %v13198_v34  ;;  %v15444_v3 = vld [vmem:[%s19967_s6 + $0xde8] sm:$0xff]  ;;  %v13149_v34 = vld [vmem:[%s14923_s16 + $0x10] ss:$8 sps:$4 sm:$0xff]  }
 0x222   : > { %v15389_v59 = vpop.f32.mrf.mxu1  ;;  %v12442_v26 = vcombine.high %v15439_v55, %v15444_v3  ;;  %v3413_v0 = vld [vmem:[%s19967_s6 + $0x68] sm:$0xff] }
 0x223   : > { %v3525_v42 = vld [vmem:[%s19967_s6 + $0x3e8] sm:$0xff] }
 0x224   : > { %v15398_v56 = vpop.f32.mrf.mxu1  ;;  %8505 = vmatprep.subr.bf16.mxu1 %v12442_v26 }
 0x226   : > { %v15402_v22 = vpop.f32.mrf.mxu1 }
 0x227   : > { %7573 = vmatmul.mubr.bf16.vlgmr.msra.gmra.mxu0 %v13141_v9 }
 0x228   : > { %v15411_v48 = vpop.f32.mrf.mxu1  ;;  %7866 = vmatmul.mubr.bf16.gmra.mxu1 %v13200_v57  ;;  %7927 = vmatpush1.bf16.msra.mxu0 %v20150_v10  ;;  %v13210_v57 = vld [vmem:[%s14911_s19 + $0xc4] ss:$8 sps:$4 sm:$0xff]  }
 0x229   : > { %7582 = vmatprep.mubr.bf16.mxu0 %v13147_v4  ;;  %7928 = vmatprep.subr.bf16.mxu0 %v12050_v43  ;;  %v3425_v4 = vld [vmem:[%s19967_s6 + $0xc8] sm:$0xff] }
 0x22a   : > { %v15429_v13 = vpop.f32.mrf.mxu1  ;;  %7875 = vmatprep.mubr.bf16.mxu1 %v13204_v37  ;;  %v3429_v43 = vld [vmem:[%s19967_s6 + $0xe8] sm:$0xff] }
 0x22b   : > { %20151 = vst [vmem:[#allocation23_spill] sm:$0xff] %v15429_v13  ;;  %v12026_v44 = vcombine.high %v3425_v4, %v3429_v43  ;;  %v12025_v41 = vcombine.low %v3425_v4, %v3429_v43 }
 0x22c   : > { %v15447_v61 = vpop.f32.mrf.mxu1  ;;  %7929 = vmatpush1.bf16.msra.mxu0 %v12049_v5  ;;  %v3417_v5 = vld [vmem:[%s19967_s6 + $0x88] sm:$0xff] }
 0x22d   : > { %20152 = vst [vmem:[#allocation25_spill] sm:$0xff] %v15447_v61  ;;  %7930 = vmatprep.subr.bf16.mxu0 %v12042_v63  ;;  %v3421_v63 = vld [vmem:[%s19967_s6 + $0xa8] sm:$0xff] }
 0x22e   : > { %v15453_v9 = vpop.f32.mrf.mxu1  ;;  %v12018_v31 = vcombine.high %v3417_v5, %v3421_v63  ;;  %v12017_v4 = vcombine.low %v3417_v5, %v3421_v63  ;;  %v13255_v61 = vld [vmem:[%s14532_s25 + $0xa0] ss:$8 sps:$4 sm:$0xff]  }
 0x22f   : > { %20153 = vst [vmem:[#allocation26_spill] sm:$0xff] %v15453_v9  ;;  %7583 = vmatmul.mubr.bf16.gmra.mxu0 %v13149_v34  ;;  %v13155_v34 = vld [vmem:[%s14923_s16 + $0x20] ss:$8 sps:$4 sm:$0xff]   ;;  %v13254_v9 = vld [vmem:[%s14532_s25 + $0xa4] ss:$8 sps:$4 sm:$0xff]  }
 0x230   : > { %v15462_v37 = vpop.f32.mrf.mxu1  ;;  %7876 = vmatmul.mubr.bf16.gmra.mxu1 %v13206_v11  ;;  %7592 = vmatprep.mubr.bf16.mxu0 %v13153_v58  ;;  %v13212_v11 = vld [vmem:[%s14911_s19 + $0xc0] ss:$8 sps:$4 sm:$0xff]   ;;  %v13159_v58 = vld [vmem:[%s14923_s16 + $0x34] ss:$8 sps:$4 sm:$0xff]  }
 0x231   : > { %20154 = vst [vmem:[#allocation29_spill] sm:$0xff] %v15462_v37  ;;  %7931 = vmatpush1.bf16.msra.mxu0 %v12041_v49  ;;  %7885 = vmatprep.mubr.bf16.mxu1 %v13210_v57  ;;  %v3409_v57 = vld [vmem:[%s19967_s6 + $0x48] sm:$0xff] }
 0x232   : > { %7932 = vmatprep.subr.bf16.mxu0 %v12034_v14  ;;  %v15464_v10 = vpop.f32.mrf.mxu1  ;;  %v13216_v14 = vld [vmem:[%s14911_s19 + $0xd4] ss:$8 sps:$4 sm:$0xff]   ;;  %v12010_v43 = vcombine.high %v3409_v57, %v3413_v0  ;;  %v12009_v5 = vcombine.low %v3409_v57, %v3413_v0 }
 0x233   : > { %20155 = vst [vmem:[#allocation27_spill] sm:$0xff] %v15464_v10  ;;  %v13247_v10 = vld [vmem:[%s14532_s25 + $0x60] ss:$8 sps:$4 sm:$0xff]  }
 0x234   : > { %v15473_v26 = vpop.f32.mrf.mxu1 }
 0x235   : > { %20156 = vst [vmem:[#allocation28_spill] sm:$0xff] %v15473_v26  ;;  %7933 = vmatpush1.bf16.msra.mxu0 %v12033_v60 }
 0x236   : > { %7934 = vmatprep.subr.bf16.mxu0 %v12026_v44  ;;  %v15477_v49 = vpop.f32.mrf.mxu1  ;;  %v3401_v44 = vld [vmem:[%s19967_s6 + $0x8] sm:$0xff] }
 0x237   : > { %20157 = vst [vmem:[#allocation30_spill] sm:$0xff] %v15477_v49  ;;  %7593 = vmatmul.mubr.bf16.gmra.mxu0 %v13155_v34  ;;  %v3405_v34 = vld [vmem:[%s19967_s6 + $0x28] sm:$0xff] }
 0x238   : > { %v15486_v27 = vpop.f32.mrf.mxu1  ;;  %7886 = vmatmul.mubr.bf16.gmra.mxu1 %v13212_v11  ;;  %7602 = vmatprep.mubr.bf16.mxu0 %v13159_v58  ;;  %v13218_v11 = vld [vmem:[%s14911_s19 + $0xd0] ss:$8 sps:$4 sm:$0xff]   ;;  %v13165_v58 = vld [vmem:[%s14923_s16 + $0x44] ss:$8 sps:$4 sm:$0xff]   ;;  %v12002_v63 = vcombine.high %v3401_v44, %v3405_v34  ;;  %v12001_v0 = vcombine.low %v3401_v44, %v3405_v34 }
 0x239   : > { %20158 = vst [vmem:[#allocation31_spill] sm:$0xff] %v15486_v27  ;;  %7935 = vmatpush1.bf16.msra.mxu0 %v12025_v41  ;;  %7895 = vmatprep.mubr.bf16.mxu1 %v13216_v14  ;;  %v3521_v14 = vld [vmem:[%s19967_s6 + $0x3c8] sm:$0xff]  ;;  %v13245_v27 = vld [vmem:[%s14532_s25 + $0x50] ss:$8 sps:$4 sm:$0xff]  }
 0x23a   : > { %7936 = vmatprep.subr.bf16.mxu0 %v12018_v31  ;;  %v15488_v60 = vpop.f32.mrf.mxu1  ;;  %v13222_v31 = vld [vmem:[%s14911_s19 + $0xe4] ss:$8 sps:$4 sm:$0xff]   ;;  %v12122_v57 = vcombine.high %v3521_v14, %v3525_v42  ;;  %v12121_v44 = vcombine.low %v3521_v14, %v3525_v42 }
 0x23b   : > { %20159 = vst [vmem:[#allocation34_spill] sm:$0xff] %v15488_v60 }
 0x23c   : > { %v15497_v30 = vpop.f32.mrf.mxu1 }
 0x23d   : > { %20160 = vst [vmem:[#allocation32_spill] sm:$0xff] %v15497_v30  ;;  %7937 = vmatpush1.bf16.msra.mxu0 %v12017_v4 }
 0x23e   : > { %7938 = vmatprep.subr.bf16.mxu0 %v12010_v43  ;;  %v15501_v41 = vpop.f32.mrf.mxu1  ;;  %v3513_v43 = vld [vmem:[%s19967_s6 + $0x388] sm:$0xff] }
 0x23f   : > { %20161 = vst [vmem:[#allocation33_spill] sm:$0xff] %v15501_v41  ;;  %7603 = vmatmul.mubr.bf16.gmra.mxu0 %v13161_v19  ;;  %v3517_v19 = vld [vmem:[%s19967_s6 + $0x3a8] sm:$0xff] }
 0x240   : > { %v15510_v25 = vpop.f32.mrf.mxu1  ;;  %7896 = vmatmul.mubr.bf16.gmra.mxu1 %v13218_v11  ;;  %7612 = vmatprep.mubr.bf16.mxu0 %v13165_v58  ;;  %v13167_v41 = vld [vmem:[%s14923_s16 + $0x40] ss:$8 sps:$4 sm:$0xff]   ;;  %v13171_v58 = vld [vmem:[%s14923_s16 + $0x54] ss:$8 sps:$4 sm:$0xff]   ;;  %v12114_v34 = vcombine.high %v3513_v43, %v3517_v19  ;;  %v12113_v42 = vcombine.low %v3513_v43, %v3517_v19 }
 0x241   : > { %20162 = vst [vmem:[#allocation35_spill] sm:$0xff] %v15510_v25  ;;  %7939 = vmatpush1.bf16.msra.mxu0 %v12009_v5  ;;  %7905 = vmatprep.mubr.bf16.mxu1 %v13222_v31  ;;  %v13224_v11 = vld [vmem:[%s14911_s19 + $0xe0] ss:$8 sps:$4 sm:$0xff]  }
 0x242   : > { %7940 = vmatprep.subr.bf16.mxu0 %v12002_v63  ;;  %v15512_v4 = vpop.f32.mrf.mxu1  ;;  %v13228_v63 = vld [vmem:[%s14911_s19 + $0xf4] ss:$8 sps:$4 sm:$0xff]   ;;  %v3505_v31 = vld [vmem:[%s19967_s6 + $0x348] sm:$0xff] }
 0x243   : > { %20163 = vst [vmem:[#allocation36_spill] sm:$0xff] %v15512_v4  ;;  %v3509_v4 = vld [vmem:[%s19967_s6 + $0x368] sm:$0xff] }
 0x244   : > { %v15521_v25 = vpop.f32.mrf.mxu1  ;;  %v12106_v14 = vcombine.high %v3505_v31, %v3509_v4  ;;  %v12105_v43 = vcombine.low %v3505_v31, %v3509_v4 }
 0x245   : > { %20164 = vst [vmem:[#allocation39_spill] sm:$0xff] %v15521_v25  ;;  %7941 = vmatpush1.bf16.msra.mxu0 %v12001_v0 }
 0x246   : > { %7942 = vmatprep.subr.bf16.mxu0 %v12122_v57  ;;  %v15525_v5 = vpop.f32.mrf.mxu1  ;;  %v3497_v57 = vld [vmem:[%s19967_s6 + $0x308] sm:$0xff] }
 0x247   : > { %20165 = vst [vmem:[#allocation37_spill] sm:$0xff] %v15525_v5  ;;  %7613 = vmatmul.mubr.bf16.gmra.mxu0 %v13167_v41  ;;  %v3501_v5 = vld [vmem:[%s19967_s6 + $0x328] sm:$0xff]  ;;  %v13173_v41 = vld [vmem:[%s14923_s16 + $0x50] ss:$8 sps:$4 sm:$0xff]  }
 0x248   : > { %v15534_v25 = vpop.f32.mrf.mxu1  ;;  %7906 = vmatmul.mubr.bf16.gmra.mxu1 %v13224_v11  ;;  %7622 = vmatprep.mubr.bf16.mxu0 %v13171_v58  ;;  %v13230_v11 = vld [vmem:[%s14911_s19 + $0xf0] ss:$8 sps:$4 sm:$0xff]   ;;  %v13177_v58 = vld [vmem:[%s14923_s16 + $0x64] ss:$8 sps:$4 sm:$0xff]   ;;  %v12098_v19 = vcombine.high %v3497_v57, %v3501_v5  ;;  %v12097_v4 = vcombine.low %v3497_v57, %v3501_v5 }
 0x249   : > { %20166 = vst [vmem:[#allocation38_spill] sm:$0xff] %v15534_v25  ;;  %7943 = vmatpush2.bf16.msra.mxu0 %v12121_v44  ;;  %7915 = vmatprep.mubr.bf16.mxu1 %v13228_v63  ;;  %v3493_v63 = vld [vmem:[%s19967_s6 + $0x2e8] sm:$0xff] }
 0x24a   : > { %7944 = vmatprep.subr.bf16.mxu0 %v12114_v34  ;;  %v15536_v0 = vpop.f32.mrf.mxu1  ;;  %v3489_v34 = vld [vmem:[%s19967_s6 + $0x2c8] sm:$0xff] }
 0x24b   : > { %20167 = vst [vmem:[#allocation40_spill] sm:$0xff] %v15536_v0  ;;  %v12090_v31 = vcombine.high %v3489_v34, %v3493_v63  ;;  %v3833_v5 = vld [vmem:[%s19967_s6 + $0xd88] sm:$0xff] }
 0x24c   : > { %v15545_v30 = vpop.f32.mrf.mxu1  ;;  %v3837_v57 = vld [vmem:[%s19967_s6 + $0xda8] sm:$0xff] }
 0x24d   : > { %20168 = vst [vmem:[#allocation41_spill] sm:$0xff] %v15545_v30  ;;  %7945 = vmatpush2.bf16.msra.mxu0 %v12113_v42  ;;  %v3477_v0 = vld [vmem:[%s19967_s6 + $0x268] sm:$0xff]  ;;  %v12434_v25 = vcombine.high %v3833_v5, %v3837_v57 }
 0x24e   : > { %7946 = vmatprep.subr.bf16.mxu0 %v12106_v14  ;;  %v15549_v44 = vpop.f32.mrf.mxu1  ;;  %v13234_v14 = vld [vmem:[%s14532_s25 + $0x4] ss:$8 sps:$4 sm:$0xff]  }
 0x24f   : > { %20169 = vst [vmem:[#allocation57_spill] sm:$0xff] %v15549_v44  ;;  %7623 = vmatmul.mubr.bf16.gmra.mxu0 %v13173_v41  ;;  %v3481_v44 = vld [vmem:[%s19967_s6 + $0x288] sm:$0xff] }
 0x250   : > { %v15557_v30 = vpop.f32.mrf.mxu1  ;;  %7916 = vmatmul.mubr.bf16.gmra.mxu1 %v13230_v11  ;;  %7632 = vmatprep.mubr.bf16.mxu0 %v13177_v58  ;;  %v3485_v41 = vld [vmem:[%s19967_s6 + $0x2a8] sm:$0xff]  ;;  %v13183_v58 = vld [vmem:[%s14923_s16 + $0x74] ss:$8 sps:$4 sm:$0xff]  }
 0x251   : > { %20170 = vst [vmem:[#allocation58_spill] sm:$0xff] %v15557_v30  ;;  %7947 = vmatpush2.bf16.msra.mxu0 %v12105_v43  ;;  %8151 = vmatprep.mubr.bf16.mxu1 %v13234_v14  ;;  %v13179_v30 = vld [vmem:[%s14923_s16 + $0x60] ss:$8 sps:$4 sm:$0xff]   ;;  %v12089_v43 = vcombine.low %v3489_v34, %v3493_v63 }
 0x252   : > { %7948 = vmatprep.subr.bf16.mxu0 %v12098_v19  ;;  %v15559_v42 = vpop.f32.mrf.mxu1  ;;  %v12082_v19 = vcombine.high %v3481_v44, %v3485_v41  ;;  %v13235_v34 = vld [vmem:[%s14532_s25] ss:$8 sps:$4 sm:$0xff]  }
 0x253   : > { %20171 = vst [vmem:[#allocation59_spill] sm:$0xff] %v15559_v42  ;;  %v12441_v42 = vcombine.low %v15439_v55, %v15444_v3  ;;  %v3825_v63 = vld [vmem:[%s19967_s6 + $0xd48] sm:$0xff]  ;;  %v12081_v3 = vcombine.low %v3481_v44, %v3485_v41  ;;  %v13185_v44 = vld [vmem:[%s14923_s16 + $0x70] ss:$8 sps:$4 sm:$0xff]  }
 0x254   : > { %v15569_v11 = vpop.f32.mrf.mxu1  ;;  %v3829_v55 = vld [vmem:[%s19967_s6 + $0xd68] sm:$0xff] }
 0x255   : > { %20172 = vst [vmem:[#allocation60_spill] sm:$0xff] %v15569_v11  ;;  %7949 = vmatpush2.bf16.msra.mxu0 %v12097_v4  ;;  %v3473_v11 = vld [vmem:[%s19967_s6 + $0x248] sm:$0xff] }
 0x256   : > { %7950 = vmatprep.subr.bf16.mxu0 %v12090_v31  ;;  %v15578_v14 = vpop.f32.mrf.mxu1 }
 0x257   : > { %20173 = vst [vmem:[#allocation61_spill] sm:$0xff] %v15578_v14  ;;  %7633 = vmatmul.mubr.bf16.gmra.mxu0 %v13179_v30  ;;  %v12074_v30 = vcombine.high %v3473_v11, %v3477_v0  ;;  %v3469_v14 = vld [vmem:[%s19967_s6 + $0x228] sm:$0xff] }
 0x258   : > { %v15588_v4 = vpop.f32.mrf.mxu1  ;;  %8152 = vmatmul.mubr.bf16.vlgmr.msra.gmra.mxu1 %v13235_v34  ;;  %7642 = vmatprep.mubr.bf16.mxu0 %v13183_v58  ;;  %v3465_v34 = vld [vmem:[%s19967_s6 + $0x208] sm:$0xff]  ;;  %v12426_v58 = vcombine.high %v3825_v63, %v3829_v55 }
 0x259   : > { %20174 = vst [vmem:[#allocation62_spill] sm:$0xff] %v15588_v4  ;;  %7951 = vmatpush2.bf16.msra.mxu0 %v12089_v43  ;;  %8506 = vmatpush1.bf16.msra.mxu1 %v12441_v42  ;;  %v12433_v4 = vcombine.low %v3833_v5, %v3837_v57  ;;  %v13189_v43 = vld [vmem:[%s14923_s16 + $0x84] ss:$8 sps:$4 sm:$0xff]   ;;  %v12073_v42 = vcombine.low %v3473_v11, %v3477_v0  ;;  %v13237_v0 = vld [vmem:[%s14532_s25 + $0x10] ss:$8 sps:$4 sm:$0xff]  }
 0x25a   : > { %7952 = vmatprep.subr.bf16.mxu0 %v12082_v19  ;;  %v15597_v31 = vpop.f32.mrf.mxu1  ;;  %8161 = vmatprep.mubr.bf16.mxu1 %v13236_v8  ;;  %v3817_v5 = vld [vmem:[%s19967_s6 + $0xd08] sm:$0xff]  ;;  %v12066_v19 = vcombine.high %v3465_v34, %v3469_v14  ;;  %v12425_v8 = vcombine.low %v3825_v63, %v3829_v55 }
 0x25b   : > { %20175 = vst [vmem:[#allocation63_spill] sm:$0xff] %v15597_v31  ;;  %8507 = vmatprep.subr.bf16.mxu1 %v12434_v25  ;;  %v3821_v57 = vld [vmem:[%s19967_s6 + $0xd28] sm:$0xff] }
 0x25c   : > { %v15607_v41 = vpop.f32.mrf.mxu1  ;;  %v12418_v11 = vcombine.high %v3817_v5, %v3821_v57  ;;  %v12417_v63 = vcombine.low %v3817_v5, %v3821_v57  ;;  %v3809_v55 = vld [vmem:[%s19967_s6 + $0xcc8] sm:$0xff] }
 0x25d   : > { %20176 = vst [vmem:[#allocation64_spill] sm:$0xff] %v15607_v41  ;;  %7953 = vmatpush2.bf16.msra.mxu0 %v12081_v3  ;;  %8508 = vmatpush1.bf16.msra.mxu1 %v12433_v4  ;;  %v12065_v3 = vcombine.low %v3465_v34, %v3469_v14  ;;  %v13238_v4 = vld [vmem:[%s14532_s25 + $0x24] ss:$8 sps:$4 sm:$0xff]   ;;  %v13191_v14 = vld [vmem:[%s14923_s16 + $0x80] ss:$8 sps:$4 sm:$0xff]  }
 0x25e   : > { %7954 = vmatprep.subr.bf16.mxu0 %v12074_v30  ;;  %v15616_v25 = vpop.f32.mrf.mxu1  ;;  %8509 = vmatprep.subr.bf16.mxu1 %v12426_v58  ;;  %v12314_v30 = vcombine.high %v15419_v62, %v15424_v54  ;;  %v3813_v58 = vld [vmem:[%s19967_s6 + $0xce8] sm:$0xff] }
 0x25f   : > { %20177 = vst [vmem:[#allocation65_spill] sm:$0xff] %v15616_v25  ;;  %7643 = vmatmul.mubr.bf16.gmra.mxu0 %v13185_v44  ;;  %v13195_v44 = vld [vmem:[%s14923_s16 + $0x94] ss:$8 sps:$4 sm:$0xff]   ;;  %v12410_v57 = vcombine.high %v3809_v55, %v3813_v58 }
 0x260   : > { %v15618_v41 = vpop.f32.mrf.mxu1  ;;  %8162 = vmatmul.mubr.bf16.gmra.mxu1 %v13237_v0  ;;  %7652 = vmatprep.mubr.bf16.mxu0 %v13189_v43  ;;  %v3801_v43 = vld [vmem:[%s19967_s6 + $0xc88] sm:$0xff] }
 0x261   : > { %20178 = vst [vmem:[#allocation66_spill] sm:$0xff] %v15618_v41  ;;  %7955 = vmatpush2.bf16.msra.mxu0 %v12073_v42  ;;  %8171 = vmatprep.mubr.bf16.mxu1 %v13238_v4  ;;  %v3805_v42 = vld [vmem:[%s19967_s6 + $0xca8] sm:$0xff]  ;;  %v13240_v4 = vld [vmem:[%s14532_s25 + $0x34] ss:$8 sps:$4 sm:$0xff]  }
 0x262   : > { %7956 = vmatprep.subr.bf16.mxu0 %v12066_v19  ;;  %v15623_v31 = vpop.f32.mrf.mxu1  ;;  %8510 = vmatpush1.bf16.msra.mxu1 %v12425_v8  ;;  %v12409_v19 = vcombine.low %v3809_v55, %v3813_v58  ;;  %v3793_v55 = vld [vmem:[%s19967_s6 + $0xc48] sm:$0xff] }
 0x263   : > { %20179 = vst [vmem:[#allocation67_spill] sm:$0xff] %v15623_v31  ;;  %8511 = vmatprep.subr.bf16.mxu1 %v12418_v11  ;;  %v13239_v11 = vld [vmem:[%s14532_s25 + $0x20] ss:$8 sps:$4 sm:$0xff]   ;;  %v13242_v41 = vld [vmem:[%s14532_s25 + $0x44] ss:$8 sps:$4 sm:$0xff]  }
 0x264   : > { %v15633_v34 = vpop.f32.mrf.mxu1  ;;  %v3797_v58 = vld [vmem:[%s19967_s6 + $0xc68] sm:$0xff] }
 0x265   : > { %20180 = vst [vmem:[#allocation68_spill] sm:$0xff] %v15633_v34  ;;  %7957 = vmatpush2.bf16.msra.mxu0 %v12065_v3  ;;  %v12402_v3 = vcombine.high %v3801_v43, %v3805_v42 }
 0x266   : > { %8312 = vmatprep.subr.bf16.mxu0 %v12314_v30  ;;  %v15642_v5 = vpop.f32.mrf.mxu1  ;;  %8512 = vmatpush1.bf16.msra.mxu1 %v12417_v63  ;;  %v12401_v63 = vcombine.low %v3801_v43, %v3805_v42  ;;  %v3785_v43 = vld [vmem:[%s19967_s6 + $0xc08] sm:$0xff] }
 0x267   : > { %20181 = vst [vmem:[#allocation69_spill] sm:$0xff] %v15642_v5  ;;  %v15644_v8 = vpop.f32.mrf.mxu0  ;;  %7653 = vmatmul.mubr.bf16.gmra.mxu0 %v13191_v14  ;;  %8513 = vmatprep.subr.bf16.mxu1 %v12410_v57  ;;  %v3789_v42 = vld [vmem:[%s19967_s6 + $0xc28] sm:$0xff] }
 0x268   : > { %v15646_v0 = vpop.f32.mrf.mxu1  ;;  %8172 = vmatmul.mubr.bf16.gmra.mxu1 %v13239_v11  ;;  %7662 = vmatprep.mubr.bf16.mxu0 %v13195_v44  ;;  %v13197_v44 = vld [vmem:[%s14923_s16 + $0x90] ss:$8 sps:$4 sm:$0xff]   ;;  %v12386_v31 = vcombine.high %v3785_v43, %v3789_v42 }
 0x269   : > { %20182 = vst [vmem:[#allocation70_spill] sm:$0xff] %v15646_v0  ;;  %8181 = vmatprep.mubr.bf16.mxu1 %v13240_v4  ;;  %v15650_v34 = vpop.f32.mrf.mxu0  ;;  %v13201_v4 = vld [vmem:[%s14923_s16 + $0xa4] ss:$8 sps:$4 sm:$0xff]   ;;  %v12393_v0 = vcombine.low %v3793_v55, %v3797_v58 }
 0x26a   : > { %v15652_v30 = vpop.f32.mrf.mxu1  ;;  %8514 = vmatpush1.bf16.msra.mxu1 %v12409_v19 }
 0x26b   : > { %20183 = vst [vmem:[#allocation71_spill] sm:$0xff] %v15652_v30  ;;  %v15660_v14 = vpop.f32.mrf.mxu0  ;;  %8515 = vmatprep.subr.bf16.mxu1 %v12402_v3  ;;  %v12394_v30 = vcombine.high %v3793_v55, %v3797_v58  ;;  %v3905_v55 = vld [vmem:[%s19967_s6 + $0xfc8] sm:$0xff] }
 0x26c   : > { %v15663_v11 = vpop.f32.mrf.mxu1  ;;  %v3909_v58 = vld [vmem:[%s19967_s6 + $0xfe8] sm:$0xff] }
 0x26d   : > { %20184 = vst [vmem:[#allocation72_spill] sm:$0xff] %v15663_v11  ;;  %v15672_v57 = vpop.f32.mrf.mxu0  ;;  %v13241_v11 = vld [vmem:[%s14532_s25 + $0x30] ss:$8 sps:$4 sm:$0xff]  }
 0x26e   : > { %v15674_v19 = vpop.f32.mrf.mxu1  ;;  %8516 = vmatpush1.bf16.msra.mxu1 %v12401_v63  ;;  %v12385_v63 = vcombine.low %v3785_v43, %v3789_v42  ;;  %v12506_v43 = vcombine.high %v3905_v55, %v3909_v58  ;;  %v12505_v42 = vcombine.low %v3905_v55, %v3909_v58  ;;  %v3901_v55 = vld [vmem:[%s19967_s6 + $0xfa8] sm:$0xff] }
 0x26f   : > { %20185 = vst [vmem:[#allocation73_spill] sm:$0xff] %v15674_v19  ;;  %v15676_v5 = vpop.f32.mrf.mxu0  ;;  %7663 = vmatmul.mubr.bf16.gmra.mxu0 %v13197_v44  ;;  %8517 = vmatprep.subr.bf16.mxu1 %v12394_v30  ;;  %v13243_v19 = vld [vmem:[%s14532_s25 + $0x40] ss:$8 sps:$4 sm:$0xff]  }
 0x270   : > { %v15678_v3 = vpop.f32.mrf.mxu1  ;;  %8182 = vmatmul.mubr.bf16.gmra.mxu1 %v13241_v11  ;;  %7672 = vmatprep.mubr.bf16.mxu0 %v13201_v4  ;;  %v13207_v4 = vld [vmem:[%s14923_s16 + $0xb4] ss:$8 sps:$4 sm:$0xff]  }
 0x271   : > { %20186 = vst [vmem:[#allocation74_spill] sm:$0xff] %v15678_v3  ;;  %8191 = vmatprep.mubr.bf16.mxu1 %v13242_v41  ;;  %v15682_v25 = vpop.f32.mrf.mxu0  ;;  %v13203_v41 = vld [vmem:[%s14923_s16 + $0xa0] ss:$8 sps:$4 sm:$0xff]  }
 0x272   : > { %v15684_v60 = vpop.f32.mrf.mxu1  ;;  %8518 = vmatpush1.bf16.msra.mxu1 %v12393_v0 }
 0x273   : > { %20187 = vst [vmem:[#allocation75_spill] sm:$0xff] %v15684_v60  ;;  %v15692_v44 = vpop.f32.mrf.mxu0  ;;  %8519 = vmatprep.subr.bf16.mxu1 %v12386_v31 }
 0x274   : > { %v15695_v11 = vpop.f32.mrf.mxu1 }
 0x275   : > { %20188 = vst [vmem:[#allocation76_spill] sm:$0xff] %v15695_v11  ;;  %v15698_v30 = vpop.f32.mrf.mxu0  ;;  %v13244_v11 = vld [vmem:[%s14532_s25 + $0x54] ss:$8 sps:$4 sm:$0xff]  }
 0x276   : > { %v15700_v0 = vpop.f32.mrf.mxu1  ;;  %8520 = vmatpush1.bf16.msra.mxu1 %v12385_v63  ;;  %v3897_v63 = vld [vmem:[%s19967_s6 + $0xf88] sm:$0xff] }
 0x277   : > { %20189 = vst [vmem:[#allocation77_spill] sm:$0xff] %v15700_v0  ;;  %v15702_v60 = vpop.f32.mrf.mxu0  ;;  %7673 = vmatmul.mubr.bf16.gmra.mxu0 %v13203_v41  ;;  %8521 = vmatprep.subr.bf16.mxu1 %v12506_v43 }
 0x278   : > { %v15704_v3 = vpop.f32.mrf.mxu1  ;;  %8192 = vmatmul.mubr.bf16.gmra.mxu1 %v13243_v19  ;;  %7682 = vmatprep.mubr.bf16.mxu0 %v13207_v4  ;;  %v13209_v19 = vld [vmem:[%s14923_s16 + $0xb0] ss:$8 sps:$4 sm:$0xff]   ;;  %v12498_v4 = vcombine.high %v3897_v63, %v3901_v55 }
 0x279   : > { %20190 = vst [vmem:[#allocation78_spill] sm:$0xff] %v15704_v3  ;;  %8201 = vmatprep.mubr.bf16.mxu1 %v13244_v11  ;;  %v15708_v31 = vpop.f32.mrf.mxu0  ;;  %v12497_v11 = vcombine.low %v3897_v63, %v3901_v55 }
 0x27a   : > { %v15710_v32 = vpop.f32.mrf.mxu1  ;;  %8522 = vmatpush2.bf16.msra.mxu1 %v12505_v42 }
 0x27b   : > { %20191 = vst [vmem:[#allocation79_spill] sm:$0xff] %v15710_v32  ;;  %v15718_v58 = vpop.f32.mrf.mxu0  ;;  %v13213_v32 = vld [vmem:[%s14923_s16 + $0xc4] ss:$8 sps:$4 sm:$0xff]   ;;  %8523 = vmatprep.subr.bf16.mxu1 %v12498_v4 }
 0x27c   : > { %v15721_v41 = vpop.f32.mrf.mxu1 }
 0x27d   : > { %20192 = vst [vmem:[#allocation80_spill] sm:$0xff] %v15721_v41  ;;  %v15724_v43 = vpop.f32.mrf.mxu0  ;;  %v13246_v41 = vld [vmem:[%s14532_s25 + $0x64] ss:$8 sps:$4 sm:$0xff]  }
 0x27e   : > { %v15726_v42 = vpop.f32.mrf.mxu1  ;;  %8524 = vmatpush2.bf16.msra.mxu1 %v12497_v11  ;;  %v3889_v11 = vld [vmem:[%s19967_s6 + $0xf48] sm:$0xff] }
 0x27f   : > { %20193 = vst [vmem:[#allocation81_spill] sm:$0xff] %v15726_v42  ;;  %v15728_v3 = vpop.f32.mrf.mxu0  ;;  %7683 = vmatmul.mubr.bf16.gmra.mxu0 %v13209_v19  ;;  %v3893_v19 = vld [vmem:[%s19967_s6 + $0xf68] sm:$0xff]  ;;  %v13219_v42 = vld [vmem:[%s14923_s16 + $0xd4] ss:$8 sps:$4 sm:$0xff]  }
 0x280   : > { %20194 = vst [vmem:[#allocation82_spill] sm:$0xff] %v15728_v3  ;;  %v15730_v0 = vpop.f32.mrf.mxu1  ;;  %8202 = vmatmul.mubr.bf16.gmra.mxu1 %v13245_v27  ;;  %7692 = vmatprep.mubr.bf16.mxu0 %v13213_v32  ;;  %v13215_v27 = vld [vmem:[%s14923_s16 + $0xc0] ss:$8 sps:$4 sm:$0xff]  }
 0x281   : > { %20195 = vst [vmem:[#allocation83_spill] sm:$0xff] %v15730_v0  ;;  %8211 = vmatprep.mubr.bf16.mxu1 %v13246_v41  ;;  %v15734_v63 = vpop.f32.mrf.mxu0  ;;  %v12489_v41 = vcombine.low %v3889_v11, %v3893_v19  ;;  %v12490_v0 = vcombine.high %v3889_v11, %v3893_v19 }
 0x282   : > { %20196 = vst [vmem:[#allocation84_spill] sm:$0xff] %v15734_v63  ;;  %v15736_v55 = vpop.f32.mrf.mxu1 }
 0x283   : > { %20197 = vst [vmem:[#allocation85_spill] sm:$0xff] %v15736_v55  ;;  %v15744_v4 = vpop.f32.mrf.mxu0  ;;  %8525 = vmatprep.subr.bf16.mxu1 %v12490_v0  ;;  %v3881_v0 = vld [vmem:[%s19967_s6 + $0xf08] sm:$0xff] }
 0x284   : > { %20198 = vst [vmem:[#allocation86_spill] sm:$0xff] %v15744_v4  ;;  %v15747_v32 = vpop.f32.mrf.mxu1  ;;  %8526 = vmatpush2.bf16.msra.mxu1 %v12489_v41  ;;  %v20223_v4 = vld [vmem:[#allocation43_spill] sm:$0xff] }
 0x285   : > { %20199 = vst [vmem:[#allocation87_spill] sm:$0xff] %v15747_v32  ;;  %v15750_v49 = vpop.f32.mrf.mxu0  ;;  %v13248_v32 = vld [vmem:[%s14532_s25 + $0x74] ss:$8 sps:$4 sm:$0xff]  }
 0x286   : > { %20200 = vst [vmem:[#allocation88_spill] sm:$0xff] %v15750_v49  ;;  %v15752_v55 = vpop.f32.mrf.mxu1  ;;  %v3857_v49 = vld [vmem:[%s19967_s6 + $0xe48] sm:$0xff] }
 0x287   : > { %20201 = vst [vmem:[#allocation89_spill] sm:$0xff] %v15752_v55  ;;  %v15754_v26 = vpop.f32.mrf.mxu0  ;;  %7693 = vmatmul.mubr.bf16.gmra.mxu0 %v13215_v27  ;;  %v3885_v27 = vld [vmem:[%s19967_s6 + $0xf28] sm:$0xff] }
 0x288   : > { %20202 = vst [vmem:[#allocation90_spill] sm:$0xff] %v15754_v26  ;;  %v15756_v35 = vpop.f32.mrf.mxu1  ;;  %8212 = vmatmul.mubr.bf16.gmra.mxu1 %v13247_v10  ;;  %7702 = vmatprep.mubr.bf16.mxu0 %v13219_v42  ;;  %v13221_v10 = vld [vmem:[%s14923_s16 + $0xd0] ss:$8 sps:$4 sm:$0xff]   ;;  %v13225_v55 = vld [vmem:[%s14923_s16 + $0xe4] ss:$8 sps:$4 sm:$0xff]  }
 0x289   : > { %20203 = vst [vmem:[#allocation91_spill] sm:$0xff] %v15756_v35  ;;  %8221 = vmatprep.mubr.bf16.mxu1 %v13248_v32  ;;  %v15760_v11 = vpop.f32.mrf.mxu0  ;;  %v12481_v32 = vcombine.low %v3881_v0, %v3885_v27  ;;  %v12482_v35 = vcombine.high %v3881_v0, %v3885_v27  ;;  %v3873_v0 = vld [vmem:[%s19967_s6 + $0xec8] sm:$0xff] }
 0x28a   : > { %20204 = vst [vmem:[#allocation92_spill] sm:$0xff] %v15760_v11  ;;  %v15762_v19 = vpop.f32.mrf.mxu1 }
 0x28b   : > { %20205 = vst [vmem:[#allocation93_spill] sm:$0xff] %v15762_v19  ;;  %v15770_v41 = vpop.f32.mrf.mxu0  ;;  %8527 = vmatprep.subr.bf16.mxu1 %v12482_v35  ;;  %v3877_v35 = vld [vmem:[%s19967_s6 + $0xee8] sm:$0xff] }
 0x28c   : > { %20206 = vst [vmem:[#allocation94_spill] sm:$0xff] %v15770_v41  ;;  %v15773_v42 = vpop.f32.mrf.mxu1  ;;  %8528 = vmatpush2.bf16.msra.mxu1 %v12481_v32  ;;  %v13249_v41 = vld [vmem:[%s14532_s25 + $0x70] ss:$8 sps:$4 sm:$0xff]  }
 0x28d   : > { %20207 = vst [vmem:[#allocation95_spill] sm:$0xff] %v15773_v42  ;;  %v15776_v11 = vpop.f32.mrf.mxu0  ;;  %v13250_v42 = vld [vmem:[%s14532_s25 + $0x84] ss:$8 sps:$4 sm:$0xff]  }
 0x28e   : > { %20208 = vst [vmem:[#allocation96_spill] sm:$0xff] %v15776_v11  ;;  %v15778_v19 = vpop.f32.mrf.mxu1 }
 0x28f   : > { %20209 = vst [vmem:[#allocation97_spill] sm:$0xff] %v15778_v19  ;;  %v15780_v26 = vpop.f32.mrf.mxu0  ;;  %7703 = vmatmul.mubr.bf16.gmra.mxu0 %v13221_v10  ;;  %v12474_v10 = vcombine.high %v3873_v0, %v3877_v35 }
 0x290   : > { %20210 = vst [vmem:[#allocation98_spill] sm:$0xff] %v15780_v26  ;;  %v15782_v39 = vpop.f32.mrf.mxu1  ;;  %8222 = vmatmul.mubr.bf16.gmra.mxu1 %v13249_v41  ;;  %7712 = vmatprep.mubr.bf16.mxu0 %v13225_v55  ;;  %v13227_v55 = vld [vmem:[%s14923_s16 + $0xe0] ss:$8 sps:$4 sm:$0xff]  }
 0x291   : > { %20211 = vst [vmem:[#allocation99_spill] sm:$0xff] %v15782_v39  ;;  %8231 = vmatprep.mubr.bf16.mxu1 %v13250_v42  ;;  %v15792_v27 = vpop.f32.mrf.mxu0  ;;  %v12473_v39 = vcombine.low %v3873_v0, %v3877_v35  ;;  %8529 = vmatprep.subr.bf16.mxu1 %v12474_v10  ;;  %v13231_v42 = vld [vmem:[%s14923_s16 + $0xf4] ss:$8 sps:$4 sm:$0xff]   ;;  %v3865_v26 = vld [vmem:[%s19967_s6 + $0xe88] sm:$0xff] }
 0x292   : > { %20212 = vst [vmem:[#allocation100_spill] sm:$0xff] %v15792_v27  ;;  %v15794_v32 = vpop.f32.mrf.mxu1 }
 0x293   : > { %20213 = vst [vmem:[#allocation101_spill] sm:$0xff] %v15794_v32  ;;  %v15796_v19 = vpop.f32.mrf.mxu0  ;;  %8530 = vmatpush2.bf16.msra.mxu1 %v12473_v39  ;;  %v3869_v32 = vld [vmem:[%s19967_s6 + $0xea8] sm:$0xff] }
 0x294   : > { %20214 = vst [vmem:[#allocation102_spill] sm:$0xff] %v15796_v19  ;;  %v15799_v41 = vpop.f32.mrf.mxu1  ;;  %v12466_v35 = vcombine.high %v3865_v26, %v3869_v32  ;;  %v12465_v19 = vcombine.low %v3865_v26, %v3869_v32  ;;  %v13251_v39 = vld [vmem:[%s14532_s25 + $0x80] ss:$8 sps:$4 sm:$0xff]  }
 0x295   : > { %20215 = vst [vmem:[#allocation103_spill] sm:$0xff] %v15799_v41  ;;  %v15808_v27 = vpop.f32.mrf.mxu0  ;;  %v13252_v41 = vld [vmem:[%s14532_s25 + $0x94] ss:$8 sps:$4 sm:$0xff]  }
 0x296   : > { %20216 = vst [vmem:[#allocation104_spill] sm:$0xff] %v15808_v27  ;;  %v15810_v0 = vpop.f32.mrf.mxu1  ;;  %8531 = vmatprep.subr.bf16.mxu1 %v12466_v35  ;;  %v3849_v27 = vld [vmem:[%s19967_s6 + $0xe08] sm:$0xff] }
 0x297   : > { %20217 = vst [vmem:[#allocation105_spill] sm:$0xff] %v15810_v0  ;;  %v15812_v11 = vpop.f32.mrf.mxu0  ;;  %7713 = vmatmul.mubr.bf16.gmra.mxu0 %v13227_v55  ;;  %v3861_v0 = vld [vmem:[%s19967_s6 + $0xe68] sm:$0xff]  ;;  %8532 = vmatpush2.bf16.msra.mxu1 %v12465_v19 }
 0x298   : > { %20218 = vst [vmem:[#allocation106_spill] sm:$0xff] %v15812_v11  ;;  %v15814_v10 = vpop.f32.mrf.mxu1  ;;  %8232 = vmatmul.mubr.bf16.gmra.mxu1 %v13251_v39  ;;  %7722 = vmatprep.mubr.bf16.mxu0 %v13231_v42  ;;  %v12458_v55 = vcombine.high %v3857_v49, %v3861_v0  ;;  %v12457_v39 = vcombine.low %v3857_v49, %v3861_v0  ;;  %v3853_v19 = vld [vmem:[%s19967_s6 + $0xe28] sm:$0xff] }
 0x299   : > { %8241 = vmatprep.mubr.bf16.mxu1 %v13252_v41  ;;  %v15824_v26 = vpop.f32.mrf.mxu0  ;;  %v13233_v41 = vld [vmem:[%s14923_s16 + $0xf0] ss:$8 sps:$4 sm:$0xff]   ;;  %v12449_v49 = vcombine.low %v3849_v27, %v3853_v19 }
 0x29a   : > { %20219 = vst [vmem:[#allocation107_spill] sm:$0xff] %v15824_v26  ;;  %v15826_v32 = vpop.f32.mrf.mxu1  ;;  %8533 = vmatprep.subr.bf16.mxu1 %v12458_v55  ;;  %v13253_v55 = vld [vmem:[%s14532_s25 + $0x90] ss:$8 sps:$4 sm:$0xff]  }
 0x29b   : > { %v15828_v42 = vpop.f32.mrf.mxu0  ;;  %8534 = vmatpush2.bf16.msra.mxu1 %v12457_v39  ;;  %v3705_v39 = vld [vmem:[%s19967_s6 + $0x988] sm:$0xff] }
 0x29c   : > { %20220 = vst [vmem:[#allocation108_spill] sm:$0xff] %v15828_v42  ;;  %v15831_v11 = vpop.f32.mrf.mxu1  ;;  %v12450_v42 = vcombine.high %v3849_v27, %v3853_v19 }
 0x29d   : > { %v15836_v37 = vpop.f32.mrf.mxu0 }
 0x29e   : > { %20221 = vst [vmem:[#allocation109_spill] sm:$0xff] %v15836_v37  ;;  %v15838_v26 = vpop.f32.mrf.mxu1  ;;  %8535 = vmatprep.subr.bf16.mxu1 %v12450_v42  ;;  %v3697_v42 = vld [vmem:[%s19967_s6 + $0x948] sm:$0xff] }
 0x29f   : > { %v15843_v0 = vpop.f32.mrf.mxu0  ;;  %7723 = vmatmul.mubr.bf16.gmra.mxu0 %v13233_v41  ;;  %v3709_v41 = vld [vmem:[%s19967_s6 + $0x9a8] sm:$0xff]  ;;  %8536 = vmatpush2.bf16.msra.mxu1 %v12449_v49  ;;  %v20229_v49 = vld [vmem:[#allocation42_spill] sm:$0xff] }
 0x2a0   : > { %20222 = vst [vmem:[#allocation110_spill] sm:$0xff] %v15843_v0  ;;  %v15845_v35 = vpop.f32.mrf.mxu1  ;;  %8242 = vmatmul.mubr.bf16.gmra.mxu1 %v13253_v55  ;;  %7958 = vmatprep.mubr.bf16.mxu0 %v20223_v4  ;;  %v12306_v55 = vcombine.high %v3705_v39, %v3709_v41  ;;  %v12305_v3 = vcombine.low %v3705_v39, %v3709_v41 }
 0x2a1   : > { %8251 = vmatprep.mubr.bf16.mxu1 %v13254_v9  ;;  %v15850_v37 = vpop.f32.mrf.mxu0 }
 0x2a2   : > { %20224 = vst [vmem:[#allocation111_spill] sm:$0xff] %v15850_v37  ;;  %v15852_v63 = vpop.f32.mrf.mxu1  ;;  %v3701_v37 = vld [vmem:[%s19967_s6 + $0x968] sm:$0xff] }
 0x2a3   : > { %v15860_v27 = vpop.f32.mrf.mxu0  ;;  %v12297_v39 = vcombine.low %v3697_v42, %v3701_v37 }
 0x2a4   : > { %20225 = vst [vmem:[#allocation112_spill] sm:$0xff] %v15860_v27  ;;  %v15862_v19 = vpop.f32.mrf.mxu1 }
 0x2a5   : > { %v15864_v9 = vpop.f32.mrf.mxu0 }
 0x2a6   : > { %20226 = vst [vmem:[#allocation113_spill] sm:$0xff] %v15864_v9  ;;  %v15866_v4 = vpop.f32.mrf.mxu1  ;;  %v20230_v9 = vcombine.low %v15419_v62, %v15424_v54 }
 0x2a7   : > { %20227 = vst [vmem:[#allocation114_spill] sm:$0xff] %v15866_v4  ;;  %v15874_v0 = vpop.f32.mrf.mxu0  ;;  %7959 = vmatmul.mubr.bf16.vlgmr.msra.gmra.mxu0 %v20229_v49  ;;  %v12298_v4 = vcombine.high %v3697_v42, %v3701_v37  ;;  %v3689_v49 = vld [vmem:[%s19967_s6 + $0x908] sm:$0xff]  ;;  %v15917_v37 = vld [vmem:[%s19967_s6 + $0x1f0] sm:$0xff] }
 0x2a8   : > { %20228 = vst [vmem:[#allocation115_spill] sm:$0xff] %v15874_v0  ;;  %v15877_v27 = vpop.f32.mrf.mxu1  ;;  %8252 = vmatmul.mubr.bf16.gmra.mxu1 %v13255_v61  ;;  %7968 = vmatprep.mubr.bf16.mxu0 %v14992_v15  ;;  %v13256_v0 = vld [vmem:[%s14532_s25 + $0xb4] ss:$8 sps:$4 sm:$0xff]   ;;  %v3693_v61 = vld [vmem:[%s19967_s6 + $0x928] sm:$0xff]  ;;  %v13257_v42 = vld [vmem:[%s14532_s25 + $0xb0] ss:$8 sps:$4 sm:$0xff]  }
 0x2a9   : > { %8313 = vmatpush1.bf16.msra.mxu0 %v20230_v9  ;;  %v15884_v2 = vpop.f32.mrf.mxu0  ;;  %8261 = vmatprep.mubr.bf16.mxu1 %v13256_v0  ;;  %v12290_v9 = vcombine.high %v3689_v49, %v3693_v61  ;;  %v3681_v0 = vld [vmem:[%s19967_s6 + $0x8c8] sm:$0xff] }
 0x2aa   : > { %20231 = vst [vmem:[#allocation116_spill] sm:$0xff] %v15884_v2  ;;  %8314 = vmatprep.subr.bf16.mxu0 %v12306_v55  ;;  %v15886_v13 = vpop.f32.mrf.mxu1  ;;  %v3685_v15 = vld [vmem:[%s19967_s6 + $0x8e8] sm:$0xff]  ;;  %v12289_v2 = vcombine.low %v3689_v49, %v3693_v61  ;;  %v15942_v49 = vld [vmem:[%s19967_s6 + $0x5d0] sm:$0xff] }
 0x2ab   : > { %20232 = vst [vmem:[#allocation117_spill] sm:$0xff] %v15886_v13  ;;  %v15895_v62 = vpop.f32.mrf.mxu0  ;;  %v15947_v61 = vld [vmem:[%s19967_s6 + $0x5f0] sm:$0xff]  ;;  %v3665_v13 = vld [vmem:[%s19967_s6 + $0x848] sm:$0xff] }
 0x2ac   : > { %20233 = vst [vmem:[#allocation118_spill] sm:$0xff] %v15895_v62  ;;  %v15897_v54 = vpop.f32.mrf.mxu1  ;;  %v15912_v62 = vld [vmem:[%s19967_s6 + $0x1d0] sm:$0xff] }
 0x2ad   : > { %20234 = vst [vmem:[#allocation119_spill] sm:$0xff] %v15897_v54  ;;  %8315 = vmatpush1.bf16.msra.mxu0 %v12305_v3  ;;  %v15899_v41 = vpop.f32.mrf.mxu0  ;;  %v12282_v54 = vcombine.high %v3681_v0, %v3685_v15 }
 0x2ae   : > { %20235 = vst [vmem:[#allocation120_spill] sm:$0xff] %v15899_v41  ;;  %8316 = vmatprep.subr.bf16.mxu0 %v12298_v4  ;;  %v15904_v55 = vpop.f32.mrf.mxu1  ;;  %v12281_v41 = vcombine.low %v3681_v0, %v3685_v15 }
 0x2af   : > { %20236 = vst [vmem:[#allocation121_spill] sm:$0xff] %v15904_v55  ;;  %v15919_v3 = vpop.f32.mrf.mxu0  ;;  %7969 = vmatmul.mubr.bf16.gmra.mxu0 %v14988_v40 }
 0x2b0   : > { %20237 = vst [vmem:[#allocation122_spill] sm:$0xff] %v15919_v3  ;;  %v15922_v4 = vpop.f32.mrf.mxu1  ;;  %8262 = vmatmul.mubr.bf16.gmra.mxu1 %v13257_v42  ;;  %7978 = vmatprep.mubr.bf16.mxu0 %v15018_v7  ;;  %v3673_v3 = vld [vmem:[%s19967_s6 + $0x888] sm:$0xff] }
 0x2b1   : > { %20238 = vst [vmem:[#allocation123_spill] sm:$0xff] %v15922_v4  ;;  %8317 = vmatpush1.bf16.msra.mxu0 %v12297_v39  ;;  %v15928_v55 = vpop.f32.mrf.mxu0  ;;  %v13258_v4 = vld [vmem:[%s14532_s25 + $0xc4] ss:$8 sps:$4 sm:$0xff]  }
 0x2b2   : > { %20239 = vst [vmem:[#allocation124_spill] sm:$0xff] %v15928_v55  ;;  %8318 = vmatprep.subr.bf16.mxu0 %v12290_v9  ;;  %v15933_v40 = vpop.f32.mrf.mxu1  ;;  %8271 = vmatprep.mubr.bf16.mxu1 %v13258_v4  ;;  %v3677_v42 = vld [vmem:[%s19967_s6 + $0x8a8] sm:$0xff]  ;;  %v12188_v4 = vcombine.high %v15942_v49, %v15947_v61 }
 0x2b3   : > { %20240 = vst [vmem:[#allocation125_spill] sm:$0xff] %v15933_v40  ;;  %v15949_v39 = vpop.f32.mrf.mxu0  ;;  %v12274_v55 = vcombine.high %v3673_v3, %v3677_v42 }
 0x2b4   : > { %20241 = vst [vmem:[#allocation126_spill] sm:$0xff] %v15949_v39  ;;  %v15951_v9 = vpop.f32.mrf.mxu1  ;;  %8891 = vmatprep.subr.bf16.mxu1 %v12188_v4  ;;  %v3669_v39 = vld [vmem:[%s19967_s6 + $0x868] sm:$0xff] }
 0x2b5   : > { %20242 = vst [vmem:[#allocation127_spill] sm:$0xff] %v15951_v9  ;;  %8319 = vmatpush1.bf16.msra.mxu0 %v12289_v2  ;;  %v15955_v7 = vpop.f32.mrf.mxu0  ;;  %v13259_v2 = vld [vmem:[%s14532_s25 + $0xc0] ss:$8 sps:$4 sm:$0xff]   ;;  %v12266_v4 = vcombine.high %v3665_v13, %v3669_v39 }
 0x2b6   : > { %20243 = vst [vmem:[#allocation128_spill] sm:$0xff] %v15955_v7  ;;  %8320 = vmatprep.subr.bf16.mxu0 %v12282_v54  ;;  %v15957_v40 = vpop.f32.mrf.mxu1  ;;  %v12273_v54 = vcombine.low %v3673_v3, %v3677_v42 }
 0x2b7   : > { %20244 = vst [vmem:[#allocation129_spill] sm:$0xff] %v15957_v40  ;;  %v15965_v9 = vpop.f32.mrf.mxu0  ;;  %7979 = vmatmul.mubr.bf16.gmra.mxu0 %v15014_v36  ;;  %v13260_v40 = vld [vmem:[%s14532_s25 + $0xd4] ss:$8 sps:$4 sm:$0xff]   ;;  %v3657_v36 = vld [vmem:[%s19967_s6 + $0x808] sm:$0xff] }
 0x2b8   : > { %20245 = vst [vmem:[#allocation130_spill] sm:$0xff] %v15965_v9  ;;  %v15968_v15 = vpop.f32.mrf.mxu1  ;;  %8272 = vmatmul.mubr.bf16.gmra.mxu1 %v13259_v2  ;;  %7988 = vmatprep.mubr.bf16.mxu0 %v15045_v38  ;;  %v3661_v2 = vld [vmem:[%s19967_s6 + $0x828] sm:$0xff] }
 0x2b9   : > { %8321 = vmatpush1.bf16.msra.mxu0 %v12281_v41  ;;  %v15972_v0 = vpop.f32.mrf.mxu0  ;;  %8281 = vmatprep.mubr.bf16.mxu1 %v13260_v40  ;;  %v12258_v42 = vcombine.high %v3657_v36, %v3661_v2  ;;  %v3781_v9 = vld [vmem:[%s19967_s6 + $0xbe8] sm:$0xff] }
 0x2ba   : > { %20246 = vst [vmem:[#allocation131_spill] sm:$0xff] %v15972_v0  ;;  %8322 = vmatprep.subr.bf16.mxu0 %v12274_v55  ;;  %v15974_v7 = vpop.f32.mrf.mxu1  ;;  %v12265_v55 = vcombine.low %v3665_v13, %v3669_v39  ;;  %v3777_v0 = vld [vmem:[%s19967_s6 + $0xbc8] sm:$0xff]  ;;  %v13261_v39 = vld [vmem:[%s14532_s25 + $0xd0] ss:$8 sps:$4 sm:$0xff]  }
 0x2bb   : > { %v15983_v38 = vpop.f32.mrf.mxu0 }
 0x2bc   : > { %20247 = vst [vmem:[#allocation132_spill] sm:$0xff] %v15983_v38  ;;  %v15985_v41 = vpop.f32.mrf.mxu1 }
 0x2bd   : > { %20248 = vst [vmem:[#allocation133_spill] sm:$0xff] %v15985_v41  ;;  %8323 = vmatpush1.bf16.msra.mxu0 %v12273_v54  ;;  %v15987_v3 = vpop.f32.mrf.mxu0  ;;  %v12257_v54 = vcombine.low %v3657_v36, %v3661_v2  ;;  %v13262_v41 = vld [vmem:[%s14532_s25 + $0xe4] ss:$8 sps:$4 sm:$0xff]   ;;  %v12377_v2 = vcombine.low %v3777_v0, %v3781_v9 }
 0x2be   : > { %20249 = vst [vmem:[#allocation134_spill] sm:$0xff] %v15987_v3  ;;  %8324 = vmatprep.subr.bf16.mxu0 %v12266_v4  ;;  %v15989_v40 = vpop.f32.mrf.mxu1  ;;  %v12378_v3 = vcombine.high %v3777_v0, %v3781_v9  ;;  %v13263_v0 = vld [vmem:[%s14532_s25 + $0xe0] ss:$8 sps:$4 sm:$0xff]  }
 0x2bf   : > { %20250 = vst [vmem:[#allocation135_spill] sm:$0xff] %v15989_v40  ;;  %v15997_v38 = vpop.f32.mrf.mxu0  ;;  %7989 = vmatmul.mubr.bf16.gmra.mxu0 %v15040_v53  ;;  %v3769_v53 = vld [vmem:[%s19967_s6 + $0xb88] sm:$0xff] }
 0x2c0   : > { %20251 = vst [vmem:[#allocation136_spill] sm:$0xff] %v15997_v38  ;;  %v16000_v13 = vpop.f32.mrf.mxu1  ;;  %8282 = vmatmul.mubr.bf16.gmra.mxu1 %v13261_v39  ;;  %7998 = vmatprep.mubr.bf16.mxu0 %v15070_v24  ;;  %v3773_v39 = vld [vmem:[%s19967_s6 + $0xba8] sm:$0xff] }
 0x2c1   : > { %8325 = vmatpush1.bf16.msra.mxu0 %v12265_v55  ;;  %v16004_v4 = vpop.f32.mrf.mxu0  ;;  %8291 = vmatprep.mubr.bf16.mxu1 %v13262_v41  ;;  %v3765_v38 = vld [vmem:[%s19967_s6 + $0xb68] sm:$0xff] }
 0x2c2   : > { %20252 = vst [vmem:[#allocation137_spill] sm:$0xff] %v16004_v4  ;;  %8326 = vmatprep.subr.bf16.mxu0 %v12258_v42  ;;  %v16006_v40 = vpop.f32.mrf.mxu1  ;;  %v12370_v42 = vcombine.high %v3769_v53, %v3773_v39  ;;  %v3761_v4 = vld [vmem:[%s19967_s6 + $0xb48] sm:$0xff] }
 0x2c3   : > { %v16015_v24 = vpop.f32.mrf.mxu0 }
 0x2c4   : > { %20253 = vst [vmem:[#allocation138_spill] sm:$0xff] %v16015_v24  ;;  %v16017_v36 = vpop.f32.mrf.mxu1 }
 0x2c5   : > { %20254 = vst [vmem:[#allocation139_spill] sm:$0xff] %v16017_v36  ;;  %8327 = vmatpush1.bf16.msra.mxu0 %v12257_v54  ;;  %v16019_v55 = vpop.f32.mrf.mxu0  ;;  %v13264_v36 = vld [vmem:[%s14532_s25 + $0xf4] ss:$8 sps:$4 sm:$0xff]  }
 0x2c6   : > { %20255 = vst [vmem:[#allocation140_spill] sm:$0xff] %v16019_v55  ;;  %8328 = vmatprep.subr.bf16.mxu0 %v12378_v3  ;;  %v16021_v41 = vpop.f32.mrf.mxu1  ;;  %v12369_v3 = vcombine.low %v3769_v53, %v3773_v39  ;;  %v12362_v55 = vcombine.high %v3761_v4, %v3765_v38  ;;  %v12361_v39 = vcombine.low %v3761_v4, %v3765_v38  ;;  %v13265_v4 = vld [vmem:[%s14532_s25 + $0xf0] ss:$8 sps:$4 sm:$0xff]  }
 0x2c7   : > { %20256 = vst [vmem:[#allocation141_spill] sm:$0xff] %v16021_v41  ;;  %v16029_v24 = vpop.f32.mrf.mxu0  ;;  %7999 = vmatmul.mubr.bf16.gmra.mxu0 %v15059_v6  ;;  %v3753_v6 = vld [vmem:[%s19967_s6 + $0xb08] sm:$0xff] }
 0x2c8   : > { %20257 = vst [vmem:[#allocation142_spill] sm:$0xff] %v16029_v24  ;;  %v16032_v9 = vpop.f32.mrf.mxu1  ;;  %8292 = vmatmul.mubr.bf16.gmra.mxu1 %v13263_v0  ;;  %8008 = vmatprep.mubr.bf16.mxu0 %v15096_v1  ;;  %v3757_v0 = vld [vmem:[%s19967_s6 + $0xb28] sm:$0xff] }
 0x2c9   : > { %8329 = vmatpush2.bf16.msra.mxu0 %v12377_v2  ;;  %v16036_v54 = vpop.f32.mrf.mxu0  ;;  %8301 = vmatprep.mubr.bf16.mxu1 %v13264_v36  ;;  %v3749_v24 = vld [vmem:[%s19967_s6 + $0xae8] sm:$0xff] }
 0x2ca   : > { %20258 = vst [vmem:[#allocation143_spill] sm:$0xff] %v16036_v54  ;;  %8330 = vmatprep.subr.bf16.mxu0 %v12370_v42  ;;  %v16038_v41 = vpop.f32.mrf.mxu1  ;;  %v12354_v42 = vcombine.high %v3753_v6, %v3757_v0  ;;  %v3745_v54 = vld [vmem:[%s19967_s6 + $0xac8] sm:$0xff] }
 0x2cb   : > { %20259 = vst [vmem:[#allocation144_spill] sm:$0xff] %v16038_v41  ;;  %v16047_v1 = vpop.f32.mrf.mxu0  ;;  %v13268_v41 = vld [vmem:[%s14911_s19 + $0x14] ss:$8 sps:$4 sm:$0xff]  }
 0x2cc   : > { %20260 = vst [vmem:[#allocation145_spill] sm:$0xff] %v16047_v1  ;;  %v16049_v53 = vpop.f32.mrf.mxu1 }
 0x2cd   : > { %20261 = vst [vmem:[#allocation146_spill] sm:$0xff] %v16049_v53  ;;  %8331 = vmatpush2.bf16.msra.mxu0 %v12369_v3  ;;  %v16051_v2 = vpop.f32.mrf.mxu0  ;;  %v13266_v53 = vld [vmem:[%s14911_s19 + $0x4] ss:$8 sps:$4 sm:$0xff]  }
 0x2ce   : > { %20262 = vst [vmem:[#allocation147_spill] sm:$0xff] %v16051_v2  ;;  %8332 = vmatprep.subr.bf16.mxu0 %v12362_v55  ;;  %v16053_v36 = vpop.f32.mrf.mxu1  ;;  %v12353_v55 = vcombine.low %v3753_v6, %v3757_v0  ;;  %v12346_v2 = vcombine.high %v3745_v54, %v3749_v24  ;;  %v3578_v6 = vld [vmem:[%s19967_s6 + $0x590] sm:$0xff] }
 0x2cf   : > { %20263 = vst [vmem:[#allocation148_spill] sm:$0xff] %v16053_v36  ;;  %v16061_v1 = vpop.f32.mrf.mxu0  ;;  %8009 = vmatmul.mubr.bf16.gmra.mxu0 %v15085_v16  ;;  %v3737_v16 = vld [vmem:[%s19967_s6 + $0xa88] sm:$0xff]  ;;  %v3582_v0 = vld [vmem:[%s19967_s6 + $0x5b0] sm:$0xff] }
 0x2d0   : > { %20264 = vst [vmem:[#allocation149_spill] sm:$0xff] %v16061_v1  ;;  %v16064_v38 = vpop.f32.mrf.mxu1  ;;  %8302 = vmatmul.mubr.bf16.gmra.mxu1 %v13265_v4  ;;  %8018 = vmatprep.mubr.bf16.mxu0 %v15132_v18  ;;  %v3741_v4 = vld [vmem:[%s19967_s6 + $0xaa8] sm:$0xff] }
 0x2d1   : > { %20265 = vst [vmem:[#allocation150_spill] sm:$0xff] %v16064_v38  ;;  %8333 = vmatpush2.bf16.msra.mxu0 %v12361_v39  ;;  %v16068_v3 = vpop.f32.mrf.mxu0  ;;  %8537 = vmatprep.mubr.bf16.mxu1 %v13266_v53  ;;  %v12345_v53 = vcombine.low %v3745_v54, %v3749_v24  ;;  %v3725_v38 = vld [vmem:[%s19967_s6 + $0xa28] sm:$0xff] }
 0x2d2   : > { %20266 = vst [vmem:[#allocation151_spill] sm:$0xff] %v16068_v3  ;;  %8334 = vmatprep.subr.bf16.mxu0 %v12354_v42  ;;  %v16070_v36 = vpop.f32.mrf.mxu1  ;;  %v12338_v3 = vcombine.high %v3737_v16, %v3741_v4 }
 0x2d3   : > { %20267 = vst [vmem:[#allocation152_spill] sm:$0xff] %v16070_v36  ;;  %v16079_v18 = vpop.f32.mrf.mxu0  ;;  %v3733_v36 = vld [vmem:[%s19967_s6 + $0xa68] sm:$0xff] }
 0x2d4   : > { %20268 = vst [vmem:[#allocation153_spill] sm:$0xff] %v16079_v18  ;;  %v16081_v39 = vpop.f32.mrf.mxu1  ;;  %v12187_v18 = vcombine.low %v15942_v49, %v15947_v61  ;;  %v3570_v49 = vld [vmem:[%s19967_s6 + $0x550] sm:$0xff] }
 0x2d5   : > { %20269 = vst [vmem:[#allocation154_spill] sm:$0xff] %v16081_v39  ;;  %8335 = vmatpush2.bf16.msra.mxu0 %v12353_v55  ;;  %v16090_v42 = vpop.f32.mrf.mxu0  ;;  %v3729_v39 = vld [vmem:[%s19967_s6 + $0xa48] sm:$0xff]  ;;  %v12180_v55 = vcombine.high %v3578_v6, %v3582_v0  ;;  %v3574_v61 = vld [vmem:[%s19967_s6 + $0x570] sm:$0xff] }
 0x2d6   : > { %20270 = vst [vmem:[#allocation155_spill] sm:$0xff] %v16090_v42  ;;  %8336 = vmatprep.subr.bf16.mxu0 %v12346_v2  ;;  %v16092_v1 = vpop.f32.mrf.mxu1  ;;  %v13267_v2 = vld [vmem:[%s14911_s19] ss:$8 sps:$4 sm:$0xff]  }
 0x2d7   : > { %20271 = vst [vmem:[#allocation156_spill] sm:$0xff] %v16092_v1  ;;  %v16102_v24 = vpop.f32.mrf.mxu0  ;;  %8019 = vmatmul.mubr.bf16.gmra.mxu0 %v15111_v33  ;;  %v12337_v33 = vcombine.low %v3737_v16, %v3741_v4  ;;  %v3721_v1 = vld [vmem:[%s19967_s6 + $0xa08] sm:$0xff]  ;;  %v12172_v16 = vcombine.high %v3570_v49, %v3574_v61  ;;  %v3912_v4 = vld [vmem:[%s16117_s11] sm:$0xff] }
 0x2d8   : > { %20272 = vst [vmem:[#allocation157_spill] sm:$0xff] %v16102_v24  ;;  %v16105_v54 = vpop.f32.mrf.mxu1  ;;  %8538 = vmatmul.mubr.bf16.vlgmr.msra.gmra.mxu1 %v13267_v2  ;;  %8028 = vmatprep.mubr.bf16.mxu0 %v15190_v45  ;;  %v12330_v2 = vcombine.high %v3729_v39, %v3733_v36 }
 0x2d9   : > { %20273 = vst [vmem:[#allocation158_spill] sm:$0xff] %v16105_v54  ;;  %8337 = vmatpush2.bf16.msra.mxu0 %v12345_v53  ;;  %v16120_v24 = vpop.f32.mrf.mxu0  ;;  %8892 = vmatpush1.bf16.msra.mxu1 %v12187_v18  ;;  %v12179_v54 = vcombine.low %v3578_v6, %v3582_v0  ;;  %v12329_v18 = vcombine.low %v3729_v39, %v3733_v36  ;;  %v3562_v6 = vld [vmem:[%s19967_s6 + $0x510] sm:$0xff] }
 0x2da   : > { %20274 = vst [vmem:[#allocation159_spill] sm:$0xff] %v16120_v24  ;;  %8338 = vmatprep.subr.bf16.mxu0 %v12338_v3  ;;  %v16122_v42 = vpop.f32.mrf.mxu1  ;;  %8547 = vmatprep.mubr.bf16.mxu1 %v13268_v41  ;;  %v3566_v0 = vld [vmem:[%s19967_s6 + $0x530] sm:$0xff]  ;;  %v12322_v41 = vcombine.high %v3721_v1, %v3725_v38 }
 0x2db   : > { %20275 = vst [vmem:[#allocation160_spill] sm:$0xff] %v16122_v42  ;;  %8893 = vmatprep.subr.bf16.mxu1 %v12180_v55  ;;  %v16132_v53 = vpop.f32.mrf.mxu0  ;;  %v13269_v42 = vld [vmem:[%s14911_s19 + $0x10] ss:$8 sps:$4 sm:$0xff]  }
 0x2dc   : > { %20276 = vst [vmem:[#allocation161_spill] sm:$0xff] %v16132_v53  ;;  %v16134_v3 = vpop.f32.mrf.mxu1  ;;  %v20280_v53 = vld [vmem:[#allocation6_spill] sm:$0xff] }
 0x2dd   : > { %20277 = vst [vmem:[#allocation162_spill] sm:$0xff] %v16134_v3  ;;  %8339 = vmatpush2.bf16.msra.mxu0 %v12337_v33  ;;  %v16142_v45 = vpop.f32.mrf.mxu0  ;;  %8894 = vmatpush1.bf16.msra.mxu1 %v12179_v54  ;;  %v20281_v24 = vsub.s32 0, %v20280_v53  ;;  %v12171_v33 = vcombine.low %v3570_v49, %v3574_v61  ;;  %v12060_v49 = vcombine.high %v15912_v62, %v15917_v37 }
 0x2de   : > { %20278 = vst [vmem:[#allocation163_spill] sm:$0xff] %v16142_v45  ;;  %8340 = vmatprep.subr.bf16.mxu0 %v12330_v2  ;;  %v16144_v55 = vpop.f32.mrf.mxu1  ;;  %8895 = vmatprep.subr.bf16.mxu1 %v12172_v16  ;;  %v12164_v2 = vcombine.high %v3562_v6, %v3566_v0  ;;  %v20282_v45 = vsub.s32 1, %v20280_v53  ;;  %v13270_v16 = vld [vmem:[%s14911_s19 + $0x24] ss:$8 sps:$4 sm:$0xff]   ;;  %v13271_v53 = vld [vmem:[%s14911_s19 + $0x20] ss:$8 sps:$4 sm:$0xff]  }
 0x2df   : > { %20279 = vst [vmem:[#allocation164_spill] sm:$0xff] %v16144_v55  ;;  %v16148_v3 = vrot.slane %v3912_v4, %v20281_v24  ;;  %v16150_v36 = vpop.f32.mrf.mxu0  ;;  %8029 = vmatmul.mubr.bf16.gmra.mxu0 %v15171_v17  ;;  %v12321_v24 = vcombine.low %v3721_v1, %v3725_v38  ;;  %v3558_v1 = vld [vmem:[%s19967_s6 + $0x4f0] sm:$0xff] }
 0x2e0   : > { %v16153_v39 = vpop.f32.mrf.mxu1  ;;  %8548 = vmatmul.mubr.bf16.gmra.mxu1 %v13269_v42  ;;  %v16158_v55 = vrot.slane %v3912_v4, %v20282_v45  ;;  %8038 = vmatprep.mubr.bf16.mxu0 %v15220_v12  ;;  %v12163_v45 = vcombine.low %v3562_v6, %v3566_v0  ;;  %v3554_v4 = vld [vmem:[%s19967_s6 + $0x4d0] sm:$0xff] }
 0x2e1   : > { %8341 = vmatpush2.bf16.msra.mxu0 %v12329_v18  ;;  %v16161_v54 = vpop.f32.mrf.mxu0  ;;  %8557 = vmatprep.mubr.bf16.mxu1 %v13270_v16  ;;  %v7189_v42 = vadd.f32 %v15644_v8, %v16148_v3  ;;  %v3546_v8 = vld [vmem:[%s19967_s6 + $0x490] sm:$0xff]  ;;  %v7193_v16 = vadd.f32 %v15660_v14, %v16148_v3 }
 0x2e2   : > { %8342 = vmatprep.subr.bf16.mxu0 %v12322_v41  ;;  %v16165_v61 = vpop.f32.mrf.mxu1  ;;  %8896 = vmatpush1.bf16.msra.mxu1 %v12171_v33  ;;  %v7191_v41 = vadd.f32 %v15650_v34, %v16158_v55  ;;  %v3550_v6 = vld [vmem:[%s19967_s6 + $0x4b0] sm:$0xff] }
 0x2e3   : > { %v16176_v38 = vpop.f32.mrf.mxu0  ;;  %8897 = vmatprep.subr.bf16.mxu1 %v12164_v2  ;;  %v12156_v2 = vcombine.high %v3554_v4, %v3558_v1  ;;  %v7382_v34 = vadd.f32 %v15358_v50, %v7189_v42  ;;  %v13272_v50 = vld [vmem:[%s14911_s19 + $0x34] ss:$8 sps:$4 sm:$0xff]   ;;  %v7199_v42 = vadd.f32 %v15676_v5, %v16148_v3 }
 0x2e4   : > { %20283 = vst [vmem:[#allocation165_spill] sm:$0xff] %v16176_v38  ;;  %v16178_v18 = vpop.f32.mrf.mxu1  ;;  %v7384_v14 = vadd.f32 %v15363_v51, %v7191_v41  ;;  %v3538_v51 = vld [vmem:[%s19967_s6 + $0x450] sm:$0xff]  ;;  %v7201_v41 = vadd.f32 %v15682_v25, %v16158_v55 }
 0x2e5   : > { %8343 = vmatpush2.bf16.msra.mxu0 %v12321_v24  ;;  %v16188_v0 = vpop.f32.mrf.mxu0  ;;  %v12155_v24 = vcombine.low %v3554_v4, %v3558_v1  ;;  %v3542_v5 = vld [vmem:[%s19967_s6 + $0x470] sm:$0xff] }
 0x2e6   : > { %20284 = vst [vmem:[#allocation166_spill] sm:$0xff] %v16188_v0  ;;  %8698 = vmatprep.subr.bf16.mxu0 %v12060_v49  ;;  %v16190_v33 = vpop.f32.mrf.mxu1  ;;  %8898 = vmatpush1.bf16.msra.mxu1 %v12163_v45  ;;  %v12148_v49 = vcombine.high %v3546_v8, %v3550_v6  ;;  %v7195_v0 = vadd.f32 %v15672_v57, %v16158_v55  ;;  %v3534_v25 = vld [vmem:[%s19967_s6 + $0x430] sm:$0xff] }
 0x2e7   : > { %v7574_v12 = vpop.f32.mrf.mxu0  ;;  %8039 = vmatmul.mubr.bf16.gmra.mxu0 %v15209_v28  ;;  %8899 = vmatprep.subr.bf16.mxu1 %v12156_v2  ;;  %v12147_v57 = vcombine.low %v3546_v8, %v3550_v6  ;;  %v16230_v8 = vld [vmem:[%s19967_s6 + $0x410] sm:$0xff]  ;;  %v7203_v6 = vadd.f32 %v15692_v44, %v16148_v3  ;;  %v7394_v44 = vadd.f32 %v15389_v59, %v7201_v41 }
 0x2e8   : > { %v16196_v17 = vpop.f32.mrf.mxu1  ;;  %8558 = vmatmul.mubr.bf16.gmra.mxu1 %v13271_v53  ;;  %v7575_v38 = vadd.f32 %v7574_v12, %v7382_v34  ;;  %8048 = vmatprep.mubr.bf16.mxu0 %v15246_v20  ;;  %v7386_v12 = vadd.f32 %v15371_v46, %v7193_v16 }
 0x2e9   : > { %8567 = vmatprep.mubr.bf16.mxu1 %v13272_v50  ;;  %v7576_v45 = vpop.f32.mrf.mxu0  ;;  %v7396_v59 = vadd.f32 %v15398_v56, %v7203_v6  ;;  %v3654_v56 = vld [vmem:[%s19967_s6 + $0x7f0] sm:$0xff] }
 0x2ea   : > { %v16207_v4 = vpop.f32.mrf.mxu1  ;;  %v7768_v53 = vadd.f32 %v15814_v10, %v7575_v38  ;;  %v7577_v1 = vadd.f32 %v7576_v45, %v7384_v14  ;;  %8900 = vmatpush1.bf16.msra.mxu1 %v12155_v24  ;;  %v7388_v38 = vadd.f32 %v15383_v47, %v7195_v0  ;;  %v7392_v24 = vadd.f32 %v15387_v52, %v7199_v42  ;;  %v13273_v42 = vld [vmem:[%s14911_s19 + $0x30] ss:$8 sps:$4 sm:$0xff]  }
 0x2eb   : > { %v7578_v34 = vpop.f32.mrf.mxu0  ;;  %8901 = vmatprep.subr.bf16.mxu1 %v12148_v49  ;;  %v12139_v49 = vcombine.low %v3538_v51, %v3542_v5  ;;  %v12140_v47 = vcombine.high %v3538_v51, %v3542_v5 }
 0x2ec   : > { %v16219_v2 = vpop.f32.mrf.mxu1  ;;  %v7770_v46 = vadd.f32 %v15826_v32, %v7577_v1  ;;  %v7579_v10 = vadd.f32 %v7578_v34, %v7386_v12  ;;  %v10242_v0 = vmax.f32 %v7768_v53, 0.0  ;;  %v7205_v1 = vadd.f32 %v15698_v30, %v16158_v55 }
 0x2ed   : > { %v7580_v16 = vpop.f32.mrf.mxu0  ;;  %v12132_v53 = vcombine.high %v16230_v8, %v3534_v25  ;;  %v7209_v30 = vadd.f32 %v15702_v60, %v16148_v3  ;;  %v3650_v60 = vld [vmem:[%s19967_s6 + $0x7d0] sm:$0xff] }
 0x2ee   : > { %v16238_v32 = vpop.f32.mrf.mxu1  ;;  %v10243_v14 = vmax.f32 %v7770_v46, 0.0  ;;  %v7772_v50 = vadd.f32 %v15831_v11, %v7579_v10  ;;  %v7581_v45 = vadd.f32 %v7580_v16, %v7388_v38  ;;  %8902 = vmatpush1.bf16.msra.mxu1 %v12147_v57  ;;  %v13274_v57 = vld [vmem:[%s14911_s19 + $0x44] ss:$8 sps:$4 sm:$0xff]   ;;  %v12131_v46 = vcombine.low %v16230_v8, %v3534_v25 }
 0x2ef   : > { %v7584_v12 = vpop.f32.mrf.mxu0  ;;  %8049 = vmatmul.mubr.bf16.gmra.mxu0 %v15235_v29  ;;  %8903 = vmatprep.subr.bf16.mxu1 %v12140_v47  ;;  %v7211_v8 = vadd.f32 %v15708_v31, %v16158_v55  ;;  %v7398_v47 = vadd.f32 %v15402_v22, %v7205_v1  ;;  %v7213_v31 = vadd.f32 %v15718_v58, %v16148_v3  ;;  %v20348_v29 = vld [vmem:[#allocation57_spill] sm:$0xff] }
 0x2f0   : > { %v16245_v52 = vpop.f32.mrf.mxu1  ;;  %8568 = vmatmul.mubr.bf16.gmra.mxu1 %v13273_v42  ;;  %v12680_v51 = vpack.c.bf16 %v10243_v14, %v10242_v0  ;;  %v7774_v11 = vadd.f32 %v15838_v26, %v7581_v45  ;;  %v7585_v5 = vadd.f32 %v7584_v12, %v7392_v24  ;;  %8058 = vmatprep.mubr.bf16.mxu0 %v15272_v21  ;;  %v10250_v26 = vmax.f32 %v7772_v50, 0.0  ;;  %v3642_v0 = vld [vmem:[%s19967_s6 + $0x790] sm:$0xff] }
 0x2f1   : > { %8577 = vmatprep.mubr.bf16.mxu1 %v13274_v57  ;;  %v7586_v34 = vpop.f32.mrf.mxu0  ;;  %v3646_v14 = vld [vmem:[%s19967_s6 + $0x7b0] sm:$0xff]  ;;  %v7402_v45 = vadd.f32 %v15411_v48, %v7209_v30  ;;  %v13275_v57 = vld [vmem:[%s14911_s19 + $0x40] ss:$8 sps:$4 sm:$0xff]  }
 0x2f2   : > { %v16255_v41 = vpop.f32.mrf.mxu1  ;;  %11266 = vst [vmem:[%s16259_s22] sm:$0xff] %v12680_v51  ;;  %v10251_v10 = vmax.f32 %v7774_v11, 0.0  ;;  %v7778_v38 = vadd.f32 %v15845_v35, %v7585_v5  ;;  %v7587_v16 = vadd.f32 %v7586_v34, %v7394_v44  ;;  %8904 = vmatpush1.bf16.msra.mxu1 %v12139_v49  ;;  %v12252_v44 = vcombine.high %v3650_v60, %v3654_v56  ;;  %v20285_v11 = vld [vmem:[#allocation23_spill] sm:$0xff] }
 0x2f3   : > { %v7588_v25 = vpop.f32.mrf.mxu0  ;;  %8905 = vmatprep.subr.bf16.mxu1 %v12132_v53  ;;  %v7215_v51 = vadd.f32 %v15724_v43, %v16158_v55  ;;  %v7404_v48 = vadd.f32 %v20285_v11, %v7211_v8  ;;  %v12244_v30 = vcombine.high %v3642_v0, %v3646_v14  ;;  %v20288_v43 = vld [vmem:[#allocation82_spill] sm:$0xff] }
 0x2f4   : > { %v16271_v6 = vpop.f32.mrf.mxu1  ;;  %v12684_v24 = vpack.c.bf16 %v10251_v10, %v10250_v26  ;;  %v7780_v35 = vadd.f32 %v15852_v63, %v7587_v16  ;;  %v7589_v49 = vadd.f32 %v7588_v25, %v7396_v59  ;;  %v12251_v63 = vcombine.low %v3650_v60, %v3654_v56  ;;  %v20286_v59 = vld [vmem:[#allocation114_spill] sm:$0xff]  ;;  %v20287_v10 = vld [vmem:[#allocation17_spill] sm:$0xff] }
 0x2f5   : > { %v7590_v50 = vpop.f32.mrf.mxu0  ;;  %v10258_v22 = vmax.f32 %v7778_v38, 0.0  ;;  %v7219_v38 = vadd.f32 %v20288_v43, %v16148_v3  ;;  %v20289_v60 = vld [vmem:[#allocation25_spill] sm:$0xff]  ;;  %v12243_v25 = vcombine.low %v3642_v0, %v3646_v14  ;;  %v20295_v43 = vld [vmem:[#allocation119_spill] sm:$0xff] }
 0x2f6   : > { %v16284_v12 = vpop.f32.mrf.mxu1  ;;  %11270 = vst [vmem:[%s16259_s22 + $0x20] sm:$0xff] %v12684_v24  ;;  %v10259_v1 = vmax.f32 %v7780_v35, 0.0  ;;  %v7782_v42 = vadd.f32 %v15862_v19, %v7589_v49  ;;  %v7591_v53 = vadd.f32 %v7590_v50, %v7398_v47  ;;  %8906 = vmatpush1.bf16.msra.mxu1 %v12131_v46  ;;  %v13276_v46 = vld [vmem:[%s14911_s19 + $0x54] ss:$8 sps:$4 sm:$0xff]   ;;  %v7406_v56 = vadd.f32 %v20289_v60, %v7213_v31 }
 0x2f7   : > { %v7594_v58 = vpop.f32.mrf.mxu0  ;;  %8059 = vmatmul.mubr.bf16.gmra.mxu0 %v15261_v23  ;;  %8907 = vmatprep.subr.bf16.mxu1 %v12252_v44  ;;  %v3634_v50 = vld [vmem:[%s19967_s6 + $0x750] sm:$0xff] }
 0x2f8   : > { %v16292_v5 = vpop.f32.mrf.mxu1  ;;  %8578 = vmatmul.mubr.bf16.gmra.mxu1 %v13275_v57  ;;  %v12688_v34 = vpack.c.bf16 %v10259_v1, %v10258_v22  ;;  %v7784_v26 = vadd.f32 %v20286_v59, %v7591_v53  ;;  %v7595_v19 = vadd.f32 %v7594_v58, %v7402_v45  ;;  %8068 = vmatprep.mubr.bf16.mxu0 %v20287_v10  ;;  %v10266_v24 = vmax.f32 %v7782_v42, 0.0  ;;  %v3638_v31 = vld [vmem:[%s19967_s6 + $0x770] sm:$0xff]  ;;  %v20292_v42 = vld [vmem:[#allocation26_spill] sm:$0xff]  ;;  %v20294_v57 = vld [vmem:[#allocation29_spill] sm:$0xff] }
 0x2f9   : > { %8587 = vmatprep.mubr.bf16.mxu1 %v13276_v46  ;;  %v7596_v16 = vpop.f32.mrf.mxu0  ;;  %v20290_v45 = vld [vmem:[#allocation84_spill] sm:$0xff]  ;;  %v7408_v53 = vadd.f32 %v20292_v42, %v7215_v51  ;;  %v20293_v58 = vld [vmem:[#allocation86_spill] sm:$0xff] }
 0x2fa   : > { %v16301_v8 = vpop.f32.mrf.mxu1  ;;  %11274 = vst [vmem:[%s16259_s22 + $0x40] sm:$0xff] %v12688_v34  ;;  %v10267_v35 = vmax.f32 %v7784_v26, 0.0  ;;  %v7788_v49 = vadd.f32 %v15877_v27, %v7595_v19  ;;  %v7597_v47 = vadd.f32 %v7596_v16, %v7404_v48  ;;  %8908 = vmatpush2.bf16.msra.mxu1 %v12251_v63  ;;  %v7221_v44 = vadd.f32 %v20290_v45, %v16158_v55  ;;  %v20291_v27 = vld [vmem:[#allocation117_spill] sm:$0xff]  ;;  %v20296_v51 = vld [vmem:[#allocation88_spill] sm:$0xff] }
 0x2fb   : > { %v7598_v0 = vpop.f32.mrf.mxu0  ;;  %8909 = vmatprep.subr.bf16.mxu1 %v12244_v30  ;;  %v7223_v11 = vadd.f32 %v20293_v58, %v16148_v3  ;;  %v7412_v34 = vadd.f32 %v20294_v57, %v7219_v38  ;;  %v12235_v26 = vcombine.low %v3634_v50, %v3638_v31  ;;  %v12236_v19 = vcombine.high %v3634_v50, %v3638_v31  ;;  %v13277_v50 = vld [vmem:[%s14911_s19 + $0x50] ss:$8 sps:$4 sm:$0xff]  }
 0x2fc   : > { %v16313_v14 = vpop.f32.mrf.mxu1  ;;  %v12692_v22 = vpack.c.bf16 %v10267_v35, %v10266_v24  ;;  %v7790_v1 = vadd.f32 %v20291_v27, %v7597_v47  ;;  %v7599_v63 = vadd.f32 %v7598_v0, %v7406_v56  ;;  %v10274_v46 = vmax.f32 %v7788_v49, 0.0  ;;  %v20297_v35 = vld [vmem:[#allocation14_spill] sm:$0xff]  ;;  %v20298_v47 = vld [vmem:[#allocation27_spill] sm:$0xff]  ;;  %v20299_v31 = vld [vmem:[#allocation121_spill] sm:$0xff] }
 0x2fd   : > { %v7600_v48 = vpop.f32.mrf.mxu0  ;;  %v7225_v56 = vadd.f32 %v20296_v51, %v16158_v55  ;;  %v7414_v38 = vadd.f32 %v20298_v47, %v7221_v44  ;;  %v20300_v27 = vld [vmem:[#allocation16_spill] sm:$0xff] }
 0x2fe   : > { %v16320_v59 = vpop.f32.mrf.mxu1  ;;  %11278 = vst [vmem:[%s16259_s22 + $0x60] sm:$0xff] %v12692_v22  ;;  %v10275_v30 = vmax.f32 %v7790_v1, 0.0  ;;  %v7792_v16 = vadd.f32 %v20295_v43, %v7599_v63  ;;  %v7601_v60 = vadd.f32 %v7600_v48, %v7408_v53  ;;  %8910 = vmatpush2.bf16.msra.mxu1 %v12243_v25  ;;  %v13278_v25 = vld [vmem:[%s14911_s19 + $0x64] ss:$8 sps:$4 sm:$0xff]   ;;  %v20302_v53 = vld [vmem:[#allocation28_spill] sm:$0xff] }
 0x2ff   : > { %v7604_v24 = vpop.f32.mrf.mxu0  ;;  %8069 = vmatmul.mubr.bf16.gmra.mxu0 %v20297_v35  ;;  %v20301_v1 = vld [vmem:[#allocation90_spill] sm:$0xff]  ;;  %v7416_v58 = vadd.f32 %v20302_v53, %v7223_v11  ;;  %8911 = vmatprep.subr.bf16.mxu1 %v12236_v19  ;;  %v20304_v11 = vld [vmem:[#allocation92_spill] sm:$0xff] }
 0x300   : > { %v16328_v45 = vpop.f32.mrf.mxu1  ;;  %8588 = vmatmul.mubr.bf16.gmra.mxu1 %v13277_v50  ;;  %v12696_v49 = vpack.c.bf16 %v10275_v30, %v10274_v46  ;;  %v7794_v0 = vadd.f32 %v20299_v31, %v7601_v60  ;;  %v7605_v22 = vadd.f32 %v7604_v24, %v7412_v34  ;;  %8078 = vmatprep.mubr.bf16.mxu0 %v20300_v27  ;;  %v10282_v44 = vmax.f32 %v7792_v16, 0.0  ;;  %v20303_v46 = vld [vmem:[#allocation123_spill] sm:$0xff]  ;;  %v3626_v34 = vld [vmem:[%s19967_s6 + $0x710] sm:$0xff]  ;;  %v20306_v31 = vld [vmem:[#allocation30_spill] sm:$0xff] }
 0x301   : > { %8597 = vmatprep.mubr.bf16.mxu1 %v13278_v25  ;;  %v7229_v63 = vadd.f32 %v20301_v1, %v16148_v3  ;;  %v7606_v42 = vpop.f32.mrf.mxu0  ;;  %v3630_v60 = vld [vmem:[%s19967_s6 + $0x730] sm:$0xff]  ;;  %v7231_v51 = vadd.f32 %v20304_v11, %v16158_v55 }
 0x302   : > { %v16337_v48 = vpop.f32.mrf.mxu1  ;;  %11282 = vst [vmem:[%s16259_s22 + $0x80] sm:$0xff] %v12696_v49  ;;  %v10283_v57 = vmax.f32 %v7794_v0, 0.0  ;;  %v7798_v30 = vadd.f32 %v20303_v46, %v7605_v22  ;;  %v7607_v43 = vadd.f32 %v7606_v42, %v7414_v38  ;;  %8912 = vmatpush2.bf16.msra.mxu1 %v12235_v26  ;;  %v12227_v16 = vcombine.low %v3626_v34, %v3630_v60  ;;  %v20305_v38 = vld [vmem:[#allocation125_spill] sm:$0xff]  ;;  %v20307_v22 = vld [vmem:[#allocation94_spill] sm:$0xff]  ;;  %v20308_v42 = vld [vmem:[#allocation31_spill] sm:$0xff] }
 0x303   : > { %v7608_v19 = vpop.f32.mrf.mxu0  ;;  %v12228_v47 = vcombine.high %v3626_v34, %v3630_v60  ;;  %v7418_v0 = vadd.f32 %v20306_v31, %v7225_v56  ;;  %v7233_v25 = vadd.f32 %v20307_v22, %v16148_v3  ;;  %v7422_v53 = vadd.f32 %v20308_v42, %v7229_v63  ;;  %v20310_v56 = vld [vmem:[#allocation96_spill] sm:$0xff] }
 0x304   : > { %v16349_v24 = vpop.f32.mrf.mxu1  ;;  %v12700_v50 = vpack.c.bf16 %v10283_v57, %v10282_v44  ;;  %v7800_v26 = vadd.f32 %v20305_v38, %v7607_v43  ;;  %v7609_v49 = vadd.f32 %v7608_v19, %v7416_v58  ;;  %v10290_v11 = vmax.f32 %v7798_v30, 0.0  ;;  %v20309_v44 = vld [vmem:[#allocation127_spill] sm:$0xff]  ;;  %v20312_v38 = vld [vmem:[#allocation34_spill] sm:$0xff] }
 0x305   : > { %v7610_v1 = vpop.f32.mrf.mxu0  ;;  %8913 = vmatprep.subr.bf16.mxu1 %v12228_v47  ;;  %v7235_v58 = vadd.f32 %v20310_v56, %v16158_v55  ;;  %v20311_v19 = vld [vmem:[#allocation15_spill] sm:$0xff]  ;;  %v7424_v63 = vadd.f32 %v20312_v38, %v7231_v51 }
 0x306   : > { %v16356_v46 = vpop.f32.mrf.mxu1  ;;  %11286 = vst [vmem:[%s16259_s22 + $0xa0] sm:$0xff] %v12700_v50  ;;  %v10291_v34 = vmax.f32 %v7800_v26, 0.0  ;;  %v7802_v57 = vadd.f32 %v20309_v44, %v7609_v49  ;;  %v7611_v43 = vadd.f32 %v7610_v1, %v7418_v0  ;;  %8914 = vmatpush2.bf16.msra.mxu1 %v12227_v16  ;;  %v13279_v47 = vld [vmem:[%s14911_s19 + $0x60] ss:$8 sps:$4 sm:$0xff]   ;;  %v20313_v50 = vld [vmem:[#allocation129_spill] sm:$0xff]  ;;  %v20316_v44 = vld [vmem:[#allocation32_spill] sm:$0xff] }
 0x307   : > { %v7614_v60 = vpop.f32.mrf.mxu0  ;;  %8079 = vmatmul.mubr.bf16.gmra.mxu0 %v20311_v19  ;;  %v20314_v49 = vld [vmem:[#allocation19_spill] sm:$0xff]  ;;  %v13280_v16 = vld [vmem:[%s14911_s19 + $0x74] ss:$8 sps:$4 sm:$0xff]   ;;  %v20315_v0 = vld [vmem:[#allocation98_spill] sm:$0xff]  ;;  %v7426_v56 = vadd.f32 %v20316_v44, %v7233_v25 }
 0x308   : > { %v16364_v31 = vpop.f32.mrf.mxu1  ;;  %8598 = vmatmul.mubr.bf16.gmra.mxu1 %v13279_v47  ;;  %v12704_v30 = vpack.c.bf16 %v10291_v34, %v10290_v11  ;;  %v7804_v26 = vadd.f32 %v20313_v50, %v7611_v43  ;;  %v7615_v22 = vadd.f32 %v7614_v60, %v7422_v53  ;;  %8088 = vmatprep.mubr.bf16.mxu0 %v20314_v49  ;;  %v10298_v51 = vmax.f32 %v7802_v57, 0.0  ;;  %v3618_v53 = vld [vmem:[%s19967_s6 + $0x6d0] sm:$0xff]  ;;  %v20320_v49 = vld [vmem:[#allocation35_spill] sm:$0xff] }
 0x309   : > { %8607 = vmatprep.mubr.bf16.mxu1 %v13280_v16  ;;  %v7239_v1 = vadd.f32 %v20315_v0, %v16148_v3  ;;  %v7616_v42 = vpop.f32.mrf.mxu0  ;;  %v3622_v43 = vld [vmem:[%s19967_s6 + $0x6f0] sm:$0xff]  ;;  %v20319_v0 = vld [vmem:[#allocation102_spill] sm:$0xff] }
 0x30a   : > { %v16373_v19 = vpop.f32.mrf.mxu1  ;;  %11290 = vst [vmem:[%s16259_s22 + $0xc0] sm:$0xff] %v12704_v30  ;;  %v10299_v38 = vmax.f32 %v7804_v26, 0.0  ;;  %v7808_v11 = vadd.f32 %v15968_v15, %v7615_v22  ;;  %v7617_v34 = vadd.f32 %v7616_v42, %v7424_v63  ;;  %v20317_v60 = vld [vmem:[#allocation100_spill] sm:$0xff]  ;;  %v12219_v57 = vcombine.low %v3618_v53, %v3622_v43  ;;  %v20318_v22 = vld [vmem:[#allocation33_spill] sm:$0xff] }
 0x30b   : > { %v7241_v25 = vadd.f32 %v20317_v60, %v16158_v55  ;;  %v7618_v47 = vpop.f32.mrf.mxu0  ;;  %v12220_v30 = vcombine.high %v3618_v53, %v3622_v43  ;;  %v7428_v16 = vadd.f32 %v20318_v22, %v7235_v58  ;;  %v7243_v42 = vadd.f32 %v20319_v0, %v16148_v3  ;;  %v20322_v58 = vld [vmem:[#allocation104_spill] sm:$0xff]  ;;  %v20323_v43 = vld [vmem:[#allocation18_spill] sm:$0xff] }
 0x30c   : > { %v16385_v50 = vpop.f32.mrf.mxu1  ;;  %v12708_v26 = vpack.c.bf16 %v10299_v38, %v10298_v51  ;;  %v7810_v15 = vadd.f32 %v15974_v7, %v7617_v34  ;;  %v7619_v63 = vadd.f32 %v7618_v47, %v7426_v56  ;;  %v7432_v27 = vadd.f32 %v20320_v49, %v7239_v1  ;;  %v20321_v51 = vld [vmem:[#allocation133_spill] sm:$0xff]  ;;  %v20324_v47 = vld [vmem:[#allocation36_spill] sm:$0xff] }
 0x30d   : > { %v7620_v44 = vpop.f32.mrf.mxu0  ;;  %8915 = vmatprep.subr.bf16.mxu1 %v12220_v30  ;;  %v10306_v60 = vmax.f32 %v7808_v11, 0.0  ;;  %v7245_v56 = vadd.f32 %v20322_v58, %v16158_v55  ;;  %v7434_v49 = vadd.f32 %v20324_v47, %v7241_v25  ;;  %v13281_v30 = vld [vmem:[%s14911_s19 + $0x70] ss:$8 sps:$4 sm:$0xff]  }
 0x30e   : > { %v16392_v35 = vpop.f32.mrf.mxu1  ;;  %11294 = vst [vmem:[%s16259_s22 + $0xe0] sm:$0xff] %v12708_v26  ;;  %v10307_v53 = vmax.f32 %v7810_v15, 0.0  ;;  %v7812_v38 = vadd.f32 %v20321_v51, %v7619_v63  ;;  %v7621_v7 = vadd.f32 %v7620_v44, %v7428_v16  ;;  %8916 = vmatpush2.bf16.msra.mxu1 %v12219_v57  ;;  %v20325_v26 = vld [vmem:[#allocation135_spill] sm:$0xff]  ;;  %v20326_v63 = vld [vmem:[#allocation21_spill] sm:$0xff]  ;;  %v20327_v16 = vld [vmem:[#allocation106_spill] sm:$0xff] }
 0x30f   : > { %v7624_v34 = vpop.f32.mrf.mxu0  ;;  %8089 = vmatmul.mubr.bf16.gmra.mxu0 %v20323_v43  ;;  %v13282_v57 = vld [vmem:[%s14911_s19 + $0x84] ss:$8 sps:$4 sm:$0xff]   ;;  %v7249_v0 = vadd.f32 %v20327_v16, %v16148_v3  ;;  %v20332_v16 = vld [vmem:[#allocation108_spill] sm:$0xff] }
 0x310   : > { %v16400_v1 = vpop.f32.mrf.mxu1  ;;  %8608 = vmatmul.mubr.bf16.gmra.mxu1 %v13281_v30  ;;  %v12712_v11 = vpack.c.bf16 %v10307_v53, %v10306_v60  ;;  %v7814_v15 = vadd.f32 %v20325_v26, %v7621_v7  ;;  %v7625_v22 = vadd.f32 %v7624_v34, %v7432_v27  ;;  %8098 = vmatprep.mubr.bf16.mxu0 %v20326_v63  ;;  %v20328_v51 = vld [vmem:[#allocation39_spill] sm:$0xff]  ;;  %v10314_v25 = vmax.f32 %v7812_v38, 0.0  ;;  %v3610_v27 = vld [vmem:[%s19967_s6 + $0x690] sm:$0xff]  ;;  %v20333_v63 = vld [vmem:[#allocation38_spill] sm:$0xff] }
 0x311   : > { %8617 = vmatprep.mubr.bf16.mxu1 %v13282_v57  ;;  %v7626_v44 = vpop.f32.mrf.mxu0  ;;  %v7436_v58 = vadd.f32 %v20328_v51, %v7243_v42  ;;  %v3614_v7 = vld [vmem:[%s19967_s6 + $0x6b0] sm:$0xff]  ;;  %v20329_v34 = vld [vmem:[#allocation107_spill] sm:$0xff]  ;;  %v7442_v10 = vadd.f32 %v20333_v63, %v7249_v0 }
 0x312   : > { %v16409_v43 = vpop.f32.mrf.mxu1  ;;  %11298 = vst [vmem:[%s16259_s22 + $0x100] sm:$0xff] %v12712_v11  ;;  %v10315_v47 = vmax.f32 %v7814_v15, 0.0  ;;  %v7818_v60 = vadd.f32 %v16000_v13, %v7625_v22  ;;  %v7627_v53 = vadd.f32 %v7626_v44, %v7434_v49  ;;  %v7251_v42 = vadd.f32 %v20329_v34, %v16158_v55  ;;  %v20331_v22 = vld [vmem:[#allocation37_spill] sm:$0xff]  ;;  %v13283_v0 = vld [vmem:[%s14911_s19 + $0x80] ss:$8 sps:$4 sm:$0xff]  }
 0x313   : > { %v7628_v30 = vpop.f32.mrf.mxu0  ;;  %v12211_v38 = vcombine.low %v3610_v27, %v3614_v7  ;;  %v12212_v11 = vcombine.high %v3610_v27, %v3614_v7  ;;  %v7438_v57 = vadd.f32 %v20331_v22, %v7245_v56  ;;  %v7253_v44 = vadd.f32 %v20332_v16, %v16148_v3  ;;  %v20336_v56 = vld [vmem:[#allocation109_spill] sm:$0xff]  ;;  %v20337_v7 = vld [vmem:[#allocation20_spill] sm:$0xff]  ;;  %v20342_v16 = vld [vmem:[#allocation110_spill] sm:$0xff] }
 0x314   : > { %v16421_v26 = vpop.f32.mrf.mxu1  ;;  %v12716_v15 = vpack.c.bf16 %v10315_v47, %v10314_v25  ;;  %v7820_v13 = vadd.f32 %v16006_v40, %v7627_v53  ;;  %v7629_v49 = vadd.f32 %v7628_v30, %v7436_v58  ;;  %v10322_v34 = vmax.f32 %v7818_v60, 0.0  ;;  %v20335_v25 = vld [vmem:[#allocation139_spill] sm:$0xff]  ;;  %v20338_v30 = vld [vmem:[#allocation40_spill] sm:$0xff] }
 0x315   : > { %20330 = vst [vmem:[#allocation23_spill] sm:$0xff] %v16421_v26  ;;  %v7630_v51 = vpop.f32.mrf.mxu0  ;;  %8917 = vmatprep.subr.bf16.mxu1 %v12212_v11  ;;  %v7255_v58 = vadd.f32 %v20336_v56, %v16158_v55  ;;  %v7444_v22 = vadd.f32 %v20338_v30, %v7251_v42  ;;  %v20340_v11 = vld [vmem:[#allocation141_spill] sm:$0xff]  ;;  %v7259_v42 = vadd.f32 %v20342_v16, %v16148_v3 }
 0x316   : > { %v16428_v23 = vpop.f32.mrf.mxu1  ;;  %11302 = vst [vmem:[%s16259_s22 + $0x120] sm:$0xff] %v12716_v15  ;;  %v10323_v27 = vmax.f32 %v7820_v13, 0.0  ;;  %v7822_v47 = vadd.f32 %v20335_v25, %v7629_v49  ;;  %v7631_v40 = vadd.f32 %v7630_v51, %v7438_v57  ;;  %8918 = vmatpush2.bf16.msra.mxu1 %v12211_v38  ;;  %v20341_v49 = vld [vmem:[#allocation22_spill] sm:$0xff]  ;;  %v13284_v38 = vld [vmem:[%s14911_s19 + $0x94] ss:$8 sps:$4 sm:$0xff]  }
 0x317   : > { %20334 = vst [vmem:[#allocation114_spill] sm:$0xff] %v16428_v23  ;;  %v7634_v53 = vpop.f32.mrf.mxu0  ;;  %8099 = vmatmul.mubr.bf16.gmra.mxu0 %v20337_v7  ;;  %v3602_v57 = vld [vmem:[%s19967_s6 + $0x650] sm:$0xff]  ;;  %v20343_v56 = vld [vmem:[#allocation41_spill] sm:$0xff]  ;;  %v20384_v23 = vld [vmem:[#allocation67_spill] sm:$0xff] }
 0x318   : > { %v16436_v63 = vpop.f32.mrf.mxu1  ;;  %8618 = vmatmul.mubr.bf16.gmra.mxu1 %v13283_v0  ;;  %v12720_v60 = vpack.c.bf16 %v10323_v27, %v10322_v34  ;;  %v7824_v15 = vadd.f32 %v20340_v11, %v7631_v40  ;;  %v7635_v13 = vadd.f32 %v7634_v53, %v7442_v10  ;;  %8108 = vmatprep.mubr.bf16.mxu0 %v20341_v49  ;;  %v10330_v51 = vmax.f32 %v7822_v47, 0.0  ;;  %v3606_v10 = vld [vmem:[%s19967_s6 + $0x670] sm:$0xff]  ;;  %v20345_v11 = vld [vmem:[#allocation111_spill] sm:$0xff] }
 0x319   : > { %20339 = vst [vmem:[#allocation82_spill] sm:$0xff] %v16436_v63  ;;  %8627 = vmatprep.mubr.bf16.mxu1 %v13284_v38  ;;  %v7636_v25 = vpop.f32.mrf.mxu0  ;;  %v7446_v30 = vadd.f32 %v20343_v56, %v7253_v44  ;;  %v12203_v53 = vcombine.low %v3602_v57, %v3606_v10  ;;  %v7261_v38 = vadd.f32 %v20345_v11, %v16158_v55  ;;  %v20347_v49 = vld [vmem:[#allocation144_spill] sm:$0xff]  ;;  %v20353_v11 = vld [vmem:[#allocation113_spill] sm:$0xff]  ;;  %v20383_v63 = vld [vmem:[#allocation66_spill] sm:$0xff] }
 0x31a   : > { %v16448_v0 = vpop.f32.mrf.mxu1  ;;  %11306 = vst [vmem:[%s16259_s22 + $0x140] sm:$0xff] %v12720_v60  ;;  %v10331_v34 = vmax.f32 %v7824_v15, 0.0  ;;  %v7828_v27 = vadd.f32 %v16032_v9, %v7635_v13  ;;  %v7637_v40 = vadd.f32 %v7636_v25, %v7444_v22  ;;  %v12204_v44 = vcombine.high %v3602_v57, %v3606_v10  ;;  %v3594_v9 = vld [vmem:[%s19967_s6 + $0x610] sm:$0xff]  ;;  %v20350_v57 = vld [vmem:[#allocation58_spill] sm:$0xff] }
 0x31b   : > { %20344 = vst [vmem:[#allocation25_spill] sm:$0xff] %v16448_v0  ;;  %v7638_v16 = vpop.f32.mrf.mxu0  ;;  %v7448_v0 = vadd.f32 %v20348_v29, %v7255_v58  ;;  %v3598_v22 = vld [vmem:[%s19967_s6 + $0x630] sm:$0xff] }
 0x31c   : > { %v16457_v47 = vpop.f32.mrf.mxu1  ;;  %v12724_v56 = vpack.c.bf16 %v10331_v34, %v10330_v51  ;;  %v7830_v7 = vadd.f32 %v20347_v49, %v7637_v40  ;;  %v7639_v21 = vadd.f32 %v7638_v16, %v7446_v30  ;;  %v20349_v60 = vld [vmem:[#allocation112_spill] sm:$0xff]  ;;  %v10338_v13 = vmax.f32 %v7828_v27, 0.0  ;;  %8919 = vmatprep.subr.bf16.mxu1 %v12204_v44  ;;  %v20352_v30 = vld [vmem:[#allocation146_spill] sm:$0xff] }
 0x31d   : > { %20346 = vst [vmem:[#allocation84_spill] sm:$0xff] %v16457_v47  ;;  %v7263_v15 = vadd.f32 %v20349_v60, %v16148_v3  ;;  %v7640_v25 = vpop.f32.mrf.mxu0  ;;  %v7452_v51 = vadd.f32 %v20350_v57, %v7259_v42  ;;  %v12196_v29 = vcombine.high %v3594_v9, %v3598_v22  ;;  %8920 = vmatpush2.bf16.msra.mxu1 %v12203_v53  ;;  %v20354_v60 = vld [vmem:[#allocation24_spill] sm:$0xff]  ;;  %v20355_v42 = vld [vmem:[#allocation59_spill] sm:$0xff] }
 0x31e   : > { %v16470_v49 = vpop.f32.mrf.mxu1  ;;  %11310 = vst [vmem:[%s16259_s22 + $0x160] sm:$0xff] %v12724_v56  ;;  %v10339_v58 = vmax.f32 %v7830_v7, 0.0  ;;  %v7832_v10 = vadd.f32 %v20352_v30, %v7639_v21  ;;  %v7641_v34 = vadd.f32 %v7640_v25, %v7448_v0  ;;  %v12195_v40 = vcombine.low %v3594_v9, %v3598_v22  ;;  %v13285_v44 = vld [vmem:[%s14911_s19 + $0x90] ss:$8 sps:$4 sm:$0xff]   ;;  %v13286_v0 = vld [vmem:[%s14923_s16 + $0x4] ss:$8 sps:$4 sm:$0xff]  }
 0x31f   : > { %20351 = vst [vmem:[#allocation117_spill] sm:$0xff] %v16470_v49  ;;  %v7265_v27 = vadd.f32 %v20353_v11, %v16158_v55  ;;  %v7644_v16 = vpop.f32.mrf.mxu0  ;;  %8109 = vmatmul.mubr.bf16.gmra.mxu0 %v20354_v60  ;;  %v7454_v57 = vadd.f32 %v20355_v42, %v7261_v38  ;;  %v20357_v56 = vld [vmem:[#allocation148_spill] sm:$0xff]  ;;  %v13287_v53 = vld [vmem:[%s14911_s19 + $0xa4] ss:$8 sps:$4 sm:$0xff]   ;;  %8921 = vmatprep.subr.bf16.mxu1 %v12196_v29 }
 0x320   : > { %v16478_v49 = vpop.f32.mrf.mxu1  ;;  %8628 = vmatmul.mubr.bf16.gmra.mxu1 %v13285_v44  ;;  %v12728_v7 = vpack.c.bf16 %v10339_v58, %v10338_v13  ;;  %v7834_v21 = vadd.f32 %v20357_v56, %v7641_v34  ;;  %v7645_v30 = vadd.f32 %v7644_v16, %v7452_v51  ;;  %8344 = vmatprep.mubr.bf16.mxu0 %v13286_v0  ;;  %v20358_v9 = vld [vmem:[#allocation115_spill] sm:$0xff]  ;;  %v20359_v25 = vld [vmem:[#allocation116_spill] sm:$0xff]  ;;  %v10346_v13 = vmax.f32 %v7832_v10, 0.0  ;;  %v20362_v51 = vld [vmem:[#allocation150_spill] sm:$0xff] }
 0x321   : > { %20356 = vst [vmem:[#allocation26_spill] sm:$0xff] %v16478_v49  ;;  %8637 = vmatprep.mubr.bf16.mxu1 %v13287_v53  ;;  %v7269_v22 = vadd.f32 %v20358_v9, %v16148_v3  ;;  %v7271_v11 = vadd.f32 %v20359_v25, %v16158_v55  ;;  %v7646_v38 = vpop.f32.mrf.mxu0  ;;  %v20360_v42 = vld [vmem:[#allocation60_spill] sm:$0xff]  ;;  %8922 = vmatpush2.bf16.msra.mxu1 %v12195_v40  ;;  %v20366_v53 = vld [vmem:[#allocation61_spill] sm:$0xff]  ;;  %v20369_v40 = vld [vmem:[#allocation63_spill] sm:$0xff] }
 0x322   : > { %v7456_v60 = vadd.f32 %v20360_v42, %v7263_v15  ;;  %v16489_v49 = vpop.f32.mrf.mxu1  ;;  %11314 = vst [vmem:[%s16259_s22 + $0x180] sm:$0xff] %v12728_v7  ;;  %v10347_v58 = vmax.f32 %v7834_v21, 0.0  ;;  %v7838_v34 = vadd.f32 %v20362_v51, %v7645_v30  ;;  %v7647_v16 = vadd.f32 %v7646_v38, %v7454_v57  ;;  %v16496_v44 = vld [vmem:[%s19967_s6 + $0x190] sm:$0xff]  ;;  %v20363_v15 = vld [vmem:[#allocation118_spill] sm:$0xff] }
 0x323   : > { %20361 = vst [vmem:[#allocation86_spill] sm:$0xff] %v16489_v49  ;;  %v16501_v56 = vld [vmem:[%s19967_s6 + $0x1b0] sm:$0xff]  ;;  %v7273_v29 = vadd.f32 %v20363_v15, %v16148_v3  ;;  %v7648_v10 = vpop.f32.mrf.mxu0  ;;  %v7458_v9 = vadd.f32 %v20366_v53, %v7265_v27  ;;  %v20368_v51 = vld [vmem:[#allocation62_spill] sm:$0xff]  ;;  %v7464_v47 = vadd.f32 %v20369_v40, %v7271_v11 }
 0x324   : > { %v16505_v7 = vpop.f32.mrf.mxu1  ;;  %v12732_v21 = vpack.c.bf16 %v10347_v58, %v10346_v13  ;;  %v20365_v57 = vld [vmem:[#allocation152_spill] sm:$0xff]  ;;  %v7649_v0 = vadd.f32 %v7648_v10, %v7456_v60  ;;  %v7462_v49 = vadd.f32 %v20368_v51, %v7269_v22  ;;  %v12052_v15 = vcombine.high %v16496_v44, %v16501_v56  ;;  %v20371_v58 = vld [vmem:[#allocation154_spill] sm:$0xff] }
 0x325   : > { %20364 = vst [vmem:[#allocation29_spill] sm:$0xff] %v16505_v7  ;;  %v7840_v30 = vadd.f32 %v20365_v57, %v7647_v16  ;;  %v20367_v25 = vld [vmem:[#allocation120_spill] sm:$0xff]  ;;  %v7650_v42 = vpop.f32.mrf.mxu0  ;;  %v10354_v13 = vmax.f32 %v7838_v34, 0.0  ;;  %v20372_v11 = vld [vmem:[#allocation122_spill] sm:$0xff]  ;;  %v12051_v53 = vcombine.low %v16496_v44, %v16501_v56 }
 0x326   : > { %v7275_v38 = vadd.f32 %v20367_v25, %v16158_v55  ;;  %v16515_v7 = vpop.f32.mrf.mxu1  ;;  %11318 = vst [vmem:[%s16259_s22 + $0x1a0] sm:$0xff] %v12732_v21  ;;  %v7842_v27 = vadd.f32 %v20371_v58, %v7649_v0  ;;  %v7651_v16 = vadd.f32 %v7650_v42, %v7458_v9  ;;  %v16522_v10 = vld [vmem:[%s19967_s6 + $0x150] sm:$0xff]  ;;  %v7279_v57 = vadd.f32 %v20372_v11, %v16148_v3  ;;  %v13288_v34 = vld [vmem:[%s14923_s16] ss:$8 sps:$4 sm:$0xff]  }
 0x327   : > { %20370 = vst [vmem:[#allocation119_spill] sm:$0xff] %v16515_v7  ;;  %v10355_v60 = vmax.f32 %v7840_v30, 0.0  ;;  %v16527_v22 = vld [vmem:[%s19967_s6 + $0x170] sm:$0xff]  ;;  %v7654_v21 = vpop.f32.mrf.mxu0  ;;  %8345 = vmatmul.mubr.bf16.vlgmr.msra.gmra.mxu0 %v13288_v34  ;;  %v13289_v25 = vld [vmem:[%s14911_s19 + $0xa0] ss:$8 sps:$4 sm:$0xff]   ;;  %v20376_v11 = vcombine.low %v15912_v62, %v15917_v37 }
 0x328   : > { %v20373_v30 = vld [vmem:[#allocation64_spill] sm:$0xff]  ;;  %v16535_v9 = vpop.f32.mrf.mxu1  ;;  %8638 = vmatmul.mubr.bf16.gmra.mxu1 %v13289_v25  ;;  %v7655_v58 = vadd.f32 %v7654_v21, %v7462_v49  ;;  %v12044_v62 = vcombine.high %v16522_v10, %v16527_v22  ;;  %v12043_v20 = vcombine.low %v16522_v10, %v16527_v22 }
 0x329   : > { %v7466_v0 = vadd.f32 %v20373_v30, %v7273_v29  ;;  %20374 = vst [vmem:[#allocation88_spill] sm:$0xff] %v16535_v9  ;;  %v12736_v42 = vpack.c.bf16 %v10355_v60, %v10354_v13  ;;  %v20375_v51 = vld [vmem:[#allocation156_spill] sm:$0xff]  ;;  %8699 = vmatpush1.bf16.msra.mxu0 %v20376_v11  ;;  %v7656_v49 = vpop.f32.mrf.mxu0  ;;  %v10362_v30 = vmax.f32 %v7842_v27, 0.0  ;;  %v20380_v27 = vld [vmem:[#allocation126_spill] sm:$0xff] }
 0x32a   : > { %v7844_v40 = vadd.f32 %v20375_v51, %v7651_v16  ;;  %v13290_v34 = vld [vmem:[%s14923_s16 + $0x14] ss:$8 sps:$4 sm:$0xff]   ;;  %8700 = vmatprep.subr.bf16.mxu0 %v12052_v15  ;;  %v16562_v60 = vpop.f32.mrf.mxu1  ;;  %v20379_v51 = vld [vmem:[#allocation158_spill] sm:$0xff]  ;;  %v7657_v11 = vadd.f32 %v7656_v49, %v7464_v47 }
 0x32b   : > { %8354 = vmatprep.mubr.bf16.mxu0 %v13290_v34  ;;  %v16546_v44 = vld [vmem:[%s19967_s6 + $0x9d0] sm:$0xff]  ;;  %20378 = vst [vmem:[#allocation27_spill] sm:$0xff] %v16562_v60  ;;  %11322 = vst [vmem:[%s16259_s22 + $0x1c0] sm:$0xff] %v12736_v42  ;;  %v7848_v15 = vadd.f32 %v20379_v51, %v7655_v58  ;;  %v7283_v42 = vadd.f32 %v20380_v27, %v16148_v3  ;;  %v20381_v47 = vld [vmem:[#allocation65_spill] sm:$0xff]  ;;  %v7472_v27 = vadd.f32 %v20383_v63, %v7279_v57 }
 0x32c   : > { %v16551_v56 = vld [vmem:[%s19967_s6 + $0x9f0] sm:$0xff]  ;;  %v10363_v25 = vmax.f32 %v7844_v40, 0.0  ;;  %v7658_v40 = vpop.f32.mrf.mxu0  ;;  %v7468_v58 = vadd.f32 %v20381_v47, %v7275_v38  ;;  %v16587_v49 = vpop.f32.mrf.mxu1 }
 0x32d   : > { %v20377_v29 = vld [vmem:[#allocation124_spill] sm:$0xff]  ;;  %v7659_v7 = vadd.f32 %v7658_v40, %v7466_v0  ;;  %8701 = vmatpush1.bf16.msra.mxu0 %v12051_v53  ;;  %v10370_v0 = vmax.f32 %v7848_v15, 0.0 }
 0x32e   : > { %v7281_v13 = vadd.f32 %v20377_v29, %v16158_v55  ;;  %v16560_v37 = vld [vmem:[%s19967_s6 + $0x110] sm:$0xff]  ;;  %v12740_v21 = vpack.c.bf16 %v10363_v25, %v10362_v30  ;;  %v7660_v28 = vpop.f32.mrf.mxu0  ;;  %8702 = vmatprep.subr.bf16.mxu0 %v12044_v62  ;;  %v16598_v47 = vpop.f32.mrf.mxu1 }
 0x32f   : > { %v13291_v16 = vld [vmem:[%s14911_s19 + $0xb4] ss:$8 sps:$4 sm:$0xff]   ;;  %v7661_v10 = vadd.f32 %v7660_v28, %v7468_v58  ;;  %v13292_v62 = vld [vmem:[%s14923_s16 + $0x10] ss:$8 sps:$4 sm:$0xff]  }
 0x330   : > { %8647 = vmatprep.mubr.bf16.mxu1 %v13291_v16  ;;  %v16572_v34 = vld [vmem:[%s19967_s6 + $0x130] sm:$0xff]  ;;  %v7474_v26 = vadd.f32 %v20384_v23, %v7281_v13  ;;  %11326 = vst [vmem:[%s16259_s22 + $0x1e0] sm:$0xff] %v12740_v21  ;;  %v7664_v13 = vpop.f32.mrf.mxu0  ;;  %8355 = vmatmul.mubr.bf16.gmra.mxu0 %v13292_v62  ;;  %v16618_v21 = vpop.f32.mrf.mxu1 }
 0x331   : > { %v16577_v29 = vld [vmem:[%s19967_s6 + $0xdd0] sm:$0xff]  ;;  %v12036_v38 = vcombine.high %v16560_v37, %v16572_v34  ;;  %v12035_v28 = vcombine.low %v16560_v37, %v16572_v34  ;;  %20388 = vst [vmem:[#allocation121_spill] sm:$0xff] %v16618_v21  ;;  %v7665_v58 = vadd.f32 %v7664_v13, %v7472_v27  ;;  %8703 = vmatpush1.bf16.msra.mxu0 %v12043_v20 }
 0x332   : > { %v16582_v16 = vld [vmem:[%s19967_s6 + $0xdf0] sm:$0xff]  ;;  %v7666_v37 = vpop.f32.mrf.mxu0 }
 0x333   : > { %v12444_v51 = vcombine.high %v16577_v29, %v16582_v16  ;;  %v20382_v60 = vld [vmem:[#allocation160_spill] sm:$0xff]  ;;  %8704 = vmatprep.subr.bf16.mxu0 %v12036_v38  ;;  %v7858_v20 = vadd.f32 %v16153_v39, %v7665_v58 }
 0x334   : > { %v7850_v9 = vadd.f32 %v20382_v60, %v7657_v11  ;;  %v20385_v60 = vld [vmem:[#allocation162_spill] sm:$0xff]  ;;  %v16605_v63 = vld [vmem:[%s19967_s6 + $0xd0] sm:$0xff] }
 0x335   : > { %9277 = vmatprep.subr.bf16.mxu1 %v12444_v51  ;;  %v7852_v30 = vadd.f32 %v20385_v60, %v7659_v7  ;;  %v16610_v23 = vld [vmem:[%s19967_s6 + $0xf0] sm:$0xff]  ;;  %v13294_v51 = vld [vmem:[%s14923_s16 + $0x24] ss:$8 sps:$4 sm:$0xff]   ;;  %8705 = vmatpush1.bf16.msra.mxu0 %v12035_v28 }
 0x336   : > { %v10371_v53 = vmax.f32 %v7850_v9, 0.0  ;;  %v20386_v22 = vld [vmem:[#allocation128_spill] sm:$0xff]  ;;  %8364 = vmatprep.mubr.bf16.mxu0 %v13294_v51  ;;  %v20390_v60 = vld [vmem:[#allocation130_spill] sm:$0xff]  ;;  %v12028_v34 = vcombine.high %v16605_v63, %v16610_v23  ;;  %v7668_v51 = vpop.f32.mrf.mxu0  ;;  %v12027_v58 = vcombine.low %v16605_v63, %v16610_v23 }
 0x337   : > { %v7285_v57 = vadd.f32 %v20386_v22, %v16158_v55  ;;  %v20387_v9 = vld [vmem:[#allocation68_spill] sm:$0xff]  ;;  %v7289_v22 = vadd.f32 %v20390_v60, %v16148_v3  ;;  %v10378_v27 = vmax.f32 %v7852_v30, 0.0  ;;  %v20394_v60 = vld [vmem:[#allocation69_spill] sm:$0xff]  ;;  %v20397_v28 = vld [vmem:[#allocation134_spill] sm:$0xff] }
 0x338   : > { %v7476_v7 = vadd.f32 %v20387_v9, %v7283_v42  ;;  %v13293_v25 = vld [vmem:[%s14911_s19 + $0xb0] ss:$8 sps:$4 sm:$0xff]   ;;  %v12744_v15 = vpack.c.bf16 %v10371_v53, %v10370_v0  ;;  %v20391_v42 = vld [vmem:[#allocation131_spill] sm:$0xff]  ;;  %v16629_v9 = vpop.f32.mrf.mxu1  ;;  %8706 = vmatprep.subr.bf16.mxu0 %v12028_v34 }
 0x339   : > { %8648 = vmatmul.mubr.bf16.gmra.mxu1 %v13293_v25  ;;  %v20389_v11 = vld [vmem:[#allocation164_spill] sm:$0xff]  ;;  %v7291_v62 = vadd.f32 %v20391_v42, %v16158_v55  ;;  %20392 = vst [vmem:[#allocation90_spill] sm:$0xff] %v16629_v9  ;;  %v13295_v0 = vld [vmem:[%s14911_s19 + $0xc4] ss:$8 sps:$4 sm:$0xff]   ;;  %v7670_v42 = vpop.f32.mrf.mxu0  ;;  %v13296_v34 = vld [vmem:[%s14923_s16 + $0x20] ss:$8 sps:$4 sm:$0xff]   ;;  %8707 = vmatpush1.bf16.msra.mxu0 %v12027_v58 }
 0x33a   : > { %v7854_v40 = vadd.f32 %v20389_v11, %v7661_v10  ;;  %8657 = vmatprep.mubr.bf16.mxu1 %v13295_v0  ;;  %11330 = vst [vmem:[%s16259_s22 + $0x200] sm:$0xff] %v12744_v15  ;;  %v7667_v10 = vadd.f32 %v7666_v37, %v7474_v26  ;;  %v3418_v13 = vld [vmem:[%s19967_s6 + $0x90] sm:$0xff]  ;;  %v7478_v15 = vadd.f32 %v20394_v60, %v7285_v57  ;;  %v16643_v30 = vpop.f32.mrf.mxu1  ;;  %v20395_v37 = vld [vmem:[#allocation70_spill] sm:$0xff]  ;;  %v20396_v9 = vld [vmem:[#allocation71_spill] sm:$0xff] }
 0x33b   : > { %v3422_v38 = vld [vmem:[%s19967_s6 + $0xb0] sm:$0xff]  ;;  %v7669_v26 = vadd.f32 %v7668_v51, %v7476_v7  ;;  %v7482_v0 = vadd.f32 %v20395_v37, %v7289_v22  ;;  %v7484_v21 = vadd.f32 %v20396_v9, %v7291_v62  ;;  %v7295_v22 = vadd.f32 %v20397_v28, %v16158_v55  ;;  %v7674_v62 = vpop.f32.mrf.mxu0  ;;  %8365 = vmatmul.mubr.bf16.gmra.mxu0 %v13296_v34  ;;  %v13297_v51 = vld [vmem:[%s14911_s19 + $0xc0] ss:$8 sps:$4 sm:$0xff]   ;;  %v20400_v37 = vld [vmem:[#allocation137_spill] sm:$0xff] }
 0x33c   : > { %v10379_v53 = vmax.f32 %v7854_v40, 0.0  ;;  %v20393_v25 = vld [vmem:[#allocation132_spill] sm:$0xff]  ;;  %v7860_v39 = vadd.f32 %v16165_v61, %v7667_v10  ;;  %v16650_v57 = vpop.f32.mrf.mxu1  ;;  %v7671_v7 = vadd.f32 %v7670_v42, %v7478_v15 }
 0x33d   : > { %v7293_v11 = vadd.f32 %v20393_v25, %v16148_v3  ;;  %v12020_v25 = vcombine.high %v3418_v13, %v3422_v38  ;;  %v7862_v61 = vadd.f32 %v16178_v18, %v7669_v26  ;;  %v16657_v63 = vld [vmem:[%s19967_s6 + $0x50] sm:$0xff] }
 0x33e   : > { %v12748_v40 = vpack.c.bf16 %v10379_v53, %v10378_v27  ;;  %v10386_v27 = vmax.f32 %v7858_v20, 0.0  ;;  %v10387_v53 = vmax.f32 %v7860_v39, 0.0  ;;  %v16662_v23 = vld [vmem:[%s19967_s6 + $0x70] sm:$0xff]  ;;  %v12019_v20 = vcombine.low %v3418_v13, %v3422_v38  ;;  %v16668_v10 = vpop.f32.mrf.mxu1  ;;  %v7676_v13 = vpop.f32.mrf.mxu0 }
 0x33f   : > { %v20398_v9 = vld [vmem:[#allocation72_spill] sm:$0xff]  ;;  %v7864_v15 = vadd.f32 %v16190_v33, %v7671_v7  ;;  %8708 = vmatprep.subr.bf16.mxu0 %v12020_v25  ;;  %v12012_v38 = vcombine.high %v16657_v63, %v16662_v23  ;;  %v10394_v33 = vmax.f32 %v7862_v61, 0.0 }
 0x340   : > { %11334 = vst [vmem:[%s16259_s22 + $0x220] sm:$0xff] %v12748_v40  ;;  %v7486_v18 = vadd.f32 %v20398_v9, %v7293_v11  ;;  %v12752_v60 = vpack.c.bf16 %v10387_v53, %v10386_v27  ;;  %v7675_v40 = vadd.f32 %v7674_v62, %v7482_v0  ;;  %v13298_v39 = vld [vmem:[%s14923_s16 + $0x34] ss:$8 sps:$4 sm:$0xff]   ;;  %v7301_v11 = vadd.f32 %v20400_v37, %v16158_v55  ;;  %v16679_v28 = vpop.f32.mrf.mxu1  ;;  %v20402_v62 = vld [vmem:[#allocation138_spill] sm:$0xff]  ;;  %v7678_v9 = vpop.f32.mrf.mxu0 }
 0x341   : > { %8658 = vmatmul.mubr.bf16.gmra.mxu1 %v13297_v51  ;;  %8374 = vmatprep.mubr.bf16.mxu0 %v13298_v39  ;;  %v20399_v26 = vld [vmem:[#allocation136_spill] sm:$0xff]  ;;  %20401 = vst [vmem:[#allocation28_spill] sm:$0xff] %v16679_v28  ;;  %v10395_v0 = vmax.f32 %v7864_v15, 0.0  ;;  %v7677_v53 = vadd.f32 %v7676_v13, %v7484_v21  ;;  %v7303_v34 = vadd.f32 %v20402_v62, %v16148_v3  ;;  %v20403_v51 = vld [vmem:[#allocation73_spill] sm:$0xff]  ;;  %v20406_v13 = vld [vmem:[#allocation75_spill] sm:$0xff] }
 0x342   : > { %v7299_v42 = vadd.f32 %v20399_v26, %v16148_v3  ;;  %v13299_v27 = vld [vmem:[%s14911_s19 + $0xd4] ss:$8 sps:$4 sm:$0xff]   ;;  %11338 = vst [vmem:[%s16259_s22 + $0x240] sm:$0xff] %v12752_v60  ;;  %v7868_v58 = vadd.f32 %v16196_v17, %v7675_v40  ;;  %v7488_v60 = vadd.f32 %v20403_v51, %v7295_v22  ;;  %v16693_v61 = vpop.f32.mrf.mxu1  ;;  %v7679_v21 = vadd.f32 %v7678_v9, %v7486_v18  ;;  %v7680_v39 = vpop.f32.mrf.mxu0  ;;  %v20405_v26 = vld [vmem:[#allocation74_spill] sm:$0xff]  ;;  %v13301_v51 = vld [vmem:[%s14911_s19 + $0xd0] ss:$8 sps:$4 sm:$0xff]  }
 0x343   : > { %8667 = vmatprep.mubr.bf16.mxu1 %v13299_v27  ;;  %v3402_v7 = vld [vmem:[%s19967_s6 + $0x10] sm:$0xff]  ;;  %20404 = vst [vmem:[#allocation123_spill] sm:$0xff] %v16693_v61  ;;  %v12756_v15 = vpack.c.bf16 %v10395_v0, %v10394_v33  ;;  %v7870_v17 = vadd.f32 %v16207_v4, %v7677_v53  ;;  %8709 = vmatpush1.bf16.msra.mxu0 %v12019_v20  ;;  %v20561_v61 = vld [vmem:[#allocation6_spill] sm:$0xff] }
 0x344   : > { %v3406_v25 = vld [vmem:[%s19967_s6 + $0x30] sm:$0xff]  ;;  %v12011_v40 = vcombine.low %v16657_v63, %v16662_v23  ;;  %v7492_v37 = vadd.f32 %v20405_v26, %v7299_v42  ;;  %v7494_v27 = vadd.f32 %v20406_v13, %v7301_v11  ;;  %8710 = vmatprep.subr.bf16.mxu0 %v12012_v38  ;;  %v16700_v22 = vpop.f32.mrf.mxu1  ;;  %v10402_v33 = vmax.f32 %v7868_v58, 0.0  ;;  %v7684_v11 = vpop.f32.mrf.mxu0  ;;  %v20412_v13 = vld [vmem:[#allocation143_spill] sm:$0xff] }
 0x345   : > { %v12004_v62 = vcombine.high %v3402_v7, %v3406_v25  ;;  %20407 = vst [vmem:[#allocation92_spill] sm:$0xff] %v16700_v22  ;;  %11342 = vst [vmem:[%s16259_s22 + $0x260] sm:$0xff] %v12756_v15  ;;  %v10403_v0 = vmax.f32 %v7870_v17, 0.0  ;;  %v7872_v4 = vadd.f32 %v16219_v2, %v7679_v21  ;;  %v7681_v18 = vadd.f32 %v7680_v39, %v7488_v60  ;;  %v16707_v63 = vld [vmem:[%s19967_s6 + $0x3d0] sm:$0xff]  ;;  %v13302_v21 = vld [vmem:[%s14923_s16 + $0x44] ss:$8 sps:$4 sm:$0xff]  }
 0x346   : > { %v16712_v23 = vld [vmem:[%s19967_s6 + $0x3f0] sm:$0xff]  ;;  %v12003_v53 = vcombine.low %v3402_v7, %v3406_v25  ;;  %v16718_v9 = vpop.f32.mrf.mxu1  ;;  %v7685_v17 = vadd.f32 %v7684_v11, %v7492_v37  ;;  %v20411_v39 = vld [vmem:[#allocation142_spill] sm:$0xff]  ;;  %v7686_v7 = vpop.f32.mrf.mxu0 }
 0x347   : > { %v20408_v20 = vld [vmem:[#allocation140_spill] sm:$0xff]  ;;  %20410 = vst [vmem:[#allocation125_spill] sm:$0xff] %v16718_v9  ;;  %v12760_v60 = vpack.c.bf16 %v10403_v0, %v10402_v33  ;;  %v7874_v15 = vadd.f32 %v16238_v32, %v7681_v18  ;;  %8711 = vmatpush1.bf16.msra.mxu0 %v12011_v40  ;;  %v7309_v26 = vadd.f32 %v20411_v39, %v16148_v3  ;;  %v13303_v33 = vld [vmem:[%s14911_s19 + $0xe4] ss:$8 sps:$4 sm:$0xff]   ;;  %v10410_v32 = vmax.f32 %v7872_v4, 0.0 }
 0x348   : > { %v7305_v42 = vadd.f32 %v20408_v20, %v16158_v55  ;;  %v13300_v38 = vld [vmem:[%s14923_s16 + $0x30] ss:$8 sps:$4 sm:$0xff]   ;;  %8712 = vmatprep.subr.bf16.mxu0 %v12004_v62  ;;  %v12124_v25 = vcombine.high %v16707_v63, %v16712_v23  ;;  %v16729_v20 = vpop.f32.mrf.mxu1  ;;  %v7878_v40 = vadd.f32 %v16245_v52, %v7685_v17  ;;  %v7687_v0 = vadd.f32 %v7686_v7, %v7494_v27  ;;  %v7688_v11 = vpop.f32.mrf.mxu0  ;;  %v20417_v39 = vld [vmem:[#allocation78_spill] sm:$0xff]  ;;  %v20418_v7 = vld [vmem:[#allocation79_spill] sm:$0xff] }
 0x349   : > { %8375 = vmatmul.mubr.bf16.gmra.mxu0 %v13300_v38  ;;  %v20409_v58 = vld [vmem:[#allocation76_spill] sm:$0xff]  ;;  %8668 = vmatmul.mubr.bf16.gmra.mxu1 %v13301_v51  ;;  %20413 = vst [vmem:[#allocation30_spill] sm:$0xff] %v16729_v20  ;;  %11346 = vst [vmem:[%s16259_s22 + $0x280] sm:$0xff] %v12760_v60  ;;  %v10411_v37 = vmax.f32 %v7874_v15, 0.0  ;;  %v20414_v38 = vld [vmem:[#allocation77_spill] sm:$0xff]  ;;  %v12123_v52 = vcombine.low %v16707_v63, %v16712_v23 }
 0x34a   : > { %v7496_v2 = vadd.f32 %v20409_v58, %v7303_v34  ;;  %8384 = vmatprep.mubr.bf16.mxu0 %v13302_v21  ;;  %v7311_v34 = vadd.f32 %v20412_v13, %v16158_v55  ;;  %8677 = vmatprep.mubr.bf16.mxu1 %v13303_v33  ;;  %v3514_v18 = vld [vmem:[%s19967_s6 + $0x390] sm:$0xff]  ;;  %v7498_v58 = vadd.f32 %v20414_v38, %v7305_v42  ;;  %v16741_v51 = vpop.f32.mrf.mxu1  ;;  %v20416_v27 = vld [vmem:[#allocation145_spill] sm:$0xff]  ;;  %v7690_v21 = vpop.f32.mrf.mxu0 }
 0x34b   : > { %v3518_v62 = vld [vmem:[%s19967_s6 + $0x3b0] sm:$0xff]  ;;  %20415 = vst [vmem:[#allocation94_spill] sm:$0xff] %v16741_v51  ;;  %v12764_v60 = vpack.c.bf16 %v10411_v37, %v10410_v32  ;;  %v7880_v4 = vadd.f32 %v16255_v41, %v7687_v0  ;;  %8713 = vmatpush1.bf16.msra.mxu0 %v12003_v53  ;;  %v7313_v17 = vadd.f32 %v20416_v27, %v16148_v3  ;;  %v10418_v41 = vmax.f32 %v7878_v40, 0.0  ;;  %v20421_v37 = vld [vmem:[#allocation149_spill] sm:$0xff] }
 0x34c   : > { %v7689_v15 = vadd.f32 %v7688_v11, %v7496_v2  ;;  %v7502_v13 = vadd.f32 %v20417_v39, %v7309_v26  ;;  %v7504_v33 = vadd.f32 %v20418_v7, %v7311_v34  ;;  %8714 = vmatprep.subr.bf16.mxu0 %v12124_v25  ;;  %v12116_v42 = vcombine.high %v3514_v18, %v3518_v62  ;;  %v16750_v32 = vpop.f32.mrf.mxu1  ;;  %v16757_v23 = vld [vmem:[%s19967_s6 + $0x350] sm:$0xff]  ;;  %v20420_v34 = vld [vmem:[#allocation147_spill] sm:$0xff]  ;;  %v7694_v0 = vpop.f32.mrf.mxu0 }
 0x34d   : > { %20419 = vst [vmem:[#allocation31_spill] sm:$0xff] %v16750_v32  ;;  %11350 = vst [vmem:[%s16259_s22 + $0x2a0] sm:$0xff] %v12764_v60  ;;  %v10419_v2 = vmax.f32 %v7880_v4, 0.0  ;;  %v7691_v63 = vadd.f32 %v7690_v21, %v7498_v58  ;;  %v16762_v26 = vld [vmem:[%s19967_s6 + $0x370] sm:$0xff]  ;;  %v7315_v25 = vadd.f32 %v20420_v34, %v16158_v55  ;;  %v7319_v40 = vadd.f32 %v20421_v37, %v16148_v3  ;;  %v13305_v58 = vld [vmem:[%s14911_s19 + $0xe0] ss:$8 sps:$4 sm:$0xff]  }
 0x34e   : > { %v7882_v53 = vadd.f32 %v16271_v6, %v7689_v15  ;;  %v13304_v6 = vld [vmem:[%s14923_s16 + $0x40] ss:$8 sps:$4 sm:$0xff]   ;;  %v12115_v11 = vcombine.low %v3514_v18, %v3518_v62  ;;  %v16769_v38 = vpop.f32.mrf.mxu1  ;;  %v7695_v15 = vadd.f32 %v7694_v0, %v7502_v13  ;;  %v13306_v27 = vld [vmem:[%s14923_s16 + $0x54] ss:$8 sps:$4 sm:$0xff]   ;;  %v7696_v7 = vpop.f32.mrf.mxu0  ;;  %v12108_v18 = vcombine.high %v16757_v23, %v16762_v26  ;;  %v13366_v28 = vld [vmem:[%s14911_s19 + $0x10] ss:$8 sps:$4 sm:$0xff]  }
 0x34f   : > { %20422 = vst [vmem:[#allocation127_spill] sm:$0xff] %v16769_v38  ;;  %v12768_v60 = vpack.c.bf16 %v10419_v2, %v10418_v41  ;;  %v7884_v4 = vadd.f32 %v16284_v12, %v7691_v63  ;;  %8715 = vmatpush2.bf16.msra.mxu0 %v12123_v52  ;;  %v20423_v21 = vld [vmem:[#allocation151_spill] sm:$0xff]  ;;  %v20424_v34 = vld [vmem:[#allocation80_spill] sm:$0xff]  ;;  %v7697_v52 = vadd.f32 %v7696_v7, %v7504_v33  ;;  %v20426_v63 = vld [vmem:[#allocation81_spill] sm:$0xff] }
 0x350   : > { %v7321_v39 = vadd.f32 %v20423_v21, %v16158_v55  ;;  %v7506_v37 = vadd.f32 %v20424_v34, %v7313_v17  ;;  %8716 = vmatprep.subr.bf16.mxu0 %v12116_v42  ;;  %v16779_v62 = vpop.f32.mrf.mxu1  ;;  %v10426_v12 = vmax.f32 %v7882_v53, 0.0  ;;  %v7888_v41 = vadd.f32 %v16292_v5, %v7695_v15  ;;  %v16787_v2 = vld [vmem:[%s19967_s6 + $0x310] sm:$0xff]  ;;  %v7698_v42 = vpop.f32.mrf.mxu0  ;;  %v20430_v7 = vld [vmem:[#allocation155_spill] sm:$0xff] }
 0x351   : > { %8385 = vmatmul.mubr.bf16.gmra.mxu0 %v13304_v6  ;;  %8678 = vmatmul.mubr.bf16.gmra.mxu1 %v13305_v58  ;;  %20425 = vst [vmem:[#allocation96_spill] sm:$0xff] %v16779_v62  ;;  %v13307_v6 = vld [vmem:[%s14911_s19 + $0xf4] ss:$8 sps:$4 sm:$0xff]   ;;  %11354 = vst [vmem:[%s16259_s22 + $0x2c0] sm:$0xff] %v12768_v60  ;;  %v10427_v13 = vmax.f32 %v7884_v4, 0.0  ;;  %v7508_v0 = vadd.f32 %v20426_v63, %v7315_v25  ;;  %v20427_v58 = vld [vmem:[#allocation83_spill] sm:$0xff]  ;;  %v7890_v33 = vadd.f32 %v16301_v8, %v7697_v52 }
 0x352   : > { %8394 = vmatprep.mubr.bf16.mxu0 %v13306_v27  ;;  %8687 = vmatprep.mubr.bf16.mxu1 %v13307_v6  ;;  %v16792_v17 = vld [vmem:[%s19967_s6 + $0x330] sm:$0xff]  ;;  %v7512_v53 = vadd.f32 %v20427_v58, %v7319_v40  ;;  %v16796_v60 = vpop.f32.mrf.mxu1  ;;  %v7699_v4 = vadd.f32 %v7698_v42, %v7506_v37  ;;  %v12107_v15 = vcombine.low %v16757_v23, %v16762_v26  ;;  %v20429_v27 = vld [vmem:[#allocation153_spill] sm:$0xff]  ;;  %v7700_v25 = vpop.f32.mrf.mxu0 }
 0x353   : > { %20428 = vst [vmem:[#allocation34_spill] sm:$0xff] %v16796_v60  ;;  %v12772_v5 = vpack.c.bf16 %v10427_v13, %v10426_v12  ;;  %8717 = vmatpush2.bf16.msra.mxu0 %v12115_v11  ;;  %v7323_v21 = vadd.f32 %v20429_v27, %v16148_v3  ;;  %v7325_v34 = vadd.f32 %v20430_v7, %v16158_v55  ;;  %v20431_v6 = vld [vmem:[#allocation85_spill] sm:$0xff]  ;;  %v10434_v11 = vmax.f32 %v7888_v41, 0.0  ;;  %v16815_v13 = vld [vmem:[%s19967_s6 + $0x2d0] sm:$0xff]  ;;  %v20434_v41 = vld [vmem:[#allocation159_spill] sm:$0xff] }
 0x354   : > { %v7514_v40 = vadd.f32 %v20431_v6, %v7321_v39  ;;  %8718 = vmatprep.subr.bf16.mxu0 %v12108_v18  ;;  %v12100_v12 = vcombine.high %v16787_v2, %v16792_v17  ;;  %v16808_v8 = vpop.f32.mrf.mxu1  ;;  %v10435_v23 = vmax.f32 %v7890_v33, 0.0  ;;  %v7892_v26 = vadd.f32 %v16313_v14, %v7699_v4  ;;  %v16820_v39 = vld [vmem:[%s19967_s6 + $0x2f0] sm:$0xff]  ;;  %v20433_v18 = vld [vmem:[#allocation157_spill] sm:$0xff]  ;;  %v7704_v63 = vpop.f32.mrf.mxu0  ;;  %v13310_v7 = vld [vmem:[%s14923_s16 + $0x64] ss:$8 sps:$4 sm:$0xff]  }
 0x355   : > { %20432 = vst [vmem:[#allocation129_spill] sm:$0xff] %v16808_v8  ;;  %11358 = vst [vmem:[%s16259_s22 + $0x2e0] sm:$0xff] %v12772_v5  ;;  %v7701_v37 = vadd.f32 %v7700_v25, %v7508_v0  ;;  %v7329_v52 = vadd.f32 %v20433_v18, %v16148_v3  ;;  %v7331_v42 = vadd.f32 %v20434_v41, %v16158_v55  ;;  %v13308_v14 = vld [vmem:[%s14923_s16 + $0x50] ss:$8 sps:$4 sm:$0xff]   ;;  %v20437_v41 = vld [vmem:[#allocation87_spill] sm:$0xff] }
 0x356   : > { %v12099_v0 = vcombine.low %v16787_v2, %v16792_v17  ;;  %v16829_v58 = vpop.f32.mrf.mxu1  ;;  %v13309_v5 = vld [vmem:[%s14911_s19 + $0xf0] ss:$8 sps:$4 sm:$0xff]   ;;  %v12776_v33 = vpack.c.bf16 %v10435_v23, %v10434_v11  ;;  %v7705_v27 = vadd.f32 %v7704_v63, %v7512_v53  ;;  %v7706_v18 = vpop.f32.mrf.mxu0  ;;  %v12092_v2 = vcombine.high %v16815_v13, %v16820_v39  ;;  %v13311_v53 = vld [vmem:[%s14532_s25 + $0x4] ss:$8 sps:$4 sm:$0xff]  }
 0x357   : > { %20435 = vst [vmem:[#allocation98_spill] sm:$0xff] %v16829_v58  ;;  %v7894_v4 = vadd.f32 %v16320_v59, %v7701_v37  ;;  %8719 = vmatpush2.bf16.msra.mxu0 %v12107_v15  ;;  %v20436_v25 = vld [vmem:[#allocation161_spill] sm:$0xff]  ;;  %v16842_v17 = vld [vmem:[%s19967_s6 + $0x290] sm:$0xff]  ;;  %v10442_v15 = vmax.f32 %v7892_v26, 0.0  ;;  %v7707_v37 = vadd.f32 %v7706_v18, %v7514_v40  ;;  %v20439_v26 = vld [vmem:[#allocation163_spill] sm:$0xff]  ;;  %v12091_v58 = vcombine.low %v16815_v13, %v16820_v39 }
 0x358   : > { %v7333_v6 = vadd.f32 %v20436_v25, %v16148_v3  ;;  %8720 = vmatprep.subr.bf16.mxu0 %v12100_v12  ;;  %v16844_v59 = vpop.f32.mrf.mxu1  ;;  %11362 = vst [vmem:[%s16259_s22 + $0x300] sm:$0xff] %v12776_v33  ;;  %v7898_v23 = vadd.f32 %v16328_v45, %v7705_v27  ;;  %v16857_v12 = vld [vmem:[%s19967_s6 + $0xd90] sm:$0xff]  ;;  %v7708_v45 = vpop.f32.mrf.mxu0  ;;  %v20440_v40 = vld [vmem:[#allocation89_spill] sm:$0xff] }
 0x359   : > { %8395 = vmatmul.mubr.bf16.gmra.mxu0 %v13308_v14  ;;  %8688 = vmatmul.mubr.bf16.gmra.mxu1 %v13309_v5  ;;  %v7516_v14 = vadd.f32 %v20437_v41, %v7323_v21  ;;  %20438 = vst [vmem:[#allocation32_spill] sm:$0xff] %v16844_v59  ;;  %v10443_v11 = vmax.f32 %v7894_v4, 0.0  ;;  %v16852_v21 = vld [vmem:[%s19967_s6 + $0x2b0] sm:$0xff]  ;;  %v7335_v5 = vadd.f32 %v20439_v26, %v16158_v55  ;;  %v20441_v4 = vld [vmem:[#allocation91_spill] sm:$0xff] }
 0x35a   : > { %8404 = vmatprep.mubr.bf16.mxu0 %v13310_v7  ;;  %8923 = vmatprep.mubr.bf16.mxu1 %v13311_v53  ;;  %v16862_v63 = vld [vmem:[%s19967_s6 + $0xdb0] sm:$0xff]  ;;  %v7518_v33 = vadd.f32 %v20440_v40, %v7325_v34  ;;  %v7522_v27 = vadd.f32 %v20441_v4, %v7329_v52  ;;  %v20442_v7 = vld [vmem:[#allocation93_spill] sm:$0xff]  ;;  %v16869_v18 = vpop.f32.mrf.mxu1  ;;  %v7900_v53 = vadd.f32 %v16337_v48, %v7707_v37  ;;  %v7710_v8 = vpop.f32.mrf.mxu0  ;;  %v20444_v26 = vld [vmem:[#allocation95_spill] sm:$0xff]  ;;  %v10450_v39 = vmax.f32 %v7898_v23, 0.0 }
 0x35b   : > { %v7524_v25 = vadd.f32 %v20442_v7, %v7331_v42  ;;  %20443 = vst [vmem:[#allocation100_spill] sm:$0xff] %v16869_v18  ;;  %v12780_v41 = vpack.c.bf16 %v10443_v11, %v10442_v15  ;;  %v7709_v59 = vadd.f32 %v7708_v45, %v7516_v14  ;;  %8721 = vmatpush2.bf16.msra.mxu0 %v12099_v0  ;;  %v16880_v52 = vld [vmem:[%s19967_s6 + $0x250] sm:$0xff]  ;;  %v13312_v15 = vld [vmem:[%s14923_s16 + $0x60] ss:$8 sps:$4 sm:$0xff]  }
 0x35c   : > { %v7526_v60 = vadd.f32 %v20444_v26, %v7333_v6  ;;  %8722 = vmatprep.subr.bf16.mxu0 %v12092_v2  ;;  %v12084_v34 = vcombine.high %v16842_v17, %v16852_v21  ;;  %v16882_v42 = vpop.f32.mrf.mxu1  ;;  %v12443_v48 = vcombine.low %v16577_v29, %v16582_v16  ;;  %v12436_v13 = vcombine.high %v16857_v12, %v16862_v63  ;;  %v16893_v2 = vld [vmem:[%s19967_s6 + $0x270] sm:$0xff]  ;;  %v13313_v37 = vld [vmem:[%s14532_s25] ss:$8 sps:$4 sm:$0xff]  }
 0x35d   : > { %20445 = vst [vmem:[#allocation33_spill] sm:$0xff] %v16882_v42  ;;  %11366 = vst [vmem:[%s16259_s22 + $0x320] sm:$0xff] %v12780_v41  ;;  %v10451_v0 = vmax.f32 %v7900_v53, 0.0  ;;  %v7902_v6 = vadd.f32 %v16349_v24, %v7709_v59  ;;  %v7711_v14 = vadd.f32 %v7710_v8, %v7518_v33  ;;  %v16898_v29 = vld [vmem:[%s19967_s6 + $0xd50] sm:$0xff]  ;;  %v7339_v24 = vadd.f32 %v16150_v36, %v16148_v3  ;;  %v7714_v59 = vpop.f32.mrf.mxu0 }
 0x35e   : > { %v16903_v16 = vld [vmem:[%s19967_s6 + $0xd70] sm:$0xff]  ;;  %v7341_v8 = vadd.f32 %v16161_v54, %v16158_v55  ;;  %v12083_v11 = vcombine.low %v16842_v17, %v16852_v21  ;;  %v16912_v23 = vpop.f32.mrf.mxu1  ;;  %v7715_v33 = vadd.f32 %v7714_v59, %v7522_v27  ;;  %v12076_v54 = vcombine.high %v16880_v52, %v16893_v2 }
 0x35f   : > { %20446 = vst [vmem:[#allocation102_spill] sm:$0xff] %v16912_v23  ;;  %v12784_v45 = vpack.c.bf16 %v10451_v0, %v10450_v39  ;;  %v7904_v40 = vadd.f32 %v16356_v46, %v7711_v14  ;;  %v13314_v4 = vld [vmem:[%s14923_s16 + $0x74] ss:$8 sps:$4 sm:$0xff]   ;;  %8723 = vmatpush2.bf16.msra.mxu0 %v12091_v58  ;;  %v7716_v36 = vpop.f32.mrf.mxu0  ;;  %v12435_v17 = vcombine.low %v16857_v12, %v16862_v63  ;;  %v10458_v46 = vmax.f32 %v7902_v6, 0.0 }
 0x360   : > { %8724 = vmatprep.subr.bf16.mxu0 %v12084_v34  ;;  %v16919_v7 = vpop.f32.mrf.mxu1  ;;  %v12428_v21 = vcombine.high %v16898_v29, %v16903_v16  ;;  %v7908_v41 = vadd.f32 %v16364_v31, %v7715_v33  ;;  %v7717_v58 = vadd.f32 %v7716_v36, %v7524_v25  ;;  %v16930_v53 = vld [vmem:[%s19967_s6 + $0x210] sm:$0xff]  ;;  %v20448_v63 = vld [vmem:[#allocation165_spill] sm:$0xff]  ;;  %v20450_v25 = vld [vmem:[#allocation99_spill] sm:$0xff] }
 0x361   : > { %8405 = vmatmul.mubr.bf16.gmra.mxu0 %v13312_v15  ;;  %8924 = vmatmul.mubr.bf16.vlgmr.msra.gmra.mxu1 %v13313_v37  ;;  %20447 = vst [vmem:[#allocation35_spill] sm:$0xff] %v16919_v7  ;;  %11370 = vst [vmem:[%s16259_s22 + $0x340] sm:$0xff] %v12784_v45  ;;  %v10459_v27 = vmax.f32 %v7904_v40, 0.0  ;;  %v16935_v26 = vld [vmem:[%s19967_s6 + $0x230] sm:$0xff]  ;;  %v7343_v34 = vadd.f32 %v20448_v63, %v16148_v3  ;;  %v20449_v39 = vld [vmem:[#allocation97_spill] sm:$0xff]  ;;  %v7532_v0 = vadd.f32 %v20450_v25, %v7339_v24 }
 0x362   : > { %8414 = vmatprep.mubr.bf16.mxu0 %v13314_v4  ;;  %9278 = vmatpush1.bf16.msra.mxu1 %v12443_v48  ;;  %v13315_v12 = vld [vmem:[%s14532_s25 + $0x14] ss:$8 sps:$4 sm:$0xff]   ;;  %v7718_v48 = vpop.f32.mrf.mxu0  ;;  %v7528_v31 = vadd.f32 %v20449_v39, %v7335_v5  ;;  %v16942_v6 = vpop.f32.mrf.mxu1  ;;  %v7910_v59 = vadd.f32 %v16373_v19, %v7717_v58  ;;  %v12075_v37 = vcombine.low %v16880_v52, %v16893_v2  ;;  %v10466_v2 = vmax.f32 %v7908_v41, 0.0  ;;  %v20456_v58 = vld [vmem:[#allocation103_spill] sm:$0xff] }
 0x363   : > { %8933 = vmatprep.mubr.bf16.mxu1 %v13315_v12  ;;  %9279 = vmatprep.subr.bf16.mxu1 %v12436_v13  ;;  %20451 = vst [vmem:[#allocation133_spill] sm:$0xff] %v16942_v6  ;;  %v12788_v14 = vpack.c.bf16 %v10459_v27, %v10458_v46  ;;  %v7719_v15 = vadd.f32 %v7718_v48, %v7526_v60  ;;  %v16950_v3 = vld [vmem:[%s19967_s6 + $0xd10] sm:$0xff]  ;;  %v20452_v24 = vld [vmem:[#allocation101_spill] sm:$0xff]  ;;  %v13319_v63 = vld [vmem:[%s14532_s25 + $0x24] ss:$8 sps:$4 sm:$0xff]  }
 0x364   : > { %8725 = vmatpush2.bf16.msra.mxu0 %v12083_v11  ;;  %v16955_v5 = vld [vmem:[%s19967_s6 + $0xd30] sm:$0xff]  ;;  %v7720_v13 = vpop.f32.mrf.mxu0  ;;  %v7534_v45 = vadd.f32 %v20452_v24, %v7341_v8  ;;  %v12068_v19 = vcombine.high %v16930_v53, %v16935_v26  ;;  %v16960_v60 = vpop.f32.mrf.mxu1  ;;  %v12427_v52 = vcombine.low %v16898_v29, %v16903_v16  ;;  %v10467_v11 = vmax.f32 %v7910_v59, 0.0  ;;  %v20454_v8 = vld [vmem:[#allocation166_spill] sm:$0xff] }
 0x365   : > { %8726 = vmatprep.subr.bf16.mxu0 %v12076_v54  ;;  %20453 = vst [vmem:[#allocation104_spill] sm:$0xff] %v16960_v60  ;;  %11374 = vst [vmem:[%s16259_s22 + $0x360] sm:$0xff] %v12788_v14  ;;  %v7912_v40 = vadd.f32 %v16385_v50, %v7719_v15  ;;  %v7721_v33 = vadd.f32 %v7720_v13, %v7528_v31  ;;  %v7345_v4 = vadd.f32 %v20454_v8, %v16158_v55  ;;  %v13316_v54 = vld [vmem:[%s14923_s16 + $0x70] ss:$8 sps:$4 sm:$0xff]   ;;  %v13318_v55 = vld [vmem:[%s14923_s16 + $0x84] ss:$8 sps:$4 sm:$0xff]  }
 0x366   : > { %9280 = vmatpush1.bf16.msra.mxu1 %v12435_v17  ;;  %v7724_v36 = vpop.f32.mrf.mxu0  ;;  %v12067_v17 = vcombine.low %v16930_v53, %v16935_v26  ;;  %v16971_v46 = vpop.f32.mrf.mxu1  ;;  %v13317_v29 = vld [vmem:[%s14532_s25 + $0x10] ss:$8 sps:$4 sm:$0xff]   ;;  %v12420_v50 = vcombine.high %v16950_v3, %v16955_v5  ;;  %v12792_v16 = vpack.c.bf16 %v10467_v11, %v10466_v2  ;;  %v7536_v12 = vadd.f32 %v20456_v58, %v7343_v34  ;;  %v13350_v60 = vld [vmem:[%s14532_s25 + $0xa4] ss:$8 sps:$4 sm:$0xff]  }
 0x367   : > { %9281 = vmatprep.subr.bf16.mxu1 %v12428_v21  ;;  %20455 = vst [vmem:[#allocation36_spill] sm:$0xff] %v16971_v46  ;;  %v7914_v21 = vadd.f32 %v16392_v35, %v7721_v33  ;;  %v7725_v27 = vadd.f32 %v7724_v36, %v7532_v0  ;;  %v12316_v53 = vcombine.high %v16546_v44, %v16551_v56  ;;  %v10474_v35 = vmax.f32 %v7912_v40, 0.0  ;;  %v3810_v34 = vld [vmem:[%s19967_s6 + $0xcd0] sm:$0xff]  ;;  %v20461_v40 = vld [vmem:[#allocation23_spill] sm:$0xff] }
 0x368   : > { %8727 = vmatpush2.bf16.msra.mxu0 %v12075_v37  ;;  %v7726_v41 = vpop.f32.mrf.mxu0  ;;  %v16981_v26 = vpop.f32.mrf.mxu1  ;;  %v12419_v48 = vcombine.low %v16950_v3, %v16955_v5  ;;  %11378 = vst [vmem:[%s16259_s22 + $0x380] sm:$0xff] %v12792_v16  ;;  %v3814_v0 = vld [vmem:[%s19967_s6 + $0xcf0] sm:$0xff]  ;;  %v13320_v36 = vld [vmem:[%s14923_s16 + $0x80] ss:$8 sps:$4 sm:$0xff]  }
 0x369   : > { %8415 = vmatmul.mubr.bf16.gmra.mxu0 %v13316_v54  ;;  %8934 = vmatmul.mubr.bf16.gmra.mxu1 %v13317_v29  ;;  %20457 = vst [vmem:[#allocation135_spill] sm:$0xff] %v16981_v26  ;;  %v10475_v39 = vmax.f32 %v7914_v21, 0.0  ;;  %v7918_v31 = vadd.f32 %v16400_v1, %v7725_v27  ;;  %v7727_v25 = vadd.f32 %v7726_v41, %v7534_v45  ;;  %v20459_v1 = vld [vmem:[#allocation105_spill] sm:$0xff]  ;;  %v3802_v13 = vld [vmem:[%s19967_s6 + $0xc90] sm:$0xff]  ;;  %v20463_v16 = vld [vmem:[#allocation114_spill] sm:$0xff] }
 0x36a   : > { %8424 = vmatprep.mubr.bf16.mxu0 %v13318_v55  ;;  %8728 = vmatprep.subr.bf16.mxu0 %v12068_v19  ;;  %v7728_v14 = vpop.f32.mrf.mxu0  ;;  %v16994_v59 = vpop.f32.mrf.mxu1  ;;  %v7538_v5 = vadd.f32 %v20459_v1, %v7345_v4  ;;  %v3806_v24 = vld [vmem:[%s19967_s6 + $0xcb0] sm:$0xff]  ;;  %v20497_v46 = vld [vmem:[#allocation43_spill] sm:$0xff] }
 0x36b   : > { %8943 = vmatprep.mubr.bf16.mxu1 %v13319_v63  ;;  %9282 = vmatpush1.bf16.msra.mxu1 %v12427_v52  ;;  %20458 = vst [vmem:[#allocation106_spill] sm:$0xff] %v16994_v59  ;;  %v12796_v15 = vpack.c.bf16 %v10475_v39, %v10474_v35  ;;  %v7920_v37 = vadd.f32 %v16409_v43, %v7727_v25  ;;  %v10482_v2 = vmax.f32 %v7918_v31, 0.0  ;;  %v13322_v27 = vld [vmem:[%s14923_s16 + $0x94] ss:$8 sps:$4 sm:$0xff]  }
 0x36c   : > { %9283 = vmatprep.subr.bf16.mxu1 %v12420_v50  ;;  %v7729_v3 = vadd.f32 %v7728_v14, %v7536_v12  ;;  %8729 = vmatpush2.bf16.msra.mxu0 %v12067_v17  ;;  %v7730_v45 = vpop.f32.mrf.mxu0  ;;  %v17004_v19 = vpop.f32.mrf.mxu1  ;;  %v12411_v52 = vcombine.low %v3810_v34, %v3814_v0  ;;  %v12412_v43 = vcombine.high %v3810_v34, %v3814_v0  ;;  %v13321_v17 = vld [vmem:[%s14532_s25 + $0x20] ss:$8 sps:$4 sm:$0xff]   ;;  %v13323_v55 = vld [vmem:[%s14532_s25 + $0x34] ss:$8 sps:$4 sm:$0xff]  }
 0x36d   : > { %9084 = vmatprep.subr.bf16.mxu0 %v12316_v53  ;;  %20460 = vst [vmem:[#allocation39_spill] sm:$0xff] %v17004_v19  ;;  %11382 = vst [vmem:[%s16259_s22 + $0x3a0] sm:$0xff] %v12796_v15  ;;  %v10483_v11 = vmax.f32 %v7920_v37, 0.0  ;;  %v7731_v8 = vadd.f32 %v7730_v45, %v7538_v5  ;;  %v12404_v29 = vcombine.high %v3802_v13, %v3806_v24  ;;  %v3798_v35 = vld [vmem:[%s19967_s6 + $0xc70] sm:$0xff] }
 0x36e   : > { %v7922_v33 = vadd.f32 %v20461_v40, %v7729_v3  ;;  %v17008_v4 = vpop.f32.mrf.mxu0  ;;  %v17011_v54 = vpop.f32.mrf.mxu1  ;;  %v12403_v63 = vcombine.low %v3802_v13, %v3806_v24  ;;  %v3786_v34 = vld [vmem:[%s19967_s6 + $0xc10] sm:$0xff] }
 0x36f   : > { %9284 = vmatpush1.bf16.msra.mxu1 %v12419_v48  ;;  %20462 = vst [vmem:[#allocation107_spill] sm:$0xff] %v17011_v54  ;;  %v12800_v50 = vpack.c.bf16 %v10483_v11, %v10482_v2  ;;  %v7924_v21 = vadd.f32 %v20463_v16, %v7731_v8  ;;  %v3794_v48 = vld [vmem:[%s19967_s6 + $0xc50] sm:$0xff] }
 0x370   : > { %v17017_v41 = vpop.f32.mrf.mxu0  ;;  %v17019_v58 = vpop.f32.mrf.mxu1  ;;  %9285 = vmatprep.subr.bf16.mxu1 %v12412_v43  ;;  %v10490_v12 = vmax.f32 %v7922_v33, 0.0  ;;  %v3790_v0 = vld [vmem:[%s19967_s6 + $0xc30] sm:$0xff]  ;;  %v12396_v37 = vcombine.high %v3794_v48, %v3798_v35  ;;  %v12395_v3 = vcombine.low %v3794_v48, %v3798_v35  ;;  %v13327_v43 = vld [vmem:[%s14532_s25 + $0x44] ss:$8 sps:$4 sm:$0xff]  }
 0x371   : > { %8425 = vmatmul.mubr.bf16.gmra.mxu0 %v13320_v36  ;;  %8944 = vmatmul.mubr.bf16.gmra.mxu1 %v13321_v17  ;;  %20464 = vst [vmem:[#allocation37_spill] sm:$0xff] %v17019_v58  ;;  %11386 = vst [vmem:[%s16259_s22 + $0x3c0] sm:$0xff] %v12800_v50  ;;  %v10491_v53 = vmax.f32 %v7924_v21, 0.0  ;;  %v13324_v5 = vld [vmem:[%s14923_s16 + $0x90] ss:$8 sps:$4 sm:$0xff]   ;;  %v12388_v45 = vcombine.high %v3786_v34, %v3790_v0  ;;  %v12387_v40 = vcombine.low %v3786_v34, %v3790_v0 }
 0x372   : > { %8434 = vmatprep.mubr.bf16.mxu0 %v13322_v27  ;;  %8953 = vmatprep.mubr.bf16.mxu1 %v13323_v55  ;;  %v17028_v39 = vpop.f32.mrf.mxu0  ;;  %v17030_v31 = vpop.f32.mrf.mxu1  ;;  %v13325_v24 = vld [vmem:[%s14532_s25 + $0x30] ss:$8 sps:$4 sm:$0xff]   ;;  %v13328_v55 = vld [vmem:[%s14923_s16 + $0xa0] ss:$8 sps:$4 sm:$0xff]   ;;  %v13331_v48 = vld [vmem:[%s14532_s25 + $0x54] ss:$8 sps:$4 sm:$0xff]  }
 0x373   : > { %9286 = vmatpush1.bf16.msra.mxu1 %v12411_v52  ;;  %20465 = vst [vmem:[#allocation108_spill] sm:$0xff] %v17030_v31  ;;  %v12804_v25 = vpack.c.bf16 %v10491_v53, %v10490_v12  ;;  %v13326_v52 = vld [vmem:[%s14923_s16 + $0xa4] ss:$8 sps:$4 sm:$0xff]   ;;  %v3906_v33 = vld [vmem:[%s19967_s6 + $0xfd0] sm:$0xff]  ;;  %v13329_v53 = vld [vmem:[%s14532_s25 + $0x40] ss:$8 sps:$4 sm:$0xff]  }
 0x374   : > { %9287 = vmatprep.subr.bf16.mxu1 %v12404_v29  ;;  %v17038_v14 = vpop.f32.mrf.mxu0  ;;  %v17040_v15 = vpop.f32.mrf.mxu1  ;;  %v3910_v8 = vld [vmem:[%s19967_s6 + $0xff0] sm:$0xff] }
 0x375   : > { %20466 = vst [vmem:[#allocation38_spill] sm:$0xff] %v17040_v15  ;;  %11390 = vst [vmem:[%s16259_s22 + $0x3e0] sm:$0xff] %v12804_v25  ;;  %v12508_v16 = vcombine.high %v3906_v33, %v3910_v8  ;;  %v12507_v21 = vcombine.low %v3906_v33, %v3910_v8  ;;  %v3898_v34 = vld [vmem:[%s19967_s6 + $0xf90] sm:$0xff] }
 0x376   : > { %v17043_v1 = vpop.f32.mrf.mxu0  ;;  %v17046_v13 = vpop.f32.mrf.mxu1  ;;  %v3902_v0 = vld [vmem:[%s19967_s6 + $0xfb0] sm:$0xff] }
 0x377   : > { %9288 = vmatpush1.bf16.msra.mxu1 %v12403_v63  ;;  %20467 = vst [vmem:[#allocation139_spill] sm:$0xff] %v17046_v13  ;;  %v13330_v63 = vld [vmem:[%s14923_s16 + $0xb4] ss:$8 sps:$4 sm:$0xff]   ;;  %v13333_v8 = vld [vmem:[%s14532_s25 + $0x50] ss:$8 sps:$4 sm:$0xff]  }
 0x378   : > { %v17051_v2 = vpop.f32.mrf.mxu0  ;;  %v17053_v11 = vpop.f32.mrf.mxu1  ;;  %9289 = vmatprep.subr.bf16.mxu1 %v12396_v37  ;;  %v13346_v13 = vld [vmem:[%s14923_s16 + $0xf4] ss:$8 sps:$4 sm:$0xff]  }
 0x379   : > { %8435 = vmatmul.mubr.bf16.gmra.mxu0 %v13324_v5  ;;  %8954 = vmatmul.mubr.bf16.gmra.mxu1 %v13325_v24  ;;  %20468 = vst [vmem:[#allocation109_spill] sm:$0xff] %v17053_v11  ;;  %v12499_v5 = vcombine.low %v3898_v34, %v3902_v0  ;;  %v12500_v24 = vcombine.high %v3898_v34, %v3902_v0  ;;  %v13347_v15 = vld [vmem:[%s14532_s25 + $0x94] ss:$8 sps:$4 sm:$0xff]  }
 0x37a   : > { %8444 = vmatprep.mubr.bf16.mxu0 %v13326_v52  ;;  %8963 = vmatprep.mubr.bf16.mxu1 %v13327_v43  ;;  %v17061_v36 = vpop.f32.mrf.mxu0  ;;  %v17063_v17 = vpop.f32.mrf.mxu1  ;;  %v3858_v31 = vld [vmem:[%s19967_s6 + $0xe50] sm:$0xff] }
 0x37b   : > { %9290 = vmatpush1.bf16.msra.mxu1 %v12395_v3  ;;  %20469 = vst [vmem:[#allocation40_spill] sm:$0xff] %v17063_v17  ;;  %v13343_v17 = vld [vmem:[%s14532_s25 + $0x84] ss:$8 sps:$4 sm:$0xff]   ;;  %v3850_v58 = vld [vmem:[%s19967_s6 + $0xe10] sm:$0xff] }
 0x37c   : > { %9291 = vmatprep.subr.bf16.mxu1 %v12388_v45  ;;  %v17065_v29 = vpop.f32.mrf.mxu0  ;;  %v17067_v50 = vpop.f32.mrf.mxu1  ;;  %v3702_v23 = vld [vmem:[%s19967_s6 + $0x970] sm:$0xff] }
 0x37d   : > { %20470 = vst [vmem:[#allocation141_spill] sm:$0xff] %v17067_v50  ;;  %v13342_v50 = vld [vmem:[%s14923_s16 + $0xe4] ss:$8 sps:$4 sm:$0xff]  }
 0x37e   : > { %v17069_v27 = vpop.f32.mrf.mxu0  ;;  %v17072_v12 = vpop.f32.mrf.mxu1 }
 0x37f   : > { %9292 = vmatpush1.bf16.msra.mxu1 %v12387_v40  ;;  %20471 = vst [vmem:[#allocation110_spill] sm:$0xff] %v17072_v12  ;;  %v13332_v40 = vld [vmem:[%s14923_s16 + $0xb0] ss:$8 sps:$4 sm:$0xff]  }
 0x380   : > { %v17077_v35 = vpop.f32.mrf.mxu0  ;;  %v17079_v25 = vpop.f32.mrf.mxu1  ;;  %9293 = vmatprep.subr.bf16.mxu1 %v12508_v16  ;;  %v13334_v16 = vld [vmem:[%s14923_s16 + $0xc4] ss:$8 sps:$4 sm:$0xff]   ;;  %v13341_v12 = vld [vmem:[%s14532_s25 + $0x70] ss:$8 sps:$4 sm:$0xff]  }
 0x381   : > { %8445 = vmatmul.mubr.bf16.gmra.mxu0 %v13328_v55  ;;  %8964 = vmatmul.mubr.bf16.gmra.mxu1 %v13329_v53  ;;  %20472 = vst [vmem:[#allocation41_spill] sm:$0xff] %v17079_v25 }
 0x382   : > { %8454 = vmatprep.mubr.bf16.mxu0 %v13330_v63  ;;  %8973 = vmatprep.mubr.bf16.mxu1 %v13331_v48  ;;  %v17087_v37 = vpop.f32.mrf.mxu0  ;;  %v17089_v3 = vpop.f32.mrf.mxu1  ;;  %v3890_v63 = vld [vmem:[%s19967_s6 + $0xf50] sm:$0xff] }
 0x383   : > { %9294 = vmatpush2.bf16.msra.mxu1 %v12507_v21  ;;  %20473 = vst [vmem:[#allocation111_spill] sm:$0xff] %v17089_v3  ;;  %v13335_v21 = vld [vmem:[%s14532_s25 + $0x64] ss:$8 sps:$4 sm:$0xff]   ;;  %v3894_v48 = vld [vmem:[%s19967_s6 + $0xf70] sm:$0xff] }
 0x384   : > { %v17091_v45 = vpop.f32.mrf.mxu0  ;;  %v17093_v52 = vpop.f32.mrf.mxu1  ;;  %9295 = vmatprep.subr.bf16.mxu1 %v12500_v24  ;;  %v12492_v24 = vcombine.high %v3890_v63, %v3894_v48  ;;  %v13340_v3 = vld [vmem:[%s14923_s16 + $0xd0] ss:$8 sps:$4 sm:$0xff]  }
 0x385   : > { %20474 = vst [vmem:[#allocation144_spill] sm:$0xff] %v17093_v52  ;;  %v13338_v52 = vld [vmem:[%s14923_s16 + $0xd4] ss:$8 sps:$4 sm:$0xff]  }
 0x386   : > { %v17095_v43 = vpop.f32.mrf.mxu0  ;;  %v17098_v33 = vpop.f32.mrf.mxu1 }
 0x387   : > { %9296 = vmatpush2.bf16.msra.mxu1 %v12499_v5  ;;  %20475 = vst [vmem:[#allocation57_spill] sm:$0xff] %v17098_v33  ;;  %v12491_v5 = vcombine.low %v3890_v63, %v3894_v48  ;;  %v13337_v33 = vld [vmem:[%s14532_s25 + $0x60] ss:$8 sps:$4 sm:$0xff]  }
 0x388   : > { %v17103_v55 = vpop.f32.mrf.mxu0  ;;  %v17105_v53 = vpop.f32.mrf.mxu1  ;;  %9297 = vmatprep.subr.bf16.mxu1 %v12492_v24  ;;  %v3886_v24 = vld [vmem:[%s19967_s6 + $0xf30] sm:$0xff] }
 0x389   : > { %8455 = vmatmul.mubr.bf16.gmra.mxu0 %v13332_v40  ;;  %8974 = vmatmul.mubr.bf16.gmra.mxu1 %v13333_v8  ;;  %20476 = vst [vmem:[#allocation112_spill] sm:$0xff] %v17105_v53 }
 0x38a   : > { %8464 = vmatprep.mubr.bf16.mxu0 %v13334_v16  ;;  %8983 = vmatprep.mubr.bf16.mxu1 %v13335_v21  ;;  %v17113_v34 = vpop.f32.mrf.mxu0  ;;  %v17115_v0 = vpop.f32.mrf.mxu1  ;;  %v13336_v21 = vld [vmem:[%s14923_s16 + $0xc0] ss:$8 sps:$4 sm:$0xff]  }
 0x38b   : > { %20477 = vst [vmem:[#allocation58_spill] sm:$0xff] %v17115_v0  ;;  %9298 = vmatpush2.bf16.msra.mxu1 %v12491_v5  ;;  %v13339_v0 = vld [vmem:[%s14532_s25 + $0x74] ss:$8 sps:$4 sm:$0xff]  }
 0x38c   : > { %v17117_v40 = vpop.f32.mrf.mxu0  ;;  %v17119_v8 = vpop.f32.mrf.mxu1  ;;  %v3882_v5 = vld [vmem:[%s19967_s6 + $0xf10] sm:$0xff] }
 0x38d   : > { %20478 = vst [vmem:[#allocation146_spill] sm:$0xff] %v17119_v8 }
 0x38e   : > { %v17121_v16 = vpop.f32.mrf.mxu0  ;;  %v17124_v53 = vpop.f32.mrf.mxu1 }
 0x38f   : > { %20479 = vst [vmem:[#allocation113_spill] sm:$0xff] %v17124_v53 }
 0x390   : > { %v17129_v63 = vpop.f32.mrf.mxu0  ;;  %v17131_v48 = vpop.f32.mrf.mxu1 }
 0x391   : > { %8465 = vmatmul.mubr.bf16.gmra.mxu0 %v13336_v21  ;;  %8984 = vmatmul.mubr.bf16.gmra.mxu1 %v13337_v33  ;;  %20480 = vst [vmem:[#allocation59_spill] sm:$0xff] %v17131_v48  ;;  %v12484_v21 = vcombine.high %v3882_v5, %v3886_v24 }
 0x392   : > { %8474 = vmatprep.mubr.bf16.mxu0 %v13338_v52  ;;  %8993 = vmatprep.mubr.bf16.mxu1 %v13339_v0  ;;  %v17139_v33 = vpop.f32.mrf.mxu0  ;;  %v17141_v52 = vpop.f32.mrf.mxu1  ;;  %v12483_v0 = vcombine.low %v3882_v5, %v3886_v24  ;;  %v3874_v5 = vld [vmem:[%s19967_s6 + $0xed0] sm:$0xff] }
 0x393   : > { %20481 = vst [vmem:[#allocation148_spill] sm:$0xff] %v17141_v52  ;;  %9299 = vmatprep.subr.bf16.mxu1 %v12484_v21  ;;  %v3878_v24 = vld [vmem:[%s19967_s6 + $0xef0] sm:$0xff] }
 0x394   : > { %v17143_v53 = vpop.f32.mrf.mxu0  ;;  %v17145_v8 = vpop.f32.mrf.mxu1  ;;  %9300 = vmatpush2.bf16.msra.mxu1 %v12483_v0  ;;  %v12476_v21 = vcombine.high %v3874_v5, %v3878_v24 }
 0x395   : > { %20482 = vst [vmem:[#allocation115_spill] sm:$0xff] %v17143_v53  ;;  %20483 = vst [vmem:[#allocation116_spill] sm:$0xff] %v17145_v8  ;;  %v3870_v8 = vld [vmem:[%s19967_s6 + $0xeb0] sm:$0xff]  ;;  %v20568_v53 = vld [vmem:[#allocation9_spill] sm:$0xff] }
 0x396   : > { %v17147_v48 = vpop.f32.mrf.mxu0  ;;  %v17150_v25 = vpop.f32.mrf.mxu1  ;;  %9301 = vmatprep.subr.bf16.mxu1 %v12476_v21 }
 0x397   : > { %20484 = vst [vmem:[#allocation60_spill] sm:$0xff] %v17147_v48  ;;  %20485 = vst [vmem:[#allocation150_spill] sm:$0xff] %v17150_v25  ;;  %v3924_v48 = vsub.s32 2, %v20561_v61 }
 0x398   : > { %v17161_v0 = vpop.f32.mrf.mxu0 }
 0x399   : > { %8475 = vmatmul.mubr.bf16.gmra.mxu0 %v13340_v3  ;;  %8994 = vmatmul.mubr.bf16.gmra.mxu1 %v13341_v12  ;;  %20486 = vst [vmem:[#allocation118_spill] sm:$0xff] %v17161_v0  ;;  %v17163_v3 = vpop.f32.mrf.mxu1  ;;  %v12475_v12 = vcombine.low %v3874_v5, %v3878_v24  ;;  %v13356_v0 = vld [vmem:[%s14532_s25 + $0xd4] ss:$8 sps:$4 sm:$0xff]  }
 0x39a   : > { %8484 = vmatprep.mubr.bf16.mxu0 %v13342_v50  ;;  %9003 = vmatprep.mubr.bf16.mxu1 %v13343_v17  ;;  %20487 = vst [vmem:[#allocation152_spill] sm:$0xff] %v17163_v3  ;;  %v17165_v25 = vpop.f32.mrf.mxu0  ;;  %v3866_v50 = vld [vmem:[%s19967_s6 + $0xe90] sm:$0xff] }
 0x39b   : > { %20488 = vst [vmem:[#allocation61_spill] sm:$0xff] %v17165_v25  ;;  %v17167_v17 = vpop.f32.mrf.mxu1  ;;  %9302 = vmatpush2.bf16.msra.mxu1 %v12475_v12  ;;  %v12468_v5 = vcombine.high %v3866_v50, %v3870_v8  ;;  %v12467_v24 = vcombine.low %v3866_v50, %v3870_v8  ;;  %v13345_v12 = vld [vmem:[%s14532_s25 + $0x80] ss:$8 sps:$4 sm:$0xff]   ;;  %v3862_v8 = vld [vmem:[%s19967_s6 + $0xe70] sm:$0xff] }
 0x39c   : > { %20489 = vst [vmem:[#allocation120_spill] sm:$0xff] %v17167_v17  ;;  %v17175_v3 = vpop.f32.mrf.mxu0  ;;  %v13344_v17 = vld [vmem:[%s14923_s16 + $0xe0] ss:$8 sps:$4 sm:$0xff]  }
 0x39d   : > { %20490 = vst [vmem:[#allocation62_spill] sm:$0xff] %v17175_v3  ;;  %v17177_v52 = vpop.f32.mrf.mxu1  ;;  %9303 = vmatprep.subr.bf16.mxu1 %v12468_v5  ;;  %v3854_v5 = vld [vmem:[%s19967_s6 + $0xe30] sm:$0xff] }
 0x39e   : > { %20491 = vst [vmem:[#allocation63_spill] sm:$0xff] %v17177_v52  ;;  %v17179_v11 = vpop.f32.mrf.mxu0  ;;  %v12460_v52 = vcombine.high %v3858_v31, %v3862_v8  ;;  %v12452_v26 = vcombine.high %v3850_v58, %v3854_v5  ;;  %v3666_v3 = vld [vmem:[%s19967_s6 + $0x850] sm:$0xff] }
 0x39f   : > { %20492 = vst [vmem:[#allocation154_spill] sm:$0xff] %v17179_v11  ;;  %v17182_v21 = vpop.f32.mrf.mxu1  ;;  %9304 = vmatpush2.bf16.msra.mxu1 %v12467_v24  ;;  %v13354_v11 = vld [vmem:[%s14532_s25 + $0xc4] ss:$8 sps:$4 sm:$0xff]  }
 0x3a0   : > { %v17193_v50 = vpop.f32.mrf.mxu0  ;;  %9305 = vmatprep.subr.bf16.mxu1 %v12460_v52  ;;  %v13349_v52 = vld [vmem:[%s14532_s25 + $0x90] ss:$8 sps:$4 sm:$0xff]  }
 0x3a1   : > { %8485 = vmatmul.mubr.bf16.gmra.mxu0 %v13344_v17  ;;  %9004 = vmatmul.mubr.bf16.gmra.mxu1 %v13345_v12  ;;  %20493 = vst [vmem:[#allocation122_spill] sm:$0xff] %v17193_v50  ;;  %v17195_v17 = vpop.f32.mrf.mxu1 }
 0x3a2   : > { %8494 = vmatprep.mubr.bf16.mxu0 %v13346_v13  ;;  %9013 = vmatprep.mubr.bf16.mxu1 %v13347_v15  ;;  %v12459_v13 = vcombine.low %v3858_v31, %v3862_v8  ;;  %v17197_v12 = vpop.f32.mrf.mxu0  ;;  %v12451_v31 = vcombine.low %v3850_v58, %v3854_v5  ;;  %v13348_v8 = vld [vmem:[%s14923_s16 + $0xf0] ss:$8 sps:$4 sm:$0xff]  }
 0x3a3   : > { %20494 = vst [vmem:[#allocation64_spill] sm:$0xff] %v17197_v12  ;;  %v17199_v15 = vpop.f32.mrf.mxu1  ;;  %v20510_v12 = vld [vmem:[#allocation47_spill] sm:$0xff] }
 0x3a4   : > { %v17204_v54 = vpop.f32.mrf.mxu0  ;;  %9306 = vmatpush2.bf16.msra.mxu1 %v12459_v13  ;;  %v3706_v13 = vld [vmem:[%s19967_s6 + $0x990] sm:$0xff] }
 0x3a5   : > { %20495 = vst [vmem:[#allocation156_spill] sm:$0xff] %v17204_v54  ;;  %v17206_v19 = vpop.f32.mrf.mxu1  ;;  %9307 = vmatprep.subr.bf16.mxu1 %v12452_v26  ;;  %v3698_v26 = vld [vmem:[%s19967_s6 + $0x950] sm:$0xff] }
 0x3a6   : > { %v17211_v24 = vpop.f32.mrf.mxu0  ;;  %v12300_v54 = vcombine.high %v3698_v26, %v3702_v23 }
 0x3a7   : > { %20496 = vst [vmem:[#allocation124_spill] sm:$0xff] %v17211_v24  ;;  %v17214_v59 = vpop.f32.mrf.mxu1 }
 0x3a8   : > { %v17219_v6 = vpop.f32.mrf.mxu0  ;;  %9308 = vmatpush2.bf16.msra.mxu1 %v12451_v31  ;;  %v20502_v31 = vld [vmem:[#allocation42_spill] sm:$0xff] }
 0x3a9   : > { %8495 = vmatmul.mubr.bf16.gmra.mxu0 %v13348_v8  ;;  %9014 = vmatmul.mubr.bf16.gmra.mxu1 %v13349_v52  ;;  %20498 = vst [vmem:[#allocation158_spill] sm:$0xff] %v17219_v6  ;;  %v17221_v7 = vpop.f32.mrf.mxu1  ;;  %v3710_v8 = vld [vmem:[%s19967_s6 + $0x9b0] sm:$0xff]  ;;  %v20504_v6 = vcombine.low %v16546_v44, %v16551_v56 }
 0x3aa   : > { %8730 = vmatprep.mubr.bf16.mxu0 %v20497_v46  ;;  %9023 = vmatprep.mubr.bf16.mxu1 %v13350_v60  ;;  %v17229_v58 = vpop.f32.mrf.mxu0  ;;  %v12308_v52 = vcombine.high %v3706_v13, %v3710_v8  ;;  %v12307_v24 = vcombine.low %v3706_v13, %v3710_v8 }
 0x3ab   : > { %20499 = vst [vmem:[#allocation126_spill] sm:$0xff] %v17229_v58  ;;  %v17231_v5 = vpop.f32.mrf.mxu1  ;;  %v13351_v58 = vld [vmem:[%s14532_s25 + $0xa0] ss:$8 sps:$4 sm:$0xff]  }
 0x3ac   : > { %v17233_v60 = vpop.f32.mrf.mxu0 }
 0x3ad   : > { %20500 = vst [vmem:[#allocation65_spill] sm:$0xff] %v17233_v60  ;;  %v17235_v46 = vpop.f32.mrf.mxu1  ;;  %v20503_v60 = vld [vmem:[#allocation45_spill] sm:$0xff] }
 0x3ae   : > { %v17243_v42 = vpop.f32.mrf.mxu0 }
 0x3af   : > { %20501 = vst [vmem:[#allocation160_spill] sm:$0xff] %v17243_v42  ;;  %v17246_v18 = vpop.f32.mrf.mxu1  ;;  %v13352_v42 = vld [vmem:[%s14532_s25 + $0xb4] ss:$8 sps:$4 sm:$0xff]  }
 0x3b0   : > { %v17253_v62 = vpop.f32.mrf.mxu0 }
 0x3b1   : > { %8731 = vmatmul.mubr.bf16.vlgmr.msra.gmra.mxu0 %v20502_v31  ;;  %9024 = vmatmul.mubr.bf16.gmra.mxu1 %v13351_v58  ;;  %20505 = vst [vmem:[#allocation66_spill] sm:$0xff] %v17253_v62  ;;  %v17255_v38 = vpop.f32.mrf.mxu1  ;;  %v3690_v31 = vld [vmem:[%s19967_s6 + $0x910] sm:$0xff] }
 0x3b2   : > { %8740 = vmatprep.mubr.bf16.mxu0 %v20503_v60  ;;  %9085 = vmatpush1.bf16.msra.mxu0 %v20504_v6  ;;  %v3694_v58 = vld [vmem:[%s19967_s6 + $0x930] sm:$0xff]  ;;  %v17264_v44 = vpop.f32.mrf.mxu0  ;;  %v12299_v6 = vcombine.low %v3698_v26, %v3702_v23  ;;  %v17286_v23 = vld [vmem:[%s19967_s6 + $0x1f8] sm:$0xff] }
 0x3b3   : > { %9086 = vmatprep.subr.bf16.mxu0 %v12308_v52  ;;  %9033 = vmatprep.mubr.bf16.mxu1 %v13352_v42  ;;  %20506 = vst [vmem:[#allocation67_spill] sm:$0xff] %v17264_v44  ;;  %v17266_v56 = vpop.f32.mrf.mxu1  ;;  %v12292_v8 = vcombine.high %v3690_v31, %v3694_v58  ;;  %v3682_v42 = vld [vmem:[%s19967_s6 + $0x8d0] sm:$0xff]  ;;  %v17281_v44 = vld [vmem:[%s19967_s6 + $0x1d8] sm:$0xff]  ;;  %v12291_v32 = vcombine.low %v3690_v31, %v3694_v58 }
 0x3b4   : > { %v17268_v13 = vpop.f32.mrf.mxu0  ;;  %v3686_v60 = vld [vmem:[%s19967_s6 + $0x8f0] sm:$0xff]  ;;  %v17311_v31 = vld [vmem:[%s19967_s6 + $0x5d8] sm:$0xff] }
 0x3b5   : > { %20507 = vst [vmem:[#allocation162_spill] sm:$0xff] %v17268_v13  ;;  %v17273_v52 = vpop.f32.mrf.mxu1  ;;  %v13353_v13 = vld [vmem:[%s14532_s25 + $0xb0] ss:$8 sps:$4 sm:$0xff]   ;;  %v12284_v51 = vcombine.high %v3682_v42, %v3686_v60  ;;  %v12283_v62 = vcombine.low %v3682_v42, %v3686_v60 }
 0x3b6   : > { %9087 = vmatpush1.bf16.msra.mxu0 %v12307_v24  ;;  %v20509_v24 = vld [vmem:[#allocation44_spill] sm:$0xff]  ;;  %v17316_v58 = vld [vmem:[%s19967_s6 + $0x5f8] sm:$0xff] }
 0x3b7   : > { %9088 = vmatprep.subr.bf16.mxu0 %v12300_v54  ;;  %v17288_v54 = vpop.f32.mrf.mxu0  ;;  %v17291_v26 = vpop.f32.mrf.mxu1  ;;  %v20518_v42 = vld [vmem:[#allocation49_spill] sm:$0xff] }
 0x3b8   : > { %20508 = vst [vmem:[#allocation128_spill] sm:$0xff] %v17288_v54  ;;  %v3674_v54 = vld [vmem:[%s19967_s6 + $0x890] sm:$0xff] }
 0x3b9   : > { %8741 = vmatmul.mubr.bf16.gmra.mxu0 %v20509_v24  ;;  %9034 = vmatmul.mubr.bf16.gmra.mxu1 %v13353_v13  ;;  %v17297_v50 = vpop.f32.mrf.mxu0  ;;  %v17302_v24 = vpop.f32.mrf.mxu1  ;;  %v3678_v13 = vld [vmem:[%s19967_s6 + $0x8b0] sm:$0xff] }
 0x3ba   : > { %8750 = vmatprep.mubr.bf16.mxu0 %v20510_v12  ;;  %9089 = vmatpush1.bf16.msra.mxu0 %v12299_v6  ;;  %20511 = vst [vmem:[#allocation68_spill] sm:$0xff] %v17297_v50  ;;  %v12276_v50 = vcombine.high %v3674_v54, %v3678_v13 }
 0x3bb   : > { %9090 = vmatprep.subr.bf16.mxu0 %v12292_v8  ;;  %9043 = vmatprep.mubr.bf16.mxu1 %v13354_v11  ;;  %v17318_v6 = vpop.f32.mrf.mxu0  ;;  %v17320_v8 = vpop.f32.mrf.mxu1  ;;  %v12190_v11 = vcombine.high %v17311_v31, %v17316_v58 }
 0x3bc   : > { %20512 = vst [vmem:[#allocation164_spill] sm:$0xff] %v17318_v6  ;;  %v3670_v6 = vld [vmem:[%s19967_s6 + $0x870] sm:$0xff] }
 0x3bd   : > { %v17324_v12 = vpop.f32.mrf.mxu0  ;;  %v17326_v20 = vpop.f32.mrf.mxu1  ;;  %9663 = vmatprep.subr.bf16.mxu1 %v12190_v11  ;;  %v12275_v11 = vcombine.low %v3674_v54, %v3678_v13  ;;  %v12268_v25 = vcombine.high %v3666_v3, %v3670_v6 }
 0x3be   : > { %9091 = vmatpush1.bf16.msra.mxu0 %v12291_v32  ;;  %20513 = vst [vmem:[#allocation130_spill] sm:$0xff] %v17324_v12  ;;  %20514 = vst [vmem:[#allocation131_spill] sm:$0xff] %v17326_v20  ;;  %v20516_v32 = vld [vmem:[#allocation46_spill] sm:$0xff]  ;;  %v3722_v20 = vld [vmem:[%s19967_s6 + $0xa10] sm:$0xff] }
 0x3bf   : > { %9092 = vmatprep.subr.bf16.mxu0 %v12284_v51  ;;  %v17334_v9 = vpop.f32.mrf.mxu0  ;;  %v17337_v60 = vpop.f32.mrf.mxu1  ;;  %v13355_v51 = vld [vmem:[%s14532_s25 + $0xc0] ss:$8 sps:$4 sm:$0xff]  }
 0x3c0   : > { %20515 = vst [vmem:[#allocation132_spill] sm:$0xff] %v17334_v9  ;;  %20517 = vst [vmem:[#allocation69_spill] sm:$0xff] %v17337_v60  ;;  %v3782_v9 = vld [vmem:[%s19967_s6 + $0xbf0] sm:$0xff]  ;;  %v13358_v60 = vld [vmem:[%s14532_s25 + $0xe4] ss:$8 sps:$4 sm:$0xff]  }
 0x3c1   : > { %8751 = vmatmul.mubr.bf16.gmra.mxu0 %v20516_v32  ;;  %9044 = vmatmul.mubr.bf16.gmra.mxu1 %v13355_v51  ;;  %v17341_v12 = vpop.f32.mrf.mxu0  ;;  %v17343_v22 = vpop.f32.mrf.mxu1  ;;  %v3658_v32 = vld [vmem:[%s19967_s6 + $0x810] sm:$0xff] }
 0x3c2   : > { %8760 = vmatprep.mubr.bf16.mxu0 %v20518_v42  ;;  %9093 = vmatpush1.bf16.msra.mxu0 %v12283_v62  ;;  %20519 = vst [vmem:[#allocation70_spill] sm:$0xff] %v17341_v12  ;;  %20520 = vst [vmem:[#allocation71_spill] sm:$0xff] %v17343_v22  ;;  %v3662_v51 = vld [vmem:[%s19967_s6 + $0x830] sm:$0xff] }
 0x3c3   : > { %9094 = vmatprep.subr.bf16.mxu0 %v12276_v50  ;;  %9053 = vmatprep.mubr.bf16.mxu1 %v13356_v0  ;;  %v17352_v42 = vpop.f32.mrf.mxu0  ;;  %v17354_v62 = vpop.f32.mrf.mxu1  ;;  %v12267_v50 = vcombine.low %v3666_v3, %v3670_v6  ;;  %v12260_v13 = vcombine.high %v3658_v32, %v3662_v51  ;;  %v3778_v12 = vld [vmem:[%s19967_s6 + $0xbd0] sm:$0xff] }
 0x3c4   : > { %20521 = vst [vmem:[#allocation134_spill] sm:$0xff] %v17352_v42  ;;  %20522 = vst [vmem:[#allocation72_spill] sm:$0xff] %v17354_v62  ;;  %v20526_v62 = vld [vmem:[#allocation48_spill] sm:$0xff] }
 0x3c5   : > { %v17356_v54 = vpop.f32.mrf.mxu0  ;;  %v17358_v0 = vpop.f32.mrf.mxu1  ;;  %v13357_v6 = vld [vmem:[%s14532_s25 + $0xd0] ss:$8 sps:$4 sm:$0xff]  }
 0x3c6   : > { %9095 = vmatpush1.bf16.msra.mxu0 %v12275_v11  ;;  %20523 = vst [vmem:[#allocation136_spill] sm:$0xff] %v17356_v54  ;;  %20524 = vst [vmem:[#allocation137_spill] sm:$0xff] %v17358_v0  ;;  %v12259_v11 = vcombine.low %v3658_v32, %v3662_v51  ;;  %v12380_v0 = vcombine.high %v3778_v12, %v3782_v9  ;;  %v12379_v51 = vcombine.low %v3778_v12, %v3782_v9  ;;  %v13359_v12 = vld [vmem:[%s14532_s25 + $0xe0] ss:$8 sps:$4 sm:$0xff]  }
 0x3c7   : > { %9096 = vmatprep.subr.bf16.mxu0 %v12268_v25  ;;  %v17366_v42 = vpop.f32.mrf.mxu0  ;;  %v17369_v3 = vpop.f32.mrf.mxu1  ;;  %v20528_v25 = vld [vmem:[#allocation51_spill] sm:$0xff] }
 0x3c8   : > { %20525 = vst [vmem:[#allocation138_spill] sm:$0xff] %v17366_v42  ;;  %20527 = vst [vmem:[#allocation73_spill] sm:$0xff] %v17369_v3  ;;  %v3766_v42 = vld [vmem:[%s19967_s6 + $0xb70] sm:$0xff] }
 0x3c9   : > { %8761 = vmatmul.mubr.bf16.gmra.mxu0 %v20526_v62  ;;  %9054 = vmatmul.mubr.bf16.gmra.mxu1 %v13357_v6  ;;  %v17373_v54 = vpop.f32.mrf.mxu0  ;;  %v17375_v22 = vpop.f32.mrf.mxu1  ;;  %v3770_v62 = vld [vmem:[%s19967_s6 + $0xb90] sm:$0xff] }
 0x3ca   : > { %8770 = vmatprep.mubr.bf16.mxu0 %v20528_v25  ;;  %9097 = vmatpush1.bf16.msra.mxu0 %v12267_v50  ;;  %20529 = vst [vmem:[#allocation74_spill] sm:$0xff] %v17373_v54  ;;  %20530 = vst [vmem:[#allocation75_spill] sm:$0xff] %v17375_v22  ;;  %v3774_v6 = vld [vmem:[%s19967_s6 + $0xbb0] sm:$0xff] }
 0x3cb   : > { %9098 = vmatprep.subr.bf16.mxu0 %v12260_v13  ;;  %9063 = vmatprep.mubr.bf16.mxu1 %v13358_v60  ;;  %v17384_v25 = vpop.f32.mrf.mxu0  ;;  %v17386_v32 = vpop.f32.mrf.mxu1  ;;  %v12372_v13 = vcombine.high %v3770_v62, %v3774_v6  ;;  %v3762_v54 = vld [vmem:[%s19967_s6 + $0xb50] sm:$0xff] }
 0x3cc   : > { %20531 = vst [vmem:[#allocation140_spill] sm:$0xff] %v17384_v25  ;;  %20532 = vst [vmem:[#allocation76_spill] sm:$0xff] %v17386_v32  ;;  %v20536_v32 = vld [vmem:[#allocation50_spill] sm:$0xff]  ;;  %v13360_v3 = vld [vmem:[%s14532_s25 + $0xf4] ss:$8 sps:$4 sm:$0xff]  }
 0x3cd   : > { %v17388_v50 = vpop.f32.mrf.mxu0  ;;  %v17390_v60 = vpop.f32.mrf.mxu1 }
 0x3ce   : > { %9099 = vmatpush1.bf16.msra.mxu0 %v12259_v11  ;;  %20533 = vst [vmem:[#allocation142_spill] sm:$0xff] %v17388_v50  ;;  %20534 = vst [vmem:[#allocation143_spill] sm:$0xff] %v17390_v60  ;;  %v12371_v11 = vcombine.low %v3770_v62, %v3774_v6  ;;  %v12364_v60 = vcombine.high %v3762_v54, %v3766_v42  ;;  %v12363_v6 = vcombine.low %v3762_v54, %v3766_v42  ;;  %v13361_v54 = vld [vmem:[%s14532_s25 + $0xf0] ss:$8 sps:$4 sm:$0xff]  }
 0x3cf   : > { %9100 = vmatprep.subr.bf16.mxu0 %v12380_v0  ;;  %v17398_v25 = vpop.f32.mrf.mxu0  ;;  %v17401_v9 = vpop.f32.mrf.mxu1  ;;  %v20538_v0 = vld [vmem:[#allocation53_spill] sm:$0xff] }
 0x3d0   : > { %20535 = vst [vmem:[#allocation77_spill] sm:$0xff] %v17398_v25  ;;  %20537 = vst [vmem:[#allocation145_spill] sm:$0xff] %v17401_v9  ;;  %v3750_v25 = vld [vmem:[%s19967_s6 + $0xaf0] sm:$0xff]  ;;  %v13362_v9 = vld [vmem:[%s14911_s19 + $0x4] ss:$8 sps:$4 sm:$0xff]  }
 0x3d1   : > { %8771 = vmatmul.mubr.bf16.gmra.mxu0 %v20536_v32  ;;  %9064 = vmatmul.mubr.bf16.gmra.mxu1 %v13359_v12  ;;  %v17405_v50 = vpop.f32.mrf.mxu0  ;;  %v17407_v22 = vpop.f32.mrf.mxu1  ;;  %v3754_v32 = vld [vmem:[%s19967_s6 + $0xb10] sm:$0xff] }
 0x3d2   : > { %8780 = vmatprep.mubr.bf16.mxu0 %v20538_v0  ;;  %9101 = vmatpush2.bf16.msra.mxu0 %v12379_v51  ;;  %20539 = vst [vmem:[#allocation78_spill] sm:$0xff] %v17405_v50  ;;  %20540 = vst [vmem:[#allocation79_spill] sm:$0xff] %v17407_v22  ;;  %v3758_v12 = vld [vmem:[%s19967_s6 + $0xb30] sm:$0xff] }
 0x3d3   : > { %9102 = vmatprep.subr.bf16.mxu0 %v12372_v13  ;;  %9073 = vmatprep.mubr.bf16.mxu1 %v13360_v3  ;;  %v17416_v0 = vpop.f32.mrf.mxu0  ;;  %v17418_v62 = vpop.f32.mrf.mxu1  ;;  %v12356_v13 = vcombine.high %v3754_v32, %v3758_v12  ;;  %v3746_v50 = vld [vmem:[%s19967_s6 + $0xad0] sm:$0xff] }
 0x3d4   : > { %20541 = vst [vmem:[#allocation147_spill] sm:$0xff] %v17416_v0  ;;  %20542 = vst [vmem:[#allocation149_spill] sm:$0xff] %v17418_v62  ;;  %v20546_v62 = vld [vmem:[#allocation52_spill] sm:$0xff] }
 0x3d5   : > { %v17420_v51 = vpop.f32.mrf.mxu0  ;;  %v17422_v3 = vpop.f32.mrf.mxu1 }
 0x3d6   : > { %9103 = vmatpush2.bf16.msra.mxu0 %v12371_v11  ;;  %20543 = vst [vmem:[#allocation151_spill] sm:$0xff] %v17420_v51  ;;  %20544 = vst [vmem:[#allocation80_spill] sm:$0xff] %v17422_v3  ;;  %v12355_v11 = vcombine.low %v3754_v32, %v3758_v12  ;;  %v12348_v3 = vcombine.high %v3746_v50, %v3750_v25  ;;  %v3579_v32 = vld [vmem:[%s19967_s6 + $0x598] sm:$0xff]  ;;  %v12347_v12 = vcombine.low %v3746_v50, %v3750_v25  ;;  %v20556_v25 = vld [vmem:[#allocation54_spill] sm:$0xff] }
 0x3d7   : > { %9104 = vmatprep.subr.bf16.mxu0 %v12364_v60  ;;  %v17430_v0 = vpop.f32.mrf.mxu0  ;;  %v17433_v42 = vpop.f32.mrf.mxu1  ;;  %v20548_v60 = vld [vmem:[#allocation55_spill] sm:$0xff] }
 0x3d8   : > { %20545 = vst [vmem:[#allocation81_spill] sm:$0xff] %v17430_v0  ;;  %20547 = vst [vmem:[#allocation83_spill] sm:$0xff] %v17433_v42 }
 0x3d9   : > { %8781 = vmatmul.mubr.bf16.gmra.mxu0 %v20546_v62  ;;  %9074 = vmatmul.mubr.bf16.gmra.mxu1 %v13361_v54  ;;  %v17437_v51 = vpop.f32.mrf.mxu0  ;;  %v17439_v22 = vpop.f32.mrf.mxu1  ;;  %v3738_v62 = vld [vmem:[%s19967_s6 + $0xa90] sm:$0xff] }
 0x3da   : > { %8790 = vmatprep.mubr.bf16.mxu0 %v20548_v60  ;;  %9105 = vmatpush2.bf16.msra.mxu0 %v12363_v6  ;;  %20549 = vst [vmem:[#allocation153_spill] sm:$0xff] %v17437_v51  ;;  %20550 = vst [vmem:[#allocation155_spill] sm:$0xff] %v17439_v22  ;;  %v3742_v54 = vld [vmem:[%s19967_s6 + $0xab0] sm:$0xff] }
 0x3db   : > { %9106 = vmatprep.subr.bf16.mxu0 %v12356_v13  ;;  %9309 = vmatprep.mubr.bf16.mxu1 %v13362_v9  ;;  %v17448_v0 = vpop.f32.mrf.mxu0  ;;  %v17450_v6 = vpop.f32.mrf.mxu1  ;;  %v3583_v9 = vld [vmem:[%s19967_s6 + $0x5b8] sm:$0xff]  ;;  %v12340_v60 = vcombine.high %v3738_v62, %v3742_v54  ;;  %v3734_v22 = vld [vmem:[%s19967_s6 + $0xa70] sm:$0xff] }
 0x3dc   : > { %20551 = vst [vmem:[#allocation85_spill] sm:$0xff] %v17448_v0  ;;  %20552 = vst [vmem:[#allocation157_spill] sm:$0xff] %v17450_v6  ;;  %v12189_v0 = vcombine.low %v17311_v31, %v17316_v58  ;;  %v3730_v6 = vld [vmem:[%s19967_s6 + $0xa50] sm:$0xff]  ;;  %v12182_v42 = vcombine.high %v3579_v32, %v3583_v9  ;;  %v3571_v31 = vld [vmem:[%s19967_s6 + $0x558] sm:$0xff] }
 0x3dd   : > { %v17458_v13 = vpop.f32.mrf.mxu0  ;;  %v17460_v51 = vpop.f32.mrf.mxu1  ;;  %v3575_v58 = vld [vmem:[%s19967_s6 + $0x578] sm:$0xff] }
 0x3de   : > { %9107 = vmatpush2.bf16.msra.mxu0 %v12355_v11  ;;  %20553 = vst [vmem:[#allocation159_spill] sm:$0xff] %v17458_v13  ;;  %20554 = vst [vmem:[#allocation161_spill] sm:$0xff] %v17460_v51  ;;  %v20558_v13 = vld [vmem:[#allocation7_spill] sm:$0xff]  ;;  %v12339_v51 = vcombine.low %v3738_v62, %v3742_v54  ;;  %v12174_v62 = vcombine.high %v3571_v31, %v3575_v58 }
 0x3df   : > { %9108 = vmatprep.subr.bf16.mxu0 %v12348_v3  ;;  %v17470_v11 = vpop.f32.mrf.mxu0  ;;  %v17473_v50 = vpop.f32.mrf.mxu1  ;;  %v13363_v3 = vld [vmem:[%s14911_s19] ss:$8 sps:$4 sm:$0xff]  }
 0x3e0   : > { %20555 = vst [vmem:[#allocation87_spill] sm:$0xff] %v17470_v11  ;;  %20557 = vst [vmem:[#allocation163_spill] sm:$0xff] %v17473_v50 }
 0x3e1   : > { %8791 = vmatmul.mubr.bf16.gmra.mxu0 %v20556_v25  ;;  %9310 = vmatmul.mubr.bf16.vlgmr.msra.gmra.mxu1 %v13363_v3  ;;  %v17483_v11 = vpop.f32.mrf.mxu0  ;;  %v12332_v25 = vcombine.high %v3730_v6, %v3734_v22  ;;  %v17485_v50 = vpop.f32.mrf.mxu1  ;;  %v12181_v3 = vcombine.low %v3579_v32, %v3583_v9  ;;  %v12331_v32 = vcombine.low %v3730_v6, %v3734_v22  ;;  %v3563_v9 = vld [vmem:[%s19967_s6 + $0x518] sm:$0xff]  ;;  %v20566_v6 = vld [vmem:[#allocation56_spill] sm:$0xff] }
 0x3e2   : > { %8800 = vmatprep.mubr.bf16.mxu0 %v20558_v13  ;;  %9109 = vmatpush2.bf16.msra.mxu0 %v12347_v12  ;;  %20559 = vst [vmem:[#allocation89_spill] sm:$0xff] %v17483_v11  ;;  %20560 = vst [vmem:[#allocation91_spill] sm:$0xff] %v17485_v50  ;;  %v3726_v13 = vld [vmem:[%s19967_s6 + $0xa30] sm:$0xff]  ;;  %v3567_v11 = vld [vmem:[%s19967_s6 + $0x538] sm:$0xff] }
 0x3e3   : > { %9110 = vmatprep.subr.bf16.mxu0 %v12340_v60  ;;  %9664 = vmatpush1.bf16.msra.mxu1 %v12189_v0  ;;  %v13364_v12 = vld [vmem:[%s14911_s19 + $0x14] ss:$8 sps:$4 sm:$0xff]   ;;  %v17495_v60 = vpop.f32.mrf.mxu0  ;;  %v17497_v54 = vpop.f32.mrf.mxu1  ;;  %v3928_v0 = vsub.s32 3, %v20561_v61 }
 0x3e4   : > { %9319 = vmatprep.mubr.bf16.mxu1 %v13364_v12  ;;  %9665 = vmatprep.subr.bf16.mxu1 %v12182_v42  ;;  %20562 = vst [vmem:[#allocation93_spill] sm:$0xff] %v17495_v60  ;;  %20563 = vst [vmem:[#allocation95_spill] sm:$0xff] %v17497_v54  ;;  %v12324_v42 = vcombine.high %v3722_v20, %v3726_v13  ;;  %v13365_v54 = vld [vmem:[%s16117_s11] sm:$0xff] }
 0x3e5   : > { %v17506_v12 = vpop.f32.mrf.mxu0  ;;  %v17508_v60 = vpop.f32.mrf.mxu1  ;;  %v17511_v61 = vrot.slane %v13365_v54, %v3924_v48 }
 0x3e6   : > { %9111 = vmatpush2.bf16.msra.mxu0 %v12339_v51  ;;  %20564 = vst [vmem:[#allocation165_spill] sm:$0xff] %v17506_v12  ;;  %v12173_v51 = vcombine.low %v3571_v31, %v3575_v58  ;;  %v12166_v12 = vcombine.high %v3563_v9, %v3567_v11  ;;  %v12062_v31 = vcombine.high %v17281_v44, %v17286_v23 }
 0x3e7   : > { %9112 = vmatprep.subr.bf16.mxu0 %v12332_v25  ;;  %9666 = vmatpush1.bf16.msra.mxu1 %v12181_v3  ;;  %v17513_v22 = vpop.f32.mrf.mxu0  ;;  %v17516_v50 = vpop.f32.mrf.mxu1  ;;  %v17519_v25 = vrot.slane %v13365_v54, %v3928_v0  ;;  %v12323_v3 = vcombine.low %v3722_v20, %v3726_v13  ;;  %v12165_v54 = vcombine.low %v3563_v9, %v3567_v11  ;;  %v3555_v0 = vld [vmem:[%s19967_s6 + $0x4d8] sm:$0xff] }
 0x3e8   : > { %9667 = vmatprep.subr.bf16.mxu1 %v12174_v62  ;;  %20565 = vst [vmem:[#allocation97_spill] sm:$0xff] %v17513_v22  ;;  %20567 = vst [vmem:[#allocation99_spill] sm:$0xff] %v17516_v50  ;;  %v13367_v62 = vld [vmem:[%s14911_s19 + $0x24] ss:$8 sps:$4 sm:$0xff]   ;;  %v3559_v20 = vld [vmem:[%s19967_s6 + $0x4f8] sm:$0xff] }
 0x3e9   : > { %8801 = vmatmul.mubr.bf16.gmra.mxu0 %v20566_v6  ;;  %9320 = vmatmul.mubr.bf16.gmra.mxu1 %v13366_v28  ;;  %v17522_v48 = vpop.f32.mrf.mxu0  ;;  %v17526_v58 = vpop.f32.mrf.mxu1  ;;  %v7961_v28 = vadd.f32 %v17008_v4, %v17511_v61  ;;  %v3547_v4 = vld [vmem:[%s19967_s6 + $0x498] sm:$0xff]  ;;  %v13368_v22 = vld [vmem:[%s14911_s19 + $0x20] ss:$8 sps:$4 sm:$0xff]  }
 0x3ea   : > { %8810 = vmatprep.mubr.bf16.mxu0 %v20568_v53  ;;  %9113 = vmatpush2.bf16.msra.mxu0 %v12331_v32  ;;  %20569 = vst [vmem:[#allocation101_spill] sm:$0xff] %v17522_v48  ;;  %20570 = vst [vmem:[#allocation166_spill] sm:$0xff] %v17526_v58  ;;  %v3551_v11 = vld [vmem:[%s19967_s6 + $0x4b8] sm:$0xff]  ;;  %v12157_v53 = vcombine.low %v3555_v0, %v3559_v20 }
 0x3eb   : > { %9114 = vmatprep.subr.bf16.mxu0 %v12324_v42  ;;  %9329 = vmatprep.mubr.bf16.mxu1 %v13367_v62  ;;  %v17537_v13 = vpop.f32.mrf.mxu0  ;;  %v17539_v32 = vpop.f32.mrf.mxu1  ;;  %v7963_v42 = vadd.f32 %v17017_v41, %v17519_v25  ;;  %v7965_v62 = vadd.f32 %v17028_v39, %v17511_v61  ;;  %v20575_v41 = vld [vmem:[#allocation82_spill] sm:$0xff]  ;;  %v20578_v58 = vld [vmem:[#allocation25_spill] sm:$0xff] }
 0x3ec   : > { %9668 = vmatpush1.bf16.msra.mxu1 %v12173_v51  ;;  %20571 = vst [vmem:[#allocation103_spill] sm:$0xff] %v17537_v13  ;;  %20572 = vst [vmem:[#allocation105_spill] sm:$0xff] %v17539_v32  ;;  %v20576_v13 = vld [vmem:[#allocation8_spill] sm:$0xff]  ;;  %v20577_v32 = vld [vmem:[#allocation10_spill] sm:$0xff] }
 0x3ed   : > { %9669 = vmatprep.subr.bf16.mxu1 %v12166_v12  ;;  %v17549_v9 = vpop.f32.mrf.mxu0  ;;  %v17551_v51 = vpop.f32.mrf.mxu1  ;;  %v12158_v12 = vcombine.high %v3555_v0, %v3559_v20  ;;  %v8156_v39 = vadd.f32 %v20578_v58, %v7963_v42  ;;  %v13369_v50 = vld [vmem:[%s14911_s19 + $0x34] ss:$8 sps:$4 sm:$0xff]  }
 0x3ee   : > { %9115 = vmatpush2.bf16.msra.mxu0 %v12323_v3  ;;  %20573 = vst [vmem:[#allocation23_spill] sm:$0xff] %v17549_v9  ;;  %20574 = vst [vmem:[#allocation114_spill] sm:$0xff] %v17551_v51  ;;  %v8154_v3 = vadd.f32 %v20575_v41, %v7961_v28  ;;  %v12150_v9 = vcombine.high %v3547_v4, %v3551_v11  ;;  %v7971_v28 = vadd.f32 %v17043_v1, %v17511_v61  ;;  %v20579_v41 = vld [vmem:[#allocation84_spill] sm:$0xff] }
 0x3ef   : > { %9470 = vmatprep.subr.bf16.mxu0 %v12062_v31  ;;  %v8346_v6 = vpop.f32.mrf.mxu0  ;;  %v17557_v48 = vpop.f32.mrf.mxu1  ;;  %v7967_v31 = vadd.f32 %v17038_v14, %v17519_v25  ;;  %v12149_v14 = vcombine.low %v3547_v4, %v3551_v11  ;;  %v7973_v1 = vadd.f32 %v17051_v2, %v17519_v25  ;;  %v3531_v11 = vld [vmem:[%s19967_s6 + $0x418] sm:$0xff]  ;;  %v7975_v2 = vadd.f32 %v17061_v36, %v17511_v61  ;;  %v20583_v36 = vld [vmem:[#allocation12_spill] sm:$0xff] }
 0x3f0   : > { %9670 = vmatpush1.bf16.msra.mxu1 %v12165_v54  ;;  %v8347_v51 = vadd.f32 %v8346_v6, %v8154_v3  ;;  %v3539_v6 = vld [vmem:[%s19967_s6 + $0x458] sm:$0xff]  ;;  %v20582_v3 = vld [vmem:[#allocation26_spill] sm:$0xff] }
 0x3f1   : > { %8811 = vmatmul.mubr.bf16.gmra.mxu0 %v20576_v13  ;;  %9330 = vmatmul.mubr.bf16.gmra.mxu1 %v13368_v22  ;;  %v8348_v54 = vpop.f32.mrf.mxu0  ;;  %v17567_v0 = vpop.f32.mrf.mxu1  ;;  %v8158_v13 = vadd.f32 %v20579_v41, %v7965_v62 }
 0x3f2   : > { %8820 = vmatprep.mubr.bf16.mxu0 %v20577_v32  ;;  %9339 = vmatprep.mubr.bf16.mxu1 %v13369_v50  ;;  %v8540_v22 = vadd.f32 %v17182_v21, %v8347_v51  ;;  %v8349_v20 = vadd.f32 %v8348_v54, %v8156_v39  ;;  %v3543_v50 = vld [vmem:[%s19967_s6 + $0x478] sm:$0xff]  ;;  %v20584_v32 = vld [vmem:[#allocation86_spill] sm:$0xff] }
 0x3f3   : > { %9671 = vmatprep.subr.bf16.mxu1 %v12158_v12  ;;  %v8350_v58 = vpop.f32.mrf.mxu0  ;;  %v17579_v42 = vpop.f32.mrf.mxu1  ;;  %v3535_v12 = vld [vmem:[%s19967_s6 + $0x438] sm:$0xff] }
 0x3f4   : > { %9672 = vmatpush1.bf16.msra.mxu1 %v12157_v53  ;;  %20580 = vst [vmem:[#allocation82_spill] sm:$0xff] %v17579_v42  ;;  %v8542_v21 = vadd.f32 %v17195_v17, %v8349_v20  ;;  %v8351_v51 = vadd.f32 %v8350_v58, %v8158_v13  ;;  %v20581_v53 = vld [vmem:[#allocation117_spill] sm:$0xff]  ;;  %v12141_v17 = vcombine.low %v3539_v6, %v3543_v50 }
 0x3f5   : > { %9673 = vmatprep.subr.bf16.mxu1 %v12150_v9  ;;  %v8160_v4 = vadd.f32 %v20581_v53, %v7967_v31  ;;  %v8352_v62 = vpop.f32.mrf.mxu0  ;;  %v8164_v9 = vadd.f32 %v20582_v3, %v7971_v28  ;;  %v17592_v39 = vpop.f32.mrf.mxu1  ;;  %v12142_v13 = vcombine.high %v3539_v6, %v3543_v50  ;;  %v10244_v31 = vmax.f32 %v8540_v22, 0.0  ;;  %v13370_v3 = vld [vmem:[%s14911_s19 + $0x30] ss:$8 sps:$4 sm:$0xff]  }
 0x3f6   : > { %v10245_v54 = vmax.f32 %v8542_v21, 0.0  ;;  %v8544_v20 = vadd.f32 %v17199_v15, %v8351_v51  ;;  %v7977_v58 = vadd.f32 %v17065_v29, %v17519_v25  ;;  %v8166_v42 = vadd.f32 %v20584_v32, %v7973_v1  ;;  %v20585_v21 = vld [vmem:[#allocation13_spill] sm:$0xff] }
 0x3f7   : > { %v8353_v41 = vadd.f32 %v8352_v62, %v8160_v4  ;;  %v8356_v53 = vpop.f32.mrf.mxu0  ;;  %v12134_v22 = vcombine.high %v3531_v11, %v3535_v12  ;;  %v7981_v29 = vadd.f32 %v17069_v27, %v17511_v61  ;;  %v20586_v4 = vld [vmem:[#allocation29_spill] sm:$0xff]  ;;  %v12133_v62 = vcombine.low %v3531_v11, %v3535_v12 }
 0x3f8   : > { %9674 = vmatpush1.bf16.msra.mxu1 %v12149_v14  ;;  %v12681_v6 = vpack.c.bf16 %v10245_v54, %v10244_v31  ;;  %v8357_v15 = vadd.f32 %v8356_v53, %v8164_v9  ;;  %v13371_v14 = vld [vmem:[%s14911_s19 + $0x44] ss:$8 sps:$4 sm:$0xff]   ;;  %v8168_v32 = vadd.f32 %v20586_v4, %v7975_v2  ;;  %v3651_v54 = vld [vmem:[%s19967_s6 + $0x7d8] sm:$0xff]  ;;  %v7983_v2 = vadd.f32 %v17077_v35, %v17519_v25 }
 0x3f9   : > { %8821 = vmatmul.mubr.bf16.gmra.mxu0 %v20583_v36  ;;  %v17599_v28 = vpop.f32.mrf.mxu1  ;;  %9340 = vmatmul.mubr.bf16.gmra.mxu1 %v13370_v3  ;;  %v8546_v50 = vadd.f32 %v17206_v19, %v8353_v41  ;;  %v8358_v51 = vpop.f32.mrf.mxu0  ;;  %v10252_v3 = vmax.f32 %v8544_v20, 0.0  ;;  %v3655_v27 = vld [vmem:[%s19967_s6 + $0x7f8] sm:$0xff]  ;;  %v7985_v35 = vadd.f32 %v17087_v37, %v17511_v61  ;;  %v20669_v36 = vld [vmem:[#allocation135_spill] sm:$0xff] }
 0x3fa   : > { %8830 = vmatprep.mubr.bf16.mxu0 %v20585_v21  ;;  %9349 = vmatprep.mubr.bf16.mxu1 %v13371_v14  ;;  %11267 = vst [vmem:[%s16259_s22 + $0x8] sm:$0xff] %v12681_v6  ;;  %v8550_v19 = vadd.f32 %v17214_v59, %v8357_v15  ;;  %v8359_v9 = vadd.f32 %v8358_v51, %v8166_v42  ;;  %v3643_v41 = vld [vmem:[%s19967_s6 + $0x798] sm:$0xff] }
 0x3fb   : > { %v17608_v1 = vpop.f32.mrf.mxu1  ;;  %9675 = vmatprep.subr.bf16.mxu1 %v12142_v13  ;;  %v10253_v31 = vmax.f32 %v8546_v50, 0.0  ;;  %v8360_v11 = vpop.f32.mrf.mxu0  ;;  %v3647_v53 = vld [vmem:[%s19967_s6 + $0x7b8] sm:$0xff]  ;;  %v20588_v50 = vld [vmem:[#allocation88_spill] sm:$0xff]  ;;  %v12254_v14 = vcombine.high %v3651_v54, %v3655_v27 }
 0x3fc   : > { %9676 = vmatpush1.bf16.msra.mxu1 %v12141_v17  ;;  %v8552_v59 = vadd.f32 %v17221_v7, %v8359_v9  ;;  %v8361_v42 = vadd.f32 %v8360_v11, %v8168_v32  ;;  %v20587_v17 = vld [vmem:[#allocation119_spill] sm:$0xff]  ;;  %v12253_v7 = vcombine.low %v3651_v54, %v3655_v27 }
 0x3fd   : > { %v17620_v12 = vpop.f32.mrf.mxu1  ;;  %9677 = vmatprep.subr.bf16.mxu1 %v12134_v22  ;;  %v12685_v13 = vpack.c.bf16 %v10253_v31, %v10252_v3  ;;  %v8170_v20 = vadd.f32 %v20587_v17, %v7977_v58  ;;  %v8362_v6 = vpop.f32.mrf.mxu0  ;;  %v8174_v22 = vadd.f32 %v20588_v50, %v7981_v29  ;;  %v10260_v58 = vmax.f32 %v8550_v19, 0.0  ;;  %v20589_v31 = vld [vmem:[#allocation11_spill] sm:$0xff] }
 0x3fe   : > { %v10261_v51 = vmax.f32 %v8552_v59, 0.0  ;;  %v8554_v4 = vadd.f32 %v17231_v5, %v8361_v42  ;;  %v7987_v3 = vadd.f32 %v17091_v45, %v17519_v25  ;;  %v20590_v9 = vld [vmem:[#allocation27_spill] sm:$0xff]  ;;  %v12246_v19 = vcombine.high %v3643_v41, %v3647_v53  ;;  %v20591_v59 = vld [vmem:[#allocation17_spill] sm:$0xff] }
 0x3ff   : > { %v17633_v15 = vpop.f32.mrf.mxu1  ;;  %11271 = vst [vmem:[%s16259_s22 + $0x28] sm:$0xff] %v12685_v13  ;;  %v8363_v32 = vadd.f32 %v8362_v6, %v8170_v20  ;;  %v8366_v37 = vpop.f32.mrf.mxu0  ;;  %v8176_v29 = vadd.f32 %v20590_v9, %v7983_v2  ;;  %v13372_v54 = vld [vmem:[%s14911_s19 + $0x40] ss:$8 sps:$4 sm:$0xff]   ;;  %v7991_v45 = vadd.f32 %v17095_v43, %v17511_v61  ;;  %v8178_v2 = vadd.f32 %v16587_v49, %v7985_v35  ;;  %v3639_v49 = vld [vmem:[%s19967_s6 + $0x778] sm:$0xff] }
 0x400   : > { %9678 = vmatpush1.bf16.msra.mxu1 %v12133_v62  ;;  %v12689_v27 = vpack.c.bf16 %v10261_v51, %v10260_v58  ;;  %v8367_v5 = vadd.f32 %v8366_v37, %v8174_v22  ;;  %v13373_v62 = vld [vmem:[%s14911_s19 + $0x54] ss:$8 sps:$4 sm:$0xff]   ;;  %v12245_v20 = vcombine.low %v3643_v41, %v3647_v53  ;;  %v10268_v6 = vmax.f32 %v8554_v4, 0.0 }
 0x401   : > { %8831 = vmatmul.mubr.bf16.gmra.mxu0 %v20589_v31  ;;  %v17641_v11 = vpop.f32.mrf.mxu1  ;;  %9350 = vmatmul.mubr.bf16.gmra.mxu1 %v13372_v54  ;;  %v8556_v13 = vadd.f32 %v17235_v46, %v8363_v32  ;;  %v8368_v42 = vpop.f32.mrf.mxu0  ;;  %v3635_v58 = vld [vmem:[%s19967_s6 + $0x758] sm:$0xff]  ;;  %v7993_v43 = vadd.f32 %v17103_v55, %v17519_v25  ;;  %v7995_v51 = vadd.f32 %v17113_v34, %v17511_v61 }
 0x402   : > { %8840 = vmatprep.mubr.bf16.mxu0 %v20591_v59  ;;  %9359 = vmatprep.mubr.bf16.mxu1 %v13373_v62  ;;  %11275 = vst [vmem:[%s16259_s22 + $0x48] sm:$0xff] %v12689_v27  ;;  %v8560_v46 = vadd.f32 %v17246_v18, %v8367_v5  ;;  %v8369_v22 = vadd.f32 %v8368_v42, %v8176_v29  ;;  %v20592_v32 = vld [vmem:[#allocation121_spill] sm:$0xff] }
 0x403   : > { %v17650_v17 = vpop.f32.mrf.mxu1  ;;  %9679 = vmatprep.subr.bf16.mxu1 %v12254_v14  ;;  %v10269_v50 = vmax.f32 %v8556_v13, 0.0  ;;  %v8370_v41 = vpop.f32.mrf.mxu0  ;;  %v8180_v14 = vadd.f32 %v16598_v47, %v7987_v3  ;;  %v8184_v37 = vadd.f32 %v20592_v32, %v7991_v45  ;;  %v12237_v55 = vcombine.low %v3635_v58, %v3639_v49  ;;  %v20593_v3 = vld [vmem:[#allocation14_spill] sm:$0xff]  ;;  %v13374_v45 = vld [vmem:[%s14911_s19 + $0x50] ss:$8 sps:$4 sm:$0xff]  }
 0x404   : > { %9680 = vmatpush2.bf16.msra.mxu1 %v12253_v7  ;;  %v8562_v18 = vadd.f32 %v17255_v38, %v8369_v22  ;;  %v8371_v7 = vadd.f32 %v8370_v41, %v8178_v2  ;;  %v12238_v29 = vcombine.high %v3635_v58, %v3639_v49  ;;  %v10276_v54 = vmax.f32 %v8560_v46, 0.0  ;;  %v20594_v13 = vld [vmem:[#allocation90_spill] sm:$0xff]  ;;  %v3627_v41 = vld [vmem:[%s19967_s6 + $0x718] sm:$0xff] }
 0x405   : > { %v17662_v53 = vpop.f32.mrf.mxu1  ;;  %9681 = vmatprep.subr.bf16.mxu1 %v12246_v19  ;;  %v12693_v35 = vpack.c.bf16 %v10269_v50, %v10268_v6  ;;  %v8372_v4 = vpop.f32.mrf.mxu0  ;;  %v7997_v47 = vadd.f32 %v17117_v40, %v17519_v25  ;;  %v8186_v5 = vadd.f32 %v20594_v13, %v7993_v43  ;;  %v8001_v40 = vadd.f32 %v17121_v16, %v17511_v61  ;;  %v3631_v16 = vld [vmem:[%s19967_s6 + $0x738] sm:$0xff] }
 0x406   : > { %v10277_v19 = vmax.f32 %v8562_v18, 0.0  ;;  %v8564_v38 = vadd.f32 %v17266_v56, %v8371_v7  ;;  %v8373_v27 = vadd.f32 %v8372_v4, %v8180_v14  ;;  %v20595_v56 = vld [vmem:[#allocation16_spill] sm:$0xff]  ;;  %v8188_v46 = vadd.f32 %v16643_v30, %v7995_v51 }
 0x407   : > { %v17669_v9 = vpop.f32.mrf.mxu1  ;;  %11279 = vst [vmem:[%s16259_s22 + $0x68] sm:$0xff] %v12693_v35  ;;  %v8003_v30 = vadd.f32 %v17129_v63, %v17519_v25  ;;  %v12229_v7 = vcombine.low %v3627_v41, %v3631_v16  ;;  %v12230_v14 = vcombine.high %v3627_v41, %v3631_v16  ;;  %v8190_v32 = vadd.f32 %v16650_v57, %v7997_v47  ;;  %v20596_v57 = vld [vmem:[#allocation115_spill] sm:$0xff]  ;;  %v20603_v16 = vld [vmem:[#allocation69_spill] sm:$0xff] }
 0x408   : > { %9682 = vmatpush2.bf16.msra.mxu1 %v12245_v20  ;;  %v12697_v42 = vpack.c.bf16 %v10277_v19, %v10276_v54  ;;  %v8566_v2 = vadd.f32 %v17273_v52, %v8373_v27  ;;  %v13375_v20 = vld [vmem:[%s14911_s19 + $0x64] ss:$8 sps:$4 sm:$0xff]   ;;  %v10284_v58 = vmax.f32 %v8564_v38, 0.0  ;;  %v8007_v27 = vadd.f32 %v20596_v57, %v17519_v25 }
 0x409   : > { %v8376_v34 = vpop.f32.mrf.mxu0  ;;  %8841 = vmatmul.mubr.bf16.gmra.mxu0 %v20593_v3  ;;  %v17677_v62 = vpop.f32.mrf.mxu1  ;;  %9360 = vmatmul.mubr.bf16.gmra.mxu1 %v13374_v45 }
 0x40a   : > { %v8377_v6 = vadd.f32 %v8376_v34, %v8184_v37  ;;  %8850 = vmatprep.mubr.bf16.mxu0 %v20595_v56  ;;  %9369 = vmatprep.mubr.bf16.mxu1 %v13375_v20  ;;  %11283 = vst [vmem:[%s16259_s22 + $0x88] sm:$0xff] %v12697_v42  ;;  %v10285_v49 = vmax.f32 %v8566_v2, 0.0  ;;  %v8005_v37 = vadd.f32 %v17139_v33, %v17511_v61  ;;  %v20597_v33 = vld [vmem:[#allocation15_spill] sm:$0xff]  ;;  %v20598_v34 = vld [vmem:[#allocation28_spill] sm:$0xff] }
 0x40b   : > { %v8378_v50 = vpop.f32.mrf.mxu0  ;;  %v17686_v22 = vpop.f32.mrf.mxu1  ;;  %9683 = vmatprep.subr.bf16.mxu1 %v12238_v29  ;;  %v8194_v29 = vadd.f32 %v16668_v10, %v8001_v40  ;;  %v8196_v10 = vadd.f32 %v20598_v34, %v8003_v30  ;;  %v20599_v42 = vld [vmem:[#allocation131_spill] sm:$0xff]  ;;  %v13377_v20 = vld [vmem:[%s14911_s19 + $0x74] ss:$8 sps:$4 sm:$0xff]  }
 0x40c   : > { %v8570_v43 = vadd.f32 %v17291_v26, %v8377_v6  ;;  %v8379_v52 = vadd.f32 %v8378_v50, %v8186_v5  ;;  %9684 = vmatpush2.bf16.msra.mxu1 %v12237_v55  ;;  %v12701_v26 = vpack.c.bf16 %v10285_v49, %v10284_v58  ;;  %v13376_v5 = vld [vmem:[%s14911_s19 + $0x60] ss:$8 sps:$4 sm:$0xff]   ;;  %v20601_v40 = vld [vmem:[#allocation60_spill] sm:$0xff] }
 0x40d   : > { %v8380_v35 = vpop.f32.mrf.mxu0  ;;  %v17698_v18 = vpop.f32.mrf.mxu1  ;;  %9685 = vmatprep.subr.bf16.mxu1 %v12230_v14  ;;  %v8011_v50 = vadd.f32 %v20601_v40, %v17511_v61  ;;  %v20602_v58 = vld [vmem:[#allocation123_spill] sm:$0xff]  ;;  %v3623_v14 = vld [vmem:[%s19967_s6 + $0x6f8] sm:$0xff] }
 0x40e   : > { %v8572_v51 = vadd.f32 %v17302_v24, %v8379_v52  ;;  %v8381_v4 = vadd.f32 %v8380_v35, %v8188_v46  ;;  %11287 = vst [vmem:[%s16259_s22 + $0xa8] sm:$0xff] %v12701_v26  ;;  %v10292_v63 = vmax.f32 %v8570_v43, 0.0  ;;  %v8198_v49 = vadd.f32 %v20602_v58, %v8005_v37  ;;  %v20604_v26 = vld [vmem:[#allocation118_spill] sm:$0xff] }
 0x40f   : > { %v8382_v55 = vpop.f32.mrf.mxu0  ;;  %v17705_v54 = vpop.f32.mrf.mxu1 }
 0x410   : > { %v10293_v19 = vmax.f32 %v8572_v51, 0.0  ;;  %v8574_v38 = vadd.f32 %v17320_v8, %v8381_v4  ;;  %v8383_v24 = vadd.f32 %v8382_v55, %v8190_v32  ;;  %9686 = vmatpush2.bf16.msra.mxu1 %v12229_v7  ;;  %v20600_v8 = vld [vmem:[#allocation19_spill] sm:$0xff]  ;;  %v3619_v7 = vld [vmem:[%s19967_s6 + $0x6d8] sm:$0xff]  ;;  %v8013_v51 = vadd.f32 %v20604_v26, %v17519_v25 }
 0x411   : > { %v8386_v47 = vpop.f32.mrf.mxu0  ;;  %8851 = vmatmul.mubr.bf16.gmra.mxu0 %v20597_v33  ;;  %v17713_v13 = vpop.f32.mrf.mxu1  ;;  %9370 = vmatmul.mubr.bf16.gmra.mxu1 %v13376_v5  ;;  %v12221_v37 = vcombine.low %v3619_v7, %v3623_v14  ;;  %v12222_v55 = vcombine.high %v3619_v7, %v3623_v14  ;;  %v20608_v5 = vld [vmem:[#allocation125_spill] sm:$0xff] }
 0x412   : > { %v12705_v45 = vpack.c.bf16 %v10293_v19, %v10292_v63  ;;  %v8576_v2 = vadd.f32 %v20599_v42, %v8383_v24  ;;  %v8387_v6 = vadd.f32 %v8386_v47, %v8194_v29  ;;  %8860 = vmatprep.mubr.bf16.mxu0 %v20600_v8  ;;  %9379 = vmatprep.mubr.bf16.mxu1 %v13377_v20  ;;  %v10300_v52 = vmax.f32 %v8574_v38, 0.0  ;;  %v20605_v63 = vld [vmem:[#allocation71_spill] sm:$0xff]  ;;  %v20606_v24 = vld [vmem:[#allocation92_spill] sm:$0xff]  ;;  %v20607_v47 = vld [vmem:[#allocation61_spill] sm:$0xff] }
 0x413   : > { %v8388_v46 = vpop.f32.mrf.mxu0  ;;  %v17722_v43 = vpop.f32.mrf.mxu1  ;;  %v8200_v57 = vadd.f32 %v20606_v24, %v8007_v27  ;;  %v8015_v34 = vadd.f32 %v20607_v47, %v17511_v61  ;;  %9687 = vmatprep.subr.bf16.mxu1 %v12222_v55  ;;  %v20609_v20 = vld [vmem:[#allocation72_spill] sm:$0xff]  ;;  %v20610_v27 = vld [vmem:[#allocation62_spill] sm:$0xff]  ;;  %v20613_v7 = vld [vmem:[#allocation137_spill] sm:$0xff] }
 0x414   : > { %11291 = vst [vmem:[%s16259_s22 + $0xc8] sm:$0xff] %v12705_v45  ;;  %v10301_v41 = vmax.f32 %v8576_v2, 0.0  ;;  %v8580_v30 = vadd.f32 %v20603_v16, %v8387_v6  ;;  %v8389_v35 = vadd.f32 %v8388_v46, %v8196_v10  ;;  %v8204_v45 = vadd.f32 %v20608_v5, %v8011_v50  ;;  %9688 = vmatpush2.bf16.msra.mxu1 %v12221_v37  ;;  %v13379_v37 = vld [vmem:[%s14911_s19 + $0x84] ss:$8 sps:$4 sm:$0xff]   ;;  %v20617_v47 = vld [vmem:[#allocation73_spill] sm:$0xff] }
 0x415   : > { %v8390_v4 = vpop.f32.mrf.mxu0  ;;  %v17734_v32 = vpop.f32.mrf.mxu1  ;;  %v8017_v58 = vadd.f32 %v20610_v27, %v17519_v25  ;;  %v20615_v55 = vld [vmem:[#allocation154_spill] sm:$0xff] }
 0x416   : > { %v12709_v29 = vpack.c.bf16 %v10301_v41, %v10300_v52  ;;  %v8582_v19 = vadd.f32 %v20605_v63, %v8389_v35  ;;  %v8391_v38 = vadd.f32 %v8390_v4, %v8198_v49  ;;  %v10308_v2 = vmax.f32 %v8580_v30, 0.0  ;;  %v20611_v52 = vld [vmem:[#allocation18_spill] sm:$0xff]  ;;  %v13378_v35 = vld [vmem:[%s14911_s19 + $0x70] ss:$8 sps:$4 sm:$0xff]  }
 0x417   : > { %v8392_v10 = vpop.f32.mrf.mxu0  ;;  %v17741_v42 = vpop.f32.mrf.mxu1  ;;  %v20612_v41 = vld [vmem:[#allocation30_spill] sm:$0xff]  ;;  %v20614_v4 = vld [vmem:[#allocation21_spill] sm:$0xff] }
 0x418   : > { %11295 = vst [vmem:[%s16259_s22 + $0xe8] sm:$0xff] %v12709_v29  ;;  %v10309_v6 = vmax.f32 %v8582_v19, 0.0  ;;  %v8584_v40 = vadd.f32 %v20609_v20, %v8391_v38  ;;  %v8393_v46 = vadd.f32 %v8392_v10, %v8200_v57  ;;  %v8206_v50 = vadd.f32 %v20612_v41, %v8013_v51  ;;  %v20616_v19 = vld [vmem:[#allocation94_spill] sm:$0xff]  ;;  %v20619_v41 = vld [vmem:[#allocation75_spill] sm:$0xff] }
 0x419   : > { %v8396_v49 = vpop.f32.mrf.mxu0  ;;  %8861 = vmatmul.mubr.bf16.gmra.mxu0 %v20611_v52  ;;  %v17749_v16 = vpop.f32.mrf.mxu1  ;;  %9380 = vmatmul.mubr.bf16.gmra.mxu1 %v13378_v35  ;;  %v8021_v29 = vadd.f32 %v20615_v55, %v17511_v61  ;;  %v8208_v38 = vadd.f32 %v20616_v19, %v8015_v34  ;;  %v20622_v55 = vld [vmem:[#allocation127_spill] sm:$0xff]  ;;  %v20634_v52 = vld [vmem:[#allocation129_spill] sm:$0xff] }
 0x41a   : > { %v12713_v30 = vpack.c.bf16 %v10309_v6, %v10308_v2  ;;  %v8586_v14 = vadd.f32 %v20613_v7, %v8393_v46  ;;  %v8397_v26 = vadd.f32 %v8396_v49, %v8204_v45  ;;  %8870 = vmatprep.mubr.bf16.mxu0 %v20614_v4  ;;  %9389 = vmatprep.mubr.bf16.mxu1 %v13379_v37  ;;  %v10316_v51 = vmax.f32 %v8584_v40, 0.0  ;;  %v3611_v45 = vld [vmem:[%s19967_s6 + $0x698] sm:$0xff]  ;;  %v20618_v6 = vld [vmem:[#allocation122_spill] sm:$0xff] }
 0x41b   : > { %v8398_v63 = vpop.f32.mrf.mxu0  ;;  %v17758_v24 = vpop.f32.mrf.mxu1  ;;  %v3615_v2 = vld [vmem:[%s19967_s6 + $0x6b8] sm:$0xff]  ;;  %v8023_v34 = vadd.f32 %v20618_v6, %v17519_v25  ;;  %v20625_v6 = vld [vmem:[#allocation20_spill] sm:$0xff] }
 0x41c   : > { %11299 = vst [vmem:[%s16259_s22 + $0x108] sm:$0xff] %v12713_v30  ;;  %v10317_v57 = vmax.f32 %v8586_v14, 0.0  ;;  %v8590_v10 = vadd.f32 %v20617_v47, %v8397_v26  ;;  %v8399_v5 = vadd.f32 %v8398_v63, %v8206_v50  ;;  %v12213_v40 = vcombine.low %v3611_v45, %v3615_v2  ;;  %v20620_v30 = vld [vmem:[#allocation31_spill] sm:$0xff]  ;;  %v20621_v14 = vld [vmem:[#allocation64_spill] sm:$0xff] }
 0x41d   : > { %v8400_v20 = vpop.f32.mrf.mxu0  ;;  %v17770_v46 = vpop.f32.mrf.mxu1  ;;  %v12214_v27 = vcombine.high %v3611_v45, %v3615_v2  ;;  %v8210_v7 = vadd.f32 %v20620_v30, %v8017_v58  ;;  %v8025_v26 = vadd.f32 %v20621_v14, %v17511_v61  ;;  %v8214_v63 = vadd.f32 %v20622_v55, %v8021_v29  ;;  %v20624_v58 = vld [vmem:[#allocation156_spill] sm:$0xff] }
 0x41e   : > { %v12717_v49 = vpack.c.bf16 %v10317_v57, %v10316_v51  ;;  %v8592_v50 = vadd.f32 %v20619_v41, %v8399_v5  ;;  %v8401_v35 = vadd.f32 %v8400_v20, %v8208_v38  ;;  %v10324_v47 = vmax.f32 %v8590_v10, 0.0  ;;  %v20623_v51 = vld [vmem:[#allocation76_spill] sm:$0xff] }
 0x41f   : > { %v8402_v37 = vpop.f32.mrf.mxu0  ;;  %v17777_v19 = vpop.f32.mrf.mxu1  ;;  %9689 = vmatprep.subr.bf16.mxu1 %v12214_v27  ;;  %v8027_v38 = vadd.f32 %v20624_v58, %v17519_v25  ;;  %v20626_v20 = vld [vmem:[#allocation96_spill] sm:$0xff]  ;;  %v13380_v27 = vld [vmem:[%s14911_s19 + $0x80] ss:$8 sps:$4 sm:$0xff]  }
 0x420   : > { %11303 = vst [vmem:[%s16259_s22 + $0x128] sm:$0xff] %v12717_v49  ;;  %v10325_v45 = vmax.f32 %v8592_v50, 0.0  ;;  %v8594_v57 = vadd.f32 %v20623_v51, %v8401_v35  ;;  %v8403_v5 = vadd.f32 %v8402_v37, %v8210_v7  ;;  %9690 = vmatpush2.bf16.msra.mxu1 %v12213_v40  ;;  %v8216_v41 = vadd.f32 %v20626_v20, %v8023_v34  ;;  %v20627_v49 = vld [vmem:[#allocation143_spill] sm:$0xff]  ;;  %v20628_v35 = vld [vmem:[#allocation22_spill] sm:$0xff]  ;;  %v13381_v40 = vld [vmem:[%s14911_s19 + $0x94] ss:$8 sps:$4 sm:$0xff]  }
 0x421   : > { %v8406_v2 = vpop.f32.mrf.mxu0  ;;  %8871 = vmatmul.mubr.bf16.gmra.mxu0 %v20625_v6  ;;  %v17785_v29 = vpop.f32.mrf.mxu1  ;;  %9390 = vmatmul.mubr.bf16.gmra.mxu1 %v13380_v27  ;;  %v3603_v7 = vld [vmem:[%s19967_s6 + $0x658] sm:$0xff]  ;;  %v20629_v14 = vld [vmem:[#allocation124_spill] sm:$0xff]  ;;  %v20630_v51 = vld [vmem:[#allocation34_spill] sm:$0xff]  ;;  %v8220_v8 = vadd.f32 %v20634_v52, %v8027_v38 }
 0x422   : > { %v12721_v10 = vpack.c.bf16 %v10325_v45, %v10324_v47  ;;  %v8596_v50 = vadd.f32 %v20627_v49, %v8403_v5  ;;  %v8407_v30 = vadd.f32 %v8406_v2, %v8214_v63  ;;  %8880 = vmatprep.mubr.bf16.mxu0 %v20628_v35  ;;  %9399 = vmatprep.mubr.bf16.mxu1 %v13381_v40  ;;  %v10332_v37 = vmax.f32 %v8594_v57, 0.0  ;;  %v3607_v63 = vld [vmem:[%s19967_s6 + $0x678] sm:$0xff]  ;;  %v20632_v49 = vld [vmem:[#allocation158_spill] sm:$0xff]  ;;  %v20633_v35 = vld [vmem:[#allocation79_spill] sm:$0xff] }
 0x423   : > { %v8031_v34 = vadd.f32 %v20629_v14, %v17511_v61  ;;  %v8408_v55 = vpop.f32.mrf.mxu0  ;;  %v8218_v58 = vadd.f32 %v20630_v51, %v8025_v26  ;;  %v17797_v20 = vpop.f32.mrf.mxu1  ;;  %v20631_v45 = vld [vmem:[#allocation145_spill] sm:$0xff]  ;;  %v12205_v27 = vcombine.low %v3603_v7, %v3607_v63  ;;  %v8033_v40 = vadd.f32 %v20632_v49, %v17519_v25 }
 0x424   : > { %11307 = vst [vmem:[%s16259_s22 + $0x148] sm:$0xff] %v12721_v10  ;;  %v10333_v47 = vmax.f32 %v8596_v50, 0.0  ;;  %v8600_v5 = vadd.f32 %v20631_v45, %v8407_v30  ;;  %v8409_v2 = vadd.f32 %v8408_v55, %v8216_v41  ;;  %v12206_v26 = vcombine.high %v3603_v7, %v3607_v63  ;;  %v3595_v10 = vld [vmem:[%s19967_s6 + $0x618] sm:$0xff]  ;;  %v20635_v50 = vld [vmem:[#allocation126_spill] sm:$0xff] }
 0x425   : > { %v8410_v14 = vpop.f32.mrf.mxu0  ;;  %v17806_v57 = vpop.f32.mrf.mxu1  ;;  %v3599_v41 = vld [vmem:[%s19967_s6 + $0x638] sm:$0xff]  ;;  %v8035_v30 = vadd.f32 %v20635_v50, %v17511_v61  ;;  %v20636_v7 = vld [vmem:[#allocation98_spill] sm:$0xff]  ;;  %v20639_v50 = vld [vmem:[#allocation24_spill] sm:$0xff] }
 0x426   : > { %v12725_v51 = vpack.c.bf16 %v10333_v47, %v10332_v37  ;;  %v8602_v6 = vadd.f32 %v20633_v35, %v8409_v2  ;;  %v8411_v4 = vadd.f32 %v8410_v14, %v8218_v58  ;;  %v10340_v55 = vmax.f32 %v8600_v5, 0.0  ;;  %9691 = vmatprep.subr.bf16.mxu1 %v12206_v26  ;;  %v20637_v58 = vld [vmem:[#allocation149_spill] sm:$0xff] }
 0x427   : > { %v8412_v45 = vpop.f32.mrf.mxu0  ;;  %v8224_v37 = vadd.f32 %v20636_v7, %v8031_v34  ;;  %v17819_v35 = vpop.f32.mrf.mxu1  ;;  %v12198_v52 = vcombine.high %v3595_v10, %v3599_v41  ;;  %9692 = vmatpush2.bf16.msra.mxu1 %v12205_v27  ;;  %v12197_v2 = vcombine.low %v3595_v10, %v3599_v41  ;;  %v20638_v49 = vld [vmem:[#allocation65_spill] sm:$0xff]  ;;  %v20640_v34 = vld [vmem:[#allocation32_spill] sm:$0xff]  ;;  %v13384_v27 = vld [vmem:[%s14911_s19 + $0xa4] ss:$8 sps:$4 sm:$0xff]  }
 0x428   : > { %11311 = vst [vmem:[%s16259_s22 + $0x168] sm:$0xff] %v12725_v51  ;;  %v10341_v38 = vmax.f32 %v8602_v6, 0.0  ;;  %v8604_v63 = vadd.f32 %v20637_v58, %v8411_v4  ;;  %v8413_v47 = vadd.f32 %v8412_v45, %v8220_v8  ;;  %v8037_v5 = vadd.f32 %v20638_v49, %v17519_v25  ;;  %v13382_v26 = vld [vmem:[%s14911_s19 + $0x90] ss:$8 sps:$4 sm:$0xff]   ;;  %v13383_v8 = vld [vmem:[%s14923_s16 + $0x4] ss:$8 sps:$4 sm:$0xff]  }
 0x429   : > { %v8416_v14 = vpop.f32.mrf.mxu0  ;;  %8881 = vmatmul.mubr.bf16.gmra.mxu0 %v20639_v50  ;;  %v8226_v7 = vadd.f32 %v20640_v34, %v8033_v40  ;;  %v17827_v33 = vpop.f32.mrf.mxu1  ;;  %9400 = vmatmul.mubr.bf16.gmra.mxu1 %v13382_v26  ;;  %v20642_v51 = vld [vmem:[#allocation80_spill] sm:$0xff]  ;;  %v20644_v45 = vld [vmem:[#allocation66_spill] sm:$0xff]  ;;  %v17845_v26 = vld [vmem:[%s19967_s6 + $0x198] sm:$0xff] }
 0x42a   : > { %20641 = vst [vmem:[#allocation25_spill] sm:$0xff] %v17827_v33  ;;  %v12729_v6 = vpack.c.bf16 %v10341_v38, %v10340_v55  ;;  %v8606_v4 = vadd.f32 %v20642_v51, %v8413_v47  ;;  %v8417_v58 = vadd.f32 %v8416_v14, %v8224_v37  ;;  %9116 = vmatprep.mubr.bf16.mxu0 %v13383_v8  ;;  %v20643_v10 = vld [vmem:[#allocation160_spill] sm:$0xff]  ;;  %v10348_v55 = vmax.f32 %v8604_v63, 0.0  ;;  %v20647_v37 = vld [vmem:[#allocation83_spill] sm:$0xff]  ;;  %v17850_v51 = vld [vmem:[%s19967_s6 + $0x1b8] sm:$0xff] }
 0x42b   : > { %9409 = vmatprep.mubr.bf16.mxu1 %v13384_v27  ;;  %v8041_v41 = vadd.f32 %v20643_v10, %v17511_v61  ;;  %v8043_v49 = vadd.f32 %v20644_v45, %v17519_v25  ;;  %v8418_v40 = vpop.f32.mrf.mxu0  ;;  %v20645_v34 = vld [vmem:[#allocation100_spill] sm:$0xff]  ;;  %v17838_v56 = vpop.f32.mrf.mxu1  ;;  %9693 = vmatprep.subr.bf16.mxu1 %v12198_v52  ;;  %v20651_v27 = vld [vmem:[#allocation33_spill] sm:$0xff]  ;;  %v20652_v45 = vld [vmem:[#allocation162_spill] sm:$0xff] }
 0x42c   : > { %v8228_v50 = vadd.f32 %v20645_v34, %v8035_v30  ;;  %20646 = vst [vmem:[#allocation84_spill] sm:$0xff] %v17838_v56  ;;  %11315 = vst [vmem:[%s16259_s22 + $0x188] sm:$0xff] %v12729_v6  ;;  %v10349_v38 = vmax.f32 %v8606_v4, 0.0  ;;  %v8610_v47 = vadd.f32 %v20647_v37, %v8417_v58  ;;  %v8419_v14 = vadd.f32 %v8418_v40, %v8226_v7  ;;  %v20648_v30 = vld [vmem:[#allocation67_spill] sm:$0xff]  ;;  %v20653_v37 = vld [vmem:[#allocation102_spill] sm:$0xff] }
 0x42d   : > { %9694 = vmatpush2.bf16.msra.mxu1 %v12197_v2  ;;  %v8045_v52 = vadd.f32 %v20648_v30, %v17511_v61  ;;  %v8420_v63 = vpop.f32.mrf.mxu0  ;;  %v17854_v6 = vpop.f32.mrf.mxu1  ;;  %v20650_v7 = vld [vmem:[#allocation155_spill] sm:$0xff]  ;;  %v8230_v10 = vadd.f32 %v20651_v27, %v8037_v5  ;;  %v8047_v40 = vadd.f32 %v20652_v45, %v17519_v25  ;;  %v8234_v3 = vadd.f32 %v20653_v37, %v8041_v41  ;;  %v17876_v41 = vld [vmem:[%s19967_s6 + $0x178] sm:$0xff]  ;;  %v20668_v56 = vld [vmem:[#allocation36_spill] sm:$0xff] }
 0x42e   : > { %20649 = vst [vmem:[#allocation117_spill] sm:$0xff] %v17854_v6  ;;  %v12733_v4 = vpack.c.bf16 %v10349_v38, %v10348_v55  ;;  %v8612_v58 = vadd.f32 %v20650_v7, %v8419_v14  ;;  %v8421_v8 = vadd.f32 %v8420_v63, %v8228_v50  ;;  %v20654_v2 = vld [vmem:[#allocation35_spill] sm:$0xff]  ;;  %v12054_v30 = vcombine.high %v17845_v26, %v17850_v51  ;;  %v20656_v38 = vld [vmem:[#allocation157_spill] sm:$0xff] }
 0x42f   : > { %v8422_v34 = vpop.f32.mrf.mxu0  ;;  %v8236_v59 = vadd.f32 %v20654_v2, %v8043_v49  ;;  %v17864_v31 = vpop.f32.mrf.mxu1  ;;  %v10356_v55 = vmax.f32 %v8610_v47, 0.0  ;;  %v17871_v63 = vld [vmem:[%s19967_s6 + $0x158] sm:$0xff]  ;;  %v20657_v49 = vld [vmem:[#allocation128_spill] sm:$0xff]  ;;  %v13385_v47 = vld [vmem:[%s14923_s16] ss:$8 sps:$4 sm:$0xff]   ;;  %v12053_v27 = vcombine.low %v17845_v26, %v17850_v51 }
 0x430   : > { %20655 = vst [vmem:[#allocation26_spill] sm:$0xff] %v17864_v31  ;;  %11319 = vst [vmem:[%s16259_s22 + $0x1a8] sm:$0xff] %v12733_v4  ;;  %v10357_v50 = vmax.f32 %v8612_v58, 0.0  ;;  %v8614_v5 = vadd.f32 %v20656_v38, %v8421_v8  ;;  %v8423_v14 = vadd.f32 %v8422_v34, %v8230_v10  ;;  %v8051_v7 = vadd.f32 %v20657_v49, %v17511_v61  ;;  %v20658_v58 = vld [vmem:[#allocation133_spill] sm:$0xff]  ;;  %v13386_v45 = vld [vmem:[%s14911_s19 + $0xa0] ss:$8 sps:$4 sm:$0xff]  }
 0x431   : > { %v8426_v4 = vpop.f32.mrf.mxu0  ;;  %9117 = vmatmul.mubr.bf16.vlgmr.msra.gmra.mxu0 %v13385_v47  ;;  %v8238_v8 = vadd.f32 %v20658_v58, %v8045_v52  ;;  %v17884_v10 = vpop.f32.mrf.mxu1  ;;  %9410 = vmatmul.mubr.bf16.gmra.mxu1 %v13386_v45  ;;  %v20660_v37 = vld [vmem:[#allocation161_spill] sm:$0xff]  ;;  %v20661_v49 = vcombine.low %v17281_v44, %v17286_v23  ;;  %v20662_v52 = vld [vmem:[#allocation68_spill] sm:$0xff]  ;;  %v12046_v44 = vcombine.high %v17871_v63, %v17876_v41 }
 0x432   : > { %20659 = vst [vmem:[#allocation86_spill] sm:$0xff] %v17884_v10  ;;  %v12737_v34 = vpack.c.bf16 %v10357_v50, %v10356_v55  ;;  %v8616_v2 = vadd.f32 %v20660_v37, %v8423_v14  ;;  %v8427_v38 = vadd.f32 %v8426_v4, %v8234_v3  ;;  %v13387_v47 = vld [vmem:[%s14923_s16 + $0x14] ss:$8 sps:$4 sm:$0xff]   ;;  %v8053_v55 = vadd.f32 %v20662_v52, %v17519_v25  ;;  %v20664_v37 = vld [vmem:[#allocation163_spill] sm:$0xff] }
 0x433   : > { %9471 = vmatpush1.bf16.msra.mxu0 %v20661_v49  ;;  %9126 = vmatprep.mubr.bf16.mxu0 %v13387_v47  ;;  %v17895_v26 = vld [vmem:[%s19967_s6 + $0x9d8] sm:$0xff]  ;;  %v8428_v3 = vpop.f32.mrf.mxu0  ;;  %v17911_v50 = vpop.f32.mrf.mxu1  ;;  %v10364_v58 = vmax.f32 %v8614_v5, 0.0  ;;  %v20665_v5 = vld [vmem:[#allocation164_spill] sm:$0xff]  ;;  %v12045_v6 = vcombine.low %v17871_v63, %v17876_v41  ;;  %v20672_v41 = vld [vmem:[#allocation130_spill] sm:$0xff] }
 0x434   : > { %v17900_v51 = vld [vmem:[%s19967_s6 + $0x9f8] sm:$0xff]  ;;  %9472 = vmatprep.subr.bf16.mxu0 %v12054_v30  ;;  %20663 = vst [vmem:[#allocation29_spill] sm:$0xff] %v17911_v50  ;;  %11323 = vst [vmem:[%s16259_s22 + $0x1c8] sm:$0xff] %v12737_v34  ;;  %v10365_v45 = vmax.f32 %v8616_v2, 0.0  ;;  %v8620_v30 = vadd.f32 %v20664_v37, %v8427_v38  ;;  %v8429_v49 = vadd.f32 %v8428_v3, %v8236_v59  ;;  %v20666_v59 = vld [vmem:[#allocation104_spill] sm:$0xff] }
 0x435   : > { %v17909_v23 = vld [vmem:[%s19967_s6 + $0x118] sm:$0xff]  ;;  %v8055_v34 = vadd.f32 %v20665_v5, %v17511_v61  ;;  %v8430_v2 = vpop.f32.mrf.mxu0  ;;  %v8240_v38 = vadd.f32 %v20666_v59, %v8047_v40  ;;  %v17936_v3 = vpop.f32.mrf.mxu1  ;;  %v20667_v50 = vld [vmem:[#allocation91_spill] sm:$0xff]  ;;  %v8244_v5 = vadd.f32 %v20668_v56, %v8051_v7  ;;  %v8246_v33 = vadd.f32 %v20669_v36, %v8053_v55 }
 0x436   : > { %v13388_v14 = vld [vmem:[%s14911_s19 + $0xb4] ss:$8 sps:$4 sm:$0xff]   ;;  %v12741_v4 = vpack.c.bf16 %v10365_v45, %v10364_v58  ;;  %v8622_v10 = vadd.f32 %v20667_v50, %v8429_v49  ;;  %v8431_v31 = vadd.f32 %v8430_v2, %v8238_v8  ;;  %v10372_v8 = vmax.f32 %v8620_v30, 0.0  ;;  %v20671_v50 = vld [vmem:[#allocation95_spill] sm:$0xff]  ;;  %v13390_v45 = vld [vmem:[%s14911_s19 + $0xb0] ss:$8 sps:$4 sm:$0xff]  }
 0x437   : > { %9419 = vmatprep.mubr.bf16.mxu1 %v13388_v14  ;;  %v17921_v47 = vld [vmem:[%s19967_s6 + $0x138] sm:$0xff]  ;;  %9473 = vmatpush1.bf16.msra.mxu0 %v12053_v27  ;;  %v8432_v21 = vpop.f32.mrf.mxu0  ;;  %v17947_v59 = vpop.f32.mrf.mxu1  ;;  %v8057_v7 = vadd.f32 %v20672_v41, %v17519_v25 }
 0x438   : > { %v17926_v52 = vld [vmem:[%s19967_s6 + $0xdd8] sm:$0xff]  ;;  %9474 = vmatprep.subr.bf16.mxu0 %v12046_v44  ;;  %v12038_v40 = vcombine.high %v17909_v23, %v17921_v47  ;;  %20670 = vst [vmem:[#allocation119_spill] sm:$0xff] %v17947_v59  ;;  %11327 = vst [vmem:[%s16259_s22 + $0x1e8] sm:$0xff] %v12741_v4  ;;  %v10373_v27 = vmax.f32 %v8622_v10, 0.0  ;;  %v8624_v58 = vadd.f32 %v20671_v50, %v8431_v31  ;;  %v20673_v10 = vld [vmem:[#allocation106_spill] sm:$0xff] }
 0x439   : > { %v17931_v14 = vld [vmem:[%s19967_s6 + $0xdf8] sm:$0xff]  ;;  %v8433_v63 = vadd.f32 %v8432_v21, %v8240_v38  ;;  %v8436_v55 = vpop.f32.mrf.mxu0  ;;  %v8248_v31 = vadd.f32 %v20673_v10, %v8055_v34  ;;  %v12037_v21 = vcombine.low %v17909_v23, %v17921_v47  ;;  %v17967_v4 = vpop.f32.mrf.mxu1  ;;  %9420 = vmatmul.mubr.bf16.gmra.mxu1 %v13390_v45  ;;  %v13391_v38 = vld [vmem:[%s14923_s16 + $0x24] ss:$8 sps:$4 sm:$0xff]  }
 0x43a   : > { %v12446_v37 = vcombine.high %v17926_v52, %v17931_v14  ;;  %v17954_v56 = vld [vmem:[%s19967_s6 + $0xd8] sm:$0xff]  ;;  %20674 = vst [vmem:[#allocation88_spill] sm:$0xff] %v17967_v4  ;;  %v12745_v30 = vpack.c.bf16 %v10373_v27, %v10372_v8  ;;  %v8437_v2 = vadd.f32 %v8436_v55, %v8244_v5  ;;  %v20676_v34 = vld [vmem:[#allocation70_spill] sm:$0xff]  ;;  %v20678_v27 = vld [vmem:[#allocation99_spill] sm:$0xff] }
 0x43b   : > { %v17959_v36 = vld [vmem:[%s19967_s6 + $0xf8] sm:$0xff]  ;;  %v8626_v49 = vadd.f32 %v17508_v60, %v8433_v63  ;;  %9475 = vmatpush1.bf16.msra.mxu0 %v12045_v6  ;;  %v8063_v41 = vadd.f32 %v20676_v34, %v17519_v25  ;;  %v8438_v23 = vpop.f32.mrf.mxu0  ;;  %v13392_v8 = vld [vmem:[%s14911_s19 + $0xc4] ss:$8 sps:$4 sm:$0xff]   ;;  %v10380_v60 = vmax.f32 %v8624_v58, 0.0 }
 0x43c   : > { %10049 = vmatprep.subr.bf16.mxu1 %v12446_v37  ;;  %v13389_v44 = vld [vmem:[%s14923_s16 + $0x10] ss:$8 sps:$4 sm:$0xff]   ;;  %9476 = vmatprep.subr.bf16.mxu0 %v12038_v40  ;;  %v12030_v47 = vcombine.high %v17954_v56, %v17959_v36  ;;  %11331 = vst [vmem:[%s16259_s22 + $0x208] sm:$0xff] %v12745_v30  ;;  %v8630_v6 = vadd.f32 %v20678_v27, %v8437_v2  ;;  %v20679_v10 = vld [vmem:[#allocation134_spill] sm:$0xff]  ;;  %v20682_v27 = vld [vmem:[#allocation107_spill] sm:$0xff] }
 0x43d   : > { %9127 = vmatmul.mubr.bf16.gmra.mxu0 %v13389_v44  ;;  %v20675_v37 = vld [vmem:[#allocation132_spill] sm:$0xff]  ;;  %v17978_v44 = vpop.f32.mrf.mxu1  ;;  %9429 = vmatprep.mubr.bf16.mxu1 %v13392_v8  ;;  %v10381_v5 = vmax.f32 %v8626_v49, 0.0  ;;  %v8439_v63 = vadd.f32 %v8438_v23, %v8246_v33  ;;  %v3419_v55 = vld [vmem:[%s19967_s6 + $0x98] sm:$0xff]  ;;  %v8065_v45 = vadd.f32 %v20679_v10, %v17511_v61  ;;  %v20681_v2 = vld [vmem:[#allocation166_spill] sm:$0xff]  ;;  %v12029_v23 = vcombine.low %v17954_v56, %v17959_v36 }
 0x43e   : > { %9136 = vmatprep.mubr.bf16.mxu0 %v13391_v38  ;;  %v8061_v50 = vadd.f32 %v20675_v37, %v17511_v61  ;;  %20677 = vst [vmem:[#allocation27_spill] sm:$0xff] %v17978_v44  ;;  %v3423_v40 = vld [vmem:[%s19967_s6 + $0xb8] sm:$0xff]  ;;  %v8440_v38 = vpop.f32.mrf.mxu0  ;;  %v20680_v37 = vld [vmem:[#allocation39_spill] sm:$0xff] }
 0x43f   : > { %v8250_v30 = vadd.f32 %v20680_v37, %v8057_v7  ;;  %v17992_v58 = vpop.f32.mrf.mxu1  ;;  %v12749_v49 = vpack.c.bf16 %v10381_v5, %v10380_v60  ;;  %v8632_v33 = vadd.f32 %v20681_v2, %v8439_v63  ;;  %v8441_v34 = vadd.f32 %v8440_v38, %v8248_v31  ;;  %9477 = vmatpush1.bf16.msra.mxu0 %v12037_v21  ;;  %v20683_v4 = vld [vmem:[#allocation37_spill] sm:$0xff] }
 0x440   : > { %v8442_v8 = vpop.f32.mrf.mxu0  ;;  %v8254_v44 = vadd.f32 %v20682_v27, %v8061_v50  ;;  %v8256_v59 = vadd.f32 %v20683_v4, %v8063_v41  ;;  %9478 = vmatprep.subr.bf16.mxu0 %v12030_v47  ;;  %v12022_v10 = vcombine.high %v3419_v55, %v3423_v40  ;;  %v10388_v60 = vmax.f32 %v8630_v6, 0.0  ;;  %v20684_v63 = vld [vmem:[#allocation105_spill] sm:$0xff]  ;;  %v20685_v4 = vld [vmem:[#allocation136_spill] sm:$0xff]  ;;  %v13393_v47 = vld [vmem:[%s14923_s16 + $0x20] ss:$8 sps:$4 sm:$0xff]  }
 0x441   : > { %v17999_v7 = vpop.f32.mrf.mxu1  ;;  %11335 = vst [vmem:[%s16259_s22 + $0x228] sm:$0xff] %v12749_v49  ;;  %v10389_v5 = vmax.f32 %v8632_v33, 0.0  ;;  %v8634_v31 = vadd.f32 %v20684_v63, %v8441_v34  ;;  %v8443_v21 = vadd.f32 %v8442_v8, %v8250_v30  ;;  %v18006_v56 = vld [vmem:[%s19967_s6 + $0x58] sm:$0xff]  ;;  %v8067_v50 = vadd.f32 %v20685_v4, %v17519_v25  ;;  %v20686_v6 = vld [vmem:[#allocation108_spill] sm:$0xff]  ;;  %v13394_v49 = vld [vmem:[%s14911_s19 + $0xc0] ss:$8 sps:$4 sm:$0xff]  }
 0x442   : > { %v18011_v36 = vld [vmem:[%s19967_s6 + $0x78] sm:$0xff]  ;;  %v8446_v41 = vpop.f32.mrf.mxu0  ;;  %v8258_v38 = vadd.f32 %v20686_v6, %v8065_v45  ;;  %v12021_v37 = vcombine.low %v3419_v55, %v3423_v40  ;;  %9430 = vmatmul.mubr.bf16.gmra.mxu1 %v13394_v49  ;;  %v20688_v33 = vld [vmem:[#allocation114_spill] sm:$0xff]  ;;  %v20692_v49 = vld [vmem:[#allocation140_spill] sm:$0xff] }
 0x443   : > { %v18017_v30 = vpop.f32.mrf.mxu1  ;;  %v12753_v2 = vpack.c.bf16 %v10389_v5, %v10388_v60  ;;  %v8636_v34 = vadd.f32 %v20688_v33, %v8443_v21  ;;  %v8447_v8 = vadd.f32 %v8446_v41, %v8254_v44  ;;  %v13395_v27 = vld [vmem:[%s14923_s16 + $0x34] ss:$8 sps:$4 sm:$0xff]   ;;  %9479 = vmatpush1.bf16.msra.mxu0 %v12029_v23  ;;  %v20689_v63 = vld [vmem:[#allocation138_spill] sm:$0xff]  ;;  %v12014_v40 = vcombine.high %v18006_v56, %v18011_v36 }
 0x444   : > { %20687 = vst [vmem:[#allocation121_spill] sm:$0xff] %v18017_v30  ;;  %v8071_v4 = vadd.f32 %v20689_v63, %v17511_v61  ;;  %v8448_v55 = vpop.f32.mrf.mxu0  ;;  %9480 = vmatprep.subr.bf16.mxu0 %v12022_v10  ;;  %v13396_v60 = vld [vmem:[%s14911_s19 + $0xd4] ss:$8 sps:$4 sm:$0xff]   ;;  %v10396_v44 = vmax.f32 %v8634_v31, 0.0  ;;  %v8075_v33 = vadd.f32 %v20692_v49, %v17511_v61  ;;  %v20693_v63 = vld [vmem:[#allocation38_spill] sm:$0xff] }
 0x445   : > { %9137 = vmatmul.mubr.bf16.gmra.mxu0 %v13393_v47  ;;  %v20690_v47 = vld [vmem:[#allocation74_spill] sm:$0xff]  ;;  %v18028_v6 = vpop.f32.mrf.mxu1  ;;  %9439 = vmatprep.mubr.bf16.mxu1 %v13396_v60  ;;  %11339 = vst [vmem:[%s16259_s22 + $0x248] sm:$0xff] %v12753_v2  ;;  %v10397_v5 = vmax.f32 %v8636_v34, 0.0  ;;  %v8640_v23 = vadd.f32 %v17557_v48, %v8447_v8  ;;  %v8449_v21 = vadd.f32 %v8448_v55, %v8256_v59  ;;  %v3403_v41 = vld [vmem:[%s19967_s6 + $0x18] sm:$0xff]  ;;  %v20694_v55 = vld [vmem:[#allocation139_spill] sm:$0xff] }
 0x446   : > { %9146 = vmatprep.mubr.bf16.mxu0 %v13395_v27  ;;  %v8073_v45 = vadd.f32 %v20690_v47, %v17519_v25  ;;  %20691 = vst [vmem:[#allocation90_spill] sm:$0xff] %v18028_v6  ;;  %v3407_v10 = vld [vmem:[%s19967_s6 + $0x38] sm:$0xff]  ;;  %v8450_v27 = vpop.f32.mrf.mxu0  ;;  %v8260_v2 = vadd.f32 %v20693_v63, %v8067_v50  ;;  %v12013_v8 = vcombine.low %v18006_v56, %v18011_v36 }
 0x447   : > { %v18042_v31 = vpop.f32.mrf.mxu1  ;;  %v12757_v34 = vpack.c.bf16 %v10397_v5, %v10396_v44  ;;  %v8642_v48 = vadd.f32 %v17567_v0, %v8449_v21  ;;  %v8451_v59 = vadd.f32 %v8450_v27, %v8258_v38  ;;  %9481 = vmatpush1.bf16.msra.mxu0 %v12021_v37  ;;  %v8264_v60 = vadd.f32 %v20694_v55, %v8071_v4  ;;  %v20695_v6 = vld [vmem:[#allocation109_spill] sm:$0xff]  ;;  %v20697_v0 = vld [vmem:[#allocation82_spill] sm:$0xff] }
 0x448   : > { %v8452_v47 = vpop.f32.mrf.mxu0  ;;  %v8266_v30 = vadd.f32 %v20695_v6, %v8073_v45  ;;  %9482 = vmatprep.subr.bf16.mxu0 %v12014_v40  ;;  %v12006_v49 = vcombine.high %v3403_v41, %v3407_v10  ;;  %v10404_v44 = vmax.f32 %v8640_v23, 0.0  ;;  %v18056_v56 = vld [vmem:[%s19967_s6 + $0x3d8] sm:$0xff]  ;;  %v20698_v4 = vld [vmem:[#allocation142_spill] sm:$0xff]  ;;  %v20699_v23 = vld [vmem:[#allocation40_spill] sm:$0xff]  ;;  %v12005_v27 = vcombine.low %v3403_v41, %v3407_v10 }
 0x449   : > { %v18049_v50 = vpop.f32.mrf.mxu1  ;;  %11343 = vst [vmem:[%s16259_s22 + $0x268] sm:$0xff] %v12757_v34  ;;  %v10405_v5 = vmax.f32 %v8642_v48, 0.0  ;;  %v8644_v38 = vadd.f32 %v20697_v0, %v8451_v59  ;;  %v8453_v37 = vadd.f32 %v8452_v47, %v8260_v2  ;;  %v18061_v36 = vld [vmem:[%s19967_s6 + $0x3f8] sm:$0xff]  ;;  %v8077_v45 = vadd.f32 %v20698_v4, %v17519_v25  ;;  %v13399_v47 = vld [vmem:[%s14923_s16 + $0x44] ss:$8 sps:$4 sm:$0xff]  }
 0x44a   : > { %20696 = vst [vmem:[#allocation115_spill] sm:$0xff] %v18049_v50  ;;  %v8456_v40 = vpop.f32.mrf.mxu0  ;;  %v13397_v6 = vld [vmem:[%s14923_s16 + $0x30] ss:$8 sps:$4 sm:$0xff]   ;;  %v8268_v21 = vadd.f32 %v20699_v23, %v8075_v33  ;;  %v20702_v4 = vld [vmem:[#allocation78_spill] sm:$0xff]  ;;  %v12126_v10 = vcombine.high %v18056_v56, %v18061_v36 }
 0x44b   : > { %v18067_v63 = vpop.f32.mrf.mxu1  ;;  %v13398_v2 = vld [vmem:[%s14911_s19 + $0xd0] ss:$8 sps:$4 sm:$0xff]   ;;  %v12761_v34 = vpack.c.bf16 %v10405_v5, %v10404_v44  ;;  %v8646_v48 = vadd.f32 %v17592_v39, %v8453_v37  ;;  %v8457_v59 = vadd.f32 %v8456_v40, %v8264_v60  ;;  %9483 = vmatpush1.bf16.msra.mxu0 %v12013_v8  ;;  %v8083_v33 = vadd.f32 %v20702_v4, %v17519_v25  ;;  %v13400_v44 = vld [vmem:[%s14911_s19 + $0xe4] ss:$8 sps:$4 sm:$0xff]  }
 0x44c   : > { %20700 = vst [vmem:[#allocation28_spill] sm:$0xff] %v18067_v63  ;;  %9440 = vmatmul.mubr.bf16.gmra.mxu1 %v13398_v2  ;;  %v20701_v55 = vld [vmem:[#allocation77_spill] sm:$0xff]  ;;  %v8458_v41 = vpop.f32.mrf.mxu0  ;;  %9484 = vmatprep.subr.bf16.mxu0 %v12006_v49  ;;  %v10412_v39 = vmax.f32 %v8644_v38, 0.0  ;;  %v20707_v4 = vld [vmem:[#allocation110_spill] sm:$0xff] }
 0x44d   : > { %9147 = vmatmul.mubr.bf16.gmra.mxu0 %v13397_v6  ;;  %v8081_v0 = vadd.f32 %v20701_v55, %v17511_v61  ;;  %v18078_v6 = vpop.f32.mrf.mxu1  ;;  %9449 = vmatprep.mubr.bf16.mxu1 %v13400_v44  ;;  %11347 = vst [vmem:[%s16259_s22 + $0x288] sm:$0xff] %v12761_v34  ;;  %v10413_v60 = vmax.f32 %v8646_v48, 0.0  ;;  %v8650_v8 = vadd.f32 %v17599_v28, %v8457_v59  ;;  %v3515_v37 = vld [vmem:[%s19967_s6 + $0x398] sm:$0xff]  ;;  %v13455_v50 = vld [vmem:[%s14532_s25 + $0xe4] ss:$8 sps:$4 sm:$0xff]  }
 0x44e   : > { %9156 = vmatprep.mubr.bf16.mxu0 %v13399_v47  ;;  %20703 = vst [vmem:[#allocation131_spill] sm:$0xff] %v18078_v6  ;;  %v8459_v5 = vadd.f32 %v8458_v41, %v8266_v30  ;;  %v3519_v49 = vld [vmem:[%s19967_s6 + $0x3b8] sm:$0xff]  ;;  %v8460_v40 = vpop.f32.mrf.mxu0  ;;  %v12125_v28 = vcombine.low %v18056_v56, %v18061_v36  ;;  %v20706_v30 = vld [vmem:[#allocation147_spill] sm:$0xff] }
 0x44f   : > { %v20704_v23 = vld [vmem:[#allocation141_spill] sm:$0xff]  ;;  %v18090_v47 = vpop.f32.mrf.mxu1  ;;  %v12765_v34 = vpack.c.bf16 %v10413_v60, %v10412_v39  ;;  %v8461_v48 = vadd.f32 %v8460_v40, %v8268_v21  ;;  %9485 = vmatpush1.bf16.msra.mxu0 %v12005_v27  ;;  %v8085_v59 = vadd.f32 %v20706_v30, %v17511_v61  ;;  %v8274_v41 = vadd.f32 %v20707_v4, %v8081_v0 }
 0x450   : > { %v8270_v2 = vadd.f32 %v20704_v23, %v8077_v45  ;;  %20705 = vst [vmem:[#allocation60_spill] sm:$0xff] %v18090_v47  ;;  %v8652_v38 = vadd.f32 %v17608_v1, %v8459_v5  ;;  %v8462_v55 = vpop.f32.mrf.mxu0  ;;  %v20708_v44 = vld [vmem:[#allocation41_spill] sm:$0xff]  ;;  %9486 = vmatprep.subr.bf16.mxu0 %v12126_v10  ;;  %v12118_v45 = vcombine.high %v3515_v37, %v3519_v49  ;;  %v10420_v1 = vmax.f32 %v8650_v8, 0.0  ;;  %v20803_v47 = vld [vmem:[#allocation46_spill] sm:$0xff] }
 0x451   : > { %v8276_v6 = vadd.f32 %v20708_v44, %v8083_v33  ;;  %v18099_v39 = vpop.f32.mrf.mxu1  ;;  %11351 = vst [vmem:[%s16259_s22 + $0x2a8] sm:$0xff] %v12765_v34  ;;  %v8654_v27 = vadd.f32 %v17620_v12, %v8461_v48  ;;  %v18106_v36 = vld [vmem:[%s19967_s6 + $0x358] sm:$0xff]  ;;  %v20710_v33 = vld [vmem:[#allocation151_spill] sm:$0xff]  ;;  %v12117_v40 = vcombine.low %v3515_v37, %v3519_v49 }
 0x452   : > { %20709 = vst [vmem:[#allocation123_spill] sm:$0xff] %v18099_v39  ;;  %v10421_v21 = vmax.f32 %v8652_v38, 0.0  ;;  %v8463_v56 = vadd.f32 %v8462_v55, %v8270_v2  ;;  %v18111_v0 = vld [vmem:[%s19967_s6 + $0x378] sm:$0xff]  ;;  %v8087_v10 = vadd.f32 %v20710_v33, %v17519_v25  ;;  %v8466_v5 = vpop.f32.mrf.mxu0  ;;  %v13401_v12 = vld [vmem:[%s14923_s16 + $0x40] ss:$8 sps:$4 sm:$0xff]  }
 0x453   : > { %v20711_v60 = vld [vmem:[#allocation81_spill] sm:$0xff]  ;;  %v18118_v23 = vpop.f32.mrf.mxu1  ;;  %v13402_v2 = vld [vmem:[%s14911_s19 + $0xe0] ss:$8 sps:$4 sm:$0xff]   ;;  %v8467_v48 = vadd.f32 %v8466_v5, %v8274_v41  ;;  %9487 = vmatpush2.bf16.msra.mxu0 %v12125_v28  ;;  %v12110_v37 = vcombine.high %v18106_v36, %v18111_v0 }
 0x454   : > { %v8091_v8 = vadd.f32 %v20711_v60, %v17511_v61  ;;  %20712 = vst [vmem:[#allocation69_spill] sm:$0xff] %v18118_v23  ;;  %9450 = vmatmul.mubr.bf16.gmra.mxu1 %v13402_v2  ;;  %v12769_v34 = vpack.c.bf16 %v10421_v21, %v10420_v1  ;;  %v8656_v38 = vadd.f32 %v17633_v15, %v8463_v56  ;;  %v13403_v30 = vld [vmem:[%s14923_s16 + $0x54] ss:$8 sps:$4 sm:$0xff]   ;;  %v8468_v44 = vpop.f32.mrf.mxu0  ;;  %v20714_v33 = vld [vmem:[#allocation111_spill] sm:$0xff]  ;;  %v10428_v15 = vmax.f32 %v8654_v27, 0.0 }
 0x455   : > { %9157 = vmatmul.mubr.bf16.gmra.mxu0 %v13401_v12  ;;  %v20713_v55 = vld [vmem:[#allocation153_spill] sm:$0xff]  ;;  %v8278_v60 = vadd.f32 %v20714_v33, %v8085_v59  ;;  %9488 = vmatprep.subr.bf16.mxu0 %v12118_v45  ;;  %v18128_v49 = vpop.f32.mrf.mxu1  ;;  %v8660_v1 = vadd.f32 %v17641_v11, %v8467_v48  ;;  %v8469_v28 = vadd.f32 %v8468_v44, %v8276_v6  ;;  %v20716_v56 = vld [vmem:[#allocation144_spill] sm:$0xff]  ;;  %v20720_v44 = vld [vmem:[#allocation159_spill] sm:$0xff] }
 0x456   : > { %9166 = vmatprep.mubr.bf16.mxu0 %v13403_v30  ;;  %v8093_v4 = vadd.f32 %v20713_v55, %v17519_v25  ;;  %20715 = vst [vmem:[#allocation118_spill] sm:$0xff] %v18128_v49  ;;  %v13404_v12 = vld [vmem:[%s14911_s19 + $0xf4] ss:$8 sps:$4 sm:$0xff]   ;;  %11355 = vst [vmem:[%s16259_s22 + $0x2c8] sm:$0xff] %v12769_v34  ;;  %v10429_v41 = vmax.f32 %v8656_v38, 0.0  ;;  %v8470_v45 = vpop.f32.mrf.mxu0  ;;  %v8280_v5 = vadd.f32 %v20716_v56, %v8087_v10 }
 0x457   : > { %9459 = vmatprep.mubr.bf16.mxu1 %v13404_v12  ;;  %v18136_v21 = vld [vmem:[%s19967_s6 + $0x318] sm:$0xff]  ;;  %v18145_v34 = vpop.f32.mrf.mxu1  ;;  %v8662_v6 = vadd.f32 %v17650_v17, %v8469_v28  ;;  %v8471_v38 = vadd.f32 %v8470_v45, %v8278_v60  ;;  %9489 = vmatpush2.bf16.msra.mxu0 %v12117_v40  ;;  %v12109_v48 = vcombine.low %v18106_v36, %v18111_v0  ;;  %v20721_v12 = vld [vmem:[#allocation112_spill] sm:$0xff]  ;;  %v10436_v40 = vmax.f32 %v8660_v1, 0.0 }
 0x458   : > { %v18141_v59 = vld [vmem:[%s19967_s6 + $0x338] sm:$0xff]  ;;  %20718 = vst [vmem:[#allocation71_spill] sm:$0xff] %v18145_v34  ;;  %v12773_v11 = vpack.c.bf16 %v10429_v41, %v10428_v15  ;;  %v8097_v33 = vadd.f32 %v20720_v44, %v17519_v25  ;;  %v8472_v10 = vpop.f32.mrf.mxu0  ;;  %9490 = vmatprep.subr.bf16.mxu0 %v12110_v37  ;;  %v20723_v37 = vld [vmem:[#allocation87_spill] sm:$0xff] }
 0x459   : > { %v20717_v2 = vld [vmem:[#allocation57_spill] sm:$0xff]  ;;  %v12102_v15 = vcombine.high %v18136_v21, %v18141_v59  ;;  %v18157_v17 = vpop.f32.mrf.mxu1  ;;  %v10437_v36 = vmax.f32 %v8662_v6, 0.0  ;;  %v8664_v0 = vadd.f32 %v17662_v53, %v8471_v38  ;;  %v8473_v60 = vadd.f32 %v8472_v10, %v8280_v5  ;;  %v13407_v44 = vld [vmem:[%s14923_s16 + $0x64] ss:$8 sps:$4 sm:$0xff]  }
 0x45a   : > { %v8284_v27 = vadd.f32 %v20717_v2, %v8091_v8  ;;  %v20719_v30 = vld [vmem:[#allocation85_spill] sm:$0xff]  ;;  %v8286_v8 = vadd.f32 %v20721_v12, %v8093_v4  ;;  %20722 = vst [vmem:[#allocation92_spill] sm:$0xff] %v18157_v17  ;;  %11359 = vst [vmem:[%s16259_s22 + $0x2e8] sm:$0xff] %v12773_v11  ;;  %v8101_v28 = vadd.f32 %v20723_v37, %v17511_v61  ;;  %v8476_v56 = vpop.f32.mrf.mxu0 }
 0x45b   : > { %v8095_v55 = vadd.f32 %v20719_v30, %v17511_v61  ;;  %v18164_v41 = vld [vmem:[%s19967_s6 + $0x2d8] sm:$0xff]  ;;  %v12101_v5 = vcombine.low %v18136_v21, %v18141_v59  ;;  %v18178_v2 = vpop.f32.mrf.mxu1  ;;  %v12777_v6 = vpack.c.bf16 %v10437_v36, %v10436_v40  ;;  %v8666_v38 = vadd.f32 %v17669_v9, %v8473_v60  ;;  %9491 = vmatpush2.bf16.msra.mxu0 %v12109_v48 }
 0x45c   : > { %v18169_v4 = vld [vmem:[%s19967_s6 + $0x2f8] sm:$0xff]  ;;  %20725 = vst [vmem:[#allocation61_spill] sm:$0xff] %v18178_v2  ;;  %v8477_v30 = vadd.f32 %v8476_v56, %v8284_v27  ;;  %v8478_v37 = vpop.f32.mrf.mxu0  ;;  %9492 = vmatprep.subr.bf16.mxu0 %v12102_v15  ;;  %v13408_v27 = vld [vmem:[%s14532_s25 + $0x4] ss:$8 sps:$4 sm:$0xff]   ;;  %v10444_v48 = vmax.f32 %v8664_v0, 0.0 }
 0x45d   : > { %v20724_v1 = vld [vmem:[#allocation89_spill] sm:$0xff]  ;;  %v12094_v21 = vcombine.high %v18164_v41, %v18169_v4  ;;  %v18193_v9 = vpop.f32.mrf.mxu1  ;;  %11363 = vst [vmem:[%s16259_s22 + $0x308] sm:$0xff] %v12777_v6  ;;  %v10445_v40 = vmax.f32 %v8666_v38, 0.0  ;;  %v8479_v60 = vadd.f32 %v8478_v37, %v8286_v8  ;;  %v20730_v8 = vld [vmem:[#allocation146_spill] sm:$0xff]  ;;  %v12093_v2 = vcombine.low %v18164_v41, %v18169_v4 }
 0x45e   : > { %v8103_v45 = vadd.f32 %v20724_v1, %v17519_v25  ;;  %v13405_v53 = vld [vmem:[%s14923_s16 + $0x50] ss:$8 sps:$4 sm:$0xff]   ;;  %v20727_v1 = vld [vmem:[#allocation58_spill] sm:$0xff]  ;;  %20728 = vst [vmem:[#allocation125_spill] sm:$0xff] %v18193_v9  ;;  %v8670_v36 = vadd.f32 %v17677_v62, %v8477_v30  ;;  %v8480_v62 = vpop.f32.mrf.mxu0  ;;  %v8290_v6 = vadd.f32 %v20730_v8, %v8097_v33  ;;  %v13453_v63 = vld [vmem:[%s14532_s25 + $0xd4] ss:$8 sps:$4 sm:$0xff]  }
 0x45f   : > { %9167 = vmatmul.mubr.bf16.gmra.mxu0 %v13405_v53  ;;  %v13406_v11 = vld [vmem:[%s14911_s19 + $0xf0] ss:$8 sps:$4 sm:$0xff]   ;;  %v8288_v53 = vadd.f32 %v20727_v1, %v8095_v55  ;;  %v18218_v37 = vpop.f32.mrf.mxu1  ;;  %v12781_v1 = vpack.c.bf16 %v10445_v40, %v10444_v48  ;;  %v13410_v8 = vld [vmem:[%s14532_s25] ss:$8 sps:$4 sm:$0xff]  }
 0x460   : > { %9460 = vmatmul.mubr.bf16.gmra.mxu1 %v13406_v11  ;;  %9176 = vmatprep.mubr.bf16.mxu0 %v13407_v44  ;;  %v20726_v10 = vld [vmem:[#allocation93_spill] sm:$0xff]  ;;  %v20732_v44 = vld [vmem:[#allocation59_spill] sm:$0xff]  ;;  %20733 = vst [vmem:[#allocation72_spill] sm:$0xff] %v18218_v37  ;;  %v8482_v17 = vpop.f32.mrf.mxu0  ;;  %v10452_v4 = vmax.f32 %v8670_v36, 0.0 }
 0x461   : > { %v8105_v12 = vadd.f32 %v20726_v10, %v17511_v61  ;;  %v18191_v59 = vld [vmem:[%s19967_s6 + $0x298] sm:$0xff]  ;;  %9695 = vmatprep.mubr.bf16.mxu1 %v13408_v27  ;;  %v8296_v10 = vadd.f32 %v20732_v44, %v8103_v45  ;;  %v8672_v27 = vadd.f32 %v17686_v22, %v8479_v60  ;;  %v8481_v9 = vadd.f32 %v8480_v62, %v8288_v53  ;;  %v18231_v45 = vpop.f32.mrf.mxu1  ;;  %v13409_v36 = vld [vmem:[%s14923_s16 + $0x60] ss:$8 sps:$4 sm:$0xff]  }
 0x462   : > { %v18201_v55 = vld [vmem:[%s19967_s6 + $0x2b8] sm:$0xff]  ;;  %9493 = vmatpush2.bf16.msra.mxu0 %v12101_v5  ;;  %20735 = vst [vmem:[#allocation62_spill] sm:$0xff] %v18231_v45  ;;  %v12445_v22 = vcombine.low %v17926_v52, %v17931_v14  ;;  %11367 = vst [vmem:[%s16259_s22 + $0x328] sm:$0xff] %v12781_v1  ;;  %v8483_v53 = vadd.f32 %v8482_v17, %v8290_v6  ;;  %v8486_v40 = vpop.f32.mrf.mxu0 }
 0x463   : > { %v18206_v15 = vld [vmem:[%s19967_s6 + $0xd98] sm:$0xff]  ;;  %9494 = vmatprep.subr.bf16.mxu0 %v12094_v21  ;;  %v12086_v33 = vcombine.high %v18191_v59, %v18201_v55  ;;  %v10453_v5 = vmax.f32 %v8672_v27, 0.0  ;;  %v12085_v60 = vcombine.low %v18191_v59, %v18201_v55  ;;  %v18261_v62 = vpop.f32.mrf.mxu1 }
 0x464   : > { %v18211_v56 = vld [vmem:[%s19967_s6 + $0xdb8] sm:$0xff]  ;;  %20738 = vst [vmem:[#allocation30_spill] sm:$0xff] %v18261_v62  ;;  %v8488_v27 = vpop.f32.mrf.mxu0 }
 0x465   : > { %v20729_v0 = vld [vmem:[#allocation165_spill] sm:$0xff]  ;;  %v12438_v41 = vcombine.high %v18206_v15, %v18211_v56  ;;  %v12785_v6 = vpack.c.bf16 %v10453_v5, %v10452_v4  ;;  %v12437_v59 = vcombine.low %v18206_v15, %v18211_v56  ;;  %v20740_v56 = vld [vmem:[#allocation103_spill] sm:$0xff] }
 0x466   : > { %v8107_v11 = vadd.f32 %v20729_v0, %v17519_v25  ;;  %v20731_v38 = vld [vmem:[#allocation113_spill] sm:$0xff]  ;;  %v20734_v0 = vld [vmem:[#allocation148_spill] sm:$0xff]  ;;  %9495 = vmatpush2.bf16.msra.mxu0 %v12093_v2  ;;  %v8489_v2 = vadd.f32 %v8488_v27, %v8296_v10  ;;  %v8115_v5 = vadd.f32 %v20740_v56, %v17511_v61  ;;  %v20742_v10 = vld [vmem:[#allocation150_spill] sm:$0xff] }
 0x467   : > { %v8294_v30 = vadd.f32 %v20731_v38, %v8101_v28  ;;  %v8298_v34 = vadd.f32 %v20734_v0, %v8105_v12  ;;  %v18229_v28 = vld [vmem:[%s19967_s6 + $0x258] sm:$0xff]  ;;  %v8674_v12 = vadd.f32 %v17698_v18, %v8481_v9  ;;  %9177 = vmatmul.mubr.bf16.gmra.mxu0 %v13409_v36  ;;  %v8676_v38 = vadd.f32 %v17705_v54, %v8483_v53  ;;  %v20741_v53 = vld [vmem:[#allocation116_spill] sm:$0xff] }
 0x468   : > { %v18242_v21 = vld [vmem:[%s19967_s6 + $0x278] sm:$0xff]  ;;  %9696 = vmatmul.mubr.bf16.vlgmr.msra.gmra.mxu1 %v13410_v8  ;;  %9496 = vmatprep.subr.bf16.mxu0 %v12086_v33  ;;  %11371 = vst [vmem:[%s16259_s22 + $0x348] sm:$0xff] %v12785_v6  ;;  %v8682_v8 = vadd.f32 %v17722_v43, %v8489_v2  ;;  %v20748_v56 = vld [vmem:[#allocation120_spill] sm:$0xff] }
 0x469   : > { %v18247_v52 = vld [vmem:[%s19967_s6 + $0xd58] sm:$0xff]  ;;  %v8487_v44 = vadd.f32 %v8486_v40, %v8294_v30  ;;  %v12078_v0 = vcombine.high %v18229_v28, %v18242_v21  ;;  %10050 = vmatpush1.bf16.msra.mxu1 %v12445_v22  ;;  %v10460_v54 = vmax.f32 %v8674_v12, 0.0  ;;  %v10461_v30 = vmax.f32 %v8676_v38, 0.0  ;;  %v8490_v12 = vpop.f32.mrf.mxu0 }
 0x46a   : > { %v18252_v14 = vld [vmem:[%s19967_s6 + $0xd78] sm:$0xff]  ;;  %10051 = vmatprep.subr.bf16.mxu1 %v12438_v41  ;;  %v8491_v6 = vadd.f32 %v8490_v12, %v8298_v34  ;;  %9497 = vmatpush2.bf16.msra.mxu0 %v12085_v60  ;;  %v12077_v38 = vcombine.low %v18229_v28, %v18242_v21  ;;  %v10469_v60 = vmax.f32 %v8682_v8, 0.0  ;;  %v8308_v12 = vadd.f32 %v20748_v56, %v8115_v5 }
 0x46b   : > { %v20736_v48 = vld [vmem:[#allocation97_spill] sm:$0xff]  ;;  %v12430_v55 = vcombine.high %v18247_v52, %v18252_v14  ;;  %v8680_v4 = vadd.f32 %v17713_v13, %v8487_v44  ;;  %v8300_v13 = vadd.f32 %v20741_v53, %v8107_v11  ;;  %v12789_v36 = vpack.c.bf16 %v10461_v30, %v10460_v54  ;;  %v8492_v41 = vpop.f32.mrf.mxu0  ;;  %9498 = vmatprep.subr.bf16.mxu0 %v12078_v0  ;;  %v13416_v53 = vld [vmem:[%s14532_s25 + $0x24] ss:$8 sps:$4 sm:$0xff]  }
 0x46c   : > { %v8111_v18 = vadd.f32 %v20736_v48, %v17511_v61  ;;  %v20737_v17 = vld [vmem:[#allocation101_spill] sm:$0xff]  ;;  %v18268_v48 = vpop.f32.mrf.mxu1  ;;  %v12429_v28 = vcombine.low %v18247_v52, %v18252_v14 }
 0x46d   : > { %v8113_v9 = vadd.f32 %v20737_v17, %v17519_v25  ;;  %v13411_v1 = vld [vmem:[%s14923_s16 + $0x74] ss:$8 sps:$4 sm:$0xff]   ;;  %20739 = vst [vmem:[#allocation137_spill] sm:$0xff] %v18268_v48  ;;  %10052 = vmatpush1.bf16.msra.mxu1 %v12437_v59  ;;  %11375 = vst [vmem:[%s16259_s22 + $0x368] sm:$0xff] %v12789_v36  ;;  %v10468_v21 = vmax.f32 %v8680_v4, 0.0  ;;  %v8493_v27 = vadd.f32 %v8492_v41, %v8300_v13  ;;  %v8496_v54 = vpop.f32.mrf.mxu0 }
 0x46e   : > { %9186 = vmatprep.mubr.bf16.mxu0 %v13411_v1  ;;  %v18279_v33 = vld [vmem:[%s19967_s6 + $0x218] sm:$0xff]  ;;  %v8304_v17 = vadd.f32 %v20742_v10, %v8111_v18  ;;  %v18291_v40 = vpop.f32.mrf.mxu1  ;;  %v20744_v18 = vld [vmem:[#allocation152_spill] sm:$0xff]  ;;  %v8684_v1 = vadd.f32 %v17734_v32, %v8491_v6  ;;  %10053 = vmatprep.subr.bf16.mxu1 %v12430_v55 }
 0x46f   : > { %v18284_v22 = vld [vmem:[%s19967_s6 + $0x238] sm:$0xff]  ;;  %20743 = vst [vmem:[#allocation154_spill] sm:$0xff] %v18291_v40  ;;  %v8306_v44 = vadd.f32 %v20744_v18, %v8113_v9  ;;  %v20746_v9 = vld [vmem:[#allocation23_spill] sm:$0xff]  ;;  %v12793_v14 = vpack.c.bf16 %v10469_v60, %v10468_v21  ;;  %v8686_v55 = vadd.f32 %v17741_v42, %v8493_v27  ;;  %9499 = vmatpush2.bf16.msra.mxu0 %v12077_v38 }
 0x470   : > { %v13412_v15 = vld [vmem:[%s14532_s25 + $0x14] ss:$8 sps:$4 sm:$0xff]   ;;  %v12070_v43 = vcombine.high %v18279_v33, %v18284_v22  ;;  %v18309_v34 = vpop.f32.mrf.mxu1  ;;  %v8117_v0 = vadd.f32 %v20746_v9, %v17519_v25  ;;  %v13413_v30 = vld [vmem:[%s14923_s16 + $0x70] ss:$8 sps:$4 sm:$0xff]   ;;  %v12069_v59 = vcombine.low %v18279_v33, %v18284_v22  ;;  %v8497_v4 = vadd.f32 %v8496_v54, %v8304_v17  ;;  %v13415_v25 = vld [vmem:[%s14923_s16 + $0x84] ss:$8 sps:$4 sm:$0xff]  }
 0x471   : > { %9705 = vmatprep.mubr.bf16.mxu1 %v13412_v15  ;;  %v18299_v61 = vld [vmem:[%s19967_s6 + $0xd18] sm:$0xff]  ;;  %20745 = vst [vmem:[#allocation94_spill] sm:$0xff] %v18309_v34  ;;  %9187 = vmatmul.mubr.bf16.gmra.mxu0 %v13413_v30  ;;  %v8498_v15 = vpop.f32.mrf.mxu0  ;;  %v12318_v33 = vcombine.high %v17895_v26, %v17900_v51  ;;  %11379 = vst [vmem:[%s16259_s22 + $0x388] sm:$0xff] %v12793_v14  ;;  %v10476_v42 = vmax.f32 %v8684_v1, 0.0  ;;  %v10477_v10 = vmax.f32 %v8686_v55, 0.0 }
 0x472   : > { %v18304_v11 = vld [vmem:[%s19967_s6 + $0xd38] sm:$0xff]  ;;  %v18320_v2 = vpop.f32.mrf.mxu1  ;;  %9196 = vmatprep.mubr.bf16.mxu0 %v13415_v25  ;;  %9500 = vmatprep.subr.bf16.mxu0 %v12070_v43  ;;  %v8690_v17 = vadd.f32 %v17749_v16, %v8497_v4  ;;  %v8499_v36 = vadd.f32 %v8498_v15, %v8306_v44  ;;  %v20751_v16 = vld [vmem:[#allocation63_spill] sm:$0xff] }
 0x473   : > { %20747 = vst [vmem:[#allocation73_spill] sm:$0xff] %v18320_v2  ;;  %v13414_v52 = vld [vmem:[%s14532_s25 + $0x10] ss:$8 sps:$4 sm:$0xff]   ;;  %v12422_v32 = vcombine.high %v18299_v61, %v18304_v11  ;;  %v12421_v13 = vcombine.low %v18299_v61, %v18304_v11  ;;  %10054 = vmatpush1.bf16.msra.mxu1 %v12429_v28  ;;  %v8500_v6 = vpop.f32.mrf.mxu0  ;;  %v12797_v61 = vpack.c.bf16 %v10477_v10, %v10476_v42  ;;  %v13417_v30 = vld [vmem:[%s14923_s16 + $0x80] ss:$8 sps:$4 sm:$0xff]  }
 0x474   : > { %9706 = vmatmul.mubr.bf16.gmra.mxu1 %v13414_v52  ;;  %v18330_v22 = vpop.f32.mrf.mxu1  ;;  %v3811_v5 = vld [vmem:[%s19967_s6 + $0xcd8] sm:$0xff]  ;;  %v8692_v11 = vadd.f32 %v17758_v24, %v8499_v36  ;;  %v8501_v41 = vadd.f32 %v8500_v6, %v8308_v12  ;;  %v8310_v18 = vadd.f32 %v20751_v16, %v8117_v0  ;;  %9501 = vmatpush2.bf16.msra.mxu0 %v12069_v59  ;;  %v10484_v1 = vmax.f32 %v8690_v17, 0.0  ;;  %v13418_v52 = vld [vmem:[%s14532_s25 + $0x20] ss:$8 sps:$4 sm:$0xff]   ;;  %v13447_v34 = vld [vmem:[%s14532_s25 + $0xa4] ss:$8 sps:$4 sm:$0xff]  }
 0x475   : > { %20749 = vst [vmem:[#allocation122_spill] sm:$0xff] %v18330_v22  ;;  %9715 = vmatprep.mubr.bf16.mxu1 %v13416_v53  ;;  %v3815_v8 = vld [vmem:[%s19967_s6 + $0xcf8] sm:$0xff]  ;;  %10055 = vmatprep.subr.bf16.mxu1 %v12422_v32  ;;  %v8502_v28 = vpop.f32.mrf.mxu0  ;;  %11383 = vst [vmem:[%s16259_s22 + $0x3a8] sm:$0xff] %v12797_v61  ;;  %v20785_v2 = vld [vmem:[#allocation43_spill] sm:$0xff] }
 0x476   : > { %v18343_v38 = vpop.f32.mrf.mxu1  ;;  %v3803_v44 = vld [vmem:[%s19967_s6 + $0xc98] sm:$0xff]  ;;  %9856 = vmatprep.subr.bf16.mxu0 %v12318_v33  ;;  %v12413_v60 = vcombine.low %v3811_v5, %v3815_v8  ;;  %v12414_v24 = vcombine.high %v3811_v5, %v3815_v8  ;;  %v10485_v27 = vmax.f32 %v8692_v11, 0.0  ;;  %v8694_v9 = vadd.f32 %v17770_v46, %v8501_v41 }
 0x477   : > { %20750 = vst [vmem:[#allocation75_spill] sm:$0xff] %v18343_v38  ;;  %v3807_v43 = vld [vmem:[%s19967_s6 + $0xcb8] sm:$0xff]  ;;  %v8503_v0 = vadd.f32 %v8502_v28, %v8310_v18  ;;  %10056 = vmatpush1.bf16.msra.mxu1 %v12421_v13  ;;  %v18357_v54 = vpop.f32.mrf.mxu0  ;;  %v13424_v28 = vld [vmem:[%s14532_s25 + $0x44] ss:$8 sps:$4 sm:$0xff]  }
 0x478   : > { %v18353_v21 = vpop.f32.mrf.mxu1  ;;  %v12406_v32 = vcombine.high %v3803_v44, %v3807_v43  ;;  %v12801_v14 = vpack.c.bf16 %v10485_v27, %v10484_v1  ;;  %v13419_v4 = vld [vmem:[%s14923_s16 + $0x94] ss:$8 sps:$4 sm:$0xff]   ;;  %10057 = vmatprep.subr.bf16.mxu1 %v12414_v24  ;;  %v10492_v56 = vmax.f32 %v8694_v9, 0.0  ;;  %v12405_v33 = vcombine.low %v3803_v44, %v3807_v43  ;;  %v13421_v41 = vld [vmem:[%s14923_s16 + $0x90] ss:$8 sps:$4 sm:$0xff]  }
 0x479   : > { %20752 = vst [vmem:[#allocation31_spill] sm:$0xff] %v18353_v21  ;;  %9197 = vmatmul.mubr.bf16.gmra.mxu0 %v13417_v30  ;;  %v8696_v55 = vadd.f32 %v17777_v19, %v8503_v0  ;;  %v13420_v25 = vld [vmem:[%s14532_s25 + $0x34] ss:$8 sps:$4 sm:$0xff]   ;;  %v18366_v46 = vpop.f32.mrf.mxu0  ;;  %v13422_v18 = vld [vmem:[%s14532_s25 + $0x30] ss:$8 sps:$4 sm:$0xff]  }
 0x47a   : > { %v18360_v59 = vpop.f32.mrf.mxu1  ;;  %9206 = vmatprep.mubr.bf16.mxu0 %v13419_v4  ;;  %11387 = vst [vmem:[%s16259_s22 + $0x3c8] sm:$0xff] %v12801_v14  ;;  %v3795_v19 = vld [vmem:[%s19967_s6 + $0xc58] sm:$0xff]  ;;  %v13423_v43 = vld [vmem:[%s14923_s16 + $0xa4] ss:$8 sps:$4 sm:$0xff]  }
 0x47b   : > { %20753 = vst [vmem:[#allocation64_spill] sm:$0xff] %v18360_v59  ;;  %v10493_v12 = vmax.f32 %v8696_v55, 0.0  ;;  %10058 = vmatpush1.bf16.msra.mxu1 %v12413_v60  ;;  %v3799_v53 = vld [vmem:[%s19967_s6 + $0xc78] sm:$0xff]  ;;  %v18377_v13 = vpop.f32.mrf.mxu0 }
 0x47c   : > { %9716 = vmatmul.mubr.bf16.gmra.mxu1 %v13418_v52  ;;  %v18368_v15 = vpop.f32.mrf.mxu1  ;;  %10059 = vmatprep.subr.bf16.mxu1 %v12406_v32  ;;  %v3787_v17 = vld [vmem:[%s19967_s6 + $0xc18] sm:$0xff]  ;;  %v12398_v6 = vcombine.high %v3795_v19, %v3799_v53  ;;  %v12397_v61 = vcombine.low %v3795_v19, %v3799_v53 }
 0x47d   : > { %9725 = vmatprep.mubr.bf16.mxu1 %v13420_v25  ;;  %20754 = vst [vmem:[#allocation127_spill] sm:$0xff] %v18368_v15  ;;  %v12805_v10 = vpack.c.bf16 %v10493_v12, %v10492_v56  ;;  %v3791_v36 = vld [vmem:[%s19967_s6 + $0xc38] sm:$0xff]  ;;  %v18387_v5 = vpop.f32.mrf.mxu0  ;;  %v13425_v25 = vld [vmem:[%s14923_s16 + $0xa0] ss:$8 sps:$4 sm:$0xff]  }
 0x47e   : > { %v18379_v42 = vpop.f32.mrf.mxu1  ;;  %v12390_v44 = vcombine.high %v3787_v17, %v3791_v36  ;;  %v12389_v1 = vcombine.low %v3787_v17, %v3791_v36  ;;  %v3907_v27 = vld [vmem:[%s19967_s6 + $0xfd8] sm:$0xff]  ;;  %v13426_v12 = vld [vmem:[%s14532_s25 + $0x40] ss:$8 sps:$4 sm:$0xff]  }
 0x47f   : > { %20755 = vst [vmem:[#allocation76_spill] sm:$0xff] %v18379_v42  ;;  %11391 = vst [vmem:[%s16259_s22 + $0x3e8] sm:$0xff] %v12805_v10  ;;  %10060 = vmatpush1.bf16.msra.mxu1 %v12405_v33  ;;  %v18392_v11 = vpop.f32.mrf.mxu0  ;;  %v3911_v9 = vld [vmem:[%s19967_s6 + $0xff8] sm:$0xff] }
 0x480   : > { %v18389_v8 = vpop.f32.mrf.mxu1  ;;  %10061 = vmatprep.subr.bf16.mxu1 %v12398_v6  ;;  %v12510_v14 = vcombine.high %v3907_v27, %v3911_v9  ;;  %v12509_v55 = vcombine.low %v3907_v27, %v3911_v9  ;;  %v13427_v33 = vld [vmem:[%s14923_s16 + $0xb4] ss:$8 sps:$4 sm:$0xff]   ;;  %v13430_v9 = vld [vmem:[%s14532_s25 + $0x50] ss:$8 sps:$4 sm:$0xff]  }
 0x481   : > { %20756 = vst [vmem:[#allocation156_spill] sm:$0xff] %v18389_v8  ;;  %9207 = vmatmul.mubr.bf16.gmra.mxu0 %v13421_v41  ;;  %v18400_v60 = vpop.f32.mrf.mxu0  ;;  %v13428_v19 = vld [vmem:[%s14532_s25 + $0x54] ss:$8 sps:$4 sm:$0xff]  }
 0x482   : > { %v18395_v16 = vpop.f32.mrf.mxu1  ;;  %9216 = vmatprep.mubr.bf16.mxu0 %v13423_v43  ;;  %v3899_v17 = vld [vmem:[%s19967_s6 + $0xf98] sm:$0xff] }
 0x483   : > { %20757 = vst [vmem:[#allocation96_spill] sm:$0xff] %v18395_v16  ;;  %10062 = vmatpush1.bf16.msra.mxu1 %v12397_v61  ;;  %v18410_v0 = vpop.f32.mrf.mxu0  ;;  %v3903_v36 = vld [vmem:[%s19967_s6 + $0xfb8] sm:$0xff] }
 0x484   : > { %9726 = vmatmul.mubr.bf16.gmra.mxu1 %v13422_v18  ;;  %v18402_v24 = vpop.f32.mrf.mxu1  ;;  %10063 = vmatprep.subr.bf16.mxu1 %v12390_v44  ;;  %v12501_v41 = vcombine.low %v3899_v17, %v3903_v36  ;;  %v12502_v18 = vcombine.high %v3899_v17, %v3903_v36  ;;  %v13443_v16 = vld [vmem:[%s14923_s16 + $0xf4] ss:$8 sps:$4 sm:$0xff]  }
 0x485   : > { %9735 = vmatprep.mubr.bf16.mxu1 %v13424_v28  ;;  %20758 = vst [vmem:[#allocation143_spill] sm:$0xff] %v18402_v24  ;;  %v18414_v52 = vpop.f32.mrf.mxu0  ;;  %v13444_v8 = vld [vmem:[%s14532_s25 + $0x94] ss:$8 sps:$4 sm:$0xff]  }
 0x486   : > { %v18412_v30 = vpop.f32.mrf.mxu1  ;;  %v3859_v42 = vld [vmem:[%s19967_s6 + $0xe58] sm:$0xff] }
 0x487   : > { %20759 = vst [vmem:[#allocation124_spill] sm:$0xff] %v18412_v30  ;;  %10064 = vmatpush1.bf16.msra.mxu1 %v12389_v1  ;;  %v18418_v4 = vpop.f32.mrf.mxu0  ;;  %v13429_v1 = vld [vmem:[%s14923_s16 + $0xb0] ss:$8 sps:$4 sm:$0xff]   ;;  %v13440_v30 = vld [vmem:[%s14532_s25 + $0x84] ss:$8 sps:$4 sm:$0xff]  }
 0x488   : > { %v18416_v32 = vpop.f32.mrf.mxu1  ;;  %10065 = vmatprep.subr.bf16.mxu1 %v12510_v14  ;;  %v13431_v14 = vld [vmem:[%s14923_s16 + $0xc4] ss:$8 sps:$4 sm:$0xff]   ;;  %v3851_v15 = vld [vmem:[%s19967_s6 + $0xe18] sm:$0xff] }
 0x489   : > { %20760 = vst [vmem:[#allocation34_spill] sm:$0xff] %v18416_v32  ;;  %9217 = vmatmul.mubr.bf16.gmra.mxu0 %v13425_v25  ;;  %v18426_v53 = vpop.f32.mrf.mxu0  ;;  %v13439_v32 = vld [vmem:[%s14923_s16 + $0xe4] ss:$8 sps:$4 sm:$0xff]   ;;  %v3703_v62 = vld [vmem:[%s19967_s6 + $0x978] sm:$0xff] }
 0x48a   : > { %v18421_v56 = vpop.f32.mrf.mxu1  ;;  %9226 = vmatprep.mubr.bf16.mxu0 %v13427_v33  ;;  %v3891_v33 = vld [vmem:[%s19967_s6 + $0xf58] sm:$0xff] }
 0x48b   : > { %20761 = vst [vmem:[#allocation145_spill] sm:$0xff] %v18421_v56  ;;  %10066 = vmatpush2.bf16.msra.mxu1 %v12509_v55  ;;  %v18436_v6 = vpop.f32.mrf.mxu0  ;;  %v13432_v55 = vld [vmem:[%s14532_s25 + $0x64] ss:$8 sps:$4 sm:$0xff]   ;;  %v13438_v56 = vld [vmem:[%s14532_s25 + $0x70] ss:$8 sps:$4 sm:$0xff]  }
 0x48c   : > { %9736 = vmatmul.mubr.bf16.gmra.mxu1 %v13426_v12  ;;  %v18428_v10 = vpop.f32.mrf.mxu1  ;;  %10067 = vmatprep.subr.bf16.mxu1 %v12502_v18 }
 0x48d   : > { %9745 = vmatprep.mubr.bf16.mxu1 %v13428_v19  ;;  %20762 = vst [vmem:[#allocation158_spill] sm:$0xff] %v18428_v10  ;;  %v18440_v44 = vpop.f32.mrf.mxu0  ;;  %v3895_v19 = vld [vmem:[%s19967_s6 + $0xf78] sm:$0xff] }
 0x48e   : > { %v18438_v61 = vpop.f32.mrf.mxu1  ;;  %v12494_v18 = vcombine.high %v3891_v33, %v3895_v19 }
 0x48f   : > { %20763 = vst [vmem:[#allocation79_spill] sm:$0xff] %v18438_v61  ;;  %10068 = vmatpush2.bf16.msra.mxu1 %v12501_v41  ;;  %v18444_v28 = vpop.f32.mrf.mxu0  ;;  %v12493_v41 = vcombine.low %v3891_v33, %v3895_v19  ;;  %v13437_v61 = vld [vmem:[%s14923_s16 + $0xd0] ss:$8 sps:$4 sm:$0xff]  }
 0x490   : > { %v18442_v43 = vpop.f32.mrf.mxu1  ;;  %10069 = vmatprep.subr.bf16.mxu1 %v12494_v18  ;;  %v3887_v18 = vld [vmem:[%s19967_s6 + $0xf38] sm:$0xff] }
 0x491   : > { %20764 = vst [vmem:[#allocation129_spill] sm:$0xff] %v18442_v43  ;;  %9227 = vmatmul.mubr.bf16.gmra.mxu0 %v13429_v1  ;;  %v18452_v25 = vpop.f32.mrf.mxu0  ;;  %v13435_v43 = vld [vmem:[%s14923_s16 + $0xd4] ss:$8 sps:$4 sm:$0xff]  }
 0x492   : > { %v18447_v27 = vpop.f32.mrf.mxu1  ;;  %9236 = vmatprep.mubr.bf16.mxu0 %v13431_v14 }
 0x493   : > { %20765 = vst [vmem:[#allocation126_spill] sm:$0xff] %v18447_v27  ;;  %v18462_v17 = vpop.f32.mrf.mxu0  ;;  %10070 = vmatpush2.bf16.msra.mxu1 %v12493_v41  ;;  %v13434_v27 = vld [vmem:[%s14532_s25 + $0x60] ss:$8 sps:$4 sm:$0xff]   ;;  %v3883_v41 = vld [vmem:[%s19967_s6 + $0xf18] sm:$0xff] }
 0x494   : > { %9746 = vmatmul.mubr.bf16.gmra.mxu1 %v13430_v9  ;;  %v18454_v12 = vpop.f32.mrf.mxu1 }
 0x495   : > { %9755 = vmatprep.mubr.bf16.mxu1 %v13432_v55  ;;  %20766 = vst [vmem:[#allocation98_spill] sm:$0xff] %v18454_v12  ;;  %v18466_v1 = vpop.f32.mrf.mxu0  ;;  %v13433_v55 = vld [vmem:[%s14923_s16 + $0xc0] ss:$8 sps:$4 sm:$0xff]  }
 0x496   : > { %v18464_v36 = vpop.f32.mrf.mxu1 }
 0x497   : > { %20767 = vst [vmem:[#allocation149_spill] sm:$0xff] %v18464_v36  ;;  %v18470_v14 = vpop.f32.mrf.mxu0  ;;  %v13436_v36 = vld [vmem:[%s14532_s25 + $0x74] ss:$8 sps:$4 sm:$0xff]  }
 0x498   : > { %v18468_v9 = vpop.f32.mrf.mxu1 }
 0x499   : > { %20768 = vst [vmem:[#allocation65_spill] sm:$0xff] %v18468_v9  ;;  %9237 = vmatmul.mubr.bf16.gmra.mxu0 %v13433_v55  ;;  %v18478_v33 = vpop.f32.mrf.mxu0  ;;  %v12486_v55 = vcombine.high %v3883_v41, %v3887_v18 }
 0x49a   : > { %v18473_v12 = vpop.f32.mrf.mxu1  ;;  %9246 = vmatprep.mubr.bf16.mxu0 %v13435_v43 }
 0x49b   : > { %20769 = vst [vmem:[#allocation32_spill] sm:$0xff] %v18473_v12  ;;  %10071 = vmatprep.subr.bf16.mxu1 %v12486_v55 }
 0x49c   : > { %9756 = vmatmul.mubr.bf16.gmra.mxu1 %v13434_v27  ;;  %v18480_v19 = vpop.f32.mrf.mxu1  ;;  %v18488_v27 = vpop.f32.mrf.mxu0 }
 0x49d   : > { %9765 = vmatprep.mubr.bf16.mxu1 %v13436_v36  ;;  %20770 = vst [vmem:[#allocation80_spill] sm:$0xff] %v18480_v19  ;;  %v12485_v36 = vcombine.low %v3883_v41, %v3887_v18  ;;  %v3875_v41 = vld [vmem:[%s19967_s6 + $0xed8] sm:$0xff] }
 0x49e   : > { %v18490_v43 = vpop.f32.mrf.mxu1  ;;  %v18492_v12 = vpop.f32.mrf.mxu0  ;;  %v3879_v18 = vld [vmem:[%s19967_s6 + $0xef8] sm:$0xff] }
 0x49f   : > { %20771 = vst [vmem:[#allocation160_spill] sm:$0xff] %v18490_v43  ;;  %10072 = vmatpush2.bf16.msra.mxu1 %v12485_v36  ;;  %v12478_v55 = vcombine.high %v3875_v41, %v3879_v18 }
 0x4a0   : > { %v18494_v9 = vpop.f32.mrf.mxu1  ;;  %v18496_v19 = vpop.f32.mrf.mxu0 }
 0x4a1   : > { %20772 = vst [vmem:[#allocation66_spill] sm:$0xff] %v18494_v9  ;;  %9247 = vmatmul.mubr.bf16.gmra.mxu0 %v13437_v61  ;;  %10073 = vmatprep.subr.bf16.mxu1 %v12478_v55  ;;  %v3871_v9 = vld [vmem:[%s19967_s6 + $0xeb8] sm:$0xff] }
 0x4a2   : > { %v18499_v10 = vpop.f32.mrf.mxu1  ;;  %9256 = vmatprep.mubr.bf16.mxu0 %v13439_v32  ;;  %v18510_v36 = vpop.f32.mrf.mxu0  ;;  %v3867_v32 = vld [vmem:[%s19967_s6 + $0xe98] sm:$0xff] }
 0x4a3   : > { %20773 = vst [vmem:[#allocation100_spill] sm:$0xff] %v18499_v10  ;;  %20774 = vst [vmem:[#allocation83_spill] sm:$0xff] %v18510_v36 }
 0x4a4   : > { %9766 = vmatmul.mubr.bf16.gmra.mxu1 %v13438_v56  ;;  %v18512_v61 = vpop.f32.mrf.mxu1  ;;  %v12477_v56 = vcombine.low %v3875_v41, %v3879_v18  ;;  %v18514_v10 = vpop.f32.mrf.mxu0  ;;  %v12470_v41 = vcombine.high %v3867_v32, %v3871_v9  ;;  %v12469_v18 = vcombine.low %v3867_v32, %v3871_v9  ;;  %v3863_v9 = vld [vmem:[%s19967_s6 + $0xe78] sm:$0xff] }
 0x4a5   : > { %9775 = vmatprep.mubr.bf16.mxu1 %v13440_v30  ;;  %20775 = vst [vmem:[#allocation67_spill] sm:$0xff] %v18512_v61  ;;  %20776 = vst [vmem:[#allocation155_spill] sm:$0xff] %v18514_v10 }
 0x4a6   : > { %v18516_v30 = vpop.f32.mrf.mxu1  ;;  %10074 = vmatpush2.bf16.msra.mxu1 %v12477_v56  ;;  %v18524_v61 = vpop.f32.mrf.mxu0  ;;  %v13442_v56 = vld [vmem:[%s14532_s25 + $0x80] ss:$8 sps:$4 sm:$0xff]  }
 0x4a7   : > { %20777 = vst [vmem:[#allocation33_spill] sm:$0xff] %v18516_v30  ;;  %20778 = vst [vmem:[#allocation162_spill] sm:$0xff] %v18524_v61  ;;  %v13441_v30 = vld [vmem:[%s14923_s16 + $0xe0] ss:$8 sps:$4 sm:$0xff]   ;;  %10075 = vmatprep.subr.bf16.mxu1 %v12470_v41  ;;  %v3855_v41 = vld [vmem:[%s19967_s6 + $0xe38] sm:$0xff] }
 0x4a8   : > { %v18526_v43 = vpop.f32.mrf.mxu1  ;;  %v18528_v24 = vpop.f32.mrf.mxu0  ;;  %v12454_v22 = vcombine.high %v3851_v15, %v3855_v41 }
 0x4a9   : > { %20779 = vst [vmem:[#allocation102_spill] sm:$0xff] %v18526_v43  ;;  %20780 = vst [vmem:[#allocation35_spill] sm:$0xff] %v18528_v24  ;;  %9257 = vmatmul.mubr.bf16.gmra.mxu0 %v13441_v30  ;;  %v12462_v43 = vcombine.high %v3859_v42, %v3863_v9 }
 0x4aa   : > { %v18531_v55 = vpop.f32.mrf.mxu1  ;;  %9266 = vmatprep.mubr.bf16.mxu0 %v13443_v16  ;;  %v18542_v32 = vpop.f32.mrf.mxu0  ;;  %10076 = vmatpush2.bf16.msra.mxu1 %v12469_v18  ;;  %v12461_v16 = vcombine.low %v3859_v42, %v3863_v9  ;;  %v12453_v42 = vcombine.low %v3851_v15, %v3855_v41  ;;  %v13445_v9 = vld [vmem:[%s14923_s16 + $0xf0] ss:$8 sps:$4 sm:$0xff]  }
 0x4ab   : > { %20781 = vst [vmem:[#allocation157_spill] sm:$0xff] %v18542_v32  ;;  %10077 = vmatprep.subr.bf16.mxu1 %v12462_v43  ;;  %v13446_v43 = vld [vmem:[%s14532_s25 + $0x90] ss:$8 sps:$4 sm:$0xff]   ;;  %v13451_v32 = vld [vmem:[%s14532_s25 + $0xc4] ss:$8 sps:$4 sm:$0xff]  }
 0x4ac   : > { %9776 = vmatmul.mubr.bf16.gmra.mxu1 %v13442_v56  ;;  %v18544_v30 = vpop.f32.mrf.mxu1  ;;  %v18546_v56 = vpop.f32.mrf.mxu0 }
 0x4ad   : > { %9785 = vmatprep.mubr.bf16.mxu1 %v13444_v8  ;;  %20782 = vst [vmem:[#allocation128_spill] sm:$0xff] %v18546_v56 }
 0x4ae   : > { %v18548_v8 = vpop.f32.mrf.mxu1  ;;  %v18553_v59 = vpop.f32.mrf.mxu0  ;;  %10078 = vmatpush2.bf16.msra.mxu1 %v12461_v16  ;;  %v3707_v16 = vld [vmem:[%s19967_s6 + $0x998] sm:$0xff] }
 0x4af   : > { %20783 = vst [vmem:[#allocation133_spill] sm:$0xff] %v18553_v59  ;;  %10079 = vmatprep.subr.bf16.mxu1 %v12454_v22  ;;  %v3699_v22 = vld [vmem:[%s19967_s6 + $0x958] sm:$0xff] }
 0x4b0   : > { %v18555_v21 = vpop.f32.mrf.mxu1  ;;  %v18560_v18 = vpop.f32.mrf.mxu0  ;;  %v12302_v59 = vcombine.high %v3699_v22, %v3703_v62 }
 0x4b1   : > { %20784 = vst [vmem:[#allocation161_spill] sm:$0xff] %v18560_v18  ;;  %9267 = vmatmul.mubr.bf16.gmra.mxu0 %v13445_v9  ;;  %v3711_v9 = vld [vmem:[%s19967_s6 + $0x9b8] sm:$0xff] }
 0x4b2   : > { %v18563_v38 = vpop.f32.mrf.mxu1  ;;  %9502 = vmatprep.mubr.bf16.mxu0 %v20785_v2  ;;  %v18568_v40 = vpop.f32.mrf.mxu0  ;;  %10080 = vmatpush2.bf16.msra.mxu1 %v12453_v42  ;;  %v12310_v41 = vcombine.high %v3707_v16, %v3711_v9  ;;  %v20790_v42 = vld [vmem:[#allocation42_spill] sm:$0xff]  ;;  %v12309_v18 = vcombine.low %v3707_v16, %v3711_v9 }
 0x4b3   : > { %20786 = vst [vmem:[#allocation68_spill] sm:$0xff] %v18568_v40  ;;  %v20792_v40 = vcombine.low %v17895_v26, %v17900_v51 }
 0x4b4   : > { %9786 = vmatmul.mubr.bf16.gmra.mxu1 %v13446_v43  ;;  %v18570_v48 = vpop.f32.mrf.mxu1  ;;  %v18578_v15 = vpop.f32.mrf.mxu0 }
 0x4b5   : > { %9795 = vmatprep.mubr.bf16.mxu1 %v13447_v34  ;;  %20787 = vst [vmem:[#allocation163_spill] sm:$0xff] %v18578_v15  ;;  %v13448_v15 = vld [vmem:[%s14532_s25 + $0xa0] ss:$8 sps:$4 sm:$0xff]  }
 0x4b6   : > { %v18580_v2 = vpop.f32.mrf.mxu1  ;;  %v18582_v34 = vpop.f32.mrf.mxu0 }
 0x4b7   : > { %20788 = vst [vmem:[#allocation164_spill] sm:$0xff] %v18582_v34  ;;  %v20791_v34 = vld [vmem:[#allocation45_spill] sm:$0xff] }
 0x4b8   : > { %v18584_v43 = vpop.f32.mrf.mxu1  ;;  %v18592_v45 = vpop.f32.mrf.mxu0 }
 0x4b9   : > { %20789 = vst [vmem:[#allocation104_spill] sm:$0xff] %v18592_v45  ;;  %9503 = vmatmul.mubr.bf16.vlgmr.msra.gmra.mxu0 %v20790_v42  ;;  %v13449_v45 = vld [vmem:[%s14532_s25 + $0xb4] ss:$8 sps:$4 sm:$0xff]  }
 0x4ba   : > { %v18595_v37 = vpop.f32.mrf.mxu1  ;;  %9512 = vmatprep.mubr.bf16.mxu0 %v20791_v34  ;;  %9857 = vmatpush1.bf16.msra.mxu0 %v20792_v40  ;;  %v18602_v49 = vpop.f32.mrf.mxu0  ;;  %v3695_v34 = vld [vmem:[%s19967_s6 + $0x938] sm:$0xff]  ;;  %v12301_v40 = vcombine.low %v3699_v22, %v3703_v62 }
 0x4bb   : > { %20793 = vst [vmem:[#allocation91_spill] sm:$0xff] %v18602_v49  ;;  %9858 = vmatprep.subr.bf16.mxu0 %v12310_v41  ;;  %v3683_v41 = vld [vmem:[%s19967_s6 + $0x8d8] sm:$0xff]  ;;  %v20797_v49 = vld [vmem:[#allocation44_spill] sm:$0xff] }
 0x4bc   : > { %9796 = vmatmul.mubr.bf16.gmra.mxu1 %v13448_v15  ;;  %v18604_v23 = vpop.f32.mrf.mxu1  ;;  %v3691_v15 = vld [vmem:[%s19967_s6 + $0x918] sm:$0xff]  ;;  %v18613_v26 = vpop.f32.mrf.mxu0 }
 0x4bd   : > { %9805 = vmatprep.mubr.bf16.mxu1 %v13449_v45  ;;  %20794 = vst [vmem:[#allocation36_spill] sm:$0xff] %v18613_v26  ;;  %v12294_v9 = vcombine.high %v3691_v15, %v3695_v34  ;;  %v3687_v42 = vld [vmem:[%s19967_s6 + $0x8f8] sm:$0xff]  ;;  %v12293_v22 = vcombine.low %v3691_v15, %v3695_v34 }
 0x4be   : > { %v18615_v51 = vpop.f32.mrf.mxu1  ;;  %9859 = vmatpush1.bf16.msra.mxu0 %v12309_v18  ;;  %v18617_v16 = vpop.f32.mrf.mxu0  ;;  %v13450_v18 = vld [vmem:[%s14532_s25 + $0xb0] ss:$8 sps:$4 sm:$0xff]   ;;  %v12286_v56 = vcombine.high %v3683_v41, %v3687_v42  ;;  %v12285_v34 = vcombine.low %v3683_v41, %v3687_v42  ;;  %v13452_v42 = vld [vmem:[%s14532_s25 + $0xc0] ss:$8 sps:$4 sm:$0xff]  }
 0x4bf   : > { %20795 = vst [vmem:[#allocation135_spill] sm:$0xff] %v18617_v16  ;;  %9860 = vmatprep.subr.bf16.mxu0 %v12302_v59  ;;  %v20798_v59 = vld [vmem:[#allocation47_spill] sm:$0xff] }
 0x4c0   : > { %v18619_v45 = vpop.f32.mrf.mxu1  ;;  %v18627_v26 = vpop.f32.mrf.mxu0 }
 0x4c1   : > { %20796 = vst [vmem:[#allocation95_spill] sm:$0xff] %v18627_v26  ;;  %9513 = vmatmul.mubr.bf16.gmra.mxu0 %v20797_v49  ;;  %v3675_v49 = vld [vmem:[%s19967_s6 + $0x898] sm:$0xff] }
 0x4c2   : > { %v18630_v62 = vpop.f32.mrf.mxu1  ;;  %9522 = vmatprep.mubr.bf16.mxu0 %v20798_v59  ;;  %9861 = vmatpush1.bf16.msra.mxu0 %v12301_v40  ;;  %v18634_v16 = vpop.f32.mrf.mxu0  ;;  %v3671_v26 = vld [vmem:[%s19967_s6 + $0x878] sm:$0xff] }
 0x4c3   : > { %20799 = vst [vmem:[#allocation130_spill] sm:$0xff] %v18634_v16  ;;  %9862 = vmatprep.subr.bf16.mxu0 %v12294_v9  ;;  %v3667_v16 = vld [vmem:[%s19967_s6 + $0x858] sm:$0xff] }
 0x4c4   : > { %9806 = vmatmul.mubr.bf16.gmra.mxu1 %v13450_v18  ;;  %v18636_v39 = vpop.f32.mrf.mxu1  ;;  %v3679_v18 = vld [vmem:[%s19967_s6 + $0x8b8] sm:$0xff]  ;;  %v18645_v59 = vpop.f32.mrf.mxu0  ;;  %v12270_v24 = vcombine.high %v3667_v16, %v3671_v26 }
 0x4c5   : > { %9815 = vmatprep.mubr.bf16.mxu1 %v13451_v32  ;;  %20800 = vst [vmem:[#allocation106_spill] sm:$0xff] %v18645_v59  ;;  %v12278_v9 = vcombine.high %v3675_v49, %v3679_v18 }
 0x4c6   : > { %v18647_v15 = vpop.f32.mrf.mxu1  ;;  %9863 = vmatpush1.bf16.msra.mxu0 %v12293_v22  ;;  %v18649_v40 = vpop.f32.mrf.mxu0  ;;  %v12277_v22 = vcombine.low %v3675_v49, %v3679_v18  ;;  %v12269_v18 = vcombine.low %v3667_v16, %v3671_v26  ;;  %v13454_v16 = vld [vmem:[%s14532_s25 + $0xd0] ss:$8 sps:$4 sm:$0xff]  }
 0x4c7   : > { %20801 = vst [vmem:[#allocation132_spill] sm:$0xff] %v18649_v40  ;;  %9864 = vmatprep.subr.bf16.mxu0 %v12286_v56  ;;  %v20805_v56 = vld [vmem:[#allocation49_spill] sm:$0xff] }
 0x4c8   : > { %v18651_v32 = vpop.f32.mrf.mxu1  ;;  %v18659_v59 = vpop.f32.mrf.mxu0 }
 0x4c9   : > { %20802 = vst [vmem:[#allocation70_spill] sm:$0xff] %v18659_v59  ;;  %9523 = vmatmul.mubr.bf16.gmra.mxu0 %v20803_v47  ;;  %v3659_v47 = vld [vmem:[%s19967_s6 + $0x818] sm:$0xff] }
 0x4ca   : > { %v18662_v41 = vpop.f32.mrf.mxu1  ;;  %9532 = vmatprep.mubr.bf16.mxu0 %v20805_v56  ;;  %9865 = vmatpush1.bf16.msra.mxu0 %v12285_v34  ;;  %v18666_v40 = vpop.f32.mrf.mxu0  ;;  %v3783_v59 = vld [vmem:[%s19967_s6 + $0xbf8] sm:$0xff] }
 0x4cb   : > { %20804 = vst [vmem:[#allocation99_spill] sm:$0xff] %v18662_v41  ;;  %20806 = vst [vmem:[#allocation134_spill] sm:$0xff] %v18666_v40  ;;  %9866 = vmatprep.subr.bf16.mxu0 %v12278_v9  ;;  %v3779_v40 = vld [vmem:[%s19967_s6 + $0xbd8] sm:$0xff]  ;;  %v20853_v41 = vld [vmem:[#allocation56_spill] sm:$0xff] }
 0x4cc   : > { %9816 = vmatmul.mubr.bf16.gmra.mxu1 %v13452_v42  ;;  %v18668_v61 = vpop.f32.mrf.mxu1  ;;  %v3663_v42 = vld [vmem:[%s19967_s6 + $0x838] sm:$0xff]  ;;  %v18677_v56 = vpop.f32.mrf.mxu0 }
 0x4cd   : > { %20807 = vst [vmem:[#allocation39_spill] sm:$0xff] %v18668_v61  ;;  %9825 = vmatprep.mubr.bf16.mxu1 %v13453_v63  ;;  %20808 = vst [vmem:[#allocation166_spill] sm:$0xff] %v18677_v56  ;;  %v12262_v9 = vcombine.high %v3659_v47, %v3663_v42 }
 0x4ce   : > { %v18679_v49 = vpop.f32.mrf.mxu1  ;;  %9867 = vmatpush1.bf16.msra.mxu0 %v12277_v22  ;;  %v18681_v34 = vpop.f32.mrf.mxu0  ;;  %v12261_v22 = vcombine.low %v3659_v47, %v3663_v42  ;;  %v12381_v42 = vcombine.low %v3779_v40, %v3783_v59 }
 0x4cf   : > { %20809 = vst [vmem:[#allocation107_spill] sm:$0xff] %v18679_v49  ;;  %20810 = vst [vmem:[#allocation37_spill] sm:$0xff] %v18681_v34  ;;  %9868 = vmatprep.subr.bf16.mxu0 %v12270_v24  ;;  %v20813_v49 = vld [vmem:[#allocation48_spill] sm:$0xff]  ;;  %v20815_v24 = vld [vmem:[#allocation51_spill] sm:$0xff] }
 0x4d0   : > { %v18683_v63 = vpop.f32.mrf.mxu1  ;;  %v18691_v56 = vpop.f32.mrf.mxu0 }
 0x4d1   : > { %20811 = vst [vmem:[#allocation105_spill] sm:$0xff] %v18683_v63  ;;  %20812 = vst [vmem:[#allocation136_spill] sm:$0xff] %v18691_v56  ;;  %9533 = vmatmul.mubr.bf16.gmra.mxu0 %v20813_v49  ;;  %v12382_v63 = vcombine.high %v3779_v40, %v3783_v59  ;;  %v3771_v49 = vld [vmem:[%s19967_s6 + $0xb98] sm:$0xff]  ;;  %v13456_v40 = vld [vmem:[%s14532_s25 + $0xe0] ss:$8 sps:$4 sm:$0xff]  }
 0x4d2   : > { %v18694_v26 = vpop.f32.mrf.mxu1  ;;  %9542 = vmatprep.mubr.bf16.mxu0 %v20815_v24  ;;  %9869 = vmatpush1.bf16.msra.mxu0 %v12269_v18  ;;  %v18698_v34 = vpop.f32.mrf.mxu0  ;;  %v3767_v56 = vld [vmem:[%s19967_s6 + $0xb78] sm:$0xff] }
 0x4d3   : > { %20814 = vst [vmem:[#allocation108_spill] sm:$0xff] %v18694_v26  ;;  %20816 = vst [vmem:[#allocation114_spill] sm:$0xff] %v18698_v34  ;;  %9870 = vmatprep.subr.bf16.mxu0 %v12262_v9  ;;  %v3763_v34 = vld [vmem:[%s19967_s6 + $0xb58] sm:$0xff] }
 0x4d4   : > { %9826 = vmatmul.mubr.bf16.gmra.mxu1 %v13454_v16  ;;  %v18700_v10 = vpop.f32.mrf.mxu1  ;;  %v3775_v16 = vld [vmem:[%s19967_s6 + $0xbb8] sm:$0xff]  ;;  %v18709_v24 = vpop.f32.mrf.mxu0 }
 0x4d5   : > { %20817 = vst [vmem:[#allocation138_spill] sm:$0xff] %v18700_v10  ;;  %9835 = vmatprep.mubr.bf16.mxu1 %v13455_v50  ;;  %20818 = vst [vmem:[#allocation74_spill] sm:$0xff] %v18709_v24  ;;  %v12374_v9 = vcombine.high %v3771_v49, %v3775_v16  ;;  %v13457_v26 = vld [vmem:[%s14532_s25 + $0xf4] ss:$8 sps:$4 sm:$0xff]  }
 0x4d6   : > { %v18711_v47 = vpop.f32.mrf.mxu1  ;;  %9871 = vmatpush1.bf16.msra.mxu0 %v12261_v22  ;;  %v18713_v18 = vpop.f32.mrf.mxu0  ;;  %v12373_v22 = vcombine.low %v3771_v49, %v3775_v16  ;;  %v12365_v16 = vcombine.low %v3763_v34, %v3767_v56 }
 0x4d7   : > { %20819 = vst [vmem:[#allocation140_spill] sm:$0xff] %v18711_v47  ;;  %20820 = vst [vmem:[#allocation38_spill] sm:$0xff] %v18713_v18  ;;  %9872 = vmatprep.subr.bf16.mxu0 %v12382_v63  ;;  %v20823_v47 = vld [vmem:[#allocation50_spill] sm:$0xff]  ;;  %v20825_v63 = vld [vmem:[#allocation53_spill] sm:$0xff] }
 0x4d8   : > { %v18715_v50 = vpop.f32.mrf.mxu1  ;;  %v18723_v24 = vpop.f32.mrf.mxu0 }
 0x4d9   : > { %20821 = vst [vmem:[#allocation139_spill] sm:$0xff] %v18715_v50  ;;  %20822 = vst [vmem:[#allocation109_spill] sm:$0xff] %v18723_v24  ;;  %9543 = vmatmul.mubr.bf16.gmra.mxu0 %v20823_v47  ;;  %v12366_v50 = vcombine.high %v3763_v34, %v3767_v56  ;;  %v3755_v47 = vld [vmem:[%s19967_s6 + $0xb18] sm:$0xff] }
 0x4da   : > { %v18726_v59 = vpop.f32.mrf.mxu1  ;;  %9552 = vmatprep.mubr.bf16.mxu0 %v20825_v63  ;;  %9873 = vmatpush2.bf16.msra.mxu0 %v12381_v42  ;;  %v18730_v18 = vpop.f32.mrf.mxu0  ;;  %v3751_v24 = vld [vmem:[%s19967_s6 + $0xaf8] sm:$0xff] }
 0x4db   : > { %20824 = vst [vmem:[#allocation82_spill] sm:$0xff] %v18726_v59  ;;  %20826 = vst [vmem:[#allocation142_spill] sm:$0xff] %v18730_v18  ;;  %9874 = vmatprep.subr.bf16.mxu0 %v12374_v9  ;;  %v3747_v18 = vld [vmem:[%s19967_s6 + $0xad8] sm:$0xff]  ;;  %v13459_v59 = vld [vmem:[%s14911_s19 + $0x4] ss:$8 sps:$4 sm:$0xff]  }
 0x4dc   : > { %9836 = vmatmul.mubr.bf16.gmra.mxu1 %v13456_v40  ;;  %v18732_v10 = vpop.f32.mrf.mxu1  ;;  %v3759_v40 = vld [vmem:[%s19967_s6 + $0xb38] sm:$0xff]  ;;  %v18741_v63 = vpop.f32.mrf.mxu0 }
 0x4dd   : > { %20827 = vst [vmem:[#allocation40_spill] sm:$0xff] %v18732_v10  ;;  %9845 = vmatprep.mubr.bf16.mxu1 %v13457_v26  ;;  %20828 = vst [vmem:[#allocation77_spill] sm:$0xff] %v18741_v63  ;;  %v12358_v9 = vcombine.high %v3755_v47, %v3759_v40  ;;  %v13458_v34 = vld [vmem:[%s14532_s25 + $0xf0] ss:$8 sps:$4 sm:$0xff]  }
 0x4de   : > { %v18743_v49 = vpop.f32.mrf.mxu1  ;;  %9875 = vmatpush2.bf16.msra.mxu0 %v12373_v22  ;;  %v18745_v42 = vpop.f32.mrf.mxu0  ;;  %v12357_v22 = vcombine.low %v3755_v47, %v3759_v40  ;;  %v12349_v40 = vcombine.low %v3747_v18, %v3751_v24 }
 0x4df   : > { %20829 = vst [vmem:[#allocation78_spill] sm:$0xff] %v18743_v49  ;;  %20830 = vst [vmem:[#allocation141_spill] sm:$0xff] %v18745_v42  ;;  %9876 = vmatprep.subr.bf16.mxu0 %v12366_v50  ;;  %v20833_v49 = vld [vmem:[#allocation52_spill] sm:$0xff]  ;;  %v20835_v50 = vld [vmem:[#allocation55_spill] sm:$0xff] }
 0x4e0   : > { %v18747_v26 = vpop.f32.mrf.mxu1  ;;  %v18755_v63 = vpop.f32.mrf.mxu0 }
 0x4e1   : > { %20831 = vst [vmem:[#allocation147_spill] sm:$0xff] %v18747_v26  ;;  %20832 = vst [vmem:[#allocation110_spill] sm:$0xff] %v18755_v63  ;;  %9553 = vmatmul.mubr.bf16.gmra.mxu0 %v20833_v49  ;;  %v12350_v26 = vcombine.high %v3747_v18, %v3751_v24  ;;  %v3739_v49 = vld [vmem:[%s19967_s6 + $0xa98] sm:$0xff]  ;;  %v13460_v18 = vld [vmem:[%s14911_s19] ss:$8 sps:$4 sm:$0xff]  }
 0x4e2   : > { %v18758_v56 = vpop.f32.mrf.mxu1  ;;  %9562 = vmatprep.mubr.bf16.mxu0 %v20835_v50  ;;  %9877 = vmatpush2.bf16.msra.mxu0 %v12365_v16  ;;  %v18762_v42 = vpop.f32.mrf.mxu0  ;;  %v3735_v63 = vld [vmem:[%s19967_s6 + $0xa78] sm:$0xff] }
 0x4e3   : > { %20834 = vst [vmem:[#allocation41_spill] sm:$0xff] %v18758_v56  ;;  %20836 = vst [vmem:[#allocation151_spill] sm:$0xff] %v18762_v42  ;;  %9878 = vmatprep.subr.bf16.mxu0 %v12358_v9  ;;  %v3731_v42 = vld [vmem:[%s19967_s6 + $0xa58] sm:$0xff] }
 0x4e4   : > { %9846 = vmatmul.mubr.bf16.gmra.mxu1 %v13458_v34  ;;  %v18764_v10 = vpop.f32.mrf.mxu1  ;;  %v3743_v34 = vld [vmem:[%s19967_s6 + $0xab8] sm:$0xff]  ;;  %v18773_v50 = vpop.f32.mrf.mxu0 }
 0x4e5   : > { %20837 = vst [vmem:[#allocation81_spill] sm:$0xff] %v18764_v10  ;;  %10081 = vmatprep.mubr.bf16.mxu1 %v13459_v59  ;;  %20838 = vst [vmem:[#allocation153_spill] sm:$0xff] %v18773_v50  ;;  %v12342_v9 = vcombine.high %v3739_v49, %v3743_v34  ;;  %v13461_v56 = vld [vmem:[%s14911_s19 + $0x14] ss:$8 sps:$4 sm:$0xff]  }
 0x4e6   : > { %v18775_v47 = vpop.f32.mrf.mxu1  ;;  %9879 = vmatpush2.bf16.msra.mxu0 %v12357_v22  ;;  %v18777_v16 = vpop.f32.mrf.mxu0  ;;  %v12341_v22 = vcombine.low %v3739_v49, %v3743_v34  ;;  %v3727_v49 = vld [vmem:[%s19967_s6 + $0xa38] sm:$0xff] }
 0x4e7   : > { %20839 = vst [vmem:[#allocation111_spill] sm:$0xff] %v18775_v47  ;;  %20840 = vst [vmem:[#allocation144_spill] sm:$0xff] %v18777_v16  ;;  %9880 = vmatprep.subr.bf16.mxu0 %v12350_v26  ;;  %v20843_v47 = vld [vmem:[#allocation54_spill] sm:$0xff]  ;;  %v20845_v26 = vld [vmem:[#allocation7_spill] sm:$0xff] }
 0x4e8   : > { %v18779_v59 = vpop.f32.mrf.mxu1  ;;  %v18787_v50 = vpop.f32.mrf.mxu0 }
 0x4e9   : > { %20841 = vst [vmem:[#allocation57_spill] sm:$0xff] %v18779_v59  ;;  %20842 = vst [vmem:[#allocation85_spill] sm:$0xff] %v18787_v50  ;;  %9563 = vmatmul.mubr.bf16.gmra.mxu0 %v20843_v47  ;;  %v12334_v59 = vcombine.high %v3731_v42, %v3735_v63  ;;  %v20848_v50 = vld [vmem:[#allocation6_spill] sm:$0xff]  ;;  %v3723_v47 = vld [vmem:[%s19967_s6 + $0xa18] sm:$0xff] }
 0x4ea   : > { %v18790_v24 = vpop.f32.mrf.mxu1  ;;  %9572 = vmatprep.mubr.bf16.mxu0 %v20845_v26  ;;  %9881 = vmatpush2.bf16.msra.mxu0 %v12349_v40  ;;  %v18794_v16 = vpop.f32.mrf.mxu0  ;;  %v3932_v61 = vsub.s32 4, %v20848_v50  ;;  %v12326_v26 = vcombine.high %v3723_v47, %v3727_v49 }
 0x4eb   : > { %20844 = vst [vmem:[#allocation159_spill] sm:$0xff] %v18790_v24  ;;  %20846 = vst [vmem:[#allocation112_spill] sm:$0xff] %v18794_v16  ;;  %9882 = vmatprep.subr.bf16.mxu0 %v12342_v9  ;;  %v3936_v9 = vsub.s32 5, %v20848_v50  ;;  %v13464_v50 = vld [vmem:[%s14911_s19 + $0x24] ss:$8 sps:$4 sm:$0xff]  }
 0x4ec   : > { %10082 = vmatmul.mubr.bf16.vlgmr.msra.gmra.mxu1 %v13460_v18  ;;  %v18796_v10 = vpop.f32.mrf.mxu1  ;;  %v18806_v34 = vpop.f32.mrf.mxu0  ;;  %v12333_v18 = vcombine.low %v3731_v42, %v3735_v63  ;;  %v20854_v63 = vld [vmem:[#allocation9_spill] sm:$0xff]  ;;  %v12325_v42 = vcombine.low %v3723_v47, %v3727_v49 }
 0x4ed   : > { %20847 = vst [vmem:[#allocation87_spill] sm:$0xff] %v18796_v10  ;;  %10091 = vmatprep.mubr.bf16.mxu1 %v13461_v56  ;;  %20849 = vst [vmem:[#allocation89_spill] sm:$0xff] %v18806_v34  ;;  %v13462_v10 = vld [vmem:[%s16117_s11] sm:$0xff] }
 0x4ee   : > { %v18808_v40 = vpop.f32.mrf.mxu1  ;;  %9883 = vmatpush2.bf16.msra.mxu0 %v12341_v22  ;;  %v18811_v56 = vpop.f32.mrf.mxu0  ;;  %v18816_v24 = vrot.slane %v13462_v10, %v3932_v61  ;;  %v18824_v22 = vrot.slane %v13462_v10, %v3936_v9 }
 0x4ef   : > { %20850 = vst [vmem:[#allocation93_spill] sm:$0xff] %v18808_v40  ;;  %20851 = vst [vmem:[#allocation58_spill] sm:$0xff] %v18811_v56  ;;  %9884 = vmatprep.subr.bf16.mxu0 %v12334_v59  ;;  %v13463_v40 = vld [vmem:[%s14911_s19 + $0x10] ss:$8 sps:$4 sm:$0xff]  }
 0x4f0   : > { %v18813_v16 = vpop.f32.mrf.mxu1  ;;  %v18818_v36 = vpop.f32.mrf.mxu0  ;;  %v8735_v10 = vadd.f32 %v18366_v46, %v18824_v22  ;;  %v8737_v9 = vadd.f32 %v18377_v13, %v18816_v24  ;;  %v8739_v46 = vadd.f32 %v18387_v5, %v18824_v22  ;;  %v8745_v5 = vadd.f32 %v18400_v60, %v18824_v22 }
 0x4f1   : > { %20852 = vst [vmem:[#allocation165_spill] sm:$0xff] %v18818_v36  ;;  %9573 = vmatmul.mubr.bf16.gmra.mxu0 %v20853_v41  ;;  %v8733_v41 = vadd.f32 %v18357_v54, %v18816_v24  ;;  %v20858_v54 = vld [vmem:[#allocation8_spill] sm:$0xff] }
 0x4f2   : > { %v18821_v34 = vpop.f32.mrf.mxu1  ;;  %9582 = vmatprep.mubr.bf16.mxu0 %v20854_v63  ;;  %9885 = vmatpush2.bf16.msra.mxu0 %v12333_v18  ;;  %v18827_v59 = vpop.f32.mrf.mxu0  ;;  %v13465_v63 = vld [vmem:[%s14911_s19 + $0x20] ss:$8 sps:$4 sm:$0xff]  }
 0x4f3   : > { %20855 = vst [vmem:[#allocation146_spill] sm:$0xff] %v18827_v59  ;;  %9886 = vmatprep.subr.bf16.mxu0 %v12326_v26  ;;  %v13466_v59 = vld [vmem:[%s14911_s19 + $0x34] ss:$8 sps:$4 sm:$0xff]  }
 0x4f4   : > { %10092 = vmatmul.mubr.bf16.gmra.mxu1 %v13463_v40  ;;  %v18829_v61 = vpop.f32.mrf.mxu1  ;;  %v18834_v36 = vpop.f32.mrf.mxu0 }
 0x4f5   : > { %10101 = vmatprep.mubr.bf16.mxu1 %v13464_v50  ;;  %20856 = vst [vmem:[#allocation113_spill] sm:$0xff] %v18834_v36  ;;  %v8926_v50 = vadd.f32 %v17785_v29, %v8733_v41  ;;  %v20859_v36 = vld [vmem:[#allocation10_spill] sm:$0xff]  ;;  %v8743_v29 = vadd.f32 %v18392_v11, %v18816_v24  ;;  %v8932_v11 = vadd.f32 %v17819_v35, %v8739_v46  ;;  %v20862_v35 = vld [vmem:[#allocation84_spill] sm:$0xff] }
 0x4f6   : > { %v18836_v40 = vpop.f32.mrf.mxu1  ;;  %9887 = vmatpush2.bf16.msra.mxu0 %v12325_v42  ;;  %v18840_v47 = vpop.f32.mrf.mxu0 }
 0x4f7   : > { %20857 = vst [vmem:[#allocation59_spill] sm:$0xff] %v18840_v47  ;;  %v8928_v47 = vadd.f32 %v17797_v20, %v8735_v10  ;;  %v8747_v10 = vadd.f32 %v18410_v0, %v18816_v24  ;;  %v8938_v0 = vadd.f32 %v20862_v35, %v8745_v5 }
 0x4f8   : > { %v18842_v49 = vpop.f32.mrf.mxu1  ;;  %v9118_v18 = vpop.f32.mrf.mxu0 }
 0x4f9   : > { %9583 = vmatmul.mubr.bf16.gmra.mxu0 %v20858_v54  ;;  %v9119_v42 = vadd.f32 %v9118_v18, %v8926_v50 }
 0x4fa   : > { %v18848_v26 = vpop.f32.mrf.mxu1  ;;  %9592 = vmatprep.mubr.bf16.mxu0 %v20859_v36  ;;  %v9120_v13 = vpop.f32.mrf.mxu0 }
 0x4fb   : > { %v9312_v54 = vadd.f32 %v18531_v55, %v9119_v42  ;;  %v9121_v56 = vadd.f32 %v9120_v13, %v8928_v47  ;;  %v20860_v55 = vld [vmem:[#allocation25_spill] sm:$0xff] }
 0x4fc   : > { %10102 = vmatmul.mubr.bf16.gmra.mxu1 %v13465_v63  ;;  %v18858_v41 = vpop.f32.mrf.mxu1  ;;  %v8930_v63 = vadd.f32 %v17806_v57, %v8737_v9  ;;  %v9122_v50 = vpop.f32.mrf.mxu0  ;;  %v8936_v47 = vadd.f32 %v20860_v55, %v8743_v29  ;;  %v13467_v29 = vld [vmem:[%s14911_s19 + $0x30] ss:$8 sps:$4 sm:$0xff]  }
 0x4fd   : > { %10111 = vmatprep.mubr.bf16.mxu1 %v13466_v59  ;;  %v9314_v20 = vadd.f32 %v18544_v30, %v9121_v56  ;;  %v10246_v57 = vmax.f32 %v9312_v54, 0.0  ;;  %v8749_v30 = vadd.f32 %v18414_v52, %v18824_v22  ;;  %v20863_v55 = vld [vmem:[#allocation13_spill] sm:$0xff]  ;;  %v8753_v52 = vadd.f32 %v18418_v4, %v18816_v24 }
 0x4fe   : > { %v18864_v36 = vpop.f32.mrf.mxu1  ;;  %v9123_v59 = vadd.f32 %v9122_v50, %v8930_v63  ;;  %v9124_v18 = vpop.f32.mrf.mxu0  ;;  %v20861_v63 = vld [vmem:[#allocation12_spill] sm:$0xff] }
 0x4ff   : > { %v10247_v60 = vmax.f32 %v9314_v20, 0.0  ;;  %v9125_v13 = vadd.f32 %v9124_v18, %v8932_v11  ;;  %v20864_v11 = vld [vmem:[#allocation117_spill] sm:$0xff] }
 0x500   : > { %v18871_v42 = vpop.f32.mrf.mxu1  ;;  %v9316_v9 = vadd.f32 %v18548_v8, %v9123_v59  ;;  %v9128_v56 = vpop.f32.mrf.mxu0  ;;  %v13468_v8 = vld [vmem:[%s14911_s19 + $0x44] ss:$8 sps:$4 sm:$0xff]   ;;  %v8940_v18 = vadd.f32 %v20864_v11, %v8747_v10 }
 0x501   : > { %9593 = vmatmul.mubr.bf16.gmra.mxu0 %v20861_v63  ;;  %v12682_v50 = vpack.c.bf16 %v10247_v60, %v10246_v57  ;;  %v9318_v54 = vadd.f32 %v18555_v21, %v9125_v13  ;;  %v9129_v20 = vadd.f32 %v9128_v56, %v8936_v47  ;;  %v8755_v47 = vadd.f32 %v18426_v53, %v18824_v22  ;;  %v20865_v10 = vld [vmem:[#allocation26_spill] sm:$0xff] }
 0x502   : > { %v18878_v46 = vpop.f32.mrf.mxu1  ;;  %9602 = vmatprep.mubr.bf16.mxu0 %v20863_v55  ;;  %v9130_v59 = vpop.f32.mrf.mxu0  ;;  %v10254_v5 = vmax.f32 %v9316_v9, 0.0  ;;  %v8942_v55 = vadd.f32 %v20865_v10, %v8749_v30  ;;  %v8757_v9 = vadd.f32 %v18436_v6, %v18816_v24  ;;  %v20867_v30 = vld [vmem:[#allocation11_spill] sm:$0xff]  ;;  %v20868_v6 = vld [vmem:[#allocation29_spill] sm:$0xff] }
 0x503   : > { %11268 = vst [vmem:[%s16259_s22 + $0x10] sm:$0xff] %v12682_v50  ;;  %v10255_v35 = vmax.f32 %v9318_v54, 0.0  ;;  %v9322_v57 = vadd.f32 %v18563_v38, %v9129_v20  ;;  %v9131_v21 = vadd.f32 %v9130_v59, %v8938_v0  ;;  %v20866_v54 = vld [vmem:[#allocation86_spill] sm:$0xff] }
 0x504   : > { %10112 = vmatmul.mubr.bf16.gmra.mxu1 %v13467_v29  ;;  %v18887_v63 = vpop.f32.mrf.mxu1  ;;  %v9132_v60 = vpop.f32.mrf.mxu0  ;;  %v8946_v38 = vadd.f32 %v20866_v54, %v8753_v52  ;;  %v13469_v52 = vld [vmem:[%s14911_s19 + $0x40] ss:$8 sps:$4 sm:$0xff]  }
 0x505   : > { %10121 = vmatprep.mubr.bf16.mxu1 %v13468_v8  ;;  %v12686_v56 = vpack.c.bf16 %v10255_v35, %v10254_v5  ;;  %v9324_v4 = vadd.f32 %v18570_v48, %v9131_v21  ;;  %v9133_v29 = vadd.f32 %v9132_v60, %v8940_v18  ;;  %v10262_v53 = vmax.f32 %v9322_v57, 0.0  ;;  %v20869_v60 = vld [vmem:[#allocation17_spill] sm:$0xff] }
 0x506   : > { %v18893_v13 = vpop.f32.mrf.mxu1  ;;  %v9134_v50 = vpop.f32.mrf.mxu0  ;;  %v8759_v48 = vadd.f32 %v18440_v44, %v18824_v22  ;;  %v8948_v18 = vadd.f32 %v20868_v6, %v8755_v47  ;;  %v8763_v44 = vadd.f32 %v18444_v28, %v18816_v24 }
 0x507   : > { %11272 = vst [vmem:[%s16259_s22 + $0x30] sm:$0xff] %v12686_v56  ;;  %v10263_v20 = vmax.f32 %v9324_v4, 0.0  ;;  %v9326_v8 = vadd.f32 %v18580_v2, %v9133_v29  ;;  %v9135_v59 = vadd.f32 %v9134_v50, %v8942_v55  ;;  %v13470_v2 = vld [vmem:[%s14911_s19 + $0x54] ss:$8 sps:$4 sm:$0xff]   ;;  %v8950_v4 = vadd.f32 %v17936_v3, %v8757_v9  ;;  %v20870_v3 = vld [vmem:[#allocation119_spill] sm:$0xff] }
 0x508   : > { %v18900_v0 = vpop.f32.mrf.mxu1  ;;  %v9138_v11 = vpop.f32.mrf.mxu0  ;;  %v8765_v50 = vadd.f32 %v18452_v25, %v18824_v22  ;;  %v8952_v9 = vadd.f32 %v20870_v3, %v8759_v48  ;;  %v20872_v48 = vld [vmem:[#allocation14_spill] sm:$0xff] }
 0x509   : > { %9603 = vmatmul.mubr.bf16.gmra.mxu0 %v20867_v30  ;;  %v12690_v35 = vpack.c.bf16 %v10263_v20, %v10262_v53  ;;  %v9328_v57 = vadd.f32 %v18584_v43, %v9135_v59  ;;  %v9139_v21 = vadd.f32 %v9138_v11, %v8946_v38  ;;  %v10270_v47 = vmax.f32 %v9326_v8, 0.0  ;;  %v20871_v11 = vld [vmem:[#allocation88_spill] sm:$0xff] }
 0x50a   : > { %v18908_v5 = vpop.f32.mrf.mxu1  ;;  %9612 = vmatprep.mubr.bf16.mxu0 %v20869_v60  ;;  %v9140_v56 = vpop.f32.mrf.mxu0  ;;  %v8767_v8 = vadd.f32 %v18462_v17, %v18816_v24  ;;  %v20873_v17 = vld [vmem:[#allocation27_spill] sm:$0xff]  ;;  %v13471_v60 = vld [vmem:[%s14911_s19 + $0x50] ss:$8 sps:$4 sm:$0xff]  }
 0x50b   : > { %11276 = vst [vmem:[%s16259_s22 + $0x50] sm:$0xff] %v12690_v35  ;;  %v10271_v10 = vmax.f32 %v9328_v57, 0.0  ;;  %v9332_v55 = vadd.f32 %v18595_v37, %v9139_v21  ;;  %v9141_v43 = vadd.f32 %v9140_v56, %v8948_v18  ;;  %v8956_v37 = vadd.f32 %v20871_v11, %v8763_v44  ;;  %v20875_v11 = vld [vmem:[#allocation121_spill] sm:$0xff] }
 0x50c   : > { %10122 = vmatmul.mubr.bf16.gmra.mxu1 %v13469_v52  ;;  %v18917_v29 = vpop.f32.mrf.mxu1  ;;  %v9142_v54 = vpop.f32.mrf.mxu0  ;;  %v8958_v57 = vadd.f32 %v20873_v17, %v8765_v50 }
 0x50d   : > { %10131 = vmatprep.mubr.bf16.mxu1 %v13470_v2  ;;  %v12694_v53 = vpack.c.bf16 %v10271_v10, %v10270_v47  ;;  %v9334_v28 = vadd.f32 %v18604_v23, %v9141_v43  ;;  %v9143_v20 = vadd.f32 %v9142_v54, %v8950_v4  ;;  %v10278_v25 = vmax.f32 %v9332_v55, 0.0  ;;  %v20874_v4 = vld [vmem:[#allocation16_spill] sm:$0xff] }
 0x50e   : > { %v18923_v38 = vpop.f32.mrf.mxu1  ;;  %v9144_v59 = vpop.f32.mrf.mxu0  ;;  %v8769_v23 = vadd.f32 %v18466_v1, %v18824_v22  ;;  %v8773_v1 = vadd.f32 %v18470_v14, %v18816_v24  ;;  %v8960_v10 = vadd.f32 %v17992_v58, %v8767_v8  ;;  %v8777_v8 = vadd.f32 %v18488_v27, %v18816_v24  ;;  %v20877_v27 = vld [vmem:[#allocation90_spill] sm:$0xff] }
 0x50f   : > { %11280 = vst [vmem:[%s16259_s22 + $0x70] sm:$0xff] %v12694_v53  ;;  %v10279_v6 = vmax.f32 %v9334_v28, 0.0  ;;  %v9336_v18 = vadd.f32 %v18615_v51, %v9143_v20  ;;  %v9145_v52 = vadd.f32 %v9144_v59, %v8952_v9  ;;  %v13472_v51 = vld [vmem:[%s14911_s19 + $0x64] ss:$8 sps:$4 sm:$0xff]   ;;  %v8775_v53 = vadd.f32 %v18478_v33, %v18824_v22 }
 0x510   : > { %v18930_v30 = vpop.f32.mrf.mxu1  ;;  %v9148_v35 = vpop.f32.mrf.mxu0  ;;  %v8962_v58 = vadd.f32 %v17999_v7, %v8769_v23  ;;  %v20876_v7 = vld [vmem:[#allocation15_spill] sm:$0xff] }
 0x511   : > { %9613 = vmatmul.mubr.bf16.gmra.mxu0 %v20872_v48  ;;  %v12698_v2 = vpack.c.bf16 %v10279_v6, %v10278_v25  ;;  %v9338_v44 = vadd.f32 %v18619_v45, %v9145_v52  ;;  %v9149_v56 = vadd.f32 %v9148_v35, %v8956_v37  ;;  %v10286_v43 = vmax.f32 %v9336_v18, 0.0  ;;  %v13473_v48 = vld [vmem:[%s14911_s19 + $0x60] ss:$8 sps:$4 sm:$0xff]  }
 0x512   : > { %v18938_v21 = vpop.f32.mrf.mxu1  ;;  %9622 = vmatprep.mubr.bf16.mxu0 %v20874_v4  ;;  %v9150_v47 = vpop.f32.mrf.mxu0  ;;  %v8968_v23 = vadd.f32 %v20877_v27, %v8775_v53 }
 0x513   : > { %11284 = vst [vmem:[%s16259_s22 + $0x90] sm:$0xff] %v12698_v2  ;;  %v10287_v50 = vmax.f32 %v9338_v44, 0.0  ;;  %v9342_v54 = vadd.f32 %v18630_v62, %v9149_v56  ;;  %v9151_v45 = vadd.f32 %v9150_v47, %v8958_v57  ;;  %v8966_v62 = vadd.f32 %v20875_v11, %v8773_v1  ;;  %v20878_v2 = vld [vmem:[#allocation19_spill] sm:$0xff] }
 0x514   : > { %10132 = vmatmul.mubr.bf16.gmra.mxu1 %v13471_v60  ;;  %v18947_v55 = vpop.f32.mrf.mxu1  ;;  %v9152_v28 = vpop.f32.mrf.mxu0  ;;  %v8970_v56 = vadd.f32 %v18042_v31, %v8777_v8  ;;  %v20879_v47 = vld [vmem:[#allocation99_spill] sm:$0xff] }
 0x515   : > { %10141 = vmatprep.mubr.bf16.mxu1 %v13472_v51  ;;  %v12702_v3 = vpack.c.bf16 %v10287_v50, %v10286_v43  ;;  %v9344_v14 = vadd.f32 %v18636_v39, %v9151_v45  ;;  %v9153_v9 = vadd.f32 %v9152_v28, %v8960_v10  ;;  %v10294_v33 = vmax.f32 %v9342_v54, 0.0  ;;  %v20880_v43 = vld [vmem:[#allocation83_spill] sm:$0xff] }
 0x516   : > { %v18953_v20 = vpop.f32.mrf.mxu1  ;;  %v9154_v59 = vpop.f32.mrf.mxu0  ;;  %v8779_v39 = vadd.f32 %v18492_v12, %v18824_v22  ;;  %v8783_v12 = vadd.f32 %v18496_v19, %v18816_v24  ;;  %v8785_v50 = vadd.f32 %v20880_v43, %v18824_v22  ;;  %v20881_v19 = vld [vmem:[#allocation39_spill] sm:$0xff] }
 0x517   : > { %11288 = vst [vmem:[%s16259_s22 + $0xb0] sm:$0xff] %v12702_v3  ;;  %v10295_v25 = vmax.f32 %v9344_v14, 0.0  ;;  %v9346_v6 = vadd.f32 %v18647_v15, %v9153_v9  ;;  %v9155_v18 = vadd.f32 %v9154_v59, %v8962_v58  ;;  %v13474_v15 = vld [vmem:[%s14911_s19 + $0x74] ss:$8 sps:$4 sm:$0xff]   ;;  %v20882_v31 = vld [vmem:[#allocation115_spill] sm:$0xff] }
 0x518   : > { %v18960_v37 = vpop.f32.mrf.mxu1  ;;  %v9158_v52 = vpop.f32.mrf.mxu0  ;;  %v8972_v14 = vadd.f32 %v20882_v31, %v8779_v39  ;;  %v20883_v9 = vld [vmem:[#allocation155_spill] sm:$0xff]  ;;  %v20884_v59 = vld [vmem:[#allocation28_spill] sm:$0xff]  ;;  %v20887_v39 = vld [vmem:[#allocation18_spill] sm:$0xff] }
 0x519   : > { %9623 = vmatmul.mubr.bf16.gmra.mxu0 %v20876_v7  ;;  %v12706_v17 = vpack.c.bf16 %v10295_v25, %v10294_v33  ;;  %v9348_v57 = vadd.f32 %v18651_v32, %v9155_v18  ;;  %v9159_v60 = vadd.f32 %v9158_v52, %v8966_v62  ;;  %v10302_v51 = vmax.f32 %v9346_v6, 0.0  ;;  %v20885_v6 = vld [vmem:[#allocation107_spill] sm:$0xff]  ;;  %v20886_v7 = vld [vmem:[#allocation162_spill] sm:$0xff]  ;;  %v20894_v31 = vld [vmem:[#allocation157_spill] sm:$0xff] }
 0x51a   : > { %v18968_v35 = vpop.f32.mrf.mxu1  ;;  %9632 = vmatprep.mubr.bf16.mxu0 %v20878_v2  ;;  %v9160_v44 = vpop.f32.mrf.mxu0  ;;  %v8787_v58 = vadd.f32 %v20883_v9, %v18816_v24  ;;  %v8976_v11 = vadd.f32 %v20884_v59, %v8783_v12  ;;  %v8789_v27 = vadd.f32 %v20886_v7, %v18824_v22 }
 0x51b   : > { %11292 = vst [vmem:[%s16259_s22 + $0xd0] sm:$0xff] %v12706_v17  ;;  %v10303_v1 = vmax.f32 %v9348_v57, 0.0  ;;  %v9352_v10 = vadd.f32 %v20879_v47, %v9159_v60  ;;  %v9161_v32 = vadd.f32 %v9160_v44, %v8968_v23  ;;  %v13475_v60 = vld [vmem:[%s14911_s19 + $0x70] ss:$8 sps:$4 sm:$0xff]  }
 0x51c   : > { %10142 = vmatmul.mubr.bf16.gmra.mxu1 %v13473_v48  ;;  %v18977_v4 = vpop.f32.mrf.mxu1  ;;  %v9162_v54 = vpop.f32.mrf.mxu0  ;;  %v20888_v48 = vld [vmem:[#allocation131_spill] sm:$0xff] }
 0x51d   : > { %10151 = vmatprep.mubr.bf16.mxu1 %v13474_v15  ;;  %v12710_v53 = vpack.c.bf16 %v10303_v1, %v10302_v51  ;;  %v9354_v28 = vadd.f32 %v20881_v19, %v9161_v32  ;;  %v9163_v3 = vadd.f32 %v9162_v54, %v8970_v56  ;;  %v10310_v33 = vmax.f32 %v9352_v10, 0.0  ;;  %v20889_v15 = vld [vmem:[#allocation105_spill] sm:$0xff]  ;;  %v13476_v51 = vld [vmem:[%s14911_s19 + $0x84] ss:$8 sps:$4 sm:$0xff]   ;;  %v20892_v32 = vld [vmem:[#allocation60_spill] sm:$0xff] }
 0x51e   : > { %v18983_v45 = vpop.f32.mrf.mxu1  ;;  %v9164_v8 = vpop.f32.mrf.mxu0  ;;  %v8978_v17 = vadd.f32 %v20888_v48, %v8785_v50  ;;  %v20890_v56 = vld [vmem:[#allocation21_spill] sm:$0xff]  ;;  %v20891_v1 = vld [vmem:[#allocation35_spill] sm:$0xff]  ;;  %v8980_v43 = vadd.f32 %v20892_v32, %v8787_v58  ;;  %v20893_v19 = vld [vmem:[#allocation108_spill] sm:$0xff] }
 0x51f   : > { %11296 = vst [vmem:[%s16259_s22 + $0xf0] sm:$0xff] %v12710_v53  ;;  %v10311_v25 = vmax.f32 %v9354_v28, 0.0  ;;  %v9356_v18 = vadd.f32 %v20885_v6, %v9163_v3  ;;  %v9165_v52 = vadd.f32 %v9164_v8, %v8972_v14  ;;  %v8793_v47 = vadd.f32 %v20891_v1, %v18816_v24  ;;  %v20896_v58 = vld [vmem:[#allocation123_spill] sm:$0xff]  ;;  %v20902_v1 = vld [vmem:[#allocation118_spill] sm:$0xff] }
 0x520   : > { %v18990_v62 = vpop.f32.mrf.mxu1  ;;  %v9168_v23 = vpop.f32.mrf.mxu0  ;;  %v8795_v14 = vadd.f32 %v20894_v31, %v18824_v22  ;;  %v8982_v6 = vadd.f32 %v20896_v58, %v8789_v27  ;;  %v20901_v27 = vld [vmem:[#allocation20_spill] sm:$0xff]  ;;  %v20905_v31 = vld [vmem:[#allocation161_spill] sm:$0xff] }
 0x521   : > { %9633 = vmatmul.mubr.bf16.gmra.mxu0 %v20887_v39  ;;  %v12714_v2 = vpack.c.bf16 %v10311_v25, %v10310_v33  ;;  %v9358_v12 = vadd.f32 %v20889_v15, %v9165_v52  ;;  %v9169_v44 = vadd.f32 %v9168_v23, %v8976_v11  ;;  %v10318_v50 = vmax.f32 %v9356_v18, 0.0  ;;  %v20895_v11 = vld [vmem:[#allocation138_spill] sm:$0xff]  ;;  %v20897_v52 = vld [vmem:[#allocation128_spill] sm:$0xff]  ;;  %v20898_v23 = vld [vmem:[#allocation69_spill] sm:$0xff] }
 0x522   : > { %v18998_v57 = vpop.f32.mrf.mxu1  ;;  %9642 = vmatprep.mubr.bf16.mxu0 %v20890_v56  ;;  %v9170_v10 = vpop.f32.mrf.mxu0  ;;  %v8797_v18 = vadd.f32 %v20897_v52, %v18816_v24  ;;  %v8986_v39 = vadd.f32 %v20898_v23, %v8793_v47  ;;  %v13477_v47 = vld [vmem:[%s14911_s19 + $0x80] ss:$8 sps:$4 sm:$0xff]   ;;  %v20908_v23 = vld [vmem:[#allocation68_spill] sm:$0xff] }
 0x523   : > { %11300 = vst [vmem:[%s16259_s22 + $0x110] sm:$0xff] %v12714_v2  ;;  %v10319_v53 = vmax.f32 %v9358_v12, 0.0  ;;  %v9362_v28 = vadd.f32 %v20893_v19, %v9169_v44  ;;  %v9171_v3 = vadd.f32 %v9170_v10, %v8978_v17  ;;  %v20899_v2 = vld [vmem:[#allocation140_spill] sm:$0xff]  ;;  %v20900_v44 = vld [vmem:[#allocation133_spill] sm:$0xff]  ;;  %v8988_v10 = vadd.f32 %v20902_v1, %v8795_v14  ;;  %v20911_v1 = vld [vmem:[#allocation163_spill] sm:$0xff] }
 0x524   : > { %10152 = vmatmul.mubr.bf16.gmra.mxu1 %v13475_v60  ;;  %v19007_v54 = vpop.f32.mrf.mxu1  ;;  %v9172_v9 = vpop.f32.mrf.mxu0  ;;  %v8799_v56 = vadd.f32 %v20900_v44, %v18824_v22 }
 0x525   : > { %10161 = vmatprep.mubr.bf16.mxu1 %v13476_v51  ;;  %v12718_v59 = vpack.c.bf16 %v10319_v53, %v10318_v50  ;;  %v9364_v33 = vadd.f32 %v20895_v11, %v9171_v3  ;;  %v9173_v25 = vadd.f32 %v9172_v9, %v8980_v43  ;;  %v10326_v17 = vmax.f32 %v9362_v28, 0.0  ;;  %v20903_v50 = vld [vmem:[#allocation139_spill] sm:$0xff]  ;;  %v20904_v28 = vld [vmem:[#allocation22_spill] sm:$0xff]  ;;  %v13478_v3 = vld [vmem:[%s14911_s19 + $0x94] ss:$8 sps:$4 sm:$0xff]  }
 0x526   : > { %v19013_v8 = vpop.f32.mrf.mxu1  ;;  %v9174_v7 = vpop.f32.mrf.mxu0  ;;  %v8803_v9 = vadd.f32 %v20905_v31, %v18816_v24  ;;  %v20906_v11 = vld [vmem:[#allocation71_spill] sm:$0xff] }
 0x527   : > { %11304 = vst [vmem:[%s16259_s22 + $0x130] sm:$0xff] %v12718_v59  ;;  %v10327_v60 = vmax.f32 %v9364_v33, 0.0  ;;  %v9366_v15 = vadd.f32 %v20899_v2, %v9173_v25  ;;  %v9175_v12 = vadd.f32 %v9174_v7, %v8982_v6  ;;  %v8990_v33 = vadd.f32 %v20906_v11, %v8797_v18  ;;  %v20907_v6 = vld [vmem:[#allocation82_spill] sm:$0xff]  ;;  %v20910_v18 = vld [vmem:[#allocation92_spill] sm:$0xff] }
 0x528   : > { %v19020_v48 = vpop.f32.mrf.mxu1  ;;  %v9178_v51 = vpop.f32.mrf.mxu0 }
 0x529   : > { %9643 = vmatmul.mubr.bf16.gmra.mxu0 %v20901_v27  ;;  %v12722_v43 = vpack.c.bf16 %v10327_v60, %v10326_v17  ;;  %v9368_v53 = vadd.f32 %v20903_v50, %v9175_v12  ;;  %v9179_v19 = vadd.f32 %v9178_v51, %v8986_v39  ;;  %v10334_v14 = vmax.f32 %v9366_v15, 0.0  ;;  %v20909_v12 = vld [vmem:[#allocation40_spill] sm:$0xff] }
 0x52a   : > { %v19028_v32 = vpop.f32.mrf.mxu1  ;;  %9652 = vmatprep.mubr.bf16.mxu0 %v20904_v28  ;;  %v9180_v59 = vpop.f32.mrf.mxu0  ;;  %v8805_v39 = vadd.f32 %v20908_v23, %v18824_v22  ;;  %v8992_v27 = vadd.f32 %v20910_v18, %v8799_v56  ;;  %v8807_v15 = vadd.f32 %v20911_v1, %v18816_v24  ;;  %v20913_v28 = vld [vmem:[#allocation78_spill] sm:$0xff] }
 0x52b   : > { %11308 = vst [vmem:[%s16259_s22 + $0x150] sm:$0xff] %v12722_v43  ;;  %v10335_v58 = vmax.f32 %v9368_v53, 0.0  ;;  %v9372_v52 = vadd.f32 %v20907_v6, %v9179_v19  ;;  %v9181_v7 = vadd.f32 %v9180_v59, %v8988_v10  ;;  %v20912_v43 = vld [vmem:[#allocation61_spill] sm:$0xff]  ;;  %v20914_v59 = vld [vmem:[#allocation164_spill] sm:$0xff] }
 0x52c   : > { %10162 = vmatmul.mubr.bf16.gmra.mxu1 %v13477_v47  ;;  %v19037_v25 = vpop.f32.mrf.mxu1  ;;  %v9182_v17 = vpop.f32.mrf.mxu0  ;;  %v8996_v50 = vadd.f32 %v20912_v43, %v8803_v9  ;;  %v8809_v11 = vadd.f32 %v20914_v59, %v18824_v22  ;;  %v13479_v6 = vld [vmem:[%s14911_s19 + $0x90] ss:$8 sps:$4 sm:$0xff]  }
 0x52d   : > { %10171 = vmatprep.mubr.bf16.mxu1 %v13478_v3  ;;  %v12726_v2 = vpack.c.bf16 %v10335_v58, %v10334_v14  ;;  %v9374_v44 = vadd.f32 %v20909_v12, %v9181_v7  ;;  %v9183_v51 = vadd.f32 %v9182_v17, %v8990_v33  ;;  %v10342_v53 = vmax.f32 %v9372_v52, 0.0  ;;  %v20915_v33 = vld [vmem:[#allocation24_spill] sm:$0xff]  ;;  %v20916_v14 = vld [vmem:[#allocation125_spill] sm:$0xff]  ;;  %v20917_v52 = vld [vmem:[#allocation147_spill] sm:$0xff] }
 0x52e   : > { %v19043_v60 = vpop.f32.mrf.mxu1  ;;  %v9184_v47 = vpop.f32.mrf.mxu0  ;;  %v8998_v58 = vadd.f32 %v20916_v14, %v8805_v39  ;;  %v13481_v12 = vld [vmem:[%s14911_s19 + $0xa4] ss:$8 sps:$4 sm:$0xff]   ;;  %v20922_v14 = vld [vmem:[#allocation81_spill] sm:$0xff] }
 0x52f   : > { %11312 = vst [vmem:[%s16259_s22 + $0x170] sm:$0xff] %v12726_v2  ;;  %v10343_v19 = vmax.f32 %v9374_v44, 0.0  ;;  %v9376_v3 = vadd.f32 %v20913_v28, %v9183_v51  ;;  %v9185_v31 = vadd.f32 %v9184_v47, %v8992_v27  ;;  %v13480_v2 = vld [vmem:[%s14923_s16 + $0x4] ss:$8 sps:$4 sm:$0xff]   ;;  %v20918_v44 = vld [vmem:[#allocation104_spill] sm:$0xff] }
 0x530   : > { %v19050_v10 = vpop.f32.mrf.mxu1  ;;  %v8813_v51 = vadd.f32 %v20918_v44, %v18816_v24  ;;  %v20919_v27 = vld [vmem:[#allocation72_spill] sm:$0xff] }
 0x531   : > { %v9188_v56 = vpop.f32.mrf.mxu0  ;;  %9653 = vmatmul.mubr.bf16.gmra.mxu0 %v20915_v33  ;;  %v12730_v7 = vpack.c.bf16 %v10343_v19, %v10342_v53  ;;  %v9378_v23 = vadd.f32 %v20917_v52, %v9185_v31  ;;  %v9000_v1 = vadd.f32 %v20919_v27, %v8807_v15  ;;  %v10350_v39 = vmax.f32 %v9376_v3, 0.0  ;;  %v20920_v53 = vld [vmem:[#allocation41_spill] sm:$0xff]  ;;  %v20923_v52 = vld [vmem:[#allocation62_spill] sm:$0xff]  ;;  %v20926_v27 = vld [vmem:[#allocation111_spill] sm:$0xff] }
 0x532   : > { %v9189_v17 = vadd.f32 %v9188_v56, %v8996_v50  ;;  %9888 = vmatprep.mubr.bf16.mxu0 %v13480_v2  ;;  %v20921_v50 = vld [vmem:[#allocation91_spill] sm:$0xff]  ;;  %v9002_v2 = vadd.f32 %v20923_v52, %v8809_v11 }
 0x533   : > { %v9190_v18 = vpop.f32.mrf.mxu0  ;;  %11316 = vst [vmem:[%s16259_s22 + $0x190] sm:$0xff] %v12730_v7  ;;  %v10351_v43 = vmax.f32 %v9378_v23, 0.0  ;;  %v8815_v31 = vadd.f32 %v20921_v50, %v18824_v22  ;;  %v20924_v7 = vld [vmem:[#allocation36_spill] sm:$0xff]  ;;  %v20928_v50 = vld [vmem:[#allocation137_spill] sm:$0xff] }
 0x534   : > { %v19058_v9 = vpop.f32.mrf.mxu1  ;;  %10172 = vmatmul.mubr.bf16.gmra.mxu1 %v13479_v6  ;;  %v9382_v19 = vadd.f32 %v20920_v53, %v9189_v17  ;;  %v9191_v28 = vadd.f32 %v9190_v18, %v8998_v58  ;;  %v8817_v3 = vadd.f32 %v20924_v7, %v18816_v24  ;;  %v20925_v17 = vld [vmem:[#allocation30_spill] sm:$0xff]  ;;  %v13484_v7 = vld [vmem:[%s14923_s16 + $0x14] ss:$8 sps:$4 sm:$0xff]  }
 0x535   : > { %10181 = vmatprep.mubr.bf16.mxu1 %v13481_v12  ;;  %v9192_v59 = vpop.f32.mrf.mxu0  ;;  %v12734_v33 = vpack.c.bf16 %v10351_v43, %v10350_v39  ;;  %v9006_v58 = vadd.f32 %v20925_v17, %v8813_v51 }
 0x536   : > { %v19067_v47 = vpop.f32.mrf.mxu1  ;;  %v9384_v6 = vadd.f32 %v20922_v14, %v9191_v28  ;;  %v9193_v15 = vadd.f32 %v9192_v59, %v9000_v1  ;;  %v10358_v44 = vmax.f32 %v9382_v19, 0.0  ;;  %v20927_v1 = vld [vmem:[#allocation135_spill] sm:$0xff]  ;;  %v9008_v59 = vadd.f32 %v20928_v50, %v8815_v31  ;;  %v20929_v19 = vld [vmem:[#allocation57_spill] sm:$0xff] }
 0x537   : > { %v9194_v23 = vpop.f32.mrf.mxu0  ;;  %11320 = vst [vmem:[%s16259_s22 + $0x1b0] sm:$0xff] %v12734_v33  ;;  %v8819_v11 = vadd.f32 %v20927_v1, %v18824_v22  ;;  %v13482_v28 = vld [vmem:[%s14923_s16] ss:$8 sps:$4 sm:$0xff]  }
 0x538   : > { %v19073_v56 = vpop.f32.mrf.mxu1  ;;  %v10359_v18 = vmax.f32 %v9384_v6, 0.0  ;;  %v9386_v39 = vadd.f32 %v20926_v27, %v9193_v15  ;;  %v9195_v43 = vadd.f32 %v9194_v23, %v9002_v2  ;;  %v13483_v14 = vld [vmem:[%s14911_s19 + $0xa0] ss:$8 sps:$4 sm:$0xff]   ;;  %v13485_v15 = vld [vmem:[%s14911_s19 + $0xb4] ss:$8 sps:$4 sm:$0xff]  }
 0x539   : > { %v9198_v53 = vpop.f32.mrf.mxu0  ;;  %9889 = vmatmul.mubr.bf16.vlgmr.msra.gmra.mxu0 %v13482_v28  ;;  %v20930_v2 = vld [vmem:[#allocation95_spill] sm:$0xff]  ;;  %v20931_v27 = vld [vmem:[#allocation154_spill] sm:$0xff] }
 0x53a   : > { %v19080_v12 = vpop.f32.mrf.mxu1  ;;  %v12738_v33 = vpack.c.bf16 %v10359_v18, %v10358_v44  ;;  %v9388_v6 = vadd.f32 %v20929_v19, %v9195_v43  ;;  %v9199_v52 = vadd.f32 %v9198_v53, %v9006_v58  ;;  %9898 = vmatprep.mubr.bf16.mxu0 %v13484_v7  ;;  %v8823_v23 = vadd.f32 %v20930_v2, %v18816_v24  ;;  %v20933_v44 = vld [vmem:[#allocation159_spill] sm:$0xff]  ;;  %v20934_v58 = vld [vmem:[#allocation130_spill] sm:$0xff] }
 0x53b   : > { %v9200_v17 = vpop.f32.mrf.mxu0  ;;  %v9010_v1 = vadd.f32 %v20931_v27, %v8817_v3  ;;  %v10366_v31 = vmax.f32 %v9386_v39, 0.0  ;;  %v8825_v53 = vadd.f32 %v20934_v58, %v18824_v22  ;;  %v20937_v27 = vld [vmem:[#allocation94_spill] sm:$0xff] }
 0x53c   : > { %v19088_v51 = vpop.f32.mrf.mxu1  ;;  %10182 = vmatmul.mubr.bf16.gmra.mxu1 %v13483_v14  ;;  %11324 = vst [vmem:[%s16259_s22 + $0x1d0] sm:$0xff] %v12738_v33  ;;  %v10367_v50 = vmax.f32 %v9388_v6, 0.0  ;;  %v9392_v18 = vadd.f32 %v20933_v44, %v9199_v52  ;;  %v9201_v43 = vadd.f32 %v9200_v17, %v9008_v59  ;;  %v20938_v33 = vld [vmem:[#allocation106_spill] sm:$0xff]  ;;  %v20939_v52 = vld [vmem:[#allocation73_spill] sm:$0xff] }
 0x53d   : > { %10191 = vmatprep.mubr.bf16.mxu1 %v13485_v15  ;;  %v9202_v14 = vpop.f32.mrf.mxu0  ;;  %v20936_v15 = vld [vmem:[#allocation87_spill] sm:$0xff]  ;;  %v8827_v39 = vadd.f32 %v20938_v33, %v18816_v24  ;;  %v9016_v59 = vadd.f32 %v20939_v52, %v8823_v23  ;;  %v13487_v33 = vld [vmem:[%s14911_s19 + $0xb0] ss:$8 sps:$4 sm:$0xff]  }
 0x53e   : > { %v19097_v28 = vpop.f32.mrf.mxu1  ;;  %v12742_v7 = vpack.c.bf16 %v10367_v50, %v10366_v31  ;;  %v9394_v2 = vadd.f32 %v20936_v15, %v9201_v43  ;;  %v9203_v3 = vadd.f32 %v9202_v14, %v9010_v1  ;;  %v10374_v44 = vmax.f32 %v9392_v18, 0.0  ;;  %v20942_v1 = vld [vmem:[#allocation132_spill] sm:$0xff]  ;;  %v20943_v15 = vld [vmem:[#allocation122_spill] sm:$0xff] }
 0x53f   : > { %20932 = vst [vmem:[#allocation148_spill] sm:$0xff] %v19097_v28  ;;  %v9012_v28 = vadd.f32 %v20937_v27, %v8819_v11  ;;  %v9204_v6 = vpop.f32.mrf.mxu0  ;;  %v8829_v11 = vadd.f32 %v20942_v1, %v18824_v22  ;;  %v13486_v14 = vld [vmem:[%s14923_s16 + $0x10] ss:$8 sps:$4 sm:$0xff]   ;;  %v9018_v27 = vadd.f32 %v20943_v15, %v8825_v53  ;;  %v13488_v52 = vld [vmem:[%s14923_s16 + $0x24] ss:$8 sps:$4 sm:$0xff]  }
 0x540   : > { %v19103_v19 = vpop.f32.mrf.mxu1  ;;  %11328 = vst [vmem:[%s16259_s22 + $0x1f0] sm:$0xff] %v12742_v7  ;;  %v10375_v58 = vmax.f32 %v9394_v2, 0.0  ;;  %v20945_v1 = vld [vmem:[#allocation75_spill] sm:$0xff] }
 0x541   : > { %20935 = vst [vmem:[#allocation97_spill] sm:$0xff] %v19103_v19  ;;  %v20941_v19 = vld [vmem:[#allocation93_spill] sm:$0xff]  ;;  %v9205_v50 = vadd.f32 %v9204_v6, %v9012_v28  ;;  %v9208_v43 = vpop.f32.mrf.mxu0  ;;  %9899 = vmatmul.mubr.bf16.gmra.mxu0 %v13486_v14  ;;  %v13489_v28 = vld [vmem:[%s14911_s19 + $0xc4] ss:$8 sps:$4 sm:$0xff]   ;;  %v9020_v14 = vadd.f32 %v20945_v1, %v8827_v39 }
 0x542   : > { %v19110_v17 = vpop.f32.mrf.mxu1  ;;  %v9396_v31 = vadd.f32 %v20941_v19, %v9203_v3  ;;  %v12746_v7 = vpack.c.bf16 %v10375_v58, %v10374_v44  ;;  %v9209_v2 = vadd.f32 %v9208_v43, %v9016_v59  ;;  %9908 = vmatprep.mubr.bf16.mxu0 %v13488_v52  ;;  %v20944_v19 = vld [vmem:[#allocation70_spill] sm:$0xff] }
 0x543   : > { %20940 = vst [vmem:[#allocation101_spill] sm:$0xff] %v19110_v17  ;;  %v9398_v18 = vadd.f32 %v18813_v16, %v9205_v50  ;;  %v8833_v3 = vadd.f32 %v20944_v19, %v18816_v24  ;;  %v9210_v6 = vpop.f32.mrf.mxu0  ;;  %v20946_v59 = vld [vmem:[#allocation134_spill] sm:$0xff] }
 0x544   : > { %v19118_v23 = vpop.f32.mrf.mxu1  ;;  %10192 = vmatmul.mubr.bf16.gmra.mxu1 %v13487_v33  ;;  %11332 = vst [vmem:[%s16259_s22 + $0x210] sm:$0xff] %v12746_v7  ;;  %v10382_v53 = vmax.f32 %v9396_v31, 0.0  ;;  %v9402_v44 = vadd.f32 %v18821_v34, %v9209_v2  ;;  %v9211_v16 = vadd.f32 %v9210_v6, %v9018_v27  ;;  %v8835_v58 = vadd.f32 %v20946_v59, %v18824_v22  ;;  %v20948_v7 = vld [vmem:[#allocation166_spill] sm:$0xff]  ;;  %v20949_v34 = vld [vmem:[#allocation64_spill] sm:$0xff]  ;;  %v20951_v59 = vld [vmem:[#allocation127_spill] sm:$0xff] }
 0x545   : > { %10201 = vmatprep.mubr.bf16.mxu1 %v13489_v28  ;;  %v10383_v15 = vmax.f32 %v9398_v18, 0.0  ;;  %v9212_v50 = vpop.f32.mrf.mxu0  ;;  %v20947_v28 = vld [vmem:[#allocation31_spill] sm:$0xff]  ;;  %v8837_v31 = vadd.f32 %v20948_v7, %v18816_v24  ;;  %v9026_v27 = vadd.f32 %v20949_v34, %v8833_v3  ;;  %v13492_v7 = vld [vmem:[%s14923_s16 + $0x34] ss:$8 sps:$4 sm:$0xff]  }
 0x546   : > { %v19127_v17 = vpop.f32.mrf.mxu1  ;;  %v9404_v52 = vadd.f32 %v18829_v61, %v9211_v16  ;;  %v9213_v39 = vadd.f32 %v9212_v50, %v9020_v14  ;;  %v9022_v19 = vadd.f32 %v20947_v28, %v8829_v11  ;;  %v10390_v6 = vmax.f32 %v9402_v44, 0.0  ;;  %v20950_v14 = vld [vmem:[#allocation37_spill] sm:$0xff]  ;;  %v13490_v16 = vld [vmem:[%s14923_s16 + $0x20] ss:$8 sps:$4 sm:$0xff]   ;;  %v20953_v34 = vld [vmem:[#allocation76_spill] sm:$0xff] }
 0x547   : > { %v12750_v33 = vpack.c.bf16 %v10383_v15, %v10382_v53  ;;  %v9214_v18 = vpop.f32.mrf.mxu0  ;;  %v8839_v11 = vadd.f32 %v20950_v14, %v18824_v22  ;;  %v9028_v50 = vadd.f32 %v20951_v59, %v8835_v58  ;;  %v13491_v28 = vld [vmem:[%s14911_s19 + $0xc0] ss:$8 sps:$4 sm:$0xff]   ;;  %v9030_v14 = vadd.f32 %v20953_v34, %v8837_v31 }
 0x548   : > { %v19133_v43 = vpop.f32.mrf.mxu1  ;;  %v10391_v1 = vmax.f32 %v9404_v52, 0.0  ;;  %v9406_v53 = vadd.f32 %v18836_v40, %v9213_v39  ;;  %v9215_v61 = vadd.f32 %v9214_v18, %v9022_v19  ;;  %v13493_v40 = vld [vmem:[%s14911_s19 + $0xd4] ss:$8 sps:$4 sm:$0xff]  }
 0x549   : > { %11336 = vst [vmem:[%s16259_s22 + $0x230] sm:$0xff] %v12750_v33  ;;  %v9218_v15 = vpop.f32.mrf.mxu0  ;;  %9909 = vmatmul.mubr.bf16.gmra.mxu0 %v13490_v16  ;;  %v20952_v39 = vld [vmem:[#allocation136_spill] sm:$0xff] }
 0x54a   : > { %v19140_v2 = vpop.f32.mrf.mxu1  ;;  %v12754_v33 = vpack.c.bf16 %v10391_v1, %v10390_v6  ;;  %v9408_v44 = vadd.f32 %v18842_v49, %v9215_v61  ;;  %v9219_v52 = vadd.f32 %v9218_v15, %v9026_v27  ;;  %9918 = vmatprep.mubr.bf16.mxu0 %v13492_v7  ;;  %v8843_v19 = vadd.f32 %v20952_v39, %v18816_v24  ;;  %v20954_v27 = vld [vmem:[#allocation114_spill] sm:$0xff] }
 0x54b   : > { %v9220_v18 = vpop.f32.mrf.mxu0  ;;  %v10398_v58 = vmax.f32 %v9406_v53, 0.0  ;;  %v8845_v1 = vadd.f32 %v20954_v27, %v18824_v22  ;;  %v20961_v27 = vld [vmem:[#allocation143_spill] sm:$0xff] }
 0x54c   : > { %v19148_v3 = vpop.f32.mrf.mxu1  ;;  %10202 = vmatmul.mubr.bf16.gmra.mxu1 %v13491_v28  ;;  %11340 = vst [vmem:[%s16259_s22 + $0x250] sm:$0xff] %v12754_v33  ;;  %v10399_v59 = vmax.f32 %v9408_v44, 0.0  ;;  %v9412_v6 = vadd.f32 %v18848_v26, %v9219_v52  ;;  %v9221_v49 = vadd.f32 %v9220_v18, %v9028_v50  ;;  %v20957_v33 = vld [vmem:[#allocation74_spill] sm:$0xff]  ;;  %v20958_v26 = vld [vmem:[#allocation96_spill] sm:$0xff] }
 0x54d   : > { %10211 = vmatprep.mubr.bf16.mxu1 %v13493_v40  ;;  %v9222_v61 = vpop.f32.mrf.mxu0  ;;  %v20956_v40 = vld [vmem:[#allocation156_spill] sm:$0xff]  ;;  %v8847_v53 = vadd.f32 %v20957_v33, %v18816_v24  ;;  %v9036_v50 = vadd.f32 %v20958_v26, %v8843_v19  ;;  %v13496_v33 = vld [vmem:[%s14923_s16 + $0x44] ss:$8 sps:$4 sm:$0xff]  }
 0x54e   : > { %v19157_v16 = vpop.f32.mrf.mxu1  ;;  %v12758_v28 = vpack.c.bf16 %v10399_v59, %v10398_v58  ;;  %v9414_v7 = vadd.f32 %v18858_v41, %v9221_v49  ;;  %v9223_v31 = vadd.f32 %v9222_v61, %v9030_v14  ;;  %v9032_v39 = vadd.f32 %v20956_v40, %v8839_v11  ;;  %v20960_v14 = vld [vmem:[#allocation38_spill] sm:$0xff]  ;;  %v13494_v49 = vld [vmem:[%s14923_s16 + $0x30] ss:$8 sps:$4 sm:$0xff]  }
 0x54f   : > { %v9224_v44 = vpop.f32.mrf.mxu0  ;;  %v10406_v18 = vmax.f32 %v9412_v6, 0.0  ;;  %v8849_v11 = vadd.f32 %v20960_v14, %v18824_v22  ;;  %v9038_v61 = vadd.f32 %v20961_v27, %v8845_v1  ;;  %v13495_v40 = vld [vmem:[%s14911_s19 + $0xd0] ss:$8 sps:$4 sm:$0xff]  }
 0x550   : > { %v19163_v15 = vpop.f32.mrf.mxu1  ;;  %11344 = vst [vmem:[%s16259_s22 + $0x270] sm:$0xff] %v12758_v28  ;;  %v10407_v34 = vmax.f32 %v9414_v7, 0.0  ;;  %v9416_v58 = vadd.f32 %v18864_v36, %v9223_v31  ;;  %v9225_v41 = vadd.f32 %v9224_v44, %v9032_v39  ;;  %v13497_v36 = vld [vmem:[%s14911_s19 + $0xe4] ss:$8 sps:$4 sm:$0xff]   ;;  %v20963_v31 = vld [vmem:[#allocation109_spill] sm:$0xff]  ;;  %v20964_v26 = vld [vmem:[#allocation124_spill] sm:$0xff] }
 0x551   : > { %20955 = vst [vmem:[#allocation103_spill] sm:$0xff] %v19163_v15  ;;  %v9228_v59 = vpop.f32.mrf.mxu0  ;;  %9919 = vmatmul.mubr.bf16.gmra.mxu0 %v13494_v49  ;;  %v8853_v39 = vadd.f32 %v20963_v31, %v18816_v24  ;;  %v9040_v14 = vadd.f32 %v20964_v26, %v8847_v53 }
 0x552   : > { %v19170_v52 = vpop.f32.mrf.mxu1  ;;  %v12762_v28 = vpack.c.bf16 %v10407_v34, %v10406_v18  ;;  %v9418_v6 = vadd.f32 %v18871_v42, %v9225_v41  ;;  %v9229_v7 = vadd.f32 %v9228_v59, %v9036_v50  ;;  %9928 = vmatprep.mubr.bf16.mxu0 %v13496_v33  ;;  %v10414_v1 = vmax.f32 %v9416_v58, 0.0  ;;  %v20966_v50 = vld [vmem:[#allocation142_spill] sm:$0xff] }
 0x553   : > { %20959 = vst [vmem:[#allocation116_spill] sm:$0xff] %v19170_v52  ;;  %v9230_v44 = vpop.f32.mrf.mxu0  ;;  %v8855_v34 = vadd.f32 %v20966_v50, %v18824_v22  ;;  %v20973_v50 = vld [vmem:[#allocation158_spill] sm:$0xff] }
 0x554   : > { %v19178_v19 = vpop.f32.mrf.mxu1  ;;  %10212 = vmatmul.mubr.bf16.gmra.mxu1 %v13495_v40  ;;  %11348 = vst [vmem:[%s16259_s22 + $0x290] sm:$0xff] %v12762_v28  ;;  %v10415_v27 = vmax.f32 %v9418_v6, 0.0  ;;  %v9422_v18 = vadd.f32 %v18878_v46, %v9229_v7  ;;  %v9231_v42 = vadd.f32 %v9230_v44, %v9038_v61  ;;  %v20969_v28 = vld [vmem:[#allocation77_spill] sm:$0xff] }
 0x555   : > { %20962 = vst [vmem:[#allocation150_spill] sm:$0xff] %v19178_v19  ;;  %10221 = vmatprep.mubr.bf16.mxu1 %v13497_v36  ;;  %v9232_v41 = vpop.f32.mrf.mxu0  ;;  %v20968_v36 = vld [vmem:[#allocation34_spill] sm:$0xff]  ;;  %v8857_v58 = vadd.f32 %v20969_v28, %v18816_v24  ;;  %v20970_v46 = vld [vmem:[#allocation145_spill] sm:$0xff] }
 0x556   : > { %v19187_v49 = vpop.f32.mrf.mxu1  ;;  %v12766_v40 = vpack.c.bf16 %v10415_v27, %v10414_v1  ;;  %v9424_v33 = vadd.f32 %v18887_v63, %v9231_v42  ;;  %v9233_v53 = vadd.f32 %v9232_v41, %v9040_v14  ;;  %v9042_v31 = vadd.f32 %v20968_v36, %v8849_v11  ;;  %v20972_v14 = vld [vmem:[#allocation141_spill] sm:$0xff]  ;;  %v13498_v42 = vld [vmem:[%s14923_s16 + $0x40] ss:$8 sps:$4 sm:$0xff]  }
 0x557   : > { %20965 = vst [vmem:[#allocation152_spill] sm:$0xff] %v19187_v49  ;;  %v9234_v6 = vpop.f32.mrf.mxu0  ;;  %v9046_v61 = vadd.f32 %v20970_v46, %v8853_v39  ;;  %v10422_v44 = vmax.f32 %v9422_v18, 0.0  ;;  %v8859_v11 = vadd.f32 %v20972_v14, %v18824_v22  ;;  %v9048_v41 = vadd.f32 %v20973_v50, %v8855_v34  ;;  %v13499_v36 = vld [vmem:[%s14911_s19 + $0xe0] ss:$8 sps:$4 sm:$0xff]   ;;  %v13500_v28 = vld [vmem:[%s14923_s16 + $0x54] ss:$8 sps:$4 sm:$0xff]  }
 0x558   : > { %v19193_v59 = vpop.f32.mrf.mxu1  ;;  %11352 = vst [vmem:[%s16259_s22 + $0x2b0] sm:$0xff] %v12766_v40  ;;  %v10423_v26 = vmax.f32 %v9424_v33, 0.0  ;;  %v9426_v1 = vadd.f32 %v18893_v13, %v9233_v53  ;;  %v9235_v63 = vadd.f32 %v9234_v6, %v9042_v31  ;;  %v13501_v13 = vld [vmem:[%s14911_s19 + $0xf4] ss:$8 sps:$4 sm:$0xff]   ;;  %v20975_v53 = vld [vmem:[#allocation110_spill] sm:$0xff]  ;;  %v20976_v46 = vld [vmem:[#allocation79_spill] sm:$0xff] }
 0x559   : > { %20967 = vst [vmem:[#allocation23_spill] sm:$0xff] %v19193_v59  ;;  %v9238_v27 = vpop.f32.mrf.mxu0  ;;  %9929 = vmatmul.mubr.bf16.gmra.mxu0 %v13498_v42  ;;  %v8863_v31 = vadd.f32 %v20975_v53, %v18816_v24  ;;  %v9050_v14 = vadd.f32 %v20976_v46, %v8857_v58 }
 0x55a   : > { %v19200_v7 = vpop.f32.mrf.mxu1  ;;  %v12770_v40 = vpack.c.bf16 %v10423_v26, %v10422_v44  ;;  %v9428_v18 = vadd.f32 %v18900_v0, %v9235_v63  ;;  %v9239_v33 = vadd.f32 %v9238_v27, %v9046_v61  ;;  %9938 = vmatprep.mubr.bf16.mxu0 %v13500_v28  ;;  %v10430_v34 = vmax.f32 %v9426_v1, 0.0  ;;  %v20978_v61 = vld [vmem:[#allocation151_spill] sm:$0xff]  ;;  %v20981_v1 = vld [vmem:[#allocation153_spill] sm:$0xff] }
 0x55b   : > { %20971 = vst [vmem:[#allocation120_spill] sm:$0xff] %v19200_v7  ;;  %v9240_v6 = vpop.f32.mrf.mxu0  ;;  %v8865_v26 = vadd.f32 %v20978_v61, %v18824_v22 }
 0x55c   : > { %v19208_v39 = vpop.f32.mrf.mxu1  ;;  %10222 = vmatmul.mubr.bf16.gmra.mxu1 %v13499_v36  ;;  %11356 = vst [vmem:[%s16259_s22 + $0x2d0] sm:$0xff] %v12770_v40  ;;  %v10431_v50 = vmax.f32 %v9428_v18, 0.0  ;;  %v9432_v44 = vadd.f32 %v18908_v5, %v9239_v33  ;;  %v9241_v0 = vadd.f32 %v9240_v6, %v9048_v41  ;;  %v8867_v18 = vadd.f32 %v20981_v1, %v18816_v24  ;;  %v20982_v5 = vld [vmem:[#allocation126_spill] sm:$0xff] }
 0x55d   : > { %20974 = vst [vmem:[#allocation63_spill] sm:$0xff] %v19208_v39  ;;  %10231 = vmatprep.mubr.bf16.mxu1 %v13501_v13  ;;  %v9242_v63 = vpop.f32.mrf.mxu0  ;;  %v20980_v13 = vld [vmem:[#allocation129_spill] sm:$0xff]  ;;  %v9056_v41 = vadd.f32 %v20982_v5, %v8863_v31  ;;  %v20986_v31 = vld [vmem:[#allocation144_spill] sm:$0xff]  ;;  %v13504_v1 = vld [vmem:[%s14923_s16 + $0x64] ss:$8 sps:$4 sm:$0xff]  }
 0x55e   : > { %v19217_v42 = vpop.f32.mrf.mxu1  ;;  %v12774_v36 = vpack.c.bf16 %v10431_v50, %v10430_v34  ;;  %v9434_v28 = vadd.f32 %v18917_v29, %v9241_v0  ;;  %v9243_v58 = vadd.f32 %v9242_v63, %v9050_v14  ;;  %v9052_v40 = vadd.f32 %v20980_v13, %v8859_v11  ;;  %v13502_v14 = vld [vmem:[%s14923_s16 + $0x50] ss:$8 sps:$4 sm:$0xff]   ;;  %v20984_v11 = vld [vmem:[#allocation98_spill] sm:$0xff] }
 0x55f   : > { %20977 = vst [vmem:[#allocation43_spill] sm:$0xff] %v19217_v42  ;;  %v9244_v53 = vpop.f32.mrf.mxu0  ;;  %v10438_v6 = vmax.f32 %v9432_v44, 0.0  ;;  %v9058_v0 = vadd.f32 %v20984_v11, %v8865_v26  ;;  %v13503_v63 = vld [vmem:[%s14911_s19 + $0xf0] ss:$8 sps:$4 sm:$0xff]   ;;  %v8869_v13 = vadd.f32 %v20986_v31, %v18824_v22  ;;  %s12808_s19 = sshll.u32 %s13593_s30, 14 }
 0x560   : > { %v19223_v27 = vpop.f32.mrf.mxu1  ;;  %11360 = vst [vmem:[%s16259_s22 + $0x2f0] sm:$0xff] %v12774_v36  ;;  %v10439_v46 = vmax.f32 %v9434_v28, 0.0  ;;  %v9436_v34 = vadd.f32 %v18923_v38, %v9243_v58  ;;  %v9245_v50 = vadd.f32 %v9244_v53, %v9052_v40  ;;  %v20987_v38 = vld [vmem:[#allocation85_spill] sm:$0xff]  ;;  %s19909_s24 = scalar_lea.hbm %s19969_s8, %s12808_s19 }
 0x561   : > { %20979 = vst [vmem:[#allocation42_spill] sm:$0xff] %v19223_v27  ;;  %v9248_v29 = vpop.f32.mrf.mxu0  ;;  %9939 = vmatmul.mubr.bf16.gmra.mxu0 %v13502_v14  ;;  %v8873_v58 = vadd.f32 %v20987_v38, %v18816_v24  ;;  %v20988_v53 = vld [vmem:[#allocation149_spill] sm:$0xff] }
 0x562   : > { %v19230_v33 = vpop.f32.mrf.mxu1  ;;  %v12778_v36 = vpack.c.bf16 %v10439_v46, %v10438_v6  ;;  %v9438_v44 = vadd.f32 %v18930_v30, %v9245_v50  ;;  %v9249_v28 = vadd.f32 %v9248_v29, %v9056_v41  ;;  %9948 = vmatprep.mubr.bf16.mxu0 %v13504_v1  ;;  %v9060_v5 = vadd.f32 %v20988_v53, %v8867_v18  ;;  %v20990_v30 = vld [vmem:[#allocation112_spill] sm:$0xff]  ;;  %v20992_v1 = vld [vmem:[#allocation65_spill] sm:$0xff] }
 0x563   : > { %20983 = vst [vmem:[#allocation45_spill] sm:$0xff] %v19230_v33  ;;  %v9250_v40 = vpop.f32.mrf.mxu0  ;;  %v10446_v14 = vmax.f32 %v9436_v34, 0.0  ;;  %v8875_v41 = vadd.f32 %v20990_v30, %v18824_v22  ;;  %v9062_v38 = vadd.f32 %v20992_v1, %v8869_v13  ;;  %v20994_v53 = vld [vmem:[#allocation32_spill] sm:$0xff] }
 0x564   : > { %v19236_v61 = vpop.f32.mrf.mxu1  ;;  %10232 = vmatmul.mubr.bf16.gmra.mxu1 %v13503_v63  ;;  %11364 = vst [vmem:[%s16259_s22 + $0x310] sm:$0xff] %v12778_v36  ;;  %v10447_v11 = vmax.f32 %v9438_v44, 0.0  ;;  %v9442_v63 = vadd.f32 %v18938_v21, %v9249_v28  ;;  %v9251_v6 = vadd.f32 %v9250_v40, %v9058_v0  ;;  %v20993_v36 = vld [vmem:[#allocation89_spill] sm:$0xff]  ;;  %v9066_v21 = vadd.f32 %v20994_v53, %v8873_v58  ;;  %v20996_v13 = vld [vmem:[#allocation80_spill] sm:$0xff] }
 0x565   : > { %20985 = vst [vmem:[#allocation44_spill] sm:$0xff] %v19236_v61  ;;  %v9252_v46 = vpop.f32.mrf.mxu0  ;;  %v8877_v34 = vadd.f32 %v20993_v36, %v18816_v24 }
 0x566   : > { %v19246_v26 = vpop.f32.mrf.mxu1  ;;  %v12782_v29 = vpack.c.bf16 %v10447_v11, %v10446_v14  ;;  %v9444_v31 = vadd.f32 %v18947_v55, %v9251_v6  ;;  %v9253_v18 = vadd.f32 %v9252_v46, %v9060_v5  ;;  %v10454_v28 = vmax.f32 %v9442_v63, 0.0  ;;  %v13505_v5 = vld [vmem:[%s14923_s16 + $0x60] ss:$8 sps:$4 sm:$0xff]   ;;  %v13506_v63 = vld [vmem:[%s14923_s16 + $0x74] ss:$8 sps:$4 sm:$0xff]  }
 0x567   : > { %20989 = vst [vmem:[#allocation47_spill] sm:$0xff] %v19246_v26  ;;  %v9254_v44 = vpop.f32.mrf.mxu0  ;;  %v9068_v11 = vadd.f32 %v20996_v13, %v8875_v41  ;;  %v20998_v46 = vld [vmem:[#allocation58_spill] sm:$0xff] }
 0x568   : > { %v19252_v50 = vpop.f32.mrf.mxu1  ;;  %11368 = vst [vmem:[%s16259_s22 + $0x330] sm:$0xff] %v12782_v29  ;;  %v10455_v40 = vmax.f32 %v9444_v31, 0.0  ;;  %v9446_v30 = vadd.f32 %v18953_v20, %v9253_v18  ;;  %v9255_v14 = vadd.f32 %v9254_v44, %v9062_v38  ;;  %v8879_v58 = vadd.f32 %v20998_v46, %v18824_v22  ;;  %v20999_v20 = vld [vmem:[#allocation165_spill] sm:$0xff]  ;;  %v21000_v38 = vld [vmem:[#allocation160_spill] sm:$0xff] }
 0x569   : > { %20991 = vst [vmem:[#allocation46_spill] sm:$0xff] %v19252_v50  ;;  %v9258_v55 = vpop.f32.mrf.mxu0  ;;  %9949 = vmatmul.mubr.bf16.gmra.mxu0 %v13505_v5  ;;  %v8883_v31 = vadd.f32 %v20999_v20, %v18816_v24  ;;  %v9070_v44 = vadd.f32 %v21000_v38, %v8877_v34  ;;  %v21006_v38 = vld [vmem:[#allocation100_spill] sm:$0xff] }
 0x56a   : > { %v19259_v0 = vpop.f32.mrf.mxu1  ;;  %v12786_v1 = vpack.c.bf16 %v10455_v40, %v10454_v28  ;;  %v9448_v36 = vadd.f32 %v18960_v37, %v9255_v14  ;;  %v9259_v29 = vadd.f32 %v9258_v55, %v9066_v21  ;;  %9958 = vmatprep.mubr.bf16.mxu0 %v13506_v63  ;;  %v10462_v41 = vmax.f32 %v9446_v30, 0.0  ;;  %v21002_v37 = vld [vmem:[#allocation146_spill] sm:$0xff] }
 0x56b   : > { %20995 = vst [vmem:[#allocation49_spill] sm:$0xff] %v19259_v0  ;;  %v9260_v18 = vpop.f32.mrf.mxu0  ;;  %v8885_v21 = vadd.f32 %v21002_v37, %v18824_v22  ;;  %v21004_v63 = vld [vmem:[#allocation66_spill] sm:$0xff]  ;;  %v13523_v0 = vld [vmem:[%s14923_s16 + $0xf0] ss:$8 sps:$4 sm:$0xff]  }
 0x56c   : > { %v19265_v6 = vpop.f32.mrf.mxu1  ;;  %11372 = vst [vmem:[%s16259_s22 + $0x350] sm:$0xff] %v12786_v1  ;;  %v10463_v5 = vmax.f32 %v9448_v36, 0.0  ;;  %v9452_v13 = vadd.f32 %v18968_v35, %v9259_v29  ;;  %v9261_v28 = vadd.f32 %v9260_v18, %v9068_v11  ;;  %v9072_v20 = vadd.f32 %v21004_v63, %v8879_v58  ;;  %v21005_v1 = vld [vmem:[#allocation113_spill] sm:$0xff]  ;;  %v21008_v58 = vld [vmem:[#allocation67_spill] sm:$0xff] }
 0x56d   : > { %20997 = vst [vmem:[#allocation48_spill] sm:$0xff] %v19265_v6  ;;  %v9262_v40 = vpop.f32.mrf.mxu0  ;;  %v8887_v30 = vadd.f32 %v21005_v1, %v18816_v24  ;;  %v9076_v35 = vadd.f32 %v21006_v38, %v8883_v31  ;;  %v21010_v24 = vld [vmem:[#allocation59_spill] sm:$0xff] }
 0x56e   : > { %v19274_v53 = vpop.f32.mrf.mxu1  ;;  %v12790_v55 = vpack.c.bf16 %v10463_v5, %v10462_v41  ;;  %v9454_v46 = vadd.f32 %v18977_v4, %v9261_v28  ;;  %v9263_v34 = vadd.f32 %v9262_v40, %v9070_v44  ;;  %v10470_v29 = vmax.f32 %v9452_v13, 0.0  ;;  %v13507_v44 = vld [vmem:[%s14923_s16 + $0x70] ss:$8 sps:$4 sm:$0xff]   ;;  %v13508_v13 = vld [vmem:[%s14923_s16 + $0x84] ss:$8 sps:$4 sm:$0xff]  }
 0x56f   : > { %21001 = vst [vmem:[#allocation51_spill] sm:$0xff] %v19274_v53  ;;  %v9264_v36 = vpop.f32.mrf.mxu0  ;;  %v9078_v5 = vadd.f32 %v21008_v58, %v8885_v21  ;;  %v8889_v31 = vadd.f32 %v21010_v24, %v18824_v22 }
 0x570   : > { %v19280_v14 = vpop.f32.mrf.mxu1  ;;  %11376 = vst [vmem:[%s16259_s22 + $0x370] sm:$0xff] %v12790_v55  ;;  %v10471_v18 = vmax.f32 %v9454_v46, 0.0  ;;  %v9456_v37 = vadd.f32 %v18983_v45, %v9263_v34  ;;  %v9265_v41 = vadd.f32 %v9264_v36, %v9072_v20  ;;  %v21011_v45 = vld [vmem:[#allocation33_spill] sm:$0xff] }
 0x571   : > { %21003 = vst [vmem:[#allocation50_spill] sm:$0xff] %v19280_v14  ;;  %v9268_v4 = vpop.f32.mrf.mxu0  ;;  %9959 = vmatmul.mubr.bf16.gmra.mxu0 %v13507_v44  ;;  %v9080_v34 = vadd.f32 %v21011_v45, %v8887_v30 }
 0x572   : > { %v19287_v11 = vpop.f32.mrf.mxu1  ;;  %v12794_v40 = vpack.c.bf16 %v10471_v18, %v10470_v29  ;;  %v9458_v63 = vadd.f32 %v18990_v62, %v9265_v41  ;;  %v9269_v55 = vadd.f32 %v9268_v4, %v9076_v35  ;;  %9968 = vmatprep.mubr.bf16.mxu0 %v13508_v13  ;;  %v10478_v1 = vmax.f32 %v9456_v37, 0.0  ;;  %v21014_v41 = vld [vmem:[#allocation102_spill] sm:$0xff] }
 0x573   : > { %21007 = vst [vmem:[#allocation53_spill] sm:$0xff] %v19287_v11  ;;  %v9270_v46 = vpop.f32.mrf.mxu0  ;;  %v9082_v4 = vadd.f32 %v21014_v41, %v8889_v31 }
 0x574   : > { %v19293_v28 = vpop.f32.mrf.mxu1  ;;  %11380 = vst [vmem:[%s16259_s22 + $0x390] sm:$0xff] %v12794_v40  ;;  %v10479_v21 = vmax.f32 %v9458_v63, 0.0  ;;  %v9462_v36 = vadd.f32 %v18998_v57, %v9269_v55  ;;  %v9271_v38 = vadd.f32 %v9270_v46, %v9078_v5  ;;  %v13509_v40 = vld [vmem:[%s14923_s16 + $0x80] ss:$8 sps:$4 sm:$0xff]   ;;  %v13510_v55 = vld [vmem:[%s14923_s16 + $0x94] ss:$8 sps:$4 sm:$0xff]  }
 0x575   : > { %21009 = vst [vmem:[#allocation52_spill] sm:$0xff] %v19293_v28  ;;  %v9272_v22 = vpop.f32.mrf.mxu0 }
 0x576   : > { %v19300_v20 = vpop.f32.mrf.mxu1  ;;  %v12798_v62 = vpack.c.bf16 %v10479_v21, %v10478_v1  ;;  %v9464_v35 = vadd.f32 %v19007_v54, %v9271_v38  ;;  %v9273_v18 = vadd.f32 %v9272_v22, %v9080_v34  ;;  %v10486_v37 = vmax.f32 %v9462_v36, 0.0  ;;  %v13511_v22 = vld [vmem:[%s14923_s16 + $0x90] ss:$8 sps:$4 sm:$0xff]  }
 0x577   : > { %21012 = vst [vmem:[#allocation55_spill] sm:$0xff] %v19300_v20  ;;  %v9274_v30 = vpop.f32.mrf.mxu0 }
 0x578   : > { %v19304_v29 = vpop.f32.mrf.mxu1  ;;  %11384 = vst [vmem:[%s16259_s22 + $0x3b0] sm:$0xff] %v12798_v62  ;;  %v10487_v58 = vmax.f32 %v9464_v35, 0.0  ;;  %v9466_v57 = vadd.f32 %v19013_v8, %v9273_v18  ;;  %v9275_v5 = vadd.f32 %v9274_v30, %v9082_v4  ;;  %v13512_v35 = vld [vmem:[%s14923_s16 + $0xa4] ss:$8 sps:$4 sm:$0xff]  }
 0x579   : > { %21013 = vst [vmem:[#allocation54_spill] sm:$0xff] %v19304_v29  ;;  %v19312_v24 = vpop.f32.mrf.mxu0  ;;  %9969 = vmatmul.mubr.bf16.gmra.mxu0 %v13509_v40 }
 0x57a   : > { %v19308_v44 = vpop.f32.mrf.mxu1  ;;  %v12802_v63 = vpack.c.bf16 %v10487_v58, %v10486_v37  ;;  %v9468_v31 = vadd.f32 %v19020_v48, %v9275_v5  ;;  %9978 = vmatprep.mubr.bf16.mxu0 %v13510_v55  ;;  %v10494_v8 = vmax.f32 %v9466_v57, 0.0  ;;  %v13513_v5 = vld [vmem:[%s14923_s16 + $0xa0] ss:$8 sps:$4 sm:$0xff]  }
 0x57b   : > { %21015 = vst [vmem:[#allocation7_spill] sm:$0xff] %v19308_v44  ;;  %v19319_v13 = vpop.f32.mrf.mxu0 }
 0x57c   : > { %v19315_v54 = vpop.f32.mrf.mxu1  ;;  %11388 = vst [vmem:[%s16259_s22 + $0x3d0] sm:$0xff] %v12802_v63  ;;  %v10495_v45 = vmax.f32 %v9468_v31, 0.0  ;;  %v13514_v63 = vld [vmem:[%s14923_s16 + $0xb4] ss:$8 sps:$4 sm:$0xff]  }
 0x57d   : > { %21016 = vst [vmem:[#allocation56_spill] sm:$0xff] %v19315_v54  ;;  %v19324_v34 = vpop.f32.mrf.mxu0 }
 0x57e   : > { %v19321_v46 = vpop.f32.mrf.mxu1  ;;  %v12806_v21 = vpack.c.bf16 %v10495_v45, %v10494_v8 }
 0x57f   : > { %21017 = vst [vmem:[#allocation9_spill] sm:$0xff] %v19321_v46  ;;  %v19328_v36 = vpop.f32.mrf.mxu0 }
 0x580   : > { %v19326_v1 = vpop.f32.mrf.mxu1  ;;  %11392 = vst [vmem:[%s16259_s22 + $0x3f0] sm:$0xff] %v12806_v21 }
 0x581   : > { %21018 = vst [vmem:[#allocation8_spill] sm:$0xff] %v19326_v1  ;;  %v19333_v48 = vpop.f32.mrf.mxu0  ;;  %9979 = vmatmul.mubr.bf16.gmra.mxu0 %v13511_v22 }
 0x582   : > { %v19330_v38 = vpop.f32.mrf.mxu1  ;;  %9988 = vmatprep.mubr.bf16.mxu0 %v13512_v35 }
 0x583   : > { %21019 = vst [vmem:[#allocation10_spill] sm:$0xff] %v19330_v38  ;;  %v19339_v18 = vpop.f32.mrf.mxu0 }
 0x584   : > { %v19336_v62 = vpop.f32.mrf.mxu1 }
 0x585   : > { %21020 = vst [vmem:[#allocation25_spill] sm:$0xff] %v19336_v62  ;;  %v19343_v4 = vpop.f32.mrf.mxu0 }
 0x586   : > { %v19341_v41 = vpop.f32.mrf.mxu1 }
 0x587   : > { %21021 = vst [vmem:[#allocation12_spill] sm:$0xff] %v19341_v41  ;;  %v19347_v37 = vpop.f32.mrf.mxu0 }
 0x588   : > { %v19345_v30 = vpop.f32.mrf.mxu1 }
 0x589   : > { %21022 = vst [vmem:[#allocation84_spill] sm:$0xff] %v19345_v30  ;;  %v19351_v57 = vpop.f32.mrf.mxu0  ;;  %9989 = vmatmul.mubr.bf16.gmra.mxu0 %v13513_v5  ;;  %v13515_v5 = vld [vmem:[%s14923_s16 + $0xb0] ss:$8 sps:$4 sm:$0xff]  }
 0x58a   : > { %v19349_v58 = vpop.f32.mrf.mxu1  ;;  %9998 = vmatprep.mubr.bf16.mxu0 %v13514_v63  ;;  %v13516_v63 = vld [vmem:[%s14923_s16 + $0xc4] ss:$8 sps:$4 sm:$0xff]  }
 0x58b   : > { %21023 = vst [vmem:[#allocation13_spill] sm:$0xff] %v19349_v58  ;;  %v19357_v31 = vpop.f32.mrf.mxu0 }
 0x58c   : > { %v19354_v40 = vpop.f32.mrf.mxu1 }
 0x58d   : > { %21024 = vst [vmem:[#allocation117_spill] sm:$0xff] %v19354_v40  ;;  %v19361_v8 = vpop.f32.mrf.mxu0 }
 0x58e   : > { %v19359_v55 = vpop.f32.mrf.mxu1 }
 0x58f   : > { %21025 = vst [vmem:[#allocation26_spill] sm:$0xff] %v19359_v55  ;;  %v19365_v21 = vpop.f32.mrf.mxu0 }
 0x590   : > { %v19363_v45 = vpop.f32.mrf.mxu1 }
 0x591   : > { %21026 = vst [vmem:[#allocation86_spill] sm:$0xff] %v19363_v45  ;;  %v19369_v35 = vpop.f32.mrf.mxu0  ;;  %9999 = vmatmul.mubr.bf16.gmra.mxu0 %v13515_v5  ;;  %v13517_v5 = vld [vmem:[%s14923_s16 + $0xc0] ss:$8 sps:$4 sm:$0xff]  }
 0x592   : > { %v19367_v22 = vpop.f32.mrf.mxu1  ;;  %10008 = vmatprep.mubr.bf16.mxu0 %v13516_v63  ;;  %v13518_v63 = vld [vmem:[%s14923_s16 + $0xd4] ss:$8 sps:$4 sm:$0xff]  }
 0x593   : > { %21027 = vst [vmem:[#allocation11_spill] sm:$0xff] %v19367_v22  ;;  %v19375_v58 = vpop.f32.mrf.mxu0 }
 0x594   : > { %v19372_v40 = vpop.f32.mrf.mxu1 }
 0x595   : > { %21028 = vst [vmem:[#allocation29_spill] sm:$0xff] %v19372_v40  ;;  %v19379_v30 = vpop.f32.mrf.mxu0 }
 0x596   : > { %v19377_v55 = vpop.f32.mrf.mxu1 }
 0x597   : > { %21029 = vst [vmem:[#allocation17_spill] sm:$0xff] %v19377_v55  ;;  %v19383_v41 = vpop.f32.mrf.mxu0 }
 0x598   : > { %v19381_v45 = vpop.f32.mrf.mxu1 }
 0x599   : > { %21030 = vst [vmem:[#allocation119_spill] sm:$0xff] %v19381_v45  ;;  %v19387_v62 = vpop.f32.mrf.mxu0  ;;  %10009 = vmatmul.mubr.bf16.gmra.mxu0 %v13517_v5  ;;  %v13519_v5 = vld [vmem:[%s14923_s16 + $0xd0] ss:$8 sps:$4 sm:$0xff]  }
 0x59a   : > { %v19385_v22 = vpop.f32.mrf.mxu1  ;;  %10018 = vmatprep.mubr.bf16.mxu0 %v13518_v63  ;;  %v13520_v63 = vld [vmem:[%s14923_s16 + $0xe4] ss:$8 sps:$4 sm:$0xff]  }
 0x59b   : > { %21031 = vst [vmem:[#allocation88_spill] sm:$0xff] %v19385_v22  ;;  %v19393_v38 = vpop.f32.mrf.mxu0 }
 0x59c   : > { %v19390_v40 = vpop.f32.mrf.mxu1 }
 0x59d   : > { %21032 = vst [vmem:[#allocation14_spill] sm:$0xff] %v19390_v40  ;;  %v19397_v1 = vpop.f32.mrf.mxu0 }
 0x59e   : > { %v19395_v55 = vpop.f32.mrf.mxu1 }
 0x59f   : > { %21033 = vst [vmem:[#allocation27_spill] sm:$0xff] %v19395_v55  ;;  %v19401_v46 = vpop.f32.mrf.mxu0 }
 0x5a0   : > { %v19399_v45 = vpop.f32.mrf.mxu1 }
 0x5a1   : > { %21034 = vst [vmem:[#allocation16_spill] sm:$0xff] %v19399_v45  ;;  %v19405_v54 = vpop.f32.mrf.mxu0  ;;  %10019 = vmatmul.mubr.bf16.gmra.mxu0 %v13519_v5  ;;  %v13521_v5 = vld [vmem:[%s14923_s16 + $0xe0] ss:$8 sps:$4 sm:$0xff]  }
 0x5a2   : > { %v19403_v22 = vpop.f32.mrf.mxu1  ;;  %21036 = vst [vmem:[#allocation15_spill] sm:$0xff] %v19405_v54  ;;  %10028 = vmatprep.mubr.bf16.mxu0 %v13520_v63  ;;  %v13522_v63 = vld [vmem:[%s14923_s16 + $0xf4] ss:$8 sps:$4 sm:$0xff]   ;;  %s11411_s16 = sshll.u32 %s16259_s22, 4  ;;  %s19911_s16 = int_to_ptr.vmem [resolvable:$true] %s11411_s16 }
 0x5a3   : > { %21035 = vst [vmem:[#allocation121_spill] sm:$0xff] %v19403_v22  ;;  %v19411_v44 = vpop.f32.mrf.mxu0  ;;  %s13525_s30 = scalar_lea.vmem %s19911_s16, 16384  ;;  %p13532_p1 = scmp.lt.s32.totalorder %s19911_s16, %s13530_s20 }
 0x5a4   : > { %v19408_v40 = vpop.f32.mrf.mxu1  ;;  %21038 = vst [vmem:[#allocation19_spill] sm:$0xff] %v19411_v44  ;;  %p13526_p12 = scmp.ne.s32.totalorder %s19911_s16, %s13525_s30  ;;  %p13533_p2 = scmp.lt.s32.totalorder %s13531_s14, %s13525_s30 }
 0x5a5   : > { %21037 = vst [vmem:[#allocation90_spill] sm:$0xff] %v19408_v40  ;;  %v19415_v29 = vpop.f32.mrf.mxu0 }
 0x5a6   : > { %v19413_v55 = vpop.f32.mrf.mxu1  ;;  %21040 = vst [vmem:[#allocation83_spill] sm:$0xff] %v19415_v29  ;;  %p13527_p13 = pnand %p13526_p12, %p13691_p4  ;;  %p13534_p3 = por %p13533_p2, %p13532_p1 }
 0x5a7   : > { %21039 = vst [vmem:[#allocation99_spill] sm:$0xff] %v19413_v55  ;;  %v19419_v20 = vpop.f32.mrf.mxu0 }
 0x5a8   : > { %v19417_v45 = vpop.f32.mrf.mxu1  ;;  %21042 = vst [vmem:[#allocation115_spill] sm:$0xff] %v19419_v20  ;;  %p13528_p0 = pneg %p13527_p13 }
 0x5a9   : > { %21041 = vst [vmem:[#allocation39_spill] sm:$0xff] %v19417_v45  ;;  %v19423_v28 = vpop.f32.mrf.mxu0  ;;  %10029 = vmatmul.mubr.bf16.gmra.mxu0 %v13521_v5 }
 0x5aa   : > { %v19421_v22 = vpop.f32.mrf.mxu1  ;;  %21044 = vst [vmem:[#allocation28_spill] sm:$0xff] %v19423_v28  ;;  %10038 = vmatprep.mubr.bf16.mxu0 %v13522_v63  ;;  %p13535_p5 = pnand %p13534_p3, %p13528_p0 }
 0x5ab   : > { %21043 = vst [vmem:[#allocation155_spill] sm:$0xff] %v19421_v22  ;;  %v19429_v11 = vpop.f32.mrf.mxu0 }
 0x5ac   : > { %v19426_v40 = vpop.f32.mrf.mxu1  ;;  %21045 = vst [vmem:[#allocation107_spill] sm:$0xff] %v19429_v11 }
 0x5ad   : > { %v19433_v14 = vpop.f32.mrf.mxu0 }
 0x5ae   : > { %v19431_v55 = vpop.f32.mrf.mxu1  ;;  %21046 = vst [vmem:[#allocation162_spill] sm:$0xff] %v19433_v14 }
 0x5af   : > { %v19437_v53 = vpop.f32.mrf.mxu0 }
 0x5b0   : > { %v19435_v45 = vpop.f32.mrf.mxu1  ;;  %21047 = vst [vmem:[#allocation18_spill] sm:$0xff] %v19437_v53 }
 0x5b1   : > { %v19441_v22 = vpop.f32.mrf.mxu0  ;;  %10039 = vmatmul.mubr.bf16.gmra.mxu0 %v13523_v0 }
 0x5b2   : > { %v19439_v6 = vpop.f32.mrf.mxu1  ;;  %21048 = vst [vmem:[#allocation131_spill] sm:$0xff] %v19441_v22 }
 0x5b3   : > { %v19446_v50 = vpop.f32.mrf.mxu0 }
 0x5b4   : > { %v19444_v5 = vpop.f32.mrf.mxu1  ;;  %21049 = vst [vmem:[#allocation105_spill] sm:$0xff] %v19446_v50 }
 0x5b5   : > { %v19450_v26 = vpop.f32.mrf.mxu0 }
 0x5b6   : > { %v19448_v63 = vpop.f32.mrf.mxu1  ;;  %21050 = vst [vmem:[#allocation21_spill] sm:$0xff] %v19450_v26 }
 0x5b7   : > { %v19454_v33 = vpop.f32.mrf.mxu0 }
 0x5b8   : > { %v19452_v61 = vpop.f32.mrf.mxu1  ;;  %21051 = vst [vmem:[#allocation35_spill] sm:$0xff] %v19454_v33 }
 0x5b9   : > { %v19458_v53 = vpop.f32.mrf.mxu0 }
 0x5ba   : > { %v19456_v27 = vpop.f32.mrf.mxu1  ;;  %21052 = vst [vmem:[#allocation60_spill] sm:$0xff] %v19458_v53 }
 0x5bb   : > { %v19462_v22 = vpop.f32.mrf.mxu0 }
 0x5bc   : > { %v19460_v42 = vpop.f32.mrf.mxu1  ;;  %21053 = vst [vmem:[#allocation108_spill] sm:$0xff] %v19462_v22 }
 0x5bd   : > { %v19466_v39 = vpop.f32.mrf.mxu0 }
 0x5be   : > { %v19464_v0 = vpop.f32.mrf.mxu1  ;;  %21054 = vst [vmem:[#allocation157_spill] sm:$0xff] %v19466_v39 }
 0x5bf   : > { %v19470_v14 = vpop.f32.mrf.mxu0 }
 0x5c0   : > { %v19468_v50 = vpop.f32.mrf.mxu1  ;;  %21055 = vst [vmem:[#allocation138_spill] sm:$0xff] %v19470_v14 }
 0x5c1   : > { %v19474_v7 = vpop.f32.mrf.mxu0 }
 0x5c2   : > { %v19472_v26 = vpop.f32.mrf.mxu1  ;;  %21056 = vst [vmem:[#allocation123_spill] sm:$0xff] %v19474_v7 }
 0x5c3   : > { %v19478_v11 = vpop.f32.mrf.mxu0 }
 0x5c4   : > { %v19476_v33 = vpop.f32.mrf.mxu1  ;;  %21057 = vst [vmem:[#allocation128_spill] sm:$0xff] %v19478_v11 }
 0x5c5   : > { %v19482_v59 = vpop.f32.mrf.mxu0 }
 0x5c6   : > { %v19480_v53 = vpop.f32.mrf.mxu1  ;;  %21058 = vst [vmem:[#allocation69_spill] sm:$0xff] %v19482_v59 }
 0x5c7   : > { %v19486_v28 = vpop.f32.mrf.mxu0 }
 0x5c8   : > { %v19484_v22 = vpop.f32.mrf.mxu1  ;;  %21059 = vst [vmem:[#allocation140_spill] sm:$0xff] %v19486_v28 }
 0x5c9   : > { %v19490_v20 = vpop.f32.mrf.mxu0 }
 0x5ca   : > { %v19488_v39 = vpop.f32.mrf.mxu1  ;;  %21060 = vst [vmem:[#allocation133_spill] sm:$0xff] %v19490_v20 }
 0x5cb   : > { %v19494_v49 = vpop.f32.mrf.mxu0 }
 0x5cc   : > { %v19492_v14 = vpop.f32.mrf.mxu1  ;;  %21062 = vst [vmem:[#allocation118_spill] sm:$0xff] %v19494_v49 }
 0x5cd   : > { %21061 = vst [vmem:[#allocation20_spill] sm:$0xff] %v19492_v14  ;;  %v19498_v19 = vpop.f32.mrf.mxu0 }
 0x5ce   : > { %v19496_v7 = vpop.f32.mrf.mxu1  ;;  %21064 = vst [vmem:[#allocation22_spill] sm:$0xff] %v19498_v19 }
 0x5cf   : > { %21063 = vst [vmem:[#allocation139_spill] sm:$0xff] %v19496_v7  ;;  %v19502_v29 = vpop.f32.mrf.mxu0 }
 0x5d0   : > { %v19500_v11 = vpop.f32.mrf.mxu1  ;;  %21066 = vst [vmem:[#allocation71_spill] sm:$0xff] %v19502_v29 }
 0x5d1   : > { %21065 = vst [vmem:[#allocation161_spill] sm:$0xff] %v19500_v11  ;;  %v19506_v52 = vpop.f32.mrf.mxu0 }
 0x5d2   : > { %v19504_v59 = vpop.f32.mrf.mxu1  ;;  %21068 = vst [vmem:[#allocation68_spill] sm:$0xff] %v19506_v52 }
 0x5d3   : > { %21067 = vst [vmem:[#allocation82_spill] sm:$0xff] %v19504_v59  ;;  %v19510_v44 = vpop.f32.mrf.mxu0 }
 0x5d4   : > { %v19508_v28 = vpop.f32.mrf.mxu1  ;;  %21070 = vst [vmem:[#allocation92_spill] sm:$0xff] %v19510_v44 }
 0x5d5   : > { %21069 = vst [vmem:[#allocation40_spill] sm:$0xff] %v19508_v28  ;;  %v19514_v14 = vpop.f32.mrf.mxu0  ;;  %v21090_v28 = vld [vmem:[#allocation6_spill] sm:$0xff] }
 0x5d6   : > { %v19512_v20 = vpop.f32.mrf.mxu1  ;;  %21072 = vst [vmem:[#allocation61_spill] sm:$0xff] %v19514_v14 }
 0x5d7   : > { %21071 = vst [vmem:[#allocation163_spill] sm:$0xff] %v19512_v20  ;;  %v19518_v7 = vpop.f32.mrf.mxu0 }
 0x5d8   : > { %v19516_v49 = vpop.f32.mrf.mxu1  ;;  %21074 = vst [vmem:[#allocation164_spill] sm:$0xff] %v19518_v7 }
 0x5d9   : > { %21073 = vst [vmem:[#allocation78_spill] sm:$0xff] %v19516_v49  ;;  %v19520_v19 = vpop.f32.mrf.mxu0 }
 0x5da   : > { %21075 = vst [vmem:[#allocation24_spill] sm:$0xff] %v19520_v19  ;;  %v19522_v11 = vpop.f32.mrf.mxu1 }
 0x5db   : > { %21076 = vst [vmem:[#allocation125_spill] sm:$0xff] %v19522_v11  ;;  %v19524_v29 = vpop.f32.mrf.mxu0 }
 0x5dc   : > { %21077 = vst [vmem:[#allocation147_spill] sm:$0xff] %v19524_v29  ;;  %v19528_v52 = vpop.f32.mrf.mxu1 }
 0x5dd   : > { %v19526_v59 = vpop.f32.mrf.mxu0  ;;  %21079 = vst [vmem:[#allocation72_spill] sm:$0xff] %v19528_v52 }
 0x5de   : > { %21078 = vst [vmem:[#allocation104_spill] sm:$0xff] %v19526_v59  ;;  %v19534_v14 = vpop.f32.mrf.mxu1 }
 0x5df   : > { %v19530_v44 = vpop.f32.mrf.mxu0  ;;  %21082 = vst [vmem:[#allocation81_spill] sm:$0xff] %v19534_v14 }
 0x5e0   : > { %21080 = vst [vmem:[#allocation41_spill] sm:$0xff] %v19530_v44  ;;  %v19540_v19 = vpop.f32.mrf.mxu1  ;;  %v3940_v44 = vsub.s32 6, %v21090_v28 }
 0x5e1   : > { %v19532_v20 = vpop.f32.mrf.mxu0  ;;  %21085 = vst [vmem:[#allocation30_spill] sm:$0xff] %v19540_v19 }
 0x5e2   : > { %21081 = vst [vmem:[#allocation91_spill] sm:$0xff] %v19532_v20  ;;  %v19546_v59 = vpop.f32.mrf.mxu1 }
 0x5e3   : > { %v19536_v49 = vpop.f32.mrf.mxu0  ;;  %21088 = vst [vmem:[#allocation137_spill] sm:$0xff] %v19546_v59 }
 0x5e4   : > { %21083 = vst [vmem:[#allocation62_spill] sm:$0xff] %v19536_v49  ;;  %v19553_v20 = vpop.f32.mrf.mxu1  ;;  %v3944_v49 = vsub.s32 7, %v21090_v28 }
 0x5e5   : > { %v19538_v7 = vpop.f32.mrf.mxu0  ;;  %21092 = vst [vmem:[#allocation154_spill] sm:$0xff] %v19553_v20 }
 0x5e6   : > { %21084 = vst [vmem:[#allocation36_spill] sm:$0xff] %v19538_v7  ;;  %v13524_v7 = vld [vmem:[%s16117_s11] sm:$0xff] }
 0x5e7   : > { %v19542_v11 = vpop.f32.mrf.mxu0  ;;  %v19559_v19 = vrot.slane %v13524_v7, %v3940_v44  ;;  %v19565_v59 = vrot.slane %v13524_v7, %v3944_v49 }
 0x5e8   : > { %21086 = vst [vmem:[#allocation111_spill] sm:$0xff] %v19542_v11 }
 0x5e9   : > { %v19544_v29 = vpop.f32.mrf.mxu0  ;;  %v9507_v28 = vadd.f32 %v19319_v13, %v19565_v59 }
 0x5ea   : > { %21087 = vst [vmem:[#allocation135_spill] sm:$0xff] %v19544_v29  ;;  %v19563_v29 = vpop.f32.mrf.mxu1 }
 0x5eb   : > { %v19548_v52 = vpop.f32.mrf.mxu0  ;;  %21095 = vst [vmem:[#allocation87_spill] sm:$0xff] %v19563_v29 }
 0x5ec   : > { %21089 = vst [vmem:[#allocation57_spill] sm:$0xff] %v19548_v52  ;;  %v19573_v20 = vpop.f32.mrf.mxu1 }
 0x5ed   : > { %v19551_v15 = vpop.f32.mrf.mxu0  ;;  %21098 = vst [vmem:[#allocation73_spill] sm:$0xff] %v19573_v20  ;;  %v9515_v20 = vadd.f32 %v19333_v48, %v19559_v19  ;;  %v9519_v48 = vadd.f32 %v19343_v4, %v19559_v19 }
 0x5ee   : > { %21091 = vst [vmem:[#allocation95_spill] sm:$0xff] %v19551_v15  ;;  %v9505_v15 = vadd.f32 %v19312_v24, %v19559_v19  ;;  %v9511_v24 = vadd.f32 %v19328_v36, %v19565_v59 }
 0x5ef   : > { %v19556_v14 = vpop.f32.mrf.mxu0 }
 0x5f0   : > { %21093 = vst [vmem:[#allocation159_spill] sm:$0xff] %v19556_v14  ;;  %v9698_v49 = vadd.f32 %v19028_v32, %v9505_v15  ;;  %v19582_v14 = vpop.f32.mrf.mxu1  ;;  %v9517_v32 = vadd.f32 %v19339_v18, %v19565_v59 }
 0x5f1   : > { %v19561_v11 = vpop.f32.mrf.mxu0  ;;  %21100 = vst [vmem:[#allocation132_spill] sm:$0xff] %v19582_v14 }
 0x5f2   : > { %21094 = vst [vmem:[#allocation130_spill] sm:$0xff] %v19561_v11  ;;  %v9509_v11 = vadd.f32 %v19324_v34, %v19559_v19  ;;  %v19593_v14 = vpop.f32.mrf.mxu1 }
 0x5f3   : > { %v19567_v52 = vpop.f32.mrf.mxu0 }
 0x5f4   : > { %21096 = vst [vmem:[#allocation94_spill] sm:$0xff] %v19567_v52  ;;  %v9702_v34 = vadd.f32 %v19043_v60, %v9509_v11 }
 0x5f5   : > { %v19571_v54 = vpop.f32.mrf.mxu0 }
 0x5f6   : > { %21097 = vst [vmem:[#allocation106_spill] sm:$0xff] %v19571_v54  ;;  %v9700_v54 = vadd.f32 %v19037_v25, %v9507_v28  ;;  %v9704_v25 = vadd.f32 %v19050_v10, %v9511_v24  ;;  %v9521_v10 = vadd.f32 %v19347_v37, %v19565_v59  ;;  %v9527_v37 = vadd.f32 %v19357_v31, %v19565_v59 }
 0x5f7   : > { %v19577_v44 = vpop.f32.mrf.mxu0 }
 0x5f8   : > { %21099 = vst [vmem:[#allocation93_spill] sm:$0xff] %v19577_v44 }
 0x5f9   : > { %v9890_v7 = vpop.f32.mrf.mxu0 }
 0x5fa   : > { %v9891_v52 = vadd.f32 %v9890_v7, %v9698_v49  ;;  %v9710_v7 = vadd.f32 %v19067_v47, %v9517_v32 }
 0x5fb   : > { %v9892_v13 = vpop.f32.mrf.mxu0 }
 0x5fc   : > { %v10084_v44 = vadd.f32 %v19426_v40, %v9891_v52  ;;  %v9893_v29 = vadd.f32 %v9892_v13, %v9700_v54  ;;  %v9708_v52 = vadd.f32 %v19058_v9, %v9515_v20  ;;  %v19602_v13 = vpop.f32.mrf.mxu1  ;;  %v9525_v9 = vadd.f32 %v19351_v57, %v19559_v19 }
 0x5fd   : > { %v9894_v15 = vpop.f32.mrf.mxu0 }
 0x5fe   : > { %v10086_v36 = vadd.f32 %v19431_v55, %v9893_v29  ;;  %v9895_v49 = vadd.f32 %v9894_v15, %v9702_v34  ;;  %v10248_v54 = vmax.f32 %v10084_v44, 0.0  ;;  %v9712_v44 = vadd.f32 %v19073_v56, %v9519_v48  ;;  %v19614_v15 = vpop.f32.mrf.mxu1 }
 0x5ff   : > { %v9896_v28 = vpop.f32.mrf.mxu0  ;;  %v9529_v56 = vadd.f32 %v19361_v8, %v19559_v19  ;;  %v9718_v48 = vadd.f32 %v19088_v51, %v9525_v9  ;;  %v9535_v51 = vadd.f32 %v19369_v35, %v19559_v19 }
 0x600   : > { %v10249_v60 = vmax.f32 %v10086_v36, 0.0  ;;  %v10088_v11 = vadd.f32 %v19435_v45, %v9895_v49  ;;  %v9897_v18 = vadd.f32 %v9896_v28, %v9704_v25  ;;  %v9714_v49 = vadd.f32 %v19080_v12, %v9521_v10  ;;  %v21102_v10 = vld [vmem:[#allocation97_spill] sm:$0xff] }
 0x601   : > { %v9900_v40 = vpop.f32.mrf.mxu0  ;;  %v9531_v12 = vadd.f32 %v19365_v21, %v19565_v59  ;;  %v9537_v21 = vadd.f32 %v19375_v58, %v19565_v59 }
 0x602   : > { %v12683_v29 = vpack.c.bf16 %v10249_v60, %v10248_v54  ;;  %v10090_v4 = vadd.f32 %v19439_v6, %v9897_v18  ;;  %v9901_v55 = vadd.f32 %v9900_v40, %v9708_v52  ;;  %v10256_v45 = vmax.f32 %v10088_v11, 0.0  ;;  %v21101_v60 = vld [vmem:[#allocation148_spill] sm:$0xff] }
 0x603   : > { %v9902_v20 = vpop.f32.mrf.mxu0  ;;  %v9720_v11 = vadd.f32 %v21101_v60, %v9527_v37 }
 0x604   : > { %11269 = vst [vmem:[%s16259_s22 + $0x18] sm:$0xff] %v12683_v29  ;;  %v10257_v24 = vmax.f32 %v10090_v4, 0.0  ;;  %v10094_v47 = vadd.f32 %v19444_v5, %v9901_v55  ;;  %v9903_v34 = vadd.f32 %v9902_v20, %v9710_v7  ;;  %v9722_v29 = vadd.f32 %v21102_v10, %v9529_v56 }
 0x605   : > { %v9904_v32 = vpop.f32.mrf.mxu0  ;;  %v9541_v56 = vadd.f32 %v19383_v41, %v19565_v59  ;;  %v9547_v41 = vadd.f32 %v19393_v38, %v19565_v59 }
 0x606   : > { %v12687_v6 = vpack.c.bf16 %v10257_v24, %v10256_v45  ;;  %v10096_v36 = vadd.f32 %v19448_v63, %v9903_v34  ;;  %v9905_v57 = vadd.f32 %v9904_v32, %v9712_v44  ;;  %v10264_v5 = vmax.f32 %v10094_v47, 0.0  ;;  %v19624_v63 = vpop.f32.mrf.mxu1  ;;  %v21103_v24 = vld [vmem:[#allocation101_spill] sm:$0xff] }
 0x607   : > { %v9906_v25 = vpop.f32.mrf.mxu0  ;;  %v9724_v47 = vadd.f32 %v21103_v24, %v9531_v12  ;;  %v9539_v34 = vadd.f32 %v19379_v30, %v19559_v19  ;;  %v9728_v32 = vadd.f32 %v19118_v23, %v9535_v51  ;;  %v9545_v23 = vadd.f32 %v19387_v62, %v19559_v19 }
 0x608   : > { %11273 = vst [vmem:[%s16259_s22 + $0x38] sm:$0xff] %v12687_v6  ;;  %v10265_v28 = vmax.f32 %v10096_v36, 0.0  ;;  %v10098_v31 = vadd.f32 %v19452_v61, %v9905_v57  ;;  %v9907_v52 = vadd.f32 %v9906_v25, %v9714_v49  ;;  %v19636_v44 = vpop.f32.mrf.mxu1  ;;  %v9730_v49 = vadd.f32 %v19127_v17, %v9537_v21 }
 0x609   : > { %v9910_v54 = vpop.f32.mrf.mxu0  ;;  %v9734_v12 = vadd.f32 %v19140_v2, %v9541_v56  ;;  %v9740_v10 = vadd.f32 %v19157_v16, %v9547_v41  ;;  %v9551_v2 = vadd.f32 %v19401_v46, %v19565_v59  ;;  %v21106_v16 = vld [vmem:[#allocation20_spill] sm:$0xff] }
 0x60a   : > { %v12691_v18 = vpack.c.bf16 %v10265_v28, %v10264_v5  ;;  %v10100_v8 = vadd.f32 %v19456_v27, %v9907_v52  ;;  %v9911_v40 = vadd.f32 %v9910_v54, %v9718_v48  ;;  %v10272_v61 = vmax.f32 %v10098_v31, 0.0 }
 0x60b   : > { %v9912_v7 = vpop.f32.mrf.mxu0  ;;  %v9732_v28 = vadd.f32 %v19133_v43, %v9539_v34  ;;  %v9549_v43 = vadd.f32 %v19397_v1, %v19559_v19  ;;  %v21108_v34 = vld [vmem:[#allocation139_spill] sm:$0xff] }
 0x60c   : > { %11277 = vst [vmem:[%s16259_s22 + $0x58] sm:$0xff] %v12691_v18  ;;  %v10273_v4 = vmax.f32 %v10100_v8, 0.0  ;;  %v10104_v55 = vadd.f32 %v19460_v42, %v9911_v40  ;;  %v9913_v9 = vadd.f32 %v9912_v7, %v9720_v11  ;;  %v9738_v8 = vadd.f32 %v19148_v3, %v9545_v23  ;;  %v21104_v3 = vld [vmem:[#allocation15_spill] sm:$0xff] }
 0x60d   : > { %v9914_v20 = vpop.f32.mrf.mxu0 }
 0x60e   : > { %v12695_v27 = vpack.c.bf16 %v10273_v4, %v10272_v61  ;;  %v10106_v45 = vadd.f32 %v19464_v0, %v9913_v9  ;;  %v9915_v35 = vadd.f32 %v9914_v20, %v9722_v29  ;;  %v10280_v42 = vmax.f32 %v10104_v55, 0.0  ;;  %v19646_v0 = vpop.f32.mrf.mxu1  ;;  %v21105_v9 = vld [vmem:[#allocation103_spill] sm:$0xff] }
 0x60f   : > { %v9916_v37 = vpop.f32.mrf.mxu0  ;;  %v9555_v4 = vadd.f32 %v21104_v3, %v19559_v19  ;;  %v9742_v21 = vadd.f32 %v21105_v9, %v9549_v43 }
 0x610   : > { %11281 = vst [vmem:[%s16259_s22 + $0x78] sm:$0xff] %v12695_v27  ;;  %v10281_v6 = vmax.f32 %v10106_v45, 0.0  ;;  %v10108_v58 = vadd.f32 %v19468_v50, %v9915_v35  ;;  %v9917_v36 = vadd.f32 %v9916_v37, %v9724_v47  ;;  %v19658_v60 = vpop.f32.mrf.mxu1  ;;  %v21107_v35 = vld [vmem:[#allocation19_spill] sm:$0xff] }
 0x611   : > { %v9920_v57 = vpop.f32.mrf.mxu0  ;;  %v9557_v46 = vadd.f32 %v21107_v35, %v19565_v59 }
 0x612   : > { %v12699_v25 = vpack.c.bf16 %v10281_v6, %v10280_v42  ;;  %v10110_v30 = vadd.f32 %v19472_v26, %v9917_v36  ;;  %v9921_v48 = vadd.f32 %v9920_v57, %v9728_v32  ;;  %v10288_v50 = vmax.f32 %v10108_v58, 0.0  ;;  %v21109_v42 = vld [vmem:[#allocation116_spill] sm:$0xff]  ;;  %v21110_v58 = vld [vmem:[#allocation83_spill] sm:$0xff] }
 0x613   : > { %v9922_v5 = vpop.f32.mrf.mxu0  ;;  %v9744_v6 = vadd.f32 %v21109_v42, %v9551_v2  ;;  %v9559_v36 = vadd.f32 %v21110_v58, %v19559_v19  ;;  %v21119_v2 = vld [vmem:[#allocation107_spill] sm:$0xff] }
 0x614   : > { %11285 = vst [vmem:[%s16259_s22 + $0x98] sm:$0xff] %v12699_v25  ;;  %v10289_v31 = vmax.f32 %v10110_v30, 0.0  ;;  %v10114_v17 = vadd.f32 %v19476_v33, %v9921_v48  ;;  %v9923_v52 = vadd.f32 %v9922_v5, %v9730_v49  ;;  %v21111_v49 = vld [vmem:[#allocation150_spill] sm:$0xff]  ;;  %v21112_v48 = vld [vmem:[#allocation161_spill] sm:$0xff]  ;;  %v21125_v42 = vld [vmem:[#allocation43_spill] sm:$0xff] }
 0x615   : > { %v9924_v54 = vpop.f32.mrf.mxu0  ;;  %v9748_v56 = vadd.f32 %v21111_v49, %v9555_v4  ;;  %v21120_v4 = vld [vmem:[#allocation163_spill] sm:$0xff] }
 0x616   : > { %v12703_v26 = vpack.c.bf16 %v10289_v31, %v10288_v50  ;;  %v10116_v11 = vadd.f32 %v19480_v53, %v9923_v52  ;;  %v9925_v62 = vadd.f32 %v9924_v54, %v9732_v28  ;;  %v10296_v33 = vmax.f32 %v10114_v17, 0.0  ;;  %v19668_v53 = vpop.f32.mrf.mxu1  ;;  %v21113_v50 = vld [vmem:[#allocation152_spill] sm:$0xff]  ;;  %v21114_v52 = vld [vmem:[#allocation115_spill] sm:$0xff] }
 0x617   : > { %v9926_v18 = vpop.f32.mrf.mxu0  ;;  %v9750_v31 = vadd.f32 %v21113_v50, %v9557_v46  ;;  %v9561_v41 = vadd.f32 %v21114_v52, %v19565_v59 }
 0x618   : > { %11289 = vst [vmem:[%s16259_s22 + $0xb8] sm:$0xff] %v12703_v26  ;;  %v10297_v40 = vmax.f32 %v10116_v11, 0.0  ;;  %v10118_v38 = vadd.f32 %v19484_v22, %v9925_v62  ;;  %v9927_v51 = vadd.f32 %v9926_v18, %v9734_v12  ;;  %v19680_v47 = vpop.f32.mrf.mxu1  ;;  %v21115_v26 = vld [vmem:[#allocation82_spill] sm:$0xff]  ;;  %v21116_v12 = vld [vmem:[#allocation28_spill] sm:$0xff] }
 0x619   : > { %v9930_v7 = vpop.f32.mrf.mxu0  ;;  %v9565_v43 = vadd.f32 %v21116_v12, %v19559_v19 }
 0x61a   : > { %v12707_v29 = vpack.c.bf16 %v10297_v40, %v10296_v33  ;;  %v10120_v1 = vadd.f32 %v19488_v39, %v9927_v51  ;;  %v9931_v61 = vadd.f32 %v9930_v7, %v9738_v8  ;;  %v10304_v22 = vmax.f32 %v10118_v38, 0.0  ;;  %v19690_v17 = vpop.f32.mrf.mxu1  ;;  %v21117_v8 = vld [vmem:[#allocation23_spill] sm:$0xff]  ;;  %v21118_v51 = vld [vmem:[#allocation40_spill] sm:$0xff] }
 0x61b   : > { %v9932_v55 = vpop.f32.mrf.mxu0  ;;  %v9752_v33 = vadd.f32 %v21117_v8, %v9559_v36  ;;  %v21126_v36 = vld [vmem:[#allocation18_spill] sm:$0xff]  ;;  %v21132_v8 = vld [vmem:[#allocation81_spill] sm:$0xff] }
 0x61c   : > { %11293 = vst [vmem:[%s16259_s22 + $0xd8] sm:$0xff] %v12707_v29  ;;  %v10305_v20 = vmax.f32 %v10120_v1, 0.0  ;;  %v10124_v27 = vadd.f32 %v21106_v16, %v9931_v61  ;;  %v9933_v45 = vadd.f32 %v9932_v55, %v9740_v10  ;;  %v9567_v29 = vadd.f32 %v21119_v2, %v19565_v59  ;;  %v19702_v61 = vpop.f32.mrf.mxu1 }
 0x61d   : > { %v9934_v24 = vpop.f32.mrf.mxu0 }
 0x61e   : > { %v12711_v39 = vpack.c.bf16 %v10305_v20, %v10304_v22  ;;  %v10126_v37 = vadd.f32 %v21108_v34, %v9933_v45  ;;  %v9935_v32 = vadd.f32 %v9934_v24, %v9742_v21  ;;  %v10312_v25 = vmax.f32 %v10124_v27, 0.0  ;;  %v21121_v21 = vld [vmem:[#allocation120_spill] sm:$0xff]  ;;  %v21122_v20 = vld [vmem:[#allocation162_spill] sm:$0xff]  ;;  %v21123_v45 = vld [vmem:[#allocation63_spill] sm:$0xff]  ;;  %v19712_v58 = vpop.f32.mrf.mxu1 }
 0x61f   : > { %v9936_v57 = vpop.f32.mrf.mxu0  ;;  %v9754_v22 = vadd.f32 %v21121_v21, %v9561_v41  ;;  %v9569_v16 = vadd.f32 %v21122_v20, %v19559_v19  ;;  %v9758_v35 = vadd.f32 %v21123_v45, %v9565_v43  ;;  %v21130_v41 = vld [vmem:[#allocation72_spill] sm:$0xff]  ;;  %v21137_v20 = vld [vmem:[#allocation47_spill] sm:$0xff] }
 0x620   : > { %11297 = vst [vmem:[%s16259_s22 + $0xf8] sm:$0xff] %v12711_v39  ;;  %v10313_v30 = vmax.f32 %v10126_v37, 0.0  ;;  %v10128_v23 = vadd.f32 %v21112_v48, %v9935_v32  ;;  %v9937_v5 = vadd.f32 %v9936_v57, %v9744_v6  ;;  %v21124_v39 = vld [vmem:[#allocation78_spill] sm:$0xff]  ;;  %v9760_v6 = vadd.f32 %v21125_v42, %v9567_v29  ;;  %v21128_v48 = vld [vmem:[#allocation131_spill] sm:$0xff]  ;;  %v19724_v43 = vpop.f32.mrf.mxu1  ;;  %v21135_v29 = vld [vmem:[#allocation44_spill] sm:$0xff] }
 0x621   : > { %v9940_v28 = vpop.f32.mrf.mxu0  ;;  %v9571_v57 = vadd.f32 %v21126_v36, %v19565_v59  ;;  %v21138_v45 = vld [vmem:[#allocation35_spill] sm:$0xff] }
 0x622   : > { %v12715_v54 = vpack.c.bf16 %v10313_v30, %v10312_v25  ;;  %v10130_v11 = vadd.f32 %v21115_v26, %v9937_v5  ;;  %v9941_v62 = vadd.f32 %v9940_v28, %v9748_v56  ;;  %v10320_v40 = vmax.f32 %v10128_v23, 0.0  ;;  %v21127_v56 = vld [vmem:[#allocation125_spill] sm:$0xff]  ;;  %v21129_v28 = vld [vmem:[#allocation42_spill] sm:$0xff] }
 0x623   : > { %v9942_v18 = vpop.f32.mrf.mxu0  ;;  %v9575_v23 = vadd.f32 %v21128_v48, %v19559_v19  ;;  %v9762_v50 = vadd.f32 %v21129_v28, %v9569_v16  ;;  %v21143_v48 = vld [vmem:[#allocation108_spill] sm:$0xff] }
 0x624   : > { %11301 = vst [vmem:[%s16259_s22 + $0x118] sm:$0xff] %v12715_v54  ;;  %v10321_v38 = vmax.f32 %v10130_v11, 0.0  ;;  %v10134_v7 = vadd.f32 %v21118_v51, %v9941_v62  ;;  %v9943_v10 = vadd.f32 %v9942_v18, %v9750_v31  ;;  %v21131_v11 = vld [vmem:[#allocation105_spill] sm:$0xff] }
 0x625   : > { %v9944_v1 = vpop.f32.mrf.mxu0  ;;  %v9577_v62 = vadd.f32 %v21131_v11, %v19565_v59  ;;  %v21146_v11 = vld [vmem:[#allocation157_spill] sm:$0xff] }
 0x626   : > { %v12719_v3 = vpack.c.bf16 %v10321_v38, %v10320_v40  ;;  %v10136_v55 = vadd.f32 %v21120_v4, %v9943_v10  ;;  %v9945_v9 = vadd.f32 %v9944_v1, %v9752_v33  ;;  %v10328_v46 = vmax.f32 %v10134_v7, 0.0  ;;  %v21133_v38 = vld [vmem:[#allocation45_spill] sm:$0xff] }
 0x627   : > { %v9946_v27 = vpop.f32.mrf.mxu0  ;;  %v9764_v51 = vadd.f32 %v21133_v38, %v9571_v57  ;;  %v21134_v7 = vld [vmem:[#allocation21_spill] sm:$0xff]  ;;  %v9768_v1 = vadd.f32 %v21135_v29, %v9575_v23  ;;  %v9770_v16 = vadd.f32 %v21137_v20, %v9577_v62  ;;  %v9587_v23 = vadd.f32 %v21143_v48, %v19565_v59  ;;  %v21152_v20 = vld [vmem:[#allocation123_spill] sm:$0xff] }
 0x628   : > { %11305 = vst [vmem:[%s16259_s22 + $0x138] sm:$0xff] %v12719_v3  ;;  %v10329_v24 = vmax.f32 %v10136_v55, 0.0  ;;  %v10138_v34 = vadd.f32 %v21124_v39, %v9945_v9  ;;  %v9947_v37 = vadd.f32 %v9946_v27, %v9754_v22  ;;  %v9579_v10 = vadd.f32 %v21134_v7, %v19559_v19  ;;  %v21136_v55 = vld [vmem:[#allocation30_spill] sm:$0xff]  ;;  %v19734_v27 = vpop.f32.mrf.mxu1  ;;  %v21148_v38 = vld [vmem:[#allocation73_spill] sm:$0xff] }
 0x629   : > { %v9950_v32 = vpop.f32.mrf.mxu0  ;;  %v9589_v62 = vadd.f32 %v21146_v11, %v19559_v19  ;;  %v21156_v48 = vld [vmem:[#allocation69_spill] sm:$0xff]  ;;  %v21158_v11 = vld [vmem:[#allocation55_spill] sm:$0xff] }
 0x62a   : > { %v12723_v49 = vpack.c.bf16 %v10329_v24, %v10328_v46  ;;  %v10140_v25 = vadd.f32 %v21127_v56, %v9947_v37  ;;  %v9951_v30 = vadd.f32 %v9950_v32, %v9758_v35  ;;  %v10336_v31 = vmax.f32 %v10138_v34, 0.0  ;;  %v21139_v24 = vld [vmem:[#allocation137_spill] sm:$0xff]  ;;  %v21140_v37 = vld [vmem:[#allocation60_spill] sm:$0xff]  ;;  %v21142_v56 = vld [vmem:[#allocation154_spill] sm:$0xff]  ;;  %v19746_v28 = vpop.f32.mrf.mxu1 }
 0x62b   : > { %v9952_v5 = vpop.f32.mrf.mxu0  ;;  %v9581_v35 = vadd.f32 %v21138_v45, %v19565_v59  ;;  %v9585_v32 = vadd.f32 %v21140_v37, %v19559_v19 }
 0x62c   : > { %11309 = vst [vmem:[%s16259_s22 + $0x158] sm:$0xff] %v12723_v49  ;;  %v10337_v52 = vmax.f32 %v10140_v25, 0.0  ;;  %v10144_v54 = vadd.f32 %v21130_v41, %v9951_v30  ;;  %v9953_v26 = vadd.f32 %v9952_v5, %v9760_v6  ;;  %v21141_v6 = vld [vmem:[#allocation46_spill] sm:$0xff] }
 0x62d   : > { %v9954_v12 = vpop.f32.mrf.mxu0  ;;  %v9772_v36 = vadd.f32 %v21141_v6, %v9579_v10 }
 0x62e   : > { %v12727_v18 = vpack.c.bf16 %v10337_v52, %v10336_v31  ;;  %v10146_v33 = vadd.f32 %v21132_v8, %v9953_v26  ;;  %v9955_v40 = vadd.f32 %v9954_v12, %v9762_v50  ;;  %v10344_v3 = vmax.f32 %v10144_v54, 0.0  ;;  %v21144_v31 = vld [vmem:[#allocation87_spill] sm:$0xff]  ;;  %v21145_v54 = vld [vmem:[#allocation49_spill] sm:$0xff] }
 0x62f   : > { %v9956_v2 = vpop.f32.mrf.mxu0  ;;  %v9774_v26 = vadd.f32 %v21145_v54, %v9581_v35  ;;  %v21153_v35 = vld [vmem:[#allocation50_spill] sm:$0xff] }
 0x630   : > { %11313 = vst [vmem:[%s16259_s22 + $0x178] sm:$0xff] %v12727_v18  ;;  %v10345_v4 = vmax.f32 %v10146_v33, 0.0  ;;  %v10148_v9 = vadd.f32 %v21136_v55, %v9955_v40  ;;  %v9957_v21 = vadd.f32 %v9956_v2, %v9764_v51  ;;  %v21147_v18 = vld [vmem:[#allocation48_spill] sm:$0xff]  ;;  %v21149_v2 = vld [vmem:[#allocation51_spill] sm:$0xff] }
 0x631   : > { %v9960_v22 = vpop.f32.mrf.mxu0  ;;  %v9778_v8 = vadd.f32 %v21147_v18, %v9585_v32  ;;  %v9780_v29 = vadd.f32 %v21149_v2, %v9587_v23  ;;  %v21154_v32 = vld [vmem:[#allocation128_spill] sm:$0xff]  ;;  %v9599_v23 = vadd.f32 %v21156_v48, %v19559_v19 }
 0x632   : > { %v12731_v46 = vpack.c.bf16 %v10345_v4, %v10344_v3  ;;  %v10150_v39 = vadd.f32 %v21139_v24, %v9957_v21  ;;  %v9961_v34 = vadd.f32 %v9960_v22, %v9768_v1  ;;  %v10352_v57 = vmax.f32 %v10148_v9, 0.0  ;;  %v19756_v1 = vpop.f32.mrf.mxu1  ;;  %v21150_v3 = vld [vmem:[#allocation138_spill] sm:$0xff]  ;;  %v21151_v9 = vld [vmem:[#allocation132_spill] sm:$0xff] }
 0x633   : > { %v9962_v42 = vpop.f32.mrf.mxu0  ;;  %v9591_v4 = vadd.f32 %v21150_v3, %v19565_v59 }
 0x634   : > { %11317 = vst [vmem:[%s16259_s22 + $0x198] sm:$0xff] %v12731_v46  ;;  %v10353_v49 = vmax.f32 %v10150_v39, 0.0  ;;  %v10154_v25 = vadd.f32 %v21142_v56, %v9961_v34  ;;  %v9963_v30 = vadd.f32 %v9962_v42, %v9770_v16  ;;  %v9595_v16 = vadd.f32 %v21152_v20, %v19559_v19 }
 0x635   : > { %v9964_v5 = vpop.f32.mrf.mxu0  ;;  %v9782_v46 = vadd.f32 %v21153_v35, %v9589_v62  ;;  %v9597_v42 = vadd.f32 %v21154_v32, %v19565_v59 }
 0x636   : > { %v12735_v50 = vpack.c.bf16 %v10353_v49, %v10352_v57  ;;  %v10156_v52 = vadd.f32 %v21144_v31, %v9963_v30  ;;  %v9965_v41 = vadd.f32 %v9964_v5, %v9772_v36  ;;  %v10360_v33 = vmax.f32 %v10154_v25, 0.0  ;;  %v19768_v36 = vpop.f32.mrf.mxu1  ;;  %v21155_v25 = vld [vmem:[#allocation53_spill] sm:$0xff] }
 0x637   : > { %v9966_v12 = vpop.f32.mrf.mxu0  ;;  %v9784_v30 = vadd.f32 %v21155_v25, %v9591_v4  ;;  %v9790_v62 = vadd.f32 %v21158_v11, %v9597_v42  ;;  %v21167_v25 = vld [vmem:[#allocation71_spill] sm:$0xff] }
 0x638   : > { %11321 = vst [vmem:[%s16259_s22 + $0x1b8] sm:$0xff] %v12735_v50  ;;  %v10361_v40 = vmax.f32 %v10156_v52, 0.0  ;;  %v10158_v51 = vadd.f32 %v21148_v38, %v9965_v41  ;;  %v9967_v7 = vadd.f32 %v9966_v12, %v9774_v26  ;;  %v21157_v50 = vld [vmem:[#allocation52_spill] sm:$0xff]  ;;  %v21160_v38 = vld [vmem:[#allocation133_spill] sm:$0xff] }
 0x639   : > { %v9970_v10 = vpop.f32.mrf.mxu0  ;;  %v9788_v31 = vadd.f32 %v21157_v50, %v9595_v16  ;;  %v21159_v12 = vld [vmem:[#allocation140_spill] sm:$0xff] }
 0x63a   : > { %v12739_v55 = vpack.c.bf16 %v10361_v40, %v10360_v33  ;;  %v10160_v21 = vadd.f32 %v21151_v9, %v9967_v7  ;;  %v9971_v22 = vadd.f32 %v9970_v10, %v9778_v8  ;;  %v10368_v24 = vmax.f32 %v10158_v51, 0.0  ;;  %v21161_v10 = vld [vmem:[#allocation54_spill] sm:$0xff]  ;;  %v21168_v50 = vld [vmem:[#allocation68_spill] sm:$0xff] }
 0x63b   : > { %v9972_v45 = vpop.f32.mrf.mxu0  ;;  %v9601_v18 = vadd.f32 %v21159_v12, %v19565_v59  ;;  %v9605_v51 = vadd.f32 %v21160_v38, %v19559_v19  ;;  %v9792_v2 = vadd.f32 %v21161_v10, %v9599_v23  ;;  %v21171_v38 = vld [vmem:[#allocation10_spill] sm:$0xff] }
 0x63c   : > { %11325 = vst [vmem:[%s16259_s22 + $0x1d8] sm:$0xff] %v12739_v55  ;;  %v10369_v39 = vmax.f32 %v10160_v21, 0.0  ;;  %v10164_v34 = vadd.f32 %v19593_v14, %v9971_v22  ;;  %v9973_v37 = vadd.f32 %v9972_v45, %v9780_v29  ;;  %v21162_v55 = vld [vmem:[#allocation118_spill] sm:$0xff]  ;;  %v21163_v45 = vld [vmem:[#allocation7_spill] sm:$0xff] }
 0x63d   : > { %v9974_v6 = vpop.f32.mrf.mxu0  ;;  %v9607_v9 = vadd.f32 %v21162_v55, %v19565_v59  ;;  %v9794_v35 = vadd.f32 %v21163_v45, %v9601_v18 }
 0x63e   : > { %v12743_v57 = vpack.c.bf16 %v10369_v39, %v10368_v24  ;;  %v10166_v49 = vadd.f32 %v19602_v13, %v9973_v37  ;;  %v9975_v56 = vadd.f32 %v9974_v6, %v9782_v46  ;;  %v10376_v14 = vmax.f32 %v10164_v34, 0.0  ;;  %v19778_v13 = vpop.f32.mrf.mxu1  ;;  %v21164_v46 = vld [vmem:[#allocation22_spill] sm:$0xff]  ;;  %v21165_v34 = vld [vmem:[#allocation56_spill] sm:$0xff] }
 0x63f   : > { %v9976_v5 = vpop.f32.mrf.mxu0  ;;  %v9609_v24 = vadd.f32 %v21164_v46, %v19559_v19  ;;  %v9798_v37 = vadd.f32 %v21165_v34, %v9605_v51 }
 0x640   : > { %11329 = vst [vmem:[%s16259_s22 + $0x1f8] sm:$0xff] %v12743_v57  ;;  %v10377_v52 = vmax.f32 %v10166_v49, 0.0  ;;  %v10168_v41 = vadd.f32 %v19614_v15, %v9975_v56  ;;  %v9977_v54 = vadd.f32 %v9976_v5, %v9784_v30  ;;  %v19790_v22 = vpop.f32.mrf.mxu1  ;;  %v21166_v49 = vld [vmem:[#allocation9_spill] sm:$0xff]  ;;  %v9611_v30 = vadd.f32 %v21167_v25, %v19565_v59 }
 0x641   : > { %v9980_v26 = vpop.f32.mrf.mxu0  ;;  %v9800_v56 = vadd.f32 %v21166_v49, %v9607_v9 }
 0x642   : > { %v12747_v8 = vpack.c.bf16 %v10377_v52, %v10376_v14  ;;  %v10170_v33 = vadd.f32 %v19624_v63, %v9977_v54  ;;  %v9981_v40 = vadd.f32 %v9980_v26, %v9788_v31  ;;  %v10384_v15 = vmax.f32 %v10168_v41, 0.0  ;;  %v21169_v52 = vld [vmem:[#allocation8_spill] sm:$0xff] }
 0x643   : > { %v9982_v7 = vpop.f32.mrf.mxu0  ;;  %v9615_v31 = vadd.f32 %v21168_v50, %v19559_v19  ;;  %v9802_v41 = vadd.f32 %v21169_v52, %v9609_v24  ;;  %v9804_v51 = vadd.f32 %v21171_v38, %v9611_v30  ;;  %v21176_v24 = vld [vmem:[#allocation24_spill] sm:$0xff]  ;;  %v21181_v52 = vld [vmem:[#allocation117_spill] sm:$0xff] }
 0x644   : > { %11333 = vst [vmem:[%s16259_s22 + $0x218] sm:$0xff] %v12747_v8  ;;  %v10385_v29 = vmax.f32 %v10170_v33, 0.0  ;;  %v10174_v3 = vadd.f32 %v19636_v44, %v9981_v40  ;;  %v9983_v4 = vadd.f32 %v9982_v7, %v9790_v62  ;;  %v21170_v62 = vld [vmem:[#allocation92_spill] sm:$0xff]  ;;  %v21172_v7 = vld [vmem:[#allocation61_spill] sm:$0xff] }
 0x645   : > { %v9984_v21 = vpop.f32.mrf.mxu0  ;;  %v9617_v12 = vadd.f32 %v21170_v62, %v19565_v59  ;;  %v9619_v10 = vadd.f32 %v21172_v7, %v19559_v19  ;;  %v21180_v50 = vld [vmem:[#allocation104_spill] sm:$0xff]  ;;  %v21182_v62 = vld [vmem:[#allocation26_spill] sm:$0xff] }
 0x646   : > { %v12751_v63 = vpack.c.bf16 %v10385_v29, %v10384_v15  ;;  %v10176_v20 = vadd.f32 %v19646_v0, %v9983_v4  ;;  %v9985_v16 = vadd.f32 %v9984_v21, %v9792_v2  ;;  %v10392_v44 = vmax.f32 %v10174_v3, 0.0  ;;  %v19800_v0 = vpop.f32.mrf.mxu1  ;;  %v21173_v15 = vld [vmem:[#allocation25_spill] sm:$0xff]  ;;  %v21174_v21 = vld [vmem:[#allocation12_spill] sm:$0xff] }
 0x647   : > { %v9986_v39 = vpop.f32.mrf.mxu0  ;;  %v9808_v29 = vadd.f32 %v21173_v15, %v9615_v31  ;;  %v9629_v31 = vadd.f32 %v21180_v50, %v19559_v19  ;;  %v21193_v50 = vld [vmem:[#allocation119_spill] sm:$0xff] }
 0x648   : > { %11337 = vst [vmem:[%s16259_s22 + $0x238] sm:$0xff] %v12751_v63  ;;  %v10393_v32 = vmax.f32 %v10176_v20, 0.0  ;;  %v10178_v42 = vadd.f32 %v19658_v60, %v9985_v16  ;;  %v9987_v6 = vadd.f32 %v9986_v39, %v9794_v35  ;;  %v19812_v8 = vpop.f32.mrf.mxu1  ;;  %v9810_v63 = vadd.f32 %v21174_v21, %v9617_v12  ;;  %v21175_v20 = vld [vmem:[#allocation164_spill] sm:$0xff] }
 0x649   : > { %v9990_v57 = vpop.f32.mrf.mxu0  ;;  %v9621_v16 = vadd.f32 %v21175_v20, %v19565_v59  ;;  %v9625_v39 = vadd.f32 %v21176_v24, %v19559_v19 }
 0x64a   : > { %v12755_v48 = vpack.c.bf16 %v10393_v32, %v10392_v44  ;;  %v10180_v23 = vadd.f32 %v19668_v53, %v9987_v6  ;;  %v9991_v5 = vadd.f32 %v9990_v57, %v9798_v37  ;;  %v10400_v60 = vmax.f32 %v10178_v42, 0.0  ;;  %v21177_v37 = vld [vmem:[#allocation84_spill] sm:$0xff]  ;;  %v21178_v57 = vld [vmem:[#allocation147_spill] sm:$0xff] }
 0x64b   : > { %v9992_v14 = vpop.f32.mrf.mxu0  ;;  %v9812_v44 = vadd.f32 %v21177_v37, %v9619_v10  ;;  %v9627_v49 = vadd.f32 %v21178_v57, %v19565_v59  ;;  %v21191_v57 = vld [vmem:[#allocation111_spill] sm:$0xff] }
 0x64c   : > { %11341 = vst [vmem:[%s16259_s22 + $0x258] sm:$0xff] %v12755_v48  ;;  %v10401_v54 = vmax.f32 %v10180_v23, 0.0  ;;  %v10184_v26 = vadd.f32 %v19680_v47, %v9991_v5  ;;  %v9993_v11 = vadd.f32 %v9992_v14, %v9800_v56  ;;  %v21179_v23 = vld [vmem:[#allocation13_spill] sm:$0xff] }
 0x64d   : > { %v9994_v18 = vpop.f32.mrf.mxu0  ;;  %v9814_v5 = vadd.f32 %v21179_v23, %v9621_v16  ;;  %v9820_v12 = vadd.f32 %v21182_v62, %v9627_v49  ;;  %v21187_v16 = vld [vmem:[#allocation11_spill] sm:$0xff]  ;;  %v9641_v49 = vadd.f32 %v21191_v57, %v19565_v59 }
 0x64e   : > { %v12759_v53 = vpack.c.bf16 %v10401_v54, %v10400_v60  ;;  %v10186_v33 = vadd.f32 %v19690_v17, %v9993_v11  ;;  %v9995_v40 = vadd.f32 %v9994_v18, %v9802_v41  ;;  %v10408_v47 = vmax.f32 %v10184_v26, 0.0  ;;  %v19822_v17 = vpop.f32.mrf.mxu1  ;;  %v21183_v18 = vld [vmem:[#allocation41_spill] sm:$0xff] }
 0x64f   : > { %v9996_v2 = vpop.f32.mrf.mxu0  ;;  %v9818_v41 = vadd.f32 %v21181_v52, %v9625_v39  ;;  %v21189_v39 = vld [vmem:[#allocation29_spill] sm:$0xff] }
 0x650   : > { %11345 = vst [vmem:[%s16259_s22 + $0x278] sm:$0xff] %v12759_v53  ;;  %v10409_v3 = vmax.f32 %v10186_v33, 0.0  ;;  %v10188_v4 = vadd.f32 %v19702_v61, %v9995_v40  ;;  %v9997_v55 = vadd.f32 %v9996_v2, %v9804_v51  ;;  %v19834_v25 = vpop.f32.mrf.mxu1  ;;  %v9631_v53 = vadd.f32 %v21183_v18, %v19565_v59  ;;  %v21184_v51 = vld [vmem:[#allocation91_spill] sm:$0xff]  ;;  %v21185_v2 = vld [vmem:[#allocation86_spill] sm:$0xff] }
 0x651   : > { %v10000_v9 = vpop.f32.mrf.mxu0  ;;  %v9635_v7 = vadd.f32 %v21184_v51, %v19559_v19  ;;  %v9822_v15 = vadd.f32 %v21185_v2, %v9629_v31 }
 0x652   : > { %v12763_v45 = vpack.c.bf16 %v10409_v3, %v10408_v47  ;;  %v10190_v35 = vadd.f32 %v19712_v58, %v9997_v55  ;;  %v10001_v46 = vadd.f32 %v10000_v9, %v9808_v29  ;;  %v10416_v61 = vmax.f32 %v10188_v4, 0.0  ;;  %v21186_v4 = vld [vmem:[#allocation62_spill] sm:$0xff] }
 0x653   : > { %v10002_v34 = vpop.f32.mrf.mxu0  ;;  %v9637_v55 = vadd.f32 %v21186_v4, %v19565_v59 }
 0x654   : > { %11349 = vst [vmem:[%s16259_s22 + $0x298] sm:$0xff] %v12763_v45  ;;  %v10417_v32 = vmax.f32 %v10190_v35, 0.0  ;;  %v10194_v42 = vadd.f32 %v19724_v43, %v10001_v46  ;;  %v10003_v6 = vadd.f32 %v10002_v34, %v9810_v63  ;;  %v9824_v45 = vadd.f32 %v21187_v16, %v9631_v53  ;;  %v21188_v35 = vld [vmem:[#allocation36_spill] sm:$0xff]  ;;  %v21196_v53 = vld [vmem:[#allocation95_spill] sm:$0xff] }
 0x655   : > { %v10004_v56 = vpop.f32.mrf.mxu0  ;;  %v9639_v46 = vadd.f32 %v21188_v35, %v19559_v19  ;;  %v9828_v34 = vadd.f32 %v21189_v39, %v9635_v7  ;;  %v21201_v16 = vld [vmem:[#allocation16_spill] sm:$0xff]  ;;  %v21202_v39 = vld [vmem:[#allocation94_spill] sm:$0xff] }
 0x656   : > { %v12767_v58 = vpack.c.bf16 %v10417_v32, %v10416_v61  ;;  %v10196_v30 = vadd.f32 %v19734_v27, %v10003_v6  ;;  %v10005_v48 = vadd.f32 %v10004_v56, %v9812_v44  ;;  %v10424_v43 = vmax.f32 %v10194_v42, 0.0  ;;  %v19844_v27 = vpop.f32.mrf.mxu1  ;;  %v21190_v42 = vld [vmem:[#allocation17_spill] sm:$0xff] }
 0x657   : > { %v10006_v14 = vpop.f32.mrf.mxu0  ;;  %v9830_v6 = vadd.f32 %v21190_v42, %v9637_v55  ;;  %v9832_v31 = vadd.f32 %v21193_v50, %v9639_v46 }
 0x658   : > { %11353 = vst [vmem:[%s16259_s22 + $0x2b8] sm:$0xff] %v12767_v58  ;;  %v10425_v60 = vmax.f32 %v10196_v30, 0.0  ;;  %v10198_v54 = vadd.f32 %v19746_v28, %v10005_v48  ;;  %v10007_v26 = vadd.f32 %v10006_v14, %v9814_v5  ;;  %v10223_v21 = vpop.f32.mrf.mxu1  ;;  %v21192_v48 = vld [vmem:[#allocation135_spill] sm:$0xff] }
 0x659   : > { %v10010_v11 = vpop.f32.mrf.mxu0  ;;  %v9645_v23 = vadd.f32 %v21192_v48, %v19559_v19 }
 0x65a   : > { %v12771_v33 = vpack.c.bf16 %v10425_v60, %v10424_v43  ;;  %v10200_v40 = vadd.f32 %v19756_v1, %v10007_v26  ;;  %v10011_v38 = vadd.f32 %v10010_v11, %v9818_v41  ;;  %v10432_v28 = vmax.f32 %v10198_v54, 0.0  ;;  %v21194_v43 = vld [vmem:[#allocation57_spill] sm:$0xff] }
 0x65b   : > { %v10012_v10 = vpop.f32.mrf.mxu0  ;;  %v9647_v60 = vadd.f32 %v21194_v43, %v19565_v59 }
 0x65c   : > { %11357 = vst [vmem:[%s16259_s22 + $0x2d8] sm:$0xff] %v12771_v33  ;;  %v10433_v29 = vmax.f32 %v10200_v40, 0.0  ;;  %v10204_v47 = vadd.f32 %v19768_v36, %v10011_v38  ;;  %v10013_v3 = vadd.f32 %v10012_v10, %v9820_v12  ;;  %v21195_v12 = vld [vmem:[#allocation88_spill] sm:$0xff]  ;;  %v9649_v33 = vadd.f32 %v21196_v53, %v19559_v19  ;;  %v21197_v38 = vld [vmem:[#allocation14_spill] sm:$0xff] }
 0x65d   : > { %v10014_v9 = vpop.f32.mrf.mxu0  ;;  %v9834_v18 = vadd.f32 %v21195_v12, %v9641_v49  ;;  %v9838_v51 = vadd.f32 %v21197_v38, %v9645_v23 }
 0x65e   : > { %v12775_v1 = vpack.c.bf16 %v10433_v29, %v10432_v28  ;;  %v10206_v63 = vadd.f32 %v19778_v13, %v10013_v3  ;;  %v10015_v20 = vadd.f32 %v10014_v9, %v9822_v15  ;;  %v10440_v36 = vmax.f32 %v10204_v47, 0.0  ;;  %v10225_v13 = vpop.f32.mrf.mxu1  ;;  %v21198_v28 = vld [vmem:[#allocation27_spill] sm:$0xff] }
 0x65f   : > { %v10016_v24 = vpop.f32.mrf.mxu0  ;;  %v9840_v29 = vadd.f32 %v21198_v28, %v9647_v60  ;;  %v21199_v47 = vld [vmem:[#allocation159_spill] sm:$0xff] }
 0x660   : > { %11361 = vst [vmem:[%s16259_s22 + $0x2f8] sm:$0xff] %v12775_v1  ;;  %v10441_v37 = vmax.f32 %v10206_v63, 0.0  ;;  %v10208_v44 = vadd.f32 %v19790_v22, %v10015_v20  ;;  %v10017_v61 = vadd.f32 %v10016_v24, %v9824_v45  ;;  %v10227_v26 = vpop.f32.mrf.mxu1  ;;  %v9651_v3 = vadd.f32 %v21199_v47, %v19565_v59  ;;  %v21200_v1 = vld [vmem:[#allocation130_spill] sm:$0xff]  ;;  %v21208_v60 = vld [vmem:[#allocation39_spill] sm:$0xff] }
 0x661   : > { %v10020_v32 = vpop.f32.mrf.mxu0  ;;  %v9655_v63 = vadd.f32 %v21200_v1, %v19559_v19  ;;  %v9842_v45 = vadd.f32 %v21201_v16, %v9649_v33 }
 0x662   : > { %v12779_v56 = vpack.c.bf16 %v10441_v37, %v10440_v36  ;;  %v10210_v58 = vadd.f32 %v19800_v0, %v10017_v61  ;;  %v10021_v30 = vadd.f32 %v10020_v32, %v9828_v34  ;;  %v10448_v22 = vmax.f32 %v10208_v44, 0.0  ;;  %v21203_v32 = vld [vmem:[#allocation121_spill] sm:$0xff] }
 0x663   : > { %v10022_v5 = vpop.f32.mrf.mxu0  ;;  %v9657_v34 = vadd.f32 %v21202_v39, %v19565_v59  ;;  %v9844_v42 = vadd.f32 %v21203_v32, %v9651_v3 }
 0x664   : > { %11365 = vst [vmem:[%s16259_s22 + $0x318] sm:$0xff] %v12779_v56  ;;  %v10449_v14 = vmax.f32 %v10210_v58, 0.0  ;;  %v10214_v52 = vadd.f32 %v19812_v8, %v10021_v30  ;;  %v10023_v41 = vadd.f32 %v10022_v5, %v9830_v6  ;;  %v21204_v6 = vld [vmem:[#allocation106_spill] sm:$0xff] }
 0x665   : > { %v10024_v54 = vpop.f32.mrf.mxu0  ;;  %v9659_v57 = vadd.f32 %v21204_v6, %v19559_v19  ;;  %v21205_v56 = vld [vmem:[#allocation90_spill] sm:$0xff] }
 0x666   : > { %v12783_v0 = vpack.c.bf16 %v10449_v14, %v10448_v22  ;;  %v10216_v11 = vadd.f32 %v19822_v17, %v10023_v41  ;;  %v10025_v62 = vadd.f32 %v10024_v54, %v9832_v31  ;;  %v10456_v8 = vmax.f32 %v10214_v52, 0.0  ;;  %v10229_v17 = vpop.f32.mrf.mxu1  ;;  %v21206_v31 = vld [vmem:[#allocation99_spill] sm:$0xff] }
 0x667   : > { %v10026_v40 = vpop.f32.mrf.mxu0  ;;  %v9848_v58 = vadd.f32 %v21205_v56, %v9655_v63  ;;  %v9850_v22 = vadd.f32 %v21206_v31, %v9657_v34  ;;  %v9852_v54 = vadd.f32 %v21208_v60, %v9659_v57 }
 0x668   : > { %11369 = vst [vmem:[%s16259_s22 + $0x338] sm:$0xff] %v12783_v0  ;;  %v10457_v7 = vmax.f32 %v10216_v11, 0.0  ;;  %v10218_v10 = vadd.f32 %v19834_v25, %v10025_v62  ;;  %v10027_v2 = vadd.f32 %v10026_v40, %v9834_v18  ;;  %v10233_v37 = vpop.f32.mrf.mxu1  ;;  %v21209_v40 = vld [vmem:[#allocation155_spill] sm:$0xff] }
 0x669   : > { %v10030_v15 = vpop.f32.mrf.mxu0 }
 0x66a   : > { %v12787_v4 = vpack.c.bf16 %v10457_v7, %v10456_v8  ;;  %v10220_v55 = vadd.f32 %v19844_v27, %v10027_v2  ;;  %v10031_v9 = vadd.f32 %v10030_v15, %v9838_v51  ;;  %v10464_v25 = vmax.f32 %v10218_v10, 0.0  ;;  %v10235_v5 = vpop.f32.mrf.mxu1 }
 0x66b   : > { %v10032_v20 = vpop.f32.mrf.mxu0 }
 0x66c   : > { %11373 = vst [vmem:[%s16259_s22 + $0x358] sm:$0xff] %v12787_v4  ;;  %v10465_v35 = vmax.f32 %v10220_v55, 0.0  ;;  %v10224_v46 = vadd.f32 %v10223_v21, %v10031_v9  ;;  %v10033_v24 = vadd.f32 %v10032_v20, %v9840_v29  ;;  %v10237_v12 = vpop.f32.mrf.mxu1 }
 0x66d   : > { %v10034_v36 = vpop.f32.mrf.mxu0 }
 0x66e   : > { %v12791_v44 = vpack.c.bf16 %v10465_v35, %v10464_v25  ;;  %v10226_v27 = vadd.f32 %v10225_v13, %v10033_v24  ;;  %v10035_v61 = vadd.f32 %v10034_v36, %v9842_v45  ;;  %v10472_v21 = vmax.f32 %v10224_v46, 0.0  ;;  %v21207_v13 = vld [vmem:[#allocation93_spill] sm:$0xff]  ;;  %v10239_v15 = vpop.f32.mrf.mxu1 }
 0x66f   : > { %v10036_v49 = vpop.f32.mrf.mxu0  ;;  %v9661_v14 = vadd.f32 %v21207_v13, %v19565_v59 }
 0x670   : > { %11377 = vst [vmem:[%s16259_s22 + $0x378] sm:$0xff] %v12791_v44  ;;  %v10473_v30 = vmax.f32 %v10226_v27, 0.0  ;;  %v10228_v48 = vadd.f32 %v10227_v26, %v10035_v61  ;;  %v10037_v23 = vadd.f32 %v10036_v49, %v9844_v42 }
 0x671   : > { %v10040_v50 = vpop.f32.mrf.mxu0  ;;  %v9854_v38 = vadd.f32 %v21209_v40, %v9661_v14 }
 0x672   : > { %v12795_v52 = vpack.c.bf16 %v10473_v30, %v10472_v21  ;;  %v10230_v41 = vadd.f32 %v10229_v17, %v10037_v23  ;;  %v10041_v19 = vadd.f32 %v10040_v50, %v9848_v58  ;;  %v10480_v0 = vmax.f32 %v10228_v48, 0.0 }
 0x673   : > { %v10042_v43 = vpop.f32.mrf.mxu0 }
 0x674   : > { %11381 = vst [vmem:[%s16259_s22 + $0x398] sm:$0xff] %v12795_v52  ;;  %v10481_v11 = vmax.f32 %v10230_v41, 0.0  ;;  %v10234_v62 = vadd.f32 %v10233_v37, %v10041_v19  ;;  %v10043_v26 = vadd.f32 %v10042_v43, %v9850_v22 }
 0x675   : > { %v10044_v18 = vpop.f32.mrf.mxu0 }
 0x676   : > { %v12799_v53 = vpack.c.bf16 %v10481_v11, %v10480_v0  ;;  %v10236_v33 = vadd.f32 %v10235_v5, %v10043_v26  ;;  %v10045_v59 = vadd.f32 %v10044_v18, %v9852_v54  ;;  %v10488_v8 = vmax.f32 %v10234_v62, 0.0 }
 0x677   : > { %v10046_v51 = vpop.f32.mrf.mxu0 }
 0x678   : > { %11385 = vst [vmem:[%s16259_s22 + $0x3b8] sm:$0xff] %v12799_v53  ;;  %v10489_v7 = vmax.f32 %v10236_v33, 0.0  ;;  %v10238_v10 = vadd.f32 %v10237_v12, %v10045_v59  ;;  %v10047_v2 = vadd.f32 %v10046_v51, %v9854_v38 }
 0x67a   : > { %v12803_v28 = vpack.c.bf16 %v10489_v7, %v10488_v8  ;;  %v10240_v29 = vadd.f32 %v10239_v15, %v10047_v2  ;;  %v10496_v17 = vmax.f32 %v10238_v10, 0.0 }
 0x67c   : > { %11389 = vst [vmem:[%s16259_s22 + $0x3d8] sm:$0xff] %v12803_v28  ;;  %v10497_v47 = vmax.f32 %v10240_v29, 0.0 }
 0x67e   : > { %v12807_v3 = vpack.c.bf16 %v10497_v47, %v10496_v17 }
 0x680   : > { %11393 = vst [vmem:[%s16259_s22 + $0x3f8] sm:$0xff] %v12807_v3 }
 0x681   : > { %13538 = shalt.err (!%p13535_p5)
}
 0x682   : > { %s13539_s22 = scalar_lea.hbm %s19909_s24, 16384  ;;  %s13543_s19 = scalar_lea.hbm %s19969_s8, 32768 }
 0x683   : > { %p13540_p6 = scmp.ne.s32.totalorder %s19909_s24, %s13539_s22  ;;  %p13544_p10 = scmp.lt.s32.totalorder %s19909_s24, %s19969_s8 }
 0x684   : > { %p13545_p11 = scmp.lt.s32.totalorder %s13543_s19, %s13539_s22 }
 0x685   : > { %p13541_p7 = pnand %p13540_p6, %p13691_p4 }
 0x686   : > { %p13546_p12 = por %p13545_p11, %p13544_p10 }
 0x687   : > { %p13542_p9 = pneg %p13541_p7 }
 0x689   : > { %p13547_p13 = pnand %p13546_p12, %p13542_p9 }
 0x68b   : > { %13550 = shalt.err (!%p13547_p13)
}
 0x68c   : > { %s13604_s0 = smov 512   ;;  %s13605_s30 = smov 32  }
 0x68d   : > { %12841 = dma.vmem_to_hbm [thread:$0]  (%p13691_p4), %s19911_s16, 16384, %s19909_s24, %s19916_s26, %s13604_s0, %s13604_s0, %s13605_s30  }
 0x68e PF: > { %p12847_p0 = scmp.ge.s32.totalorder %s13601_s10, 2  ;;  %s11426_s21 = sand.u32 1, %s13581_s27  }
 0x68f   : > { %s11427_s20 = scalar_lea.sflag [#allocation4], %s11426_s21 }
 0x690   : > { %p12844_p1 = pnand %p12847_p0, %p13698_p8 }
 0x692   : > { %p12845_p2 = pneg %p12844_p1 }
 0x694   : > { %13576 = dma.done.wait (%p12845_p2), %s11427_s20, 16384  }
 0x695   : > { %13578 = vsyncadd (%p12845_p2), %s11427_s20, 4294950912  ;;  %s21_s10 = sadd.s32 1, %s13601_s10   ;;  %s21211_s27 = smov %s13585_s28 }
 0x696   : > { %p18_p3 = scmp.ge.s32.totalorder %s21_s10, 4   ;;  %s21212_s28 = smov %s13589_s29 }
 0x697   : > { %s21213_s29 = smov %s13704_s18  ;;  %s21214_s30 = smov %s13597_s9 }
 0x698   : > { %s21215_s9 = smov %s21217_s13  ;;  %20 = sbr.rel (!%p18_p3) target bundleno = 6 (0x6), region = 99 }
 0x69d   :  { %11432 = vsyncpa [#allocation4], 1 }
 0x69e   :  { %11434 = vsyncpa [#allocation4 + $0x1], 1 }

</bundles_post_ra>
